<compile_context>
chip_gen: v7x
topology: tpu7x:2x2x1
jax: 0.10.0
libtpu: 0.0.40
codegen_flags: <defaults>
</compile_context>

<pallas_src>
import functools

import jax
import jax.numpy as jnp
from jax.experimental import pallas as pl
from jax.experimental.pallas import tpu as pltpu


def _round_up(n, m):
    return ((n + m - 1) // m) * m


# ---------------------------------------------------------------------------
# Kernel
# ---------------------------------------------------------------------------
def _pt_layer_kernel(x_ref, w1_ref, b1_ref, seg_ref, gath_ref,
                     fcw_ref, fcb_ref, scat_ref, out_ref, *, window, in_dim):
    W, D = window, in_dim
    R = W + 1
    F = R * D                     # flattened (row, feature) width, lane-dense
    FW = W * D
    eps2 = 1e-24                  # (torch F.normalize eps = 1e-12) ** 2

    x = x_ref[...].astype(jnp.float32)                       # (BT, F)

    # ---- one fused MXU matmul:  [q_tiled | k | ff_window] = x @ W1 + B1 ----
    big = jnp.dot(x, w1_ref[...],
                  preferred_element_type=jnp.float32) + b1_ref[...]
    q_tiled = big[:, 0:F]          # (BT, F)  q(x_last) replicated per segment
    k = big[:, F:2 * F]            # (BT, F)  grouped-conv k, per-row linear
    x_win_lin = big[:, 2 * F:3 * F]  # (BT, F)  window grouped conv (seg W = 0)

    # ---- attention over the R row-segments (all lane-dense) ---------------
    # logits broadcast to every lane of its 32-lane segment via SEG matmul
    logits = jnp.dot(q_tiled * k, seg_ref[...],
                     preferred_element_type=jnp.float32)     # (BT, F)
    m = jnp.max(logits, axis=-1, keepdims=True)              # max over R
    e = jnp.exp(logits - m)                                   # EUP
    denom = jnp.sum(e, axis=-1, keepdims=True) * (1.0 / D)    # sum over R
    attn = e * pl.reciprocal(denom, approx=True)              # (BT, F)

    # ---- central branch ----------------------------------------------------
    x_cent = jnp.dot(attn * x, gath_ref[...],
                     preferred_element_type=jnp.float32)      # (BT, D)
    ss = jnp.sum(x_cent * x_cent, axis=-1, keepdims=True)
    x_cent = x_cent * jax.lax.rsqrt(jnp.maximum(ss, eps2))    # l2 normalize
    x_cent = jnp.dot(x_cent, fcw_ref[...],
                     preferred_element_type=jnp.float32) + fcb_ref[...]
    # dropout: identity in eval mode
    x_last = x[:, FW:F]                                       # (BT, D)
    x_cent = x_cent + x_last
    ss = jnp.sum(x_cent * x_cent, axis=-1, keepdims=True)
    x_cent = x_cent * jax.lax.rsqrt(jnp.maximum(ss, eps2))
    # scatter the central row into lanes [FW, F) with a tiny MXU matmul
    cent_placed = jnp.dot(x_cent, scat_ref[...],
                          preferred_element_type=jnp.float32)  # (BT, F)

    # ---- window branch ------------------------------------------------------
    xw = x_win_lin + x                            # residual (last segment is
    #                                               garbage, masked out below)
    # dropout: identity in eval mode
    ss_seg = jnp.dot(xw * xw, seg_ref[...],
                     preferred_element_type=jnp.float32)       # per-seg sumsq
    xw = xw * jax.lax.rsqrt(jnp.maximum(ss_seg, eps2))

    # ---- assemble lane-dense output (no concatenate, one dense store) ------
    lane = jax.lax.broadcasted_iota(jnp.int32, (xw.shape[0], F), 1)
    out_ref[...] = jnp.where(lane < FW, xw, cent_placed).astype(out_ref.dtype)


# ---------------------------------------------------------------------------
# Wrapper: build block-structured weights + call the kernel
# ---------------------------------------------------------------------------
def _build_kernel_params(params, window, in_dim):
    W, D = window, in_dim
    R, F, FW = W + 1, (W + 1) * in_dim, W * in_dim
    f32 = jnp.float32

    qw = params["qw"].astype(f32)                 # (D, D) [out, in]
    qb = params["qb"].astype(f32).reshape(D)
    kw = params["kw"].astype(f32)                 # (R, D, D) [row, out, in]
    kb = params["kb"].astype(f32)                 # (R, D)
    fcw = params["fcw"].astype(f32)
    fcb = params["fcb"].astype(f32).reshape(D)
    fww = params["fww"].astype(f32)               # (W, D, D)
    fwb = params["fwb"].astype(f32)               # (W, D)

    eye_r = jnp.eye(R, dtype=f32)

    # q-Linear applied to the last row, replicated into every column segment.
    qw_tiled = jnp.zeros((R, D, R, D), f32)
    qw_tiled = qw_tiled.at[R - 1].set(
        jnp.broadcast_to(qw.T[:, None, :], (D, R, D)))
    qw_tiled = qw_tiled.reshape(F, F)
    qb_tiled = jnp.tile(qb, R)                                        # (F,)

    # grouped Conv1d == block-diagonal per-row Linear
    kw_bd = (eye_r[:, None, :, None] *
             jnp.transpose(kw, (0, 2, 1))[:, :, None, :]).reshape(F, F)
    kb_flat = kb.reshape(F)

    fww_full = jnp.concatenate([fww, jnp.zeros((1, D, D), f32)], axis=0)
    fww_bd = (eye_r[:, None, :, None] *
              jnp.transpose(fww_full, (0, 2, 1))[:, :, None, :]).reshape(F, F)
    fwb_pad = jnp.concatenate([fwb.reshape(FW), jnp.zeros((D,), f32)])  # (F,)

    w1 = jnp.concatenate([qw_tiled, kw_bd, fww_bd], axis=1)         # (F, 3F)
    b1 = jnp.concatenate([qb_tiled, kb_flat, fwb_pad]).reshape(1, 3 * F)

    seg = jnp.kron(eye_r, jnp.ones((D, D), f32))                    # (F, F)
    gath = jnp.tile(jnp.eye(D, dtype=f32), (R, 1))                  # (F, D)
    scat = jnp.zeros((D, F), f32).at[jnp.arange(D),
                                     FW + jnp.arange(D)].set(1.0)   # (D, F)

    return w1, b1, seg, gath, fcw.T, fcb.reshape(1, D), scat


def pt_layer_forward(x, params, *, window, in_dim, block_b=256):
    """x: (B, window+1, in_dim) float32 -> (B, window+1, in_dim)."""
    B, R, D = x.shape
    assert R == window + 1 and D == in_dim
    F = R * D

    w1, b1, seg, gath, fcw_t, fcb, scat = _build_kernel_params(
        params, window, in_dim)

    # lane-dense layout for both input and output
    x2 = x.reshape(B, F)
    bt = min(block_b, _round_up(B, 8))          # batch tile (multiple of 8)
    b_pad = _round_up(B, bt)
    if b_pad != B:
        x2 = jnp.pad(x2, ((0, b_pad - B), (0, 0)))

    kernel = functools.partial(_pt_layer_kernel, window=window, in_dim=in_dim)

    def full(a):
        nd = a.ndim
        return pl.BlockSpec(a.shape, lambda b, _nd=nd: (0,) * _nd)

    out2 = pl.pallas_call(
        kernel,
        out_shape=jax.ShapeDtypeStruct((b_pad, F), x.dtype),
        grid=(b_pad // bt,),
        in_specs=[
            pl.BlockSpec((bt, F), lambda b: (b, 0)),    # x (batch-tiled)
            full(w1), full(b1), full(seg), full(gath),
            full(fcw_t), full(fcb), full(scat),
        ],
        out_specs=pl.BlockSpec((bt, F), lambda b: (b, 0)),
        compiler_params=pltpu.CompilerParams(
            dimension_semantics=("parallel",)),
    )(x2, w1, b1, seg, gath, fcw_t, fcb, scat)

    return out2[:B].reshape(B, R, D)


# ---------------------------------------------------------------------------
# Pure-JAX reference (mirrors the PyTorch forward in eval mode)
# ---------------------------------------------------------------------------
def reference_forward(x, p):
    eps = 1e-12

    def l2n(v):
        n = jnp.sqrt(jnp.sum(v * v, axis=-1, keepdims=True))
        return v / jnp.maximum(n, eps)

    x_last = x[:, -1, :]                                            # (B, D)
    q = x_last @ p["qw"].T + p["qb"]                                # (B, D)
    k = jnp.einsum('bri,roi->bro', x, p["kw"]) + p["kb"]            # (B, R, D)
    attn = jax.nn.softmax(jnp.einsum('bd,brd->br', q, k), axis=-1)  # (B, R)
    x_cent = jnp.einsum('br,brd->bd', attn, x)                      # (B, D)
    x_cent = l2n(x_cent)
    x_cent = x_cent @ p["fcw"].T + p["fcb"]
    x_cent = l2n(x_cent + x_last)
    x_win_in = x[:, :-1, :]
    xw = jnp.einsum('bri,roi->bro', x_win_in, p["fww"]) + p["fwb"]
    xw = l2n(xw + x_win_in)
    return jnp.concatenate([xw, x_cent[:, None, :]], axis=1)


def init_params(key, window, in_dim):
    D, W = in_dim, window
    ks = jax.random.split(key, 8)
    s = 0.1
    return {
        "qw":  s * jax.random.normal(ks[0], (D, D), jnp.float32),
        "qb":  s * jax.random.normal(ks[1], (D,), jnp.float32),
        "kw":  s * jax.random.normal(ks[2], (W + 1, D, D), jnp.float32),
        "kb":  s * jax.random.normal(ks[3], (W + 1, D), jnp.float32),
        "fcw": s * jax.random.normal(ks[4], (D, D), jnp.float32),
        "fcb": s * jax.random.normal(ks[5], (D,), jnp.float32),
        "fww": s * jax.random.normal(ks[6], (W, D, D), jnp.float32),
        "fwb": s * jax.random.normal(ks[7], (W, D), jnp.float32),
    }


if __name__ == "__main__":
    WINDOW, IN_DIM = 7, 32
    # Batch is tiled BT=256 per grid step -> grid of 4 parallel steps
    # (even & >=2 so both v7x TensorCores get work).
    B = 1024

    root = jax.random.PRNGKey(0)
    kx, kp = jax.random.split(root)
    x = jax.random.normal(kx, (B, WINDOW + 1, IN_DIM), jnp.float32)
    params = init_params(kp, WINDOW, IN_DIM)

    out = pt_layer_forward(x, params, window=WINDOW, in_dim=IN_DIM)
    out = jax.block_until_ready(out)

    ref = jax.block_until_ready(reference_forward(x, params))
    assert out.shape == (B, WINDOW + 1, IN_DIM)
    # tolerance slightly loosened for EUP rsqrt / approx reciprocal paths
    err = float(jnp.max(jnp.abs(out - ref)))
    assert jnp.allclose(out, ref, atol=1e-3, rtol=1e-3), f"max err {err}"

    print("KERNEL_OK")
</pallas_src>

<mosaic_0001>
module attributes {stable_mosaic.version = 11 : i64} {
  func.func @_pt_layer_kernel(%arg0: i32, %arg1: memref<256x256xf32, #tpu.memory_space<vmem>>, %arg2: memref<256x768xf32, #tpu.memory_space<vmem>>, %arg3: memref<1x768xf32, #tpu.memory_space<vmem>>, %arg4: memref<256x256xf32, #tpu.memory_space<vmem>>, %arg5: memref<256x32xf32, #tpu.memory_space<vmem>>, %arg6: memref<32x32xf32, #tpu.memory_space<vmem>>, %arg7: memref<1x32xf32, #tpu.memory_space<vmem>>, %arg8: memref<32x256xf32, #tpu.memory_space<vmem>>, %arg9: memref<256x256xf32, #tpu.memory_space<vmem>>) attributes {dimension_semantics = [#tpu.dimension_semantics<parallel>], iteration_bounds = array<i64: 4>, scalar_prefetch = 0 : i64, scratch_operands = 0 : i64, tpu.core_type = #tpu.core_type<tc>, window_params = [{transform_indices = @transform_0, window_bounds = array<i64: 256, 256>}, {pipeline_mode = #tpu.pipeline_mode<synchronous>, transform_indices = @transform_1, window_bounds = array<i64: 256, 768>}, {pipeline_mode = #tpu.pipeline_mode<synchronous>, transform_indices = @transform_2, window_bounds = array<i64: 1, 768>}, {pipeline_mode = #tpu.pipeline_mode<synchronous>, transform_indices = @transform_3, window_bounds = array<i64: 256, 256>}, {pipeline_mode = #tpu.pipeline_mode<synchronous>, transform_indices = @transform_4, window_bounds = array<i64: 256, 32>}, {pipeline_mode = #tpu.pipeline_mode<synchronous>, transform_indices = @transform_5, window_bounds = array<i64: 32, 32>}, {pipeline_mode = #tpu.pipeline_mode<synchronous>, transform_indices = @transform_6, window_bounds = array<i64: 1, 32>}, {pipeline_mode = #tpu.pipeline_mode<synchronous>, transform_indices = @transform_7, window_bounds = array<i64: 32, 256>}, {transform_indices = @transform_8, window_bounds = array<i64: 256, 256>}]} {
    %c0 = arith.constant 0 : index
    %c0_0 = arith.constant 0 : index
    %0 = vector.load %arg1[%c0, %c0_0] : memref<256x256xf32, #tpu.memory_space<vmem>>, vector<256x256xf32>
    %c0_1 = arith.constant 0 : index
    %c0_2 = arith.constant 0 : index
    %1 = vector.load %arg2[%c0_1, %c0_2] : memref<256x768xf32, #tpu.memory_space<vmem>>, vector<256x768xf32>
    %cst = arith.constant dense<0.000000e+00> : vector<256x768xf32>
    %2 = tpu.matmul %0, %1, %cst {dimension_numbers = #tpu.dot_dimension_numbers<[1], [0], [0], [1], [0, 0, 1, 1], [], []>} : vector<256x256xf32>, vector<256x768xf32>, vector<256x768xf32> -> vector<256x768xf32>
    %c0_3 = arith.constant 0 : index
    %c0_4 = arith.constant 0 : index
    %3 = vector.load %arg3[%c0_3, %c0_4] : memref<1x768xf32, #tpu.memory_space<vmem>>, vector<1x768xf32>
    %4 = vector.broadcast %3 : vector<1x768xf32> to vector<256x768xf32>
    %5 = arith.addf %2, %4 : vector<256x768xf32>
    %6 = vector.extract_strided_slice %5 {offsets = [0, 0], sizes = [256, 256], strides = [1, 1]} : vector<256x768xf32> to vector<256x256xf32>
    %7 = vector.extract_strided_slice %5 {offsets = [0, 256], sizes = [256, 256], strides = [1, 1]} : vector<256x768xf32> to vector<256x256xf32>
    %8 = vector.extract_strided_slice %5 {offsets = [0, 512], sizes = [256, 256], strides = [1, 1]} : vector<256x768xf32> to vector<256x256xf32>
    %9 = arith.mulf %6, %7 : vector<256x256xf32>
    %c0_5 = arith.constant 0 : index
    %c0_6 = arith.constant 0 : index
    %10 = vector.load %arg4[%c0_5, %c0_6] : memref<256x256xf32, #tpu.memory_space<vmem>>, vector<256x256xf32>
    %cst_7 = arith.constant dense<0.000000e+00> : vector<256x256xf32>
    %11 = tpu.matmul %9, %10, %cst_7 {dimension_numbers = #tpu.dot_dimension_numbers<[1], [0], [0], [1], [0, 0, 1, 1], [], []>} : vector<256x256xf32>, vector<256x256xf32>, vector<256x256xf32> -> vector<256x256xf32>
    %cst_8 = arith.constant dense<0xFF800000> : vector<256xf32>
    %12 = vector.multi_reduction <maximumf>, %11, %cst_8 [1] : vector<256x256xf32> to vector<256xf32>
    %13 = vector.shape_cast %12 : vector<256xf32> to vector<256x1xf32>
    %14 = vector.broadcast %13 : vector<256x1xf32> to vector<256x256xf32>
    %15 = arith.subf %11, %14 : vector<256x256xf32>
    %16 = math.exp %15 : vector<256x256xf32>
    %cst_9 = arith.constant dense<0.000000e+00> : vector<256xf32>
    %17 = vector.multi_reduction <add>, %16, %cst_9 [1] : vector<256x256xf32> to vector<256xf32>
    %18 = vector.shape_cast %17 : vector<256xf32> to vector<256x1xf32>
    %cst_10 = arith.constant 3.125000e-02 : f32
    %19 = vector.broadcast %cst_10 : f32 to vector<256x1xf32>
    %20 = arith.mulf %18, %19 : vector<256x1xf32>
    %21 = tpu.reciprocal %20 {approx = true} : vector<256x1xf32> -> vector<256x1xf32>
    %22 = vector.broadcast %21 : vector<256x1xf32> to vector<256x256xf32>
    %23 = arith.mulf %16, %22 : vector<256x256xf32>
    %24 = arith.mulf %23, %0 : vector<256x256xf32>
    %c0_11 = arith.constant 0 : index
    %c0_12 = arith.constant 0 : index
    %25 = vector.load %arg5[%c0_11, %c0_12] : memref<256x32xf32, #tpu.memory_space<vmem>>, vector<256x32xf32>
    %cst_13 = arith.constant dense<0.000000e+00> : vector<256x32xf32>
    %26 = tpu.matmul %24, %25, %cst_13 {dimension_numbers = #tpu.dot_dimension_numbers<[1], [0], [0], [1], [0, 0, 1, 1], [], []>} : vector<256x256xf32>, vector<256x32xf32>, vector<256x32xf32> -> vector<256x32xf32>
    %27 = arith.mulf %26, %26 : vector<256x32xf32>
    %cst_14 = arith.constant dense<0.000000e+00> : vector<256xf32>
    %28 = vector.multi_reduction <add>, %27, %cst_14 [1] : vector<256x32xf32> to vector<256xf32>
    %29 = vector.shape_cast %28 : vector<256xf32> to vector<256x1xf32>
    %cst_15 = arith.constant 1.000000e-24 : f32
    %30 = vector.broadcast %cst_15 : f32 to vector<256x1xf32>
    %31 = arith.maximumf %29, %30 : vector<256x1xf32>
    %32 = math.rsqrt %31 : vector<256x1xf32>
    %33 = vector.broadcast %32 : vector<256x1xf32> to vector<256x32xf32>
    %34 = arith.mulf %26, %33 : vector<256x32xf32>
    %c0_16 = arith.constant 0 : index
    %c0_17 = arith.constant 0 : index
    %35 = vector.load %arg6[%c0_16, %c0_17] : memref<32x32xf32, #tpu.memory_space<vmem>>, vector<32x32xf32>
    %cst_18 = arith.constant dense<0.000000e+00> : vector<256x32xf32>
    %36 = tpu.matmul %34, %35, %cst_18 {dimension_numbers = #tpu.dot_dimension_numbers<[1], [0], [0], [1], [0, 0, 1, 1], [], []>} : vector<256x32xf32>, vector<32x32xf32>, vector<256x32xf32> -> vector<256x32xf32>
    %c0_19 = arith.constant 0 : index
    %c0_20 = arith.constant 0 : index
    %37 = vector.load %arg7[%c0_19, %c0_20] : memref<1x32xf32, #tpu.memory_space<vmem>>, vector<1x32xf32>
    %38 = vector.broadcast %37 : vector<1x32xf32> to vector<256x32xf32>
    %39 = arith.addf %36, %38 : vector<256x32xf32>
    %40 = vector.extract_strided_slice %0 {offsets = [0, 224], sizes = [256, 32], strides = [1, 1]} : vector<256x256xf32> to vector<256x32xf32>
    %41 = arith.addf %39, %40 : vector<256x32xf32>
    %42 = arith.mulf %41, %41 : vector<256x32xf32>
    %cst_21 = arith.constant dense<0.000000e+00> : vector<256xf32>
    %43 = vector.multi_reduction <add>, %42, %cst_21 [1] : vector<256x32xf32> to vector<256xf32>
    %44 = vector.shape_cast %43 : vector<256xf32> to vector<256x1xf32>
    %cst_22 = arith.constant 1.000000e-24 : f32
    %45 = vector.broadcast %cst_22 : f32 to vector<256x1xf32>
    %46 = arith.maximumf %44, %45 : vector<256x1xf32>
    %47 = math.rsqrt %46 : vector<256x1xf32>
    %48 = vector.broadcast %47 : vector<256x1xf32> to vector<256x32xf32>
    %49 = arith.mulf %41, %48 : vector<256x32xf32>
    %c0_23 = arith.constant 0 : index
    %c0_24 = arith.constant 0 : index
    %50 = vector.load %arg8[%c0_23, %c0_24] : memref<32x256xf32, #tpu.memory_space<vmem>>, vector<32x256xf32>
    %cst_25 = arith.constant dense<0.000000e+00> : vector<256x256xf32>
    %51 = tpu.matmul %49, %50, %cst_25 {dimension_numbers = #tpu.dot_dimension_numbers<[1], [0], [0], [1], [0, 0, 1, 1], [], []>} : vector<256x32xf32>, vector<32x256xf32>, vector<256x256xf32> -> vector<256x256xf32>
    %52 = arith.addf %8, %0 : vector<256x256xf32>
    %53 = arith.mulf %52, %52 : vector<256x256xf32>
    %c0_26 = arith.constant 0 : index
    %c0_27 = arith.constant 0 : index
    %54 = vector.load %arg4[%c0_26, %c0_27] : memref<256x256xf32, #tpu.memory_space<vmem>>, vector<256x256xf32>
    %cst_28 = arith.constant dense<0.000000e+00> : vector<256x256xf32>
    %55 = tpu.matmul %53, %54, %cst_28 {dimension_numbers = #tpu.dot_dimension_numbers<[1], [0], [0], [1], [0, 0, 1, 1], [], []>} : vector<256x256xf32>, vector<256x256xf32>, vector<256x256xf32> -> vector<256x256xf32>
    %cst_29 = arith.constant 1.000000e-24 : f32
    %56 = vector.broadcast %cst_29 : f32 to vector<256x256xf32>
    %57 = arith.maximumf %55, %56 : vector<256x256xf32>
    %58 = math.rsqrt %57 : vector<256x256xf32>
    %59 = arith.mulf %52, %58 : vector<256x256xf32>
    %60 = tpu.iota {dimensions = array<i32: 1>} : vector<256x256xi32>
    %c224_i32 = arith.constant 224 : i32
    %61 = vector.broadcast %c224_i32 : i32 to vector<256x256xi32>
    %62 = arith.cmpi slt, %60, %61 : vector<256x256xi32>
    %63 = arith.select %62, %59, %51 : vector<256x256xi1>, vector<256x256xf32>
    %c0_30 = arith.constant 0 : index
    %c0_31 = arith.constant 0 : index
    %64 = vector.load %arg9[%c0_30, %c0_31] : memref<256x256xf32, #tpu.memory_space<vmem>>, vector<256x256xf32>
    tpu.vector_store %arg9[%c0_30, %c0_31], %63 {strides = array<i32>} : memref<256x256xf32, #tpu.memory_space<vmem>>, vector<256x256xf32>,
    return
  }
  func.func @transform_0(%arg0: i32) -> (i32, i32) {
    %c0_i32 = arith.constant 0 : i32
    %c0_i32_0 = arith.constant 0 : i32
    return %arg0, %c0_i32 : i32, i32
  }
  func.func @transform_1(%arg0: i32) -> (i32, i32) {
    %c0_i32 = arith.constant 0 : i32
    %c0_i32_0 = arith.constant 0 : i32
    %c0_i32_1 = arith.constant 0 : i32
    return %c0_i32, %c0_i32_0 : i32, i32
  }
  func.func @transform_2(%arg0: i32) -> (i32, i32) {
    %c0_i32 = arith.constant 0 : i32
    %c0_i32_0 = arith.constant 0 : i32
    %c0_i32_1 = arith.constant 0 : i32
    return %c0_i32, %c0_i32_0 : i32, i32
  }
  func.func @transform_3(%arg0: i32) -> (i32, i32) {
    %c0_i32 = arith.constant 0 : i32
    %c0_i32_0 = arith.constant 0 : i32
    %c0_i32_1 = arith.constant 0 : i32
    return %c0_i32, %c0_i32_0 : i32, i32
  }
  func.func @transform_4(%arg0: i32) -> (i32, i32) {
    %c0_i32 = arith.constant 0 : i32
    %c0_i32_0 = arith.constant 0 : i32
    %c0_i32_1 = arith.constant 0 : i32
    return %c0_i32, %c0_i32_0 : i32, i32
  }
  func.func @transform_5(%arg0: i32) -> (i32, i32) {
    %c0_i32 = arith.constant 0 : i32
    %c0_i32_0 = arith.constant 0 : i32
    %c0_i32_1 = arith.constant 0 : i32
    return %c0_i32, %c0_i32_0 : i32, i32
  }
  func.func @transform_6(%arg0: i32) -> (i32, i32) {
    %c0_i32 = arith.constant 0 : i32
    %c0_i32_0 = arith.constant 0 : i32
    %c0_i32_1 = arith.constant 0 : i32
    return %c0_i32, %c0_i32_0 : i32, i32
  }
  func.func @transform_7(%arg0: i32) -> (i32, i32) {
    %c0_i32 = arith.constant 0 : i32
    %c0_i32_0 = arith.constant 0 : i32
    %c0_i32_1 = arith.constant 0 : i32
    return %c0_i32, %c0_i32_0 : i32, i32
  }
  func.func @transform_8(%arg0: i32) -> (i32, i32) {
    %c0_i32 = arith.constant 0 : i32
    %c0_i32_0 = arith.constant 0 : i32
    return %arg0, %c0_i32 : i32, i32
  }
}

</mosaic_0001>

<bundles_post_ra>
// kernel: tpu_custom_call.1
= control target key start
LH: loop header
LB: loop body
LE: loop exit
PB: predicated region body
PF: predicated region fallthrough
CT: control target
= control target key end

     0   :  { %13 = vsyncpa [#allocation3], 0  ;;  %s9351_s0 = inlined_call_operand.hbm [shape: f32[1024,256], index: 0, kind: input, shape index: {}]   ;;  %s9352_s1 = inlined_call_operand.hbm [shape: f32[256,768], index: 1, kind: input, shape index: {}]   ;;  %s9353_s2 = inlined_call_operand.vmem [shape: f32[1,768], index: 2, kind: input, shape index: {}]   ;;  %s9354_s3 = inlined_call_operand.hbm [shape: f32[256,256], index: 3, kind: input, shape index: {}]   ;;  %s9355_s4 = inlined_call_operand.vmem [shape: f32[256,32], index: 4, kind: input, shape index: {}]   ;;  %s9356_s5 = inlined_call_operand.vmem [shape: f32[32,32], index: 5, kind: input, shape index: {}]   ;;  %s9357_s6 = inlined_call_operand.vmem [shape: f32[1,32], index: 6, kind: input, shape index: {}]   ;;  %s9358_s7 = inlined_call_operand.vmem [shape: f32[32,256], index: 7, kind: input, shape index: {}]   ;;  %s9359_s8 = inlined_call_operand.hbm [shape: f32[1024,256], index: 8, kind: output, shape index: {}]  }
   0x1   :  { %15 = vsyncpa [#allocation3 + $0x1], 0 }
   0x2   :  { %16 = vsyncpa [#allocation6], 0 }
   0x3   :  { %17 = vsyncpa [#allocation4], 0 }
   0x4   :  { %19 = vsyncpa [#allocation4 + $0x1], 0  ;;  %s6249_s27 = smov 0   ;;  %s6251_s28 = smov 0  }
   0x5   :  { %s6253_s29 = smov 0   ;;  %s6255_s30 = smov 0  }
   0x6 LB: > { %s6270_s9 = sadd.s32 4294967295, %s6189_s30   ;;  %s4752_s10 = sadd.s32 4294967294, %s6189_s30   ;;  %s6189_s30 = sphi %s6255_s30, %s9877_s30   ;;  %s6185_s29 = sphi %s6253_s29, %s9876_s29   ;;  %s6181_s28 = sphi %s6251_s28, %s9875_s28   ;;  %s6177_s27 = sphi %s6249_s27, %s9874_s27  }
   0x7   : > { %p45_p0 = scmp.ne.s32.totalorder %s6181_s28, %s6177_s27  ;;  %p9360_p1 = scmp.eq.s32.totalorder %s6270_s9, 0 }
   0x8   : > { %p222_p3 = scmp.eq.s32.totalorder %s4752_s10, 3  ;;  %p4753_p5 = scmp.ge.s32.totalorder %s6189_s30, 1 }
   0x9   : > { %p6279_p4 = por %p9360_p1, %p45_p0  ;;  %p229_p7 = scmp.lt.s32.totalorder %s6189_s30, 5 }
   0xa   : > { %p6284_p6 = por %p222_p3, %p45_p0  ;;  %s6191_s14 = smov [#allocation5]  }
   0xb   : > { %s9483_s11 = scalar_select %p6279_p4, 1, 0 }
   0xc   : > { %s9484_s12 = scalar_select %p6284_p6, 1, 0 }
   0xd   : > { %p6289_p8 = pnand %p4753_p5, %p229_p7  ;;  %s241_s15 = sshll.u32 %s6191_s14, 4  ;;  %s242_s15 = int_to_ptr.vmem [resolvable:$true] %s241_s15 }
   0xe   : > { %s6192_s17 = smov [#allocation7]   ;;  %s6033_s21 = scalar_lea.hbm %s9352_s1, 24576 }
   0xf   : > { %s9485_s13 = scalar_select %p6289_p8, 1, 0 }
  0x10   : > { %p5361_p9 = pneg %p6289_p8  ;;  %s257_s18 = sshll.u32 %s6192_s17, 4  ;;  %s6301_s18 = int_to_ptr.vmem [resolvable:$true] %s257_s18 }
  0x11   : > { %p6034_p11 = scmp.ne.s32.totalorder %s9352_s1, %s6033_s21  ;;  %p6040_p3 = scmp.lt.u32.totalorder %s6033_s21, %s9352_s1 }
  0x12   : > { %p6297_p10 = pnand %p5361_p9, %p9360_p1 }
  0x14   : > { %p6035_p12 = pneg %p6297_p10 }
  0x16   : > { %p6036_p13 = pnand %p6035_p12, %p6034_p11 }
  0x18   : > { %p6037_p0 = pneg %p6036_p13 }
  0x1a   : > { %p6042_p5 = pnand %p6040_p3, %p6037_p0 }
  0x1c   : > { %6045 = shalt.err (!%p6042_p5)
}
  0x1d   : > { %s6046_s26 = scalar_lea.vmem %s242_s15, 24576  ;;  %p6054_p2 = scmp.lt.s32.totalorder %s242_s15, %s242_s15 }
  0x1e   : > { %p6047_p7 = scmp.ne.s32.totalorder %s242_s15, %s6046_s26  ;;  %p6055_p6 = scmp.lt.s32.totalorder %s6046_s26, %s6046_s26 }
  0x20   : > { %p6049_p9 = pnand %p6047_p7, %p6035_p12  ;;  %p6056_p4 = por %p6055_p6, %p6054_p2 }
  0x22   : > { %p6050_p1 = pneg %p6049_p9 }
  0x24   : > { %p6057_p8 = pnand %p6056_p4, %p6050_p1 }
  0x26   : > { %6060 = shalt.err (!%p6057_p8)
}
  0x27   : > { %s6193_s10 = smov 768   ;;  %s6194_s14 = smov 48  }
  0x28   : > { %5364 = dma.hbm_to_vmem [thread:$0]  (!%p6297_p10), %s9352_s1, 24576, %s242_s15, [#allocation6], %s6193_s10, %s6193_s10, %s6194_s14  }
  0x29   : > { %s6061_s22 = scalar_lea.hbm %s9354_s3, 8192 }
  0x2a   : > { %p6062_p11 = scmp.ne.s32.totalorder %s9354_s3, %s6061_s22  ;;  %p6068_p4 = scmp.lt.u32.totalorder %s6061_s22, %s9354_s3 }
  0x2c   : > { %p6064_p1 = pnand %p6062_p11, %p6035_p12 }
  0x2e   : > { %p6065_p2 = pneg %p6064_p1 }
  0x30   : > { %p6070_p6 = pnand %p6068_p4, %p6065_p2 }
  0x32   : > { %6073 = shalt.err (!%p6070_p6)
}
  0x33   : > { %s6074_s15 = scalar_lea.vmem %s6301_s18, 8192  ;;  %p6082_p3 = scmp.lt.s32.totalorder %s6301_s18, %s6301_s18 }
  0x34   : > { %p6075_p8 = scmp.ne.s32.totalorder %s6301_s18, %s6074_s15  ;;  %p6083_p5 = scmp.lt.s32.totalorder %s6074_s15, %s6074_s15 }
  0x36   : > { %p6077_p13 = pnand %p6075_p8, %p6035_p12  ;;  %p6084_p7 = por %p6083_p5, %p6082_p3 }
  0x38   : > { %p6078_p0 = pneg %p6077_p13 }
  0x3a   : > { %p6085_p9 = pnand %p6084_p7, %p6078_p0 }
  0x3c   : > { %6088 = shalt.err (!%p6085_p9)
}
  0x3d   : > { %s9363_s10 = smov 256   ;;  %s9364_s14 = smov 16  }
  0x3e   : > { %5367 = dma.hbm_to_vmem [thread:$0]  (!%p6297_p10), %s9354_s3, 8192, %s6301_s18, [#allocation6], %s9363_s10, %s9363_s10, %s9364_s14  }
  0x3f   : > { %s6354_s20 = sadd.s32 1, %s6189_s30   ;;  %s32_s22 = sadd.s32 1, %s6185_s29 }
  0x40   : > { %s29_s21 = ssub.s32 %s6189_s30, %s6354_s20  ;;  %p39_p11 = scmp.ne.s32.totalorder %s6185_s29, %s6181_s28 }
  0x41   : > { %p30_p12 = scmp.eq.s32.totalorder %s29_s21, 0  ;;  %p40_p1 = scmp.eq.s32.totalorder %s6189_s30, 0 }
  0x42   : > { %p9487_p4 = scmp.eq.s32.totalorder %s6270_s9, 3  ;;  %p5378_p8 = scmp.lt.s32.totalorder %s6189_s30, 4 }
  0x43   : > { %s6363_s23 = scalar_select %p30_p12, %s6185_s29, %s32_s22  }
  0x44   : > { %p41_p2 = por %p40_p1, %p39_p11  ;;  %p6367_p6 = por %p9487_p4, %p39_p11 }
  0x45   : > { %s283_s24 = sand.u32 1, %s6185_s29   ;;  %s4838_s18 = sshll.u32 %s6189_s30, 13 }
  0x46   : > { %s4757_s25 = sshll.u32 %s283_s24, 9  ;;  %s6377_s17 = scalar_lea.hbm %s9351_s0, %s4838_s18 }
  0x47   : > { %s287_s19 = scalar_lea.vmem [#allocation2], %s4757_s25  ;;  %p6381_p10 = pnand %p5378_p8, %p41_p2 }
  0x48   : > { %s295_s21 = sshll.u32 %s287_s19, 4  ;;  %s6385_s10 = scalar_lea.sflag [#allocation3], %s283_s24  ;;  %s6379_s21 = int_to_ptr.vmem [resolvable:$true] %s295_s21 }
  0x49   : > { %s6089_s14 = scalar_lea.hbm %s6377_s17, 8192  ;;  %p6091_p0 = pneg %p6381_p10 }
  0x4a   : > { %p6090_p13 = scmp.ne.s32.totalorder %s6377_s17, %s6089_s14  ;;  %s6094_s26 = scalar_lea.hbm %s9351_s0, 32768 }
  0x4b   : > { %p6095_p7 = scmp.lt.u32.totalorder %s6377_s17, %s9351_s0  ;;  %p6096_p9 = scmp.lt.u32.totalorder %s6094_s26, %s6089_s14 }
  0x4c   : > { %p6092_p3 = pnand %p6091_p0, %p6090_p13  ;;  %p6098_p11 = scmp.lt.u32.totalorder %s6089_s14, %s6377_s17 }
  0x4d   : > { %p6097_p12 = por %p6096_p9, %p6095_p7 }
  0x4e   : > { %p6093_p5 = pneg %p6092_p3 }
  0x4f   : > { %p6099_p1 = por %p6098_p11, %p6097_p12 }
  0x51   : > { %p6100_p2 = pnand %p6099_p1, %p6093_p5 }
  0x53   : > { %6103 = shalt.err (!%p6100_p2)
}
  0x54   : > { %s6104_s24 = scalar_lea.vmem %s6379_s21, 8192  ;;  %s6197_s25 = smov [#allocation2]  }
  0x55   : > { %p6105_p4 = scmp.ne.s32.totalorder %s6379_s21, %s6104_s24  ;;  %s6109_s18 = sshll.u32 %s6197_s25, 4  ;;  %s6110_s18 = int_to_ptr.vmem [resolvable:$false] %s6109_s18 }
  0x56   : > { %s6111_s15 = scalar_lea.vmem %s6110_s18, 16384  ;;  %p6112_p3 = scmp.lt.s32.totalorder %s6379_s21, %s6110_s18 }
  0x57   : > { %p6107_p8 = pnand %p6105_p4, %p6091_p0  ;;  %p6113_p7 = scmp.lt.s32.totalorder %s6111_s15, %s6104_s24 }
  0x59   : > { %p6108_p13 = pneg %p6107_p8  ;;  %p6114_p9 = por %p6113_p7, %p6112_p3 }
  0x5b   : > { %p6115_p12 = pnand %p6114_p9, %p6108_p13 }
  0x5d   : > { %6118 = shalt.err (!%p6115_p12)
}
  0x5e   : > { %s9490_s14 = smov 16   ;;  %s9491_s26 = smov 256  }
  0x5f   : > { %5371 = dma.hbm_to_vmem [thread:$0]  (!%p6381_p10), %s6377_s17, 8192, %s6379_s21, %s6385_s10, %s9491_s26, %s9491_s26, %s9490_s14  }
  0x60   : > { %p9492_p0 = scmp.ne.s32.totalorder %s9485_s13, 0 }
  0x62   : > { %307 = sbr.rel (%p9492_p0) target bundleno = 2123 (0x84b), region = 52 }
  0x69   : > { %s6419_s19 = sand.u32 1, %s6181_s28   ;;  %p9493_p5 = scmp.ne.s32.totalorder %s9483_s11, 0 }
  0x6a   : > { %s4762_s24 = sshll.u32 %s6419_s19, 9  ;;  %s310_s25 = scalar_lea.sflag [#allocation3], %s6419_s19 }
  0x6b   : > { %s6425_s22 = scalar_lea.vmem [#allocation2], %s4762_s24 }
  0x6c   : > { %6164 = dma.done.wait (%p9493_p5), %s310_s25, 8192  }
  0x6d   : > { %6166 = vsyncadd (%p9493_p5), %s310_s25, 4294959104  ;;  %p9494_p10 = scmp.eq.s32.totalorder %s6270_s9, 0 }
  0x6f   : > { %6168 = dma.done.wait (%p9494_p10), [#allocation6], 32768   ;;  %p9495_p11 = pmov %p9494_p10 }
  0x70   : > { %v421_v0 = vld [vmem:[#allocation5 + $0x8] sm:$0xff]  ;;  %v427_v1 = vld [vmem:[#allocation5 + $0x38] sm:$0xff]  ;;  %v420_v5 = vld [vmem:[#allocation5] sm:$0xff]  ;;  %vm2665_vm0 = vcmask 261120   ;;  %s8485_s15 = scalar_lea.vmem [#allocation8], %s4762_s24  ;;  %s6199_s24 = smov 32  }
  0x71   : > { %6170 = vsyncadd (%p9495_p11), [#allocation6], 4294934528  ;;  %v423_v2 = vld [vmem:[#allocation5 + $0x18] sm:$0xff]  ;;  %v4933_v3 = vpack.c.bf16 %v427_v1, %v421_v0  ;;  %v429_v4 = vld [vmem:[#allocation5 + $0x48] sm:$0xff]  ;;  %s6201_s13 = smov [#allocation8]  }
  0x72   : > { %v426_v6 = vld [vmem:[#allocation5 + $0x30] sm:$0xff]  ;;  %v4997_v7 = vpack.c.bf16 %v429_v4, %v423_v2  ;;  %v428_v10 = vld [vmem:[#allocation5 + $0x40] sm:$0xff]  ;;  %v433_v11 = vld [vmem:[#allocation5 + $0x68] sm:$0xff]  ;;  %s6123_s10 = sshll.u32 %s6201_s13, 4  ;;  %s6124_s10 = int_to_ptr.vmem [resolvable:$false] %s6123_s10 }
  0x73   : > { %v4935_v8 = vpack.c.bf16 %v426_v6, %v420_v5  ;;  %v422_v9 = vld [vmem:[#allocation5 + $0x10] sm:$0xff]  ;;  %4934 = vmatprep.subr.bf16.mxu0 %v4933_v3  ;;  %v439_v13 = vld [vmem:[#allocation5 + $0x98] sm:$0xff]  ;;  %v441_v15 = vld [vmem:[#allocation5 + $0xa8] sm:$0xff]  ;;  %s6125_s17 = scalar_lea.vmem %s6124_s10, 16384 }
  0x74   : > { %v4999_v12 = vpack.c.bf16 %v428_v10, %v422_v9  ;;  %v435_v14 = vld [vmem:[#allocation5 + $0x78] sm:$0xff]  ;;  %4998 = vmatprep.subr.bf16.mxu1 %v4997_v7  ;;  %v4937_v16 = vpack.c.bf16 %v439_v13, %v433_v11  ;;  %v432_v18 = vld [vmem:[#allocation5 + $0x60] sm:$0xff]  ;;  %v438_v19 = vld [vmem:[#allocation5 + $0x90] sm:$0xff] }
  0x75   : > { %4936 = vmatpush1.bf16.msra.mxu0 %v4935_v8  ;;  %v5001_v17 = vpack.c.bf16 %v441_v15, %v435_v14  ;;  %v434_v20 = vld [vmem:[#allocation5 + $0x70] sm:$0xff]  ;;  %v4939_v21 = vpack.c.bf16 %v438_v19, %v432_v18  ;;  %v440_v22 = vld [vmem:[#allocation5 + $0xa0] sm:$0xff]  ;;  %v445_v23 = vld [vmem:[#allocation5 + $0xc8] sm:$0xff] }
  0x76   : > { %5000 = vmatpush1.bf16.msra.mxu1 %v4999_v12  ;;  %v451_v24 = vld [vmem:[#allocation5 + $0xf8] sm:$0xff]  ;;  %4938 = vmatprep.subr.bf16.mxu0 %v4937_v16  ;;  %v5003_v25 = vpack.c.bf16 %v440_v22, %v434_v20  ;;  %v453_v28 = vld [vmem:[#allocation5 + $0x108] sm:$0xff]  ;;  %v444_v29 = vld [vmem:[#allocation5 + $0xc0] sm:$0xff] }
  0x77   : > { %5002 = vmatprep.subr.bf16.mxu1 %v5001_v17  ;;  %v4941_v26 = vpack.c.bf16 %v451_v24, %v445_v23  ;;  %v447_v27 = vld [vmem:[#allocation5 + $0xd8] sm:$0xff]  ;;  %v450_v31 = vld [vmem:[#allocation5 + $0xf0] sm:$0xff]  ;;  %v452_v33 = vld [vmem:[#allocation5 + $0x100] sm:$0xff] }
  0x78   : > { %v5005_v30 = vpack.c.bf16 %v453_v28, %v447_v27  ;;  %v446_v32 = vld [vmem:[#allocation5 + $0xd0] sm:$0xff]  ;;  %v4943_v34 = vpack.c.bf16 %v450_v31, %v444_v29  ;;  %v457_v35 = vld [vmem:[#allocation5 + $0x128] sm:$0xff]  ;;  %v463_v36 = vld [vmem:[#allocation5 + $0x158] sm:$0xff] }
  0x79   : > { %4940 = vmatpush1.bf16.msra.mxu0 %v4939_v21  ;;  %v459_v37 = vld [vmem:[#allocation5 + $0x138] sm:$0xff]  ;;  %v5007_v38 = vpack.c.bf16 %v452_v33, %v446_v32  ;;  %v4945_v39 = vpack.c.bf16 %v463_v36, %v457_v35  ;;  %v465_v40 = vld [vmem:[#allocation5 + $0x168] sm:$0xff]  ;;  %v456_v41 = vld [vmem:[#allocation5 + $0x120] sm:$0xff] }
  0x7a   : > { %5004 = vmatpush1.bf16.msra.mxu1 %v5003_v25  ;;  %4942 = vmatprep.subr.bf16.mxu0 %v4941_v26  ;;  %v462_v42 = vld [vmem:[#allocation5 + $0x150] sm:$0xff]  ;;  %v5009_v43 = vpack.c.bf16 %v465_v40, %v459_v37  ;;  %v464_v45 = vld [vmem:[#allocation5 + $0x160] sm:$0xff]  ;;  %v469_v46 = vld [vmem:[#allocation5 + $0x188] sm:$0xff] }
  0x7b   : > { %5006 = vmatprep.subr.bf16.mxu1 %v5005_v30  ;;  %v458_v44 = vld [vmem:[#allocation5 + $0x130] sm:$0xff]  ;;  %v475_v47 = vld [vmem:[#allocation5 + $0x1b8] sm:$0xff]  ;;  %v477_v49 = vld [vmem:[#allocation5 + $0x1c8] sm:$0xff]  ;;  %v4947_v50 = vpack.c.bf16 %v462_v42, %v456_v41 }
  0x7c   : > { %v471_v48 = vld [vmem:[#allocation5 + $0x198] sm:$0xff]  ;;  %v5011_v51 = vpack.c.bf16 %v464_v45, %v458_v44  ;;  %v4949_v52 = vpack.c.bf16 %v475_v47, %v469_v46  ;;  %v468_v53 = vld [vmem:[#allocation5 + $0x180] sm:$0xff]  ;;  %v474_v54 = vld [vmem:[#allocation5 + $0x1b0] sm:$0xff] }
  0x7d   : > { %4944 = vmatpush1.bf16.msra.mxu0 %v4943_v34  ;;  %v470_v55 = vld [vmem:[#allocation5 + $0x190] sm:$0xff]  ;;  %v5013_v56 = vpack.c.bf16 %v477_v49, %v471_v48  ;;  %v476_v57 = vld [vmem:[#allocation5 + $0x1c0] sm:$0xff]  ;;  %v481_v58 = vld [vmem:[#allocation5 + $0x1e8] sm:$0xff]  ;;  %v4951_v62 = vpack.c.bf16 %v474_v54, %v468_v53 }
  0x7e   : > { %5008 = vmatpush1.bf16.msra.mxu1 %v5007_v38  ;;  %4946 = vmatprep.subr.bf16.mxu0 %v4945_v39  ;;  %v487_v59 = vld [vmem:[#allocation5 + $0x218] sm:$0xff]  ;;  %v489_v61 = vld [vmem:[#allocation5 + $0x228] sm:$0xff]  ;;  %v5015_v63 = vpack.c.bf16 %v476_v57, %v470_v55  ;;  %v480_v1 = vld [vmem:[#allocation5 + $0x1e0] sm:$0xff] }
  0x7f   : > { %5010 = vmatprep.subr.bf16.mxu1 %v5009_v43  ;;  %v483_v60 = vld [vmem:[#allocation5 + $0x1f8] sm:$0xff]  ;;  %v4953_v0 = vpack.c.bf16 %v487_v59, %v481_v58  ;;  %v486_v2 = vld [vmem:[#allocation5 + $0x210] sm:$0xff]  ;;  %v488_v5 = vld [vmem:[#allocation5 + $0x220] sm:$0xff] }
  0x80   : > { %v482_v3 = vld [vmem:[#allocation5 + $0x1f0] sm:$0xff]  ;;  %v5017_v4 = vpack.c.bf16 %v489_v61, %v483_v60  ;;  %v493_v6 = vld [vmem:[#allocation5 + $0x248] sm:$0xff]  ;;  %v499_v7 = vld [vmem:[#allocation5 + $0x278] sm:$0xff]  ;;  %v4955_v10 = vpack.c.bf16 %v486_v2, %v480_v1 }
  0x81   : > { %4948 = vmatpush1.bf16.msra.mxu0 %v4947_v50  ;;  %v495_v8 = vld [vmem:[#allocation5 + $0x258] sm:$0xff]  ;;  %v501_v9 = vld [vmem:[#allocation5 + $0x288] sm:$0xff]  ;;  %v5019_v11 = vpack.c.bf16 %v488_v5, %v482_v3  ;;  %v4957_v12 = vpack.c.bf16 %v499_v7, %v493_v6  ;;  %v492_v13 = vld [vmem:[#allocation5 + $0x240] sm:$0xff] }
  0x82   : > { %5012 = vmatpush1.bf16.msra.mxu1 %v5011_v51  ;;  %4950 = vmatprep.subr.bf16.mxu0 %v4949_v52  ;;  %v498_v14 = vld [vmem:[#allocation5 + $0x270] sm:$0xff]  ;;  %v5021_v16 = vpack.c.bf16 %v501_v9, %v495_v8  ;;  %v500_v17 = vld [vmem:[#allocation5 + $0x280] sm:$0xff]  ;;  %v505_v18 = vld [vmem:[#allocation5 + $0x2a8] sm:$0xff] }
  0x83   : > { %5014 = vmatprep.subr.bf16.mxu1 %v5013_v56  ;;  %v494_v15 = vld [vmem:[#allocation5 + $0x250] sm:$0xff]  ;;  %v511_v19 = vld [vmem:[#allocation5 + $0x2d8] sm:$0xff]  ;;  %v513_v21 = vld [vmem:[#allocation5 + $0x2e8] sm:$0xff]  ;;  %v4959_v22 = vpack.c.bf16 %v498_v14, %v492_v13 }
  0x84   : > { %v507_v20 = vld [vmem:[#allocation5 + $0x2b8] sm:$0xff]  ;;  %v5023_v23 = vpack.c.bf16 %v500_v17, %v494_v15  ;;  %v4961_v24 = vpack.c.bf16 %v511_v19, %v505_v18  ;;  %v504_v25 = vld [vmem:[#allocation5 + $0x2a0] sm:$0xff]  ;;  %v510_v26 = vld [vmem:[#allocation5 + $0x2d0] sm:$0xff] }
  0x85   : > { %4952 = vmatpush1.bf16.msra.mxu0 %v4951_v62  ;;  %v506_v27 = vld [vmem:[#allocation5 + $0x2b0] sm:$0xff]  ;;  %v5025_v28 = vpack.c.bf16 %v513_v21, %v507_v20  ;;  %v512_v29 = vld [vmem:[#allocation5 + $0x2e0] sm:$0xff]  ;;  %v517_v30 = vld [vmem:[#allocation5 + $0x308] sm:$0xff]  ;;  %v4963_v34 = vpack.c.bf16 %v510_v26, %v504_v25 }
  0x86   : > { %5016 = vmatpush1.bf16.msra.mxu1 %v5015_v63  ;;  %4954 = vmatprep.subr.bf16.mxu0 %v4953_v0  ;;  %v523_v31 = vld [vmem:[#allocation5 + $0x338] sm:$0xff]  ;;  %v525_v33 = vld [vmem:[#allocation5 + $0x348] sm:$0xff]  ;;  %v5027_v35 = vpack.c.bf16 %v512_v29, %v506_v27  ;;  %v516_v37 = vld [vmem:[#allocation5 + $0x300] sm:$0xff] }
  0x87   : > { %5018 = vmatprep.subr.bf16.mxu1 %v5017_v4  ;;  %v519_v32 = vld [vmem:[#allocation5 + $0x318] sm:$0xff]  ;;  %v4965_v36 = vpack.c.bf16 %v523_v31, %v517_v30  ;;  %v522_v38 = vld [vmem:[#allocation5 + $0x330] sm:$0xff]  ;;  %v524_v41 = vld [vmem:[#allocation5 + $0x340] sm:$0xff] }
  0x88   : > { %v518_v39 = vld [vmem:[#allocation5 + $0x310] sm:$0xff]  ;;  %v5029_v40 = vpack.c.bf16 %v525_v33, %v519_v32  ;;  %v529_v42 = vld [vmem:[#allocation5 + $0x368] sm:$0xff]  ;;  %v535_v43 = vld [vmem:[#allocation5 + $0x398] sm:$0xff]  ;;  %v4967_v46 = vpack.c.bf16 %v522_v38, %v516_v37 }
  0x89   : > { %4956 = vmatpush1.bf16.msra.mxu0 %v4955_v10  ;;  %v531_v44 = vld [vmem:[#allocation5 + $0x378] sm:$0xff]  ;;  %v537_v45 = vld [vmem:[#allocation5 + $0x3a8] sm:$0xff]  ;;  %v5031_v47 = vpack.c.bf16 %v524_v41, %v518_v39  ;;  %v4969_v48 = vpack.c.bf16 %v535_v43, %v529_v42  ;;  %v528_v49 = vld [vmem:[#allocation5 + $0x360] sm:$0xff] }
  0x8a   : > { %5020 = vmatpush1.bf16.msra.mxu1 %v5019_v11  ;;  %4958 = vmatprep.subr.bf16.mxu0 %v4957_v12  ;;  %v534_v50 = vld [vmem:[#allocation5 + $0x390] sm:$0xff]  ;;  %v5033_v52 = vpack.c.bf16 %v537_v45, %v531_v44  ;;  %v536_v53 = vld [vmem:[#allocation5 + $0x3a0] sm:$0xff]  ;;  %v541_v54 = vld [vmem:[#allocation5 + $0x3c8] sm:$0xff] }
  0x8b   : > { %5022 = vmatprep.subr.bf16.mxu1 %v5021_v16  ;;  %v530_v51 = vld [vmem:[#allocation5 + $0x370] sm:$0xff]  ;;  %v547_v55 = vld [vmem:[#allocation5 + $0x3f8] sm:$0xff]  ;;  %v549_v57 = vld [vmem:[#allocation5 + $0x408] sm:$0xff]  ;;  %v4971_v58 = vpack.c.bf16 %v534_v50, %v528_v49 }
  0x8c   : > { %v543_v56 = vld [vmem:[#allocation5 + $0x3d8] sm:$0xff]  ;;  %v5035_v59 = vpack.c.bf16 %v536_v53, %v530_v51  ;;  %v4973_v60 = vpack.c.bf16 %v547_v55, %v541_v54  ;;  %v540_v61 = vld [vmem:[#allocation5 + $0x3c0] sm:$0xff]  ;;  %v546_v62 = vld [vmem:[#allocation5 + $0x3f0] sm:$0xff] }
  0x8d   : > { %4960 = vmatpush1.bf16.msra.mxu0 %v4959_v22  ;;  %v542_v63 = vld [vmem:[#allocation5 + $0x3d0] sm:$0xff]  ;;  %v5037_v0 = vpack.c.bf16 %v549_v57, %v543_v56  ;;  %v548_v1 = vld [vmem:[#allocation5 + $0x400] sm:$0xff]  ;;  %v553_v2 = vld [vmem:[#allocation5 + $0x428] sm:$0xff]  ;;  %v4975_v6 = vpack.c.bf16 %v546_v62, %v540_v61 }
  0x8e   : > { %5024 = vmatpush1.bf16.msra.mxu1 %v5023_v23  ;;  %4962 = vmatprep.subr.bf16.mxu0 %v4961_v24  ;;  %v559_v3 = vld [vmem:[#allocation5 + $0x458] sm:$0xff]  ;;  %v561_v5 = vld [vmem:[#allocation5 + $0x468] sm:$0xff]  ;;  %v552_v7 = vld [vmem:[#allocation5 + $0x420] sm:$0xff]  ;;  %v5039_v8 = vpack.c.bf16 %v548_v1, %v542_v63 }
  0x8f   : > { %5026 = vmatprep.subr.bf16.mxu1 %v5025_v28  ;;  %v555_v4 = vld [vmem:[#allocation5 + $0x438] sm:$0xff]  ;;  %v4977_v9 = vpack.c.bf16 %v559_v3, %v553_v2  ;;  %v558_v10 = vld [vmem:[#allocation5 + $0x450] sm:$0xff]  ;;  %v560_v12 = vld [vmem:[#allocation5 + $0x460] sm:$0xff] }
  0x90   : > { %v554_v11 = vld [vmem:[#allocation5 + $0x430] sm:$0xff]  ;;  %v5041_v13 = vpack.c.bf16 %v561_v5, %v555_v4  ;;  %v565_v14 = vld [vmem:[#allocation5 + $0x488] sm:$0xff]  ;;  %v571_v15 = vld [vmem:[#allocation5 + $0x4b8] sm:$0xff]  ;;  %v4979_v19 = vpack.c.bf16 %v558_v10, %v552_v7 }
  0x91   : > { %4964 = vmatpush1.bf16.msra.mxu0 %v4963_v34  ;;  %v6436_v16 = vld [vmem:[%s6425_s22 + $0x8] sm:$0xff]  ;;  %v567_v17 = vld [vmem:[#allocation5 + $0x498] sm:$0xff]  ;;  %v5043_v20 = vpack.c.bf16 %v560_v12, %v554_v11  ;;  %v4981_v21 = vpack.c.bf16 %v571_v15, %v565_v14  ;;  %v564_v22 = vld [vmem:[#allocation5 + $0x480] sm:$0xff] }
  0x92   : > { %5028 = vmatpush1.bf16.msra.mxu1 %v5027_v35  ;;  %4966 = vmatprep.subr.bf16.mxu0 %v4965_v36  ;;  %v573_v18 = vld [vmem:[#allocation5 + $0x4c8] sm:$0xff]  ;;  %v570_v23 = vld [vmem:[#allocation5 + $0x4b0] sm:$0xff]  ;;  %v572_v26 = vld [vmem:[#allocation5 + $0x4c0] sm:$0xff] }
  0x93   : > { %5030 = vmatprep.subr.bf16.mxu1 %v5029_v40  ;;  %708 = vmatprep.mubr.f32.mxu0 %v6436_v16  ;;  %v566_v24 = vld [vmem:[#allocation5 + $0x490] sm:$0xff]  ;;  %v5045_v25 = vpack.c.bf16 %v573_v18, %v567_v17  ;;  %v577_v27 = vld [vmem:[#allocation5 + $0x4e8] sm:$0xff]  ;;  %v583_v28 = vld [vmem:[#allocation5 + $0x518] sm:$0xff]  ;;  %v4983_v31 = vpack.c.bf16 %v570_v23, %v564_v22 }
  0x94   : > { %965 = vmatprep.mubr.f32.mxu1 %v6436_v16  ;;  %v579_v29 = vld [vmem:[#allocation5 + $0x4f8] sm:$0xff]  ;;  %v585_v30 = vld [vmem:[#allocation5 + $0x528] sm:$0xff]  ;;  %v5047_v32 = vpack.c.bf16 %v572_v26, %v566_v24  ;;  %v4985_v33 = vpack.c.bf16 %v583_v28, %v577_v27  ;;  %v576_v34 = vld [vmem:[#allocation5 + $0x4e0] sm:$0xff] }
  0x95   : > { %4968 = vmatpush1.bf16.msra.mxu0 %v4967_v46  ;;  %v582_v35 = vld [vmem:[#allocation5 + $0x510] sm:$0xff]  ;;  %v5049_v37 = vpack.c.bf16 %v585_v30, %v579_v29  ;;  %v584_v38 = vld [vmem:[#allocation5 + $0x520] sm:$0xff]  ;;  %v589_v39 = vld [vmem:[#allocation5 + $0x548] sm:$0xff] }
  0x96   : > { %5032 = vmatpush1.bf16.msra.mxu1 %v5031_v47  ;;  %4970 = vmatprep.subr.bf16.mxu0 %v4969_v48  ;;  %v578_v36 = vld [vmem:[#allocation5 + $0x4f0] sm:$0xff]  ;;  %v595_v40 = vld [vmem:[#allocation5 + $0x578] sm:$0xff]  ;;  %v597_v42 = vld [vmem:[#allocation5 + $0x588] sm:$0xff]  ;;  %v4987_v43 = vpack.c.bf16 %v582_v35, %v576_v34 }
  0x97   : > { %5034 = vmatprep.subr.bf16.mxu1 %v5033_v52  ;;  %v591_v41 = vld [vmem:[#allocation5 + $0x558] sm:$0xff]  ;;  %v5051_v44 = vpack.c.bf16 %v584_v38, %v578_v36  ;;  %v4989_v45 = vpack.c.bf16 %v595_v40, %v589_v39  ;;  %v588_v46 = vld [vmem:[#allocation5 + $0x540] sm:$0xff]  ;;  %v594_v47 = vld [vmem:[#allocation5 + $0x570] sm:$0xff] }
  0x98   : > { %v590_v48 = vld [vmem:[#allocation5 + $0x550] sm:$0xff]  ;;  %v5053_v49 = vpack.c.bf16 %v597_v42, %v591_v41  ;;  %v596_v50 = vld [vmem:[#allocation5 + $0x580] sm:$0xff]  ;;  %v601_v51 = vld [vmem:[#allocation5 + $0x5a8] sm:$0xff]  ;;  %v4991_v55 = vpack.c.bf16 %v594_v47, %v588_v46 }
  0x99   : > { %4972 = vmatpush1.bf16.msra.mxu0 %v4971_v58  ;;  %v607_v52 = vld [vmem:[#allocation5 + $0x5d8] sm:$0xff]  ;;  %v609_v54 = vld [vmem:[#allocation5 + $0x5e8] sm:$0xff]  ;;  %v5055_v56 = vpack.c.bf16 %v596_v50, %v590_v48  ;;  %v600_v58 = vld [vmem:[#allocation5 + $0x5a0] sm:$0xff] }
  0x9a   : > { %5036 = vmatpush1.bf16.msra.mxu1 %v5035_v59  ;;  %4974 = vmatprep.subr.bf16.mxu0 %v4973_v60  ;;  %v603_v53 = vld [vmem:[#allocation5 + $0x5b8] sm:$0xff]  ;;  %v4993_v57 = vpack.c.bf16 %v607_v52, %v601_v51  ;;  %v606_v59 = vld [vmem:[#allocation5 + $0x5d0] sm:$0xff]  ;;  %v608_v62 = vld [vmem:[#allocation5 + $0x5e0] sm:$0xff] }
  0x9b   : > { %5038 = vmatprep.subr.bf16.mxu1 %v5037_v0  ;;  %v5057_v60 = vpack.c.bf16 %v609_v54, %v603_v53  ;;  %v602_v61 = vld [vmem:[#allocation5 + $0x5b0] sm:$0xff]  ;;  %v1480_v63 = vld [vmem:[#allocation7 + $0x8] sm:$0xff]  ;;  %v1482_v0 = vld [vmem:[#allocation7 + $0x18] sm:$0xff]  ;;  %v4995_v1 = vpack.c.bf16 %v606_v59, %v600_v58 }
  0x9c   : > { %v5059_v2 = vpack.c.bf16 %v608_v62, %v602_v61  ;;  %v6440_v3 = vpack.c.bf16 %v1482_v0, %v1480_v63  ;;  %v1479_v4 = vld [vmem:[#allocation7] sm:$0xff]  ;;  %v1481_v5 = vld [vmem:[#allocation7 + $0x10] sm:$0xff]  ;;  %v1486_v7 = vld [vmem:[#allocation7 + $0x38] sm:$0xff] }
  0x9d   : > { %4976 = vmatpush1.bf16.msra.mxu0 %v4975_v6  ;;  %v1484_v6 = vld [vmem:[#allocation7 + $0x28] sm:$0xff]  ;;  %v6444_v10 = vpack.c.bf16 %v1481_v5, %v1479_v4  ;;  %v1483_v12 = vld [vmem:[#allocation7 + $0x20] sm:$0xff]  ;;  %v1490_v15 = vld [vmem:[#allocation7 + $0x58] sm:$0xff] }
  0x9e   : > { %5040 = vmatpush1.bf16.msra.mxu1 %v5039_v8  ;;  %4978 = vmatprep.subr.bf16.mxu0 %v4977_v9  ;;  %v356_v8 = vld [vmem:[%s6425_s22] sm:$0xff]  ;;  %v359_v9 = vld [vmem:[%s6425_s22 + $0x18] sm:$0xff]  ;;  %v6447_v11 = vpack.c.bf16 %v1486_v7, %v1484_v6  ;;  %v1488_v14 = vld [vmem:[#allocation7 + $0x48] sm:$0xff] }
  0x9f   : > { %5042 = vmatprep.subr.bf16.mxu1 %v5041_v13  ;;  %9496 = vst [vmem:[#allocation12_spill] sm:$0xff] %v6444_v10  ;;  %v1485_v13 = vld [vmem:[#allocation7 + $0x30] sm:$0xff]  ;;  %v361_v18 = vld [vmem:[%s6425_s22 + $0x28] sm:$0xff]  ;;  %v1494_v24 = vld [vmem:[#allocation7 + $0x78] sm:$0xff] }
  0xa0   : > { %9497 = vst [vmem:[#allocation13_spill] sm:$0xff] %v6447_v11  ;;  %v358_v17 = vld [vmem:[%s6425_s22 + $0x10] sm:$0xff]  ;;  %v1492_v23 = vld [vmem:[#allocation7 + $0x68] sm:$0xff]  ;;  %v363_v26 = vld [vmem:[%s6425_s22 + $0x38] sm:$0xff] }
  0xa1   : > { %4980 = vmatpush1.bf16.msra.mxu0 %v4979_v19  ;;  %v6452_v19 = vpack.c.bf16 %v1485_v13, %v1483_v12  ;;  %v1489_v22 = vld [vmem:[#allocation7 + $0x50] sm:$0xff]  ;;  %v6463_v28 = vpack.c.bf16 %v1494_v24, %v1492_v23  ;;  %v1491_v29 = vld [vmem:[#allocation7 + $0x60] sm:$0xff]  ;;  %v365_v34 = vld [vmem:[%s6425_s22 + $0x48] sm:$0xff] }
  0xa2   : > { %5044 = vmatpush1.bf16.msra.mxu1 %v5043_v20  ;;  %4982 = vmatprep.subr.bf16.mxu0 %v4981_v21  ;;  %v6455_v20 = vpack.c.bf16 %v1490_v15, %v1488_v14  ;;  %v1487_v21 = vld [vmem:[#allocation7 + $0x40] sm:$0xff]  ;;  %v1493_v30 = vld [vmem:[#allocation7 + $0x70] sm:$0xff]  ;;  %v1500_v39 = vld [vmem:[#allocation7 + $0xa8] sm:$0xff] }
  0xa3   : > { %5046 = vmatprep.subr.bf16.mxu1 %v5045_v25  ;;  %9498 = vst [vmem:[#allocation14_spill] sm:$0xff] %v6452_v19  ;;  %v360_v25 = vld [vmem:[%s6425_s22 + $0x20] sm:$0xff]  ;;  %v6460_v27 = vpack.c.bf16 %v1489_v22, %v1487_v21  ;;  %9501 = vst [vmem:[#allocation17_spill] sm:$0xff] %v6463_v28  ;;  %v6468_v35 = vpack.c.bf16 %v1493_v30, %v1491_v29  ;;  %v1497_v38 = vld [vmem:[#allocation7 + $0x90] sm:$0xff] }
  0xa4   : > { %9499 = vst [vmem:[#allocation15_spill] sm:$0xff] %v6455_v20  ;;  %v1502_v40 = vld [vmem:[#allocation7 + $0xb8] sm:$0xff]  ;;  %v364_v41 = vld [vmem:[%s6425_s22 + $0x40] sm:$0xff]  ;;  %v1501_v46 = vld [vmem:[#allocation7 + $0xb0] sm:$0xff] }
  0xa5   : > { %4984 = vmatpush1.bf16.msra.mxu0 %v4983_v31  ;;  %9500 = vst [vmem:[#allocation16_spill] sm:$0xff] %v6460_v27  ;;  %v1496_v31 = vld [vmem:[#allocation7 + $0x88] sm:$0xff]  ;;  %9502 = vst [vmem:[#allocation18_spill] sm:$0xff] %v6468_v35  ;;  %v367_v42 = vld [vmem:[%s6425_s22 + $0x58] sm:$0xff] }
  0xa6   : > { %5048 = vmatpush1.bf16.msra.mxu1 %v5047_v32  ;;  %4986 = vmatprep.subr.bf16.mxu0 %v4985_v33  ;;  %v1498_v32 = vld [vmem:[#allocation7 + $0x98] sm:$0xff]  ;;  %v362_v33 = vld [vmem:[%s6425_s22 + $0x30] sm:$0xff]  ;;  %v1504_v47 = vld [vmem:[#allocation7 + $0xc8] sm:$0xff] }
  0xa7   : > { %5050 = vmatprep.subr.bf16.mxu1 %v5049_v37  ;;  %v6471_v36 = vpack.c.bf16 %v1498_v32, %v1496_v31  ;;  %v1495_v37 = vld [vmem:[#allocation7 + $0x80] sm:$0xff]  ;;  %v1506_v48 = vld [vmem:[#allocation7 + $0xd8] sm:$0xff]  ;;  %v369_v50 = vld [vmem:[%s6425_s22 + $0x68] sm:$0xff] }
  0xa8   : > { %v6487_v52 = vpack.c.bf16 %v1506_v48, %v1504_v47  ;;  %v1503_v53 = vld [vmem:[#allocation7 + $0xc0] sm:$0xff]  ;;  %v1505_v54 = vld [vmem:[#allocation7 + $0xd0] sm:$0xff]  ;;  %v371_v58 = vld [vmem:[%s6425_s22 + $0x78] sm:$0xff] }
  0xa9   : > { %4988 = vmatpush1.bf16.msra.mxu0 %v4987_v43  ;;  %9503 = vst [vmem:[#allocation19_spill] sm:$0xff] %v6471_v36  ;;  %v6476_v43 = vpack.c.bf16 %v1497_v38, %v1495_v37  ;;  %v6492_v59 = vpack.c.bf16 %v1505_v54, %v1503_v53  ;;  %v1507_v61 = vld [vmem:[#allocation7 + $0xe0] sm:$0xff]  ;;  %v1509_v62 = vld [vmem:[#allocation7 + $0xf0] sm:$0xff]  ;;  %v1512_v63 = vld [vmem:[#allocation7 + $0x108] sm:$0xff] }
  0xaa   : > { %5052 = vmatpush1.bf16.msra.mxu1 %v5051_v44  ;;  %4990 = vmatprep.subr.bf16.mxu0 %v4989_v45  ;;  %v6479_v44 = vpack.c.bf16 %v1502_v40, %v1500_v39  ;;  %v1499_v45 = vld [vmem:[#allocation7 + $0xa0] sm:$0xff]  ;;  %9507 = vst [vmem:[#allocation23_spill] sm:$0xff] %v6487_v52  ;;  %v1514_v0 = vld [vmem:[#allocation7 + $0x118] sm:$0xff]  ;;  %v6500_v4 = vpack.c.bf16 %v1509_v62, %v1507_v61  ;;  %v1513_v7 = vld [vmem:[#allocation7 + $0x110] sm:$0xff] }
  0xab   : > { %5054 = vmatprep.subr.bf16.mxu1 %v5053_v49  ;;  %9504 = vst [vmem:[#allocation20_spill] sm:$0xff] %v6476_v43  ;;  %v366_v49 = vld [vmem:[%s6425_s22 + $0x50] sm:$0xff]  ;;  %v6484_v51 = vpack.c.bf16 %v1501_v46, %v1499_v45  ;;  %9508 = vst [vmem:[#allocation24_spill] sm:$0xff] %v6492_v59  ;;  %v6503_v5 = vpack.c.bf16 %v1514_v0, %v1512_v63  ;;  %v1511_v6 = vld [vmem:[#allocation7 + $0x100] sm:$0xff] }
  0xac   : > { %9505 = vst [vmem:[#allocation21_spill] sm:$0xff] %v6479_v44  ;;  %9510 = vst [vmem:[#allocation26_spill] sm:$0xff] %v6500_v4  ;;  %v372_v12 = vld [vmem:[%s6425_s22 + $0x80] sm:$0xff]  ;;  %v375_v13 = vld [vmem:[%s6425_s22 + $0x98] sm:$0xff]  ;;  %v6508_v14 = vpack.c.bf16 %v1513_v7, %v1511_v6 }
  0xad   : > { %4992 = vmatpush1.bf16.msra.mxu0 %v4991_v55  ;;  %9506 = vst [vmem:[#allocation22_spill] sm:$0xff] %v6484_v51  ;;  %v1508_v55 = vld [vmem:[#allocation7 + $0xe8] sm:$0xff]  ;;  %9511 = vst [vmem:[#allocation27_spill] sm:$0xff] %v6503_v5  ;;  %v1522_v22 = vld [vmem:[#allocation7 + $0x158] sm:$0xff] }
  0xae   : > { %5056 = vmatpush1.bf16.msra.mxu1 %v5055_v56  ;;  %4994 = vmatprep.subr.bf16.mxu0 %v4993_v57  ;;  %v1510_v56 = vld [vmem:[#allocation7 + $0xf8] sm:$0xff]  ;;  %v368_v57 = vld [vmem:[%s6425_s22 + $0x60] sm:$0xff]  ;;  %9512 = vst [vmem:[#allocation28_spill] sm:$0xff] %v6508_v14  ;;  %v1520_v21 = vld [vmem:[#allocation7 + $0x148] sm:$0xff] }
  0xaf   : > { %5058 = vmatprep.subr.bf16.mxu1 %v5057_v60  ;;  %v6495_v60 = vpack.c.bf16 %v1510_v56, %v1508_v55  ;;  %v374_v23 = vld [vmem:[%s6425_s22 + $0x90] sm:$0xff]  ;;  %v377_v24 = vld [vmem:[%s6425_s22 + $0xa8] sm:$0xff]  ;;  %v1519_v29 = vld [vmem:[#allocation7 + $0x140] sm:$0xff] }
  0xb0   : > { %v1521_v30 = vld [vmem:[#allocation7 + $0x150] sm:$0xff]  ;;  %v1524_v31 = vld [vmem:[#allocation7 + $0x168] sm:$0xff]  ;;  %v1526_v32 = vld [vmem:[#allocation7 + $0x178] sm:$0xff] }
  0xb1   : > { %4996 = vmatpush1.bf16.msra.mxu0 %v4995_v1  ;;  %9509 = vst [vmem:[#allocation25_spill] sm:$0xff] %v6495_v60  ;;  %v370_v1 = vld [vmem:[%s6425_s22 + $0x70] sm:$0xff]  ;;  %v6524_v37 = vpack.c.bf16 %v1521_v30, %v1519_v29  ;;  %v6527_v38 = vpack.c.bf16 %v1526_v32, %v1524_v31  ;;  %v1523_v39 = vld [vmem:[#allocation7 + $0x160] sm:$0xff]  ;;  %v381_v46 = vld [vmem:[%s6425_s22 + $0xc8] sm:$0xff] }
  0xb2   : > { %5060 = vmatpush1.bf16.msra.mxu1 %v5059_v2  ;;  %v373_v2 = vld [vmem:[%s6425_s22 + $0x88] sm:$0xff]  ;;  %v1525_v40 = vld [vmem:[#allocation7 + $0x170] sm:$0xff]  ;;  %v1534_v54 = vld [vmem:[#allocation7 + $0x1b8] sm:$0xff] }
  0xb3   : > { %5126 = vmatprep.subr.bf16.mxu1 %v6440_v3  ;;  %9516 = vst [vmem:[#allocation32_spill] sm:$0xff] %v6524_v37  ;;  %9517 = vst [vmem:[#allocation33_spill] sm:$0xff] %v6527_v38  ;;  %v378_v45 = vld [vmem:[%s6425_s22 + $0xb0] sm:$0xff]  ;;  %v6532_v47 = vpack.c.bf16 %v1525_v40, %v1523_v39  ;;  %v1532_v53 = vld [vmem:[#allocation7 + $0x1a8] sm:$0xff] }
  0xb4   : > { %709 = vmatmul.mubr.f32.vlgmr.msra.gmra.mrb[0].mxu0 %v356_v8  ;;  %v380_v55 = vld [vmem:[%s6425_s22 + $0xc0] sm:$0xff]  ;;  %v383_v56 = vld [vmem:[%s6425_s22 + $0xd8] sm:$0xff]  ;;  %v1533_v62 = vld [vmem:[#allocation7 + $0x1b0] sm:$0xff] }
  0xb5   : > { %966 = vmatmul.mubr.f32.vlgmr.msra.gmra.mrb[0].mxu1 %v356_v8  ;;  %714 = vmatprep.mubr.f32.mxu0 %v359_v9  ;;  %v1516_v8 = vld [vmem:[#allocation7 + $0x128] sm:$0xff]  ;;  %9518 = vst [vmem:[#allocation34_spill] sm:$0xff] %v6532_v47  ;;  %v1531_v61 = vld [vmem:[#allocation7 + $0x1a0] sm:$0xff]  ;;  %v1538_v0 = vld [vmem:[#allocation7 + $0x1d8] sm:$0xff] }
  0xb6   : > { %971 = vmatprep.mubr.f32.mxu1 %v359_v9  ;;  %5128 = vmatpush1.bf16.msra.mxu1 %v6444_v10  ;;  %v1518_v9 = vld [vmem:[#allocation7 + $0x138] sm:$0xff]  ;;  %v1536_v63 = vld [vmem:[#allocation7 + $0x1c8] sm:$0xff]  ;;  %v6548_v6 = vpack.c.bf16 %v1533_v62, %v1531_v61  ;;  %v386_v29 = vld [vmem:[%s6425_s22 + $0xf0] sm:$0xff] }
  0xb7   : > { %5130 = vmatprep.subr.bf16.mxu1 %v6447_v11  ;;  %v6511_v15 = vpack.c.bf16 %v1518_v9, %v1516_v8  ;;  %v6551_v7 = vpack.c.bf16 %v1538_v0, %v1536_v63  ;;  %v1535_v8 = vld [vmem:[#allocation7 + $0x1c0] sm:$0xff]  ;;  %v1537_v9 = vld [vmem:[#allocation7 + $0x1d0] sm:$0xff]  ;;  %v389_v30 = vld [vmem:[%s6425_s22 + $0x108] sm:$0xff] }
  0xb8   : > { %715 = vmatmul.mubr.f32.gmra.mrb[2].mxu0 %v358_v17  ;;  %9522 = vst [vmem:[#allocation38_spill] sm:$0xff] %v6548_v6  ;;  %v388_v32 = vld [vmem:[%s6425_s22 + $0x100] sm:$0xff]  ;;  %v393_v39 = vld [vmem:[%s6425_s22 + $0x128] sm:$0xff]  ;;  %v407_v63 = vld [vmem:[%s6425_s22 + $0x198] sm:$0xff] }
  0xb9   : > { %972 = vmatmul.mubr.f32.gmra.mrb[2].mxu1 %v358_v17  ;;  %720 = vmatprep.mubr.f32.mxu0 %v361_v18  ;;  %9513 = vst [vmem:[#allocation29_spill] sm:$0xff] %v6511_v15  ;;  %v1515_v17 = vld [vmem:[#allocation7 + $0x120] sm:$0xff]  ;;  %9523 = vst [vmem:[#allocation39_spill] sm:$0xff] %v6551_v7  ;;  %v405_v61 = vld [vmem:[%s6425_s22 + $0x188] sm:$0xff] }
  0xba   : > { %977 = vmatprep.mubr.f32.mxu1 %v361_v18  ;;  %5132 = vmatpush1.bf16.msra.mxu1 %v6452_v19  ;;  %v1517_v18 = vld [vmem:[#allocation7 + $0x130] sm:$0xff]  ;;  %v392_v40 = vld [vmem:[%s6425_s22 + $0x120] sm:$0xff] }
  0xbb   : > { %5134 = vmatprep.subr.bf16.mxu1 %v6455_v20  ;;  %v404_v62 = vld [vmem:[%s6425_s22 + $0x180] sm:$0xff]  ;;  %v406_v0 = vld [vmem:[%s6425_s22 + $0x190] sm:$0xff]  ;;  %v5892_v20 = vld [vmem:[%s6425_s22 + $0xa8] sm:$0xff] }
  0xbc   : > { %721 = vmatmul.mubr.f32.gmra.mrb[4].mxu0 %v360_v25  ;;  %v5893_v10 = vld [vmem:[%s6425_s22 + $0xa0] sm:$0xff] }
  0xbd   : > { %978 = vmatmul.mubr.f32.gmra.mrb[4].mxu1 %v360_v25  ;;  %726 = vmatprep.mubr.f32.mxu0 %v363_v26  ;;  %v6516_v25 = vpack.c.bf16 %v1517_v18, %v1515_v17  ;;  %v384_v17 = vld [vmem:[%s6425_s22 + $0xe0] sm:$0xff]  ;;  %v387_v18 = vld [vmem:[%s6425_s22 + $0xf8] sm:$0xff] }
  0xbe   : > { %983 = vmatprep.mubr.f32.mxu1 %v363_v26  ;;  %5136 = vmatpush1.bf16.msra.mxu1 %v6460_v27  ;;  %v6519_v26 = vpack.c.bf16 %v1522_v22, %v1520_v21  ;;  %v6556_v21 = vpack.c.bf16 %v1537_v9, %v1535_v8  ;;  %v411_v8 = vld [vmem:[%s6425_s22 + $0x1b8] sm:$0xff]  ;;  %v410_v9 = vld [vmem:[%s6425_s22 + $0x1b0] sm:$0xff]  ;;  %v5889_v27 = vld [vmem:[%s6425_s22 + $0x80] sm:$0xff] }
  0xbf   : > { %5138 = vmatprep.subr.bf16.mxu1 %v6463_v28  ;;  %9514 = vst [vmem:[#allocation30_spill] sm:$0xff] %v6516_v25 }
  0xc0   : > { %727 = vmatmul.mubr.f32.gmra.mrb[6].mxu0 %v362_v33  ;;  %9515 = vst [vmem:[#allocation31_spill] sm:$0xff] %v6519_v26  ;;  %9524 = vst [vmem:[#allocation40_spill] sm:$0xff] %v6556_v21 }
  0xc1   : > { %984 = vmatmul.mubr.f32.gmra.mrb[6].mxu1 %v362_v33  ;;  %732 = vmatprep.mubr.f32.mxu0 %v365_v34  ;;  %v376_v33 = vld [vmem:[%s6425_s22 + $0xa0] sm:$0xff] }
  0xc2   : > { %989 = vmatprep.mubr.f32.mxu1 %v365_v34  ;;  %5140 = vmatpush1.bf16.msra.mxu1 %v6468_v35  ;;  %v379_v34 = vld [vmem:[%s6425_s22 + $0xb8] sm:$0xff] }
  0xc3   : > { %5142 = vmatprep.subr.bf16.mxu1 %v6471_v36  ;;  %v5888_v36 = vld [vmem:[%s6425_s22 + $0x88] sm:$0xff] }
  0xc4   : > { %733 = vmatmul.mubr.f32.gmra.mrb[8].mxu0 %v364_v41 }
  0xc5   : > { %990 = vmatmul.mubr.f32.gmra.mrb[8].mxu1 %v364_v41  ;;  %738 = vmatprep.mubr.f32.mxu0 %v367_v42  ;;  %v1528_v41 = vld [vmem:[#allocation7 + $0x188] sm:$0xff] }
  0xc6   : > { %995 = vmatprep.mubr.f32.mxu1 %v367_v42  ;;  %5144 = vmatpush1.bf16.msra.mxu1 %v6476_v43  ;;  %v1530_v42 = vld [vmem:[#allocation7 + $0x198] sm:$0xff]  ;;  %v5885_v43 = vld [vmem:[%s6425_s22 + $0x60] sm:$0xff] }
  0xc7   : > { %5146 = vmatprep.subr.bf16.mxu1 %v6479_v44  ;;  %v6535_v48 = vpack.c.bf16 %v1530_v42, %v1528_v41  ;;  %v395_v41 = vld [vmem:[%s6425_s22 + $0x138] sm:$0xff]  ;;  %v394_v42 = vld [vmem:[%s6425_s22 + $0x130] sm:$0xff] }
  0xc8   : > { %739 = vmatmul.mubr.f32.gmra.mrb[10].mxu0 %v366_v49 }
  0xc9   : > { %996 = vmatmul.mubr.f32.gmra.mrb[10].mxu1 %v366_v49  ;;  %744 = vmatprep.mubr.f32.mxu0 %v369_v50  ;;  %9519 = vst [vmem:[#allocation35_spill] sm:$0xff] %v6535_v48  ;;  %v1527_v49 = vld [vmem:[#allocation7 + $0x180] sm:$0xff] }
  0xca   : > { %1001 = vmatprep.mubr.f32.mxu1 %v369_v50  ;;  %5148 = vmatpush1.bf16.msra.mxu1 %v6484_v51  ;;  %v1529_v50 = vld [vmem:[#allocation7 + $0x190] sm:$0xff] }
  0xcb   : > { %5150 = vmatprep.subr.bf16.mxu1 %v6487_v52  ;;  %v5884_v52 = vld [vmem:[%s6425_s22 + $0x68] sm:$0xff] }
  0xcc   : > { %745 = vmatmul.mubr.f32.gmra.mrb[12].mxu0 %v368_v57 }
  0xcd   : > { %1002 = vmatmul.mubr.f32.gmra.mrb[12].mxu1 %v368_v57  ;;  %750 = vmatprep.mubr.f32.mxu0 %v371_v58  ;;  %v6540_v57 = vpack.c.bf16 %v1529_v50, %v1527_v49  ;;  %v399_v49 = vld [vmem:[%s6425_s22 + $0x158] sm:$0xff]  ;;  %v398_v50 = vld [vmem:[%s6425_s22 + $0x150] sm:$0xff] }
  0xce   : > { %1007 = vmatprep.mubr.f32.mxu1 %v371_v58  ;;  %5152 = vmatpush1.bf16.msra.mxu1 %v6492_v59  ;;  %v6543_v58 = vpack.c.bf16 %v1534_v54, %v1532_v53  ;;  %v401_v53 = vld [vmem:[%s6425_s22 + $0x168] sm:$0xff]  ;;  %v400_v54 = vld [vmem:[%s6425_s22 + $0x160] sm:$0xff]  ;;  %v9528_v59 = vmov 0.0|0.0  }
  0xcf   : > { %5154 = vmatprep.subr.bf16.mxu1 %v6495_v60  ;;  %9520 = vst [vmem:[#allocation36_spill] sm:$0xff] %v6540_v57  ;;  %v5881_v60 = vld [vmem:[%s6425_s22 + $0x40] sm:$0xff] }
  0xd0   : > { %751 = vmatmul.mubr.f32.gmra.mrb[14].mxu0 %v370_v1  ;;  %9521 = vst [vmem:[#allocation37_spill] sm:$0xff] %v6543_v58 }
  0xd1   : > { %1008 = vmatmul.mubr.f32.gmra.mrb[14].mxu1 %v370_v1  ;;  %756 = vmatprep.mubr.f32.mxu0 %v373_v2  ;;  %v382_v1 = vld [vmem:[%s6425_s22 + $0xd0] sm:$0xff] }
  0xd2   : > { %1013 = vmatprep.mubr.f32.mxu1 %v373_v2  ;;  %5156 = vmatpush1.bf16.msra.mxu1 %v6500_v4  ;;  %v385_v2 = vld [vmem:[%s6425_s22 + $0xe8] sm:$0xff] }
  0xd3   : > { %5158 = vmatprep.subr.bf16.mxu1 %v6503_v5  ;;  %v5880_v5 = vld [vmem:[%s6425_s22 + $0x48] sm:$0xff] }
  0xd4   : > { %757 = vmatmul.mubr.f32.gmra.mrb[16].mxu0 %v372_v12 }
  0xd5   : > { %1014 = vmatmul.mubr.f32.gmra.mrb[16].mxu1 %v372_v12  ;;  %762 = vmatprep.mubr.f32.mxu0 %v375_v13  ;;  %v1540_v12 = vld [vmem:[#allocation7 + $0x1e8] sm:$0xff] }
  0xd6   : > { %1019 = vmatprep.mubr.f32.mxu1 %v375_v13  ;;  %5160 = vmatpush1.bf16.msra.mxu1 %v6508_v14  ;;  %v1542_v13 = vld [vmem:[#allocation7 + $0x1f8] sm:$0xff] }
  0xd7   : > { %5162 = vmatprep.subr.bf16.mxu1 %v6511_v15  ;;  %v6559_v22 = vpack.c.bf16 %v1542_v13, %v1540_v12  ;;  %v413_v12 = vld [vmem:[%s6425_s22 + $0x1c8] sm:$0xff]  ;;  %v412_v13 = vld [vmem:[%s6425_s22 + $0x1c0] sm:$0xff] }
  0xd8   : > { %763 = vmatmul.mubr.f32.gmra.mrb[18].mxu0 %v374_v23 }
  0xd9   : > { %1020 = vmatmul.mubr.f32.gmra.mrb[18].mxu1 %v374_v23  ;;  %768 = vmatprep.mubr.f32.mxu0 %v377_v24  ;;  %9525 = vst [vmem:[#allocation41_spill] sm:$0xff] %v6559_v22  ;;  %v1539_v23 = vld [vmem:[#allocation7 + $0x1e0] sm:$0xff] }
  0xda   : > { %1025 = vmatprep.mubr.f32.mxu1 %v377_v24  ;;  %5164 = vmatpush1.bf16.msra.mxu1 %v6516_v25  ;;  %v1541_v24 = vld [vmem:[#allocation7 + $0x1f0] sm:$0xff]  ;;  %v5876_v25 = vld [vmem:[%s6425_s22 + $0x28] sm:$0xff] }
  0xdb   : > { %5166 = vmatprep.subr.bf16.mxu1 %v6519_v26  ;;  %v6564_v31 = vpack.c.bf16 %v1541_v24, %v1539_v23  ;;  %v417_v23 = vld [vmem:[%s6425_s22 + $0x1e8] sm:$0xff]  ;;  %v416_v24 = vld [vmem:[%s6425_s22 + $0x1e0] sm:$0xff] }
  0xdc   : > { %769 = vmatmul.mubr.f32.gmra.mrb[20].mxu0 %v376_v33 }
  0xdd   : > { %1026 = vmatmul.mubr.f32.gmra.mrb[20].mxu1 %v376_v33  ;;  %774 = vmatprep.mubr.f32.mxu0 %v379_v34  ;;  %9526 = vst [vmem:[#allocation42_spill] sm:$0xff] %v6564_v31  ;;  %v391_v33 = vld [vmem:[%s6425_s22 + $0x118] sm:$0xff] }
  0xde   : > { %1031 = vmatprep.mubr.f32.mxu1 %v379_v34  ;;  %5168 = vmatpush1.bf16.msra.mxu1 %v6524_v37  ;;  %v390_v34 = vld [vmem:[%s6425_s22 + $0x110] sm:$0xff]  ;;  %v5873_v37 = vld [vmem:[%s6425_s22] sm:$0xff] }
  0xdf   : > { %5170 = vmatprep.subr.bf16.mxu1 %v6527_v38 }
  0xe0   : > { %775 = vmatmul.mubr.f32.gmra.mrb[22].mxu0 %v378_v45 }
  0xe1   : > { %1032 = vmatmul.mubr.f32.gmra.mrb[22].mxu1 %v378_v45  ;;  %780 = vmatprep.mubr.f32.mxu0 %v381_v46  ;;  %v397_v45 = vld [vmem:[%s6425_s22 + $0x148] sm:$0xff] }
  0xe2   : > { %1037 = vmatprep.mubr.f32.mxu1 %v381_v46  ;;  %5172 = vmatpush1.bf16.msra.mxu1 %v6532_v47  ;;  %v396_v46 = vld [vmem:[%s6425_s22 + $0x140] sm:$0xff]  ;;  %v611_v47 = vld [vmem:[#allocation5 + $0x5f8] sm:$0xff] }
  0xe3   : > { %5174 = vmatprep.subr.bf16.mxu1 %v6535_v48  ;;  %v605_v48 = vld [vmem:[#allocation5 + $0x5c8] sm:$0xff] }
  0xe4   : > { %781 = vmatmul.mubr.f32.gmra.mrb[24].mxu0 %v380_v55 }
  0xe5   : > { %1038 = vmatmul.mubr.f32.gmra.mrb[24].mxu1 %v380_v55  ;;  %786 = vmatprep.mubr.f32.mxu0 %v383_v56  ;;  %v403_v55 = vld [vmem:[%s6425_s22 + $0x178] sm:$0xff] }
  0xe6   : > { %1043 = vmatprep.mubr.f32.mxu1 %v383_v56  ;;  %5176 = vmatpush1.bf16.msra.mxu1 %v6540_v57  ;;  %v402_v56 = vld [vmem:[%s6425_s22 + $0x170] sm:$0xff] }
  0xe7   : > { %5178 = vmatprep.subr.bf16.mxu1 %v6543_v58  ;;  %v599_v58 = vld [vmem:[#allocation5 + $0x598] sm:$0xff] }
  0xe8   : > { %787 = vmatmul.mubr.f32.gmra.mrb[26].mxu0 %v382_v1 }
  0xe9   : > { %1044 = vmatmul.mubr.f32.gmra.mrb[26].mxu1 %v382_v1  ;;  %792 = vmatprep.mubr.f32.mxu0 %v385_v2  ;;  %v409_v1 = vld [vmem:[%s6425_s22 + $0x1a8] sm:$0xff] }
  0xea   : > { %1049 = vmatprep.mubr.f32.mxu1 %v385_v2  ;;  %5180 = vmatpush1.bf16.msra.mxu1 %v6548_v6  ;;  %v408_v2 = vld [vmem:[%s6425_s22 + $0x1a0] sm:$0xff]  ;;  %v593_v6 = vld [vmem:[#allocation5 + $0x568] sm:$0xff] }
  0xeb   : > { %5182 = vmatprep.subr.bf16.mxu1 %v6551_v7 }
  0xec   : > { %793 = vmatmul.mubr.f32.gmra.mrb[28].mxu0 %v384_v17 }
  0xed   : > { %1050 = vmatmul.mubr.f32.gmra.mrb[28].mxu1 %v384_v17  ;;  %798 = vmatprep.mubr.f32.mxu0 %v387_v18  ;;  %v415_v17 = vld [vmem:[%s6425_s22 + $0x1d8] sm:$0xff] }
  0xee   : > { %1055 = vmatprep.mubr.f32.mxu1 %v387_v18  ;;  %5184 = vmatpush1.bf16.msra.mxu1 %v6556_v21  ;;  %v414_v18 = vld [vmem:[%s6425_s22 + $0x1d0] sm:$0xff] }
  0xef   : > { %5186 = vmatprep.subr.bf16.mxu1 %v6559_v22  ;;  %v587_v22 = vld [vmem:[#allocation5 + $0x538] sm:$0xff] }
  0xf0   : > { %799 = vmatmul.mubr.f32.gmra.mrb[30].mxu0 %v386_v29 }
  0xf1   : > { %1056 = vmatmul.mubr.f32.gmra.mrb[30].mxu1 %v386_v29  ;;  %804 = vmatprep.mubr.f32.mxu0 %v389_v30  ;;  %v419_v29 = vld [vmem:[%s6425_s22 + $0x1f8] sm:$0xff] }
  0xf2   : > { %1061 = vmatprep.mubr.f32.mxu1 %v389_v30  ;;  %5188 = vmatpush1.bf16.msra.mxu1 %v6564_v31  ;;  %v418_v30 = vld [vmem:[%s6425_s22 + $0x1f0] sm:$0xff]  ;;  %v581_v31 = vld [vmem:[#allocation5 + $0x508] sm:$0xff] }
  0xf4   : > { %805 = vmatmul.mubr.f32.gmra.mrb[32].mxu0 %v388_v32 }
  0xf5   : > { %1062 = vmatmul.mubr.f32.gmra.mrb[32].mxu1 %v388_v32  ;;  %810 = vmatprep.mubr.f32.mxu0 %v391_v33  ;;  %v9365_v32 = vlaneseq }
  0xf6   : > { %1067 = vmatprep.mubr.f32.mxu1 %v391_v33 }
  0xf7   : > { %v6601_v33 = vshrl.u32 %v9365_v32, 7 }
  0xf8   : > { %811 = vmatmul.mubr.f32.gmra.mrb[34].mxu0 %v390_v34 }
  0xf9   : > { %1068 = vmatmul.mubr.f32.gmra.mrb[34].mxu1 %v390_v34  ;;  %816 = vmatprep.mubr.f32.mxu0 %v393_v39  ;;  %9527 = vst [vmem:[#allocation43_spill] sm:$0xff] %v6601_v33  ;;  %v616_v34 = vsub.s32 0, %v6601_v33 }
  0xfa   : > { %1073 = vmatprep.mubr.f32.mxu1 %v393_v39  ;;  %v612_v39 = vld [vmem:[%s9353_s2] sm:$0x3f] }
  0xfc   : > { %817 = vmatmul.mubr.f32.gmra.mrb[36].mxu0 %v392_v40 }
  0xfd   : > { %1074 = vmatmul.mubr.f32.gmra.mrb[36].mxu1 %v392_v40  ;;  %822 = vmatprep.mubr.f32.mxu0 %v395_v41  ;;  %v624_v40 = vsub.s32 2, %v6601_v33 }
  0xfe   : > { %1079 = vmatprep.mubr.f32.mxu1 %v395_v41  ;;  %v620_v41 = vsub.s32 1, %v6601_v33 }
 0x100   : > { %823 = vmatmul.mubr.f32.gmra.mrb[38].mxu0 %v394_v42 }
 0x101   : > { %1080 = vmatmul.mubr.f32.gmra.mrb[38].mxu1 %v394_v42  ;;  %828 = vmatprep.mubr.f32.mxu0 %v397_v45  ;;  %v628_v42 = vsub.s32 3, %v6601_v33 }
 0x102   : > { %1085 = vmatprep.mubr.f32.mxu1 %v397_v45  ;;  %v6610_v45 = vrot.slane %v612_v39, %v616_v34 }
 0x104   : > { %829 = vmatmul.mubr.f32.gmra.mrb[40].mxu0 %v396_v46 }
 0x105   : > { %1086 = vmatmul.mubr.f32.gmra.mrb[40].mxu1 %v396_v46  ;;  %834 = vmatprep.mubr.f32.mxu0 %v399_v49  ;;  %v6612_v46 = vrot.slane %v612_v39, %v624_v40 }
 0x106   : > { %1091 = vmatprep.mubr.f32.mxu1 %v399_v49  ;;  %v6616_v49 = vrot.slane %v612_v39, %v628_v42 }
 0x108   : > { %835 = vmatmul.mubr.f32.gmra.mrb[42].mxu0 %v398_v50 }
 0x109   : > { %1092 = vmatmul.mubr.f32.gmra.mrb[42].mxu1 %v398_v50  ;;  %840 = vmatprep.mubr.f32.mxu0 %v401_v53 }
 0x10a   : > { %1097 = vmatprep.mubr.f32.mxu1 %v401_v53 }
 0x10c   : > { %841 = vmatmul.mubr.f32.gmra.mrb[44].mxu0 %v400_v54 }
 0x10d   : > { %1098 = vmatmul.mubr.f32.gmra.mrb[44].mxu1 %v400_v54  ;;  %846 = vmatprep.mubr.f32.mxu0 %v403_v55 }
 0x10e   : > { %1103 = vmatprep.mubr.f32.mxu1 %v403_v55 }
 0x110   : > { %847 = vmatmul.mubr.f32.gmra.mrb[46].mxu0 %v402_v56 }
 0x111   : > { %1104 = vmatmul.mubr.f32.gmra.mrb[46].mxu1 %v402_v56  ;;  %852 = vmatprep.mubr.f32.mxu0 %v405_v61 }
 0x112   : > { %1109 = vmatprep.mubr.f32.mxu1 %v405_v61 }
 0x114   : > { %853 = vmatmul.mubr.f32.gmra.mrb[48].mxu0 %v404_v62 }
 0x115   : > { %1110 = vmatmul.mubr.f32.gmra.mrb[48].mxu1 %v404_v62  ;;  %858 = vmatprep.mubr.f32.mxu0 %v407_v63 }
 0x116   : > { %1115 = vmatprep.mubr.f32.mxu1 %v407_v63 }
 0x118   : > { %859 = vmatmul.mubr.f32.gmra.mrb[50].mxu0 %v406_v0 }
 0x119   : > { %1116 = vmatmul.mubr.f32.gmra.mrb[50].mxu1 %v406_v0  ;;  %864 = vmatprep.mubr.f32.mxu0 %v409_v1 }
 0x11a   : > { %1121 = vmatprep.mubr.f32.mxu1 %v409_v1 }
 0x11c   : > { %865 = vmatmul.mubr.f32.gmra.mrb[52].mxu0 %v408_v2 }
 0x11d   : > { %1122 = vmatmul.mubr.f32.gmra.mrb[52].mxu1 %v408_v2  ;;  %870 = vmatprep.mubr.f32.mxu0 %v411_v8 }
 0x11e   : > { %1127 = vmatprep.mubr.f32.mxu1 %v411_v8 }
 0x120   : > { %871 = vmatmul.mubr.f32.gmra.mrb[54].mxu0 %v410_v9 }
 0x121   : > { %1128 = vmatmul.mubr.f32.gmra.mrb[54].mxu1 %v410_v9  ;;  %876 = vmatprep.mubr.f32.mxu0 %v413_v12 }
 0x122   : > { %1133 = vmatprep.mubr.f32.mxu1 %v413_v12 }
 0x124   : > { %877 = vmatmul.mubr.f32.gmra.mrb[56].mxu0 %v412_v13 }
 0x125   : > { %1134 = vmatmul.mubr.f32.gmra.mrb[56].mxu1 %v412_v13  ;;  %882 = vmatprep.mubr.f32.mxu0 %v415_v17 }
 0x126   : > { %1139 = vmatprep.mubr.f32.mxu1 %v415_v17 }
 0x128   : > { %883 = vmatmul.mubr.f32.gmra.mrb[58].mxu0 %v414_v18 }
 0x129   : > { %1140 = vmatmul.mubr.f32.gmra.mrb[58].mxu1 %v414_v18  ;;  %888 = vmatprep.mubr.f32.mxu0 %v417_v23 }
 0x12a   : > { %1145 = vmatprep.mubr.f32.mxu1 %v417_v23 }
 0x12c   : > { %889 = vmatmul.mubr.f32.gmra.mrb[60].mxu0 %v416_v24 }
 0x12d   : > { %1146 = vmatmul.mubr.f32.gmra.mrb[60].mxu1 %v416_v24  ;;  %894 = vmatprep.mubr.f32.mxu0 %v419_v29 }
 0x12e   : > { %1151 = vmatprep.mubr.f32.mxu1 %v419_v29 }
 0x130   : > { %895 = vmatmul.mubr.f32.gmra.mrb[62].mxu0 %v418_v30 }
 0x131   : > { %1152 = vmatmul.mubr.f32.gmra.mrb[62].mxu1 %v418_v30  ;;  %1222 = vmatprep.mubr.f32.mxu0 %v6436_v16  ;;  %v6614_v16 = vrot.slane %v612_v39, %v620_v41 }
 0x187   : > { %v710_v50 = vpop.f32.mrb[0].mxu0 }
 0x188   : > { %v711_v53 = vadd.f32 %v710_v50, %v6610_v45  ;;  %v967_v54 = vpop.f32.mrb[0].mxu1  ;;  %v712_v55 = vpop.f32.mrb[1].mxu0 }
 0x189   : > { %v968_v56 = vadd.f32 %v967_v54, %v6612_v46  ;;  %v713_v61 = vadd.f32 %v712_v55, %v6614_v16  ;;  %v969_v62 = vpop.f32.mrb[1].mxu1 }
 0x18a   : > { %v970_v63 = vadd.f32 %v969_v62, %v6616_v49 }
 0x18b   : > { %v1415_v0 = vmul.f32 %v968_v56, %v711_v53  ;;  %v716_v1 = vpop.f32.mrb[2].mxu0 }
 0x18c   : > { %v1416_v2 = vmul.f32 %v970_v63, %v713_v61  ;;  %v717_v8 = vadd.f32 %v716_v1, %v6610_v45  ;;  %v973_v9 = vpop.f32.mrb[2].mxu1  ;;  %v718_v12 = vpop.f32.mrb[3].mxu0 }
 0x18d   : > { %v974_v13 = vadd.f32 %v973_v9, %v6612_v46  ;;  %v719_v17 = vadd.f32 %v718_v12, %v6614_v16  ;;  %v975_v18 = vpop.f32.mrb[3].mxu1 }
 0x18e   : > { %v976_v23 = vadd.f32 %v975_v18, %v6616_v49  ;;  %1607 = vmatprep.mubr.f32.mxu1 %v1416_v2 }
 0x18f   : > { %v1417_v24 = vmul.f32 %v974_v13, %v717_v8  ;;  %1608 = vmatmul.mubr.f32.vlgmr.msra.gmra.mrb[64].mxu1 %v1415_v0  ;;  %v722_v29 = vpop.f32.mrb[4].mxu0 }
 0x190   : > { %v1418_v30 = vmul.f32 %v976_v23, %v719_v17  ;;  %v723_v34 = vadd.f32 %v722_v29, %v6610_v45  ;;  %v979_v39 = vpop.f32.mrb[4].mxu1  ;;  %v724_v40 = vpop.f32.mrb[5].mxu0 }
 0x191   : > { %v980_v41 = vadd.f32 %v979_v39, %v6612_v46  ;;  %v725_v42 = vadd.f32 %v724_v40, %v6614_v16  ;;  %v981_v50 = vpop.f32.mrb[5].mxu1 }
 0x192   : > { %v982_v53 = vadd.f32 %v981_v50, %v6616_v49  ;;  %1613 = vmatprep.mubr.f32.mxu1 %v1418_v30 }
 0x193   : > { %v1419_v54 = vmul.f32 %v980_v41, %v723_v34  ;;  %1614 = vmatmul.mubr.f32.gmra.mrb[66].mxu1 %v1417_v24  ;;  %v728_v55 = vpop.f32.mrb[6].mxu0 }
 0x194   : > { %v1420_v56 = vmul.f32 %v982_v53, %v725_v42  ;;  %v729_v61 = vadd.f32 %v728_v55, %v6610_v45  ;;  %v985_v62 = vpop.f32.mrb[6].mxu1  ;;  %v730_v63 = vpop.f32.mrb[7].mxu0 }
 0x195   : > { %v986_v0 = vadd.f32 %v985_v62, %v6612_v46  ;;  %v731_v1 = vadd.f32 %v730_v63, %v6614_v16  ;;  %v987_v2 = vpop.f32.mrb[7].mxu1 }
 0x196   : > { %v988_v8 = vadd.f32 %v987_v2, %v6616_v49  ;;  %1619 = vmatprep.mubr.f32.mxu1 %v1420_v56 }
 0x197   : > { %v1421_v9 = vmul.f32 %v986_v0, %v729_v61  ;;  %1620 = vmatmul.mubr.f32.gmra.mrb[68].mxu1 %v1419_v54  ;;  %v734_v12 = vpop.f32.mrb[8].mxu0 }
 0x198   : > { %v1422_v13 = vmul.f32 %v988_v8, %v731_v1  ;;  %v735_v17 = vadd.f32 %v734_v12, %v6610_v45  ;;  %v991_v18 = vpop.f32.mrb[8].mxu1  ;;  %v736_v23 = vpop.f32.mrb[9].mxu0 }
 0x199   : > { %v992_v24 = vadd.f32 %v991_v18, %v6612_v46  ;;  %v737_v29 = vadd.f32 %v736_v23, %v6614_v16  ;;  %v993_v30 = vpop.f32.mrb[9].mxu1 }
 0x19a   : > { %v994_v34 = vadd.f32 %v993_v30, %v6616_v49  ;;  %1625 = vmatprep.mubr.f32.mxu1 %v1422_v13 }
 0x19b   : > { %v1423_v39 = vmul.f32 %v992_v24, %v735_v17  ;;  %1626 = vmatmul.mubr.f32.gmra.mrb[70].mxu1 %v1421_v9  ;;  %v740_v40 = vpop.f32.mrb[10].mxu0 }
 0x19c   : > { %v1424_v41 = vmul.f32 %v994_v34, %v737_v29  ;;  %v741_v42 = vadd.f32 %v740_v40, %v6610_v45  ;;  %v997_v50 = vpop.f32.mrb[10].mxu1  ;;  %v742_v53 = vpop.f32.mrb[11].mxu0 }
 0x19d   : > { %v998_v54 = vadd.f32 %v997_v50, %v6612_v46  ;;  %v743_v55 = vadd.f32 %v742_v53, %v6614_v16  ;;  %v999_v56 = vpop.f32.mrb[11].mxu1 }
 0x19e   : > { %v1000_v61 = vadd.f32 %v999_v56, %v6616_v49  ;;  %1631 = vmatprep.mubr.f32.mxu1 %v1424_v41 }
 0x19f   : > { %v1425_v62 = vmul.f32 %v998_v54, %v741_v42  ;;  %1632 = vmatmul.mubr.f32.gmra.mrb[72].mxu1 %v1423_v39  ;;  %v746_v63 = vpop.f32.mrb[12].mxu0 }
 0x1a0   : > { %v1426_v0 = vmul.f32 %v1000_v61, %v743_v55  ;;  %v747_v1 = vadd.f32 %v746_v63, %v6610_v45  ;;  %v1003_v2 = vpop.f32.mrb[12].mxu1  ;;  %v748_v8 = vpop.f32.mrb[13].mxu0 }
 0x1a1   : > { %v1004_v9 = vadd.f32 %v1003_v2, %v6612_v46  ;;  %v749_v12 = vadd.f32 %v748_v8, %v6614_v16  ;;  %v1005_v13 = vpop.f32.mrb[13].mxu1 }
 0x1a2   : > { %v1006_v17 = vadd.f32 %v1005_v13, %v6616_v49  ;;  %1637 = vmatprep.mubr.f32.mxu1 %v1426_v0 }
 0x1a3   : > { %v1427_v18 = vmul.f32 %v1004_v9, %v747_v1  ;;  %1638 = vmatmul.mubr.f32.gmra.mrb[74].mxu1 %v1425_v62  ;;  %v752_v23 = vpop.f32.mrb[14].mxu0 }
 0x1a4   : > { %v1428_v24 = vmul.f32 %v1006_v17, %v749_v12  ;;  %v753_v29 = vadd.f32 %v752_v23, %v6610_v45  ;;  %v1009_v30 = vpop.f32.mrb[14].mxu1  ;;  %v754_v34 = vpop.f32.mrb[15].mxu0 }
 0x1a5   : > { %v1010_v39 = vadd.f32 %v1009_v30, %v6612_v46  ;;  %v755_v40 = vadd.f32 %v754_v34, %v6614_v16  ;;  %v1011_v41 = vpop.f32.mrb[15].mxu1 }
 0x1a6   : > { %v1012_v42 = vadd.f32 %v1011_v41, %v6616_v49  ;;  %1643 = vmatprep.mubr.f32.mxu1 %v1428_v24 }
 0x1a7   : > { %v1429_v50 = vmul.f32 %v1010_v39, %v753_v29  ;;  %1644 = vmatmul.mubr.f32.gmra.mrb[76].mxu1 %v1427_v18  ;;  %v758_v53 = vpop.f32.mrb[16].mxu0 }
 0x1a8   : > { %v1430_v54 = vmul.f32 %v1012_v42, %v755_v40  ;;  %v759_v55 = vadd.f32 %v758_v53, %v6610_v45  ;;  %v1015_v56 = vpop.f32.mrb[16].mxu1  ;;  %v760_v61 = vpop.f32.mrb[17].mxu0 }
 0x1a9   : > { %v1016_v62 = vadd.f32 %v1015_v56, %v6612_v46  ;;  %v761_v63 = vadd.f32 %v760_v61, %v6614_v16  ;;  %v1017_v0 = vpop.f32.mrb[17].mxu1 }
 0x1aa   : > { %v1018_v1 = vadd.f32 %v1017_v0, %v6616_v49  ;;  %1649 = vmatprep.mubr.f32.mxu1 %v1430_v54 }
 0x1ab   : > { %v1431_v2 = vmul.f32 %v1016_v62, %v759_v55  ;;  %1650 = vmatmul.mubr.f32.gmra.mrb[78].mxu1 %v1429_v50  ;;  %v764_v8 = vpop.f32.mrb[18].mxu0 }
 0x1ac   : > { %v1432_v9 = vmul.f32 %v1018_v1, %v761_v63  ;;  %v765_v12 = vadd.f32 %v764_v8, %v6610_v45  ;;  %v1021_v13 = vpop.f32.mrb[18].mxu1  ;;  %v766_v17 = vpop.f32.mrb[19].mxu0 }
 0x1ad   : > { %v1022_v18 = vadd.f32 %v1021_v13, %v6612_v46  ;;  %v767_v23 = vadd.f32 %v766_v17, %v6614_v16  ;;  %v1023_v24 = vpop.f32.mrb[19].mxu1 }
 0x1ae   : > { %v1024_v29 = vadd.f32 %v1023_v24, %v6616_v49  ;;  %1655 = vmatprep.mubr.f32.mxu1 %v1432_v9 }
 0x1af   : > { %v1433_v30 = vmul.f32 %v1022_v18, %v765_v12  ;;  %1656 = vmatmul.mubr.f32.gmra.mrb[80].mxu1 %v1431_v2  ;;  %v770_v34 = vpop.f32.mrb[20].mxu0 }
 0x1b0   : > { %v1434_v39 = vmul.f32 %v1024_v29, %v767_v23  ;;  %v771_v40 = vadd.f32 %v770_v34, %v6610_v45  ;;  %v1027_v41 = vpop.f32.mrb[20].mxu1  ;;  %v772_v42 = vpop.f32.mrb[21].mxu0 }
 0x1b1   : > { %v1028_v50 = vadd.f32 %v1027_v41, %v6612_v46  ;;  %v773_v53 = vadd.f32 %v772_v42, %v6614_v16  ;;  %v1029_v54 = vpop.f32.mrb[21].mxu1 }
 0x1b2   : > { %v1030_v55 = vadd.f32 %v1029_v54, %v6616_v49  ;;  %1661 = vmatprep.mubr.f32.mxu1 %v1434_v39 }
 0x1b3   : > { %v1435_v56 = vmul.f32 %v1028_v50, %v771_v40  ;;  %1662 = vmatmul.mubr.f32.gmra.mrb[82].mxu1 %v1433_v30  ;;  %v776_v61 = vpop.f32.mrb[22].mxu0 }
 0x1b4   : > { %v1436_v62 = vmul.f32 %v1030_v55, %v773_v53  ;;  %v777_v63 = vadd.f32 %v776_v61, %v6610_v45  ;;  %v1033_v0 = vpop.f32.mrb[22].mxu1  ;;  %v778_v1 = vpop.f32.mrb[23].mxu0 }
 0x1b5   : > { %v1034_v2 = vadd.f32 %v1033_v0, %v6612_v46  ;;  %v779_v8 = vadd.f32 %v778_v1, %v6614_v16  ;;  %v1035_v9 = vpop.f32.mrb[23].mxu1 }
 0x1b6   : > { %v1036_v12 = vadd.f32 %v1035_v9, %v6616_v49  ;;  %1667 = vmatprep.mubr.f32.mxu1 %v1436_v62 }
 0x1b7   : > { %v1437_v13 = vmul.f32 %v1034_v2, %v777_v63  ;;  %1668 = vmatmul.mubr.f32.gmra.mrb[84].mxu1 %v1435_v56  ;;  %v782_v17 = vpop.f32.mrb[24].mxu0 }
 0x1b8   : > { %v1438_v18 = vmul.f32 %v1036_v12, %v779_v8  ;;  %v783_v23 = vadd.f32 %v782_v17, %v6610_v45  ;;  %v1039_v24 = vpop.f32.mrb[24].mxu1  ;;  %v784_v29 = vpop.f32.mrb[25].mxu0 }
 0x1b9   : > { %v1040_v30 = vadd.f32 %v1039_v24, %v6612_v46  ;;  %v785_v34 = vadd.f32 %v784_v29, %v6614_v16  ;;  %v1041_v39 = vpop.f32.mrb[25].mxu1 }
 0x1ba   : > { %v1042_v40 = vadd.f32 %v1041_v39, %v6616_v49  ;;  %1673 = vmatprep.mubr.f32.mxu1 %v1438_v18 }
 0x1bb   : > { %v1439_v41 = vmul.f32 %v1040_v30, %v783_v23  ;;  %1674 = vmatmul.mubr.f32.gmra.mrb[86].mxu1 %v1437_v13  ;;  %v788_v42 = vpop.f32.mrb[26].mxu0 }
 0x1bc   : > { %v1440_v50 = vmul.f32 %v1042_v40, %v785_v34  ;;  %v789_v53 = vadd.f32 %v788_v42, %v6610_v45  ;;  %v1045_v54 = vpop.f32.mrb[26].mxu1  ;;  %v790_v55 = vpop.f32.mrb[27].mxu0 }
 0x1bd   : > { %v1046_v56 = vadd.f32 %v1045_v54, %v6612_v46  ;;  %v791_v61 = vadd.f32 %v790_v55, %v6614_v16  ;;  %v1047_v62 = vpop.f32.mrb[27].mxu1 }
 0x1be   : > { %v1048_v63 = vadd.f32 %v1047_v62, %v6616_v49  ;;  %1679 = vmatprep.mubr.f32.mxu1 %v1440_v50 }
 0x1bf   : > { %v1441_v0 = vmul.f32 %v1046_v56, %v789_v53  ;;  %1680 = vmatmul.mubr.f32.gmra.mrb[88].mxu1 %v1439_v41  ;;  %v794_v1 = vpop.f32.mrb[28].mxu0 }
 0x1c0   : > { %v1442_v2 = vmul.f32 %v1048_v63, %v791_v61  ;;  %v795_v8 = vadd.f32 %v794_v1, %v6610_v45  ;;  %v1051_v9 = vpop.f32.mrb[28].mxu1  ;;  %v796_v12 = vpop.f32.mrb[29].mxu0 }
 0x1c1   : > { %v1052_v13 = vadd.f32 %v1051_v9, %v6612_v46  ;;  %v797_v17 = vadd.f32 %v796_v12, %v6614_v16  ;;  %v1053_v18 = vpop.f32.mrb[29].mxu1 }
 0x1c2   : > { %v1054_v23 = vadd.f32 %v1053_v18, %v6616_v49  ;;  %1685 = vmatprep.mubr.f32.mxu1 %v1442_v2 }
 0x1c3   : > { %v1443_v24 = vmul.f32 %v1052_v13, %v795_v8  ;;  %1686 = vmatmul.mubr.f32.gmra.mrb[90].mxu1 %v1441_v0  ;;  %v800_v29 = vpop.f32.mrb[30].mxu0 }
 0x1c4   : > { %v1444_v30 = vmul.f32 %v1054_v23, %v797_v17  ;;  %v801_v34 = vadd.f32 %v800_v29, %v6610_v45  ;;  %v1057_v39 = vpop.f32.mrb[30].mxu1  ;;  %v802_v40 = vpop.f32.mrb[31].mxu0 }
 0x1c5   : > { %v1058_v41 = vadd.f32 %v1057_v39, %v6612_v46  ;;  %v803_v42 = vadd.f32 %v802_v40, %v6614_v16  ;;  %v1059_v50 = vpop.f32.mrb[31].mxu1 }
 0x1c6   : > { %v1060_v53 = vadd.f32 %v1059_v50, %v6616_v49  ;;  %1691 = vmatprep.mubr.f32.mxu1 %v1444_v30 }
 0x1c7   : > { %v1445_v54 = vmul.f32 %v1058_v41, %v801_v34  ;;  %1692 = vmatmul.mubr.f32.gmra.mrb[92].mxu1 %v1443_v24  ;;  %v806_v55 = vpop.f32.mrb[32].mxu0 }
 0x1c8   : > { %v1446_v56 = vmul.f32 %v1060_v53, %v803_v42  ;;  %v807_v61 = vadd.f32 %v806_v55, %v6610_v45  ;;  %v1063_v62 = vpop.f32.mrb[32].mxu1  ;;  %v808_v63 = vpop.f32.mrb[33].mxu0 }
 0x1c9   : > { %v1064_v0 = vadd.f32 %v1063_v62, %v6612_v46  ;;  %v809_v1 = vadd.f32 %v808_v63, %v6614_v16  ;;  %v1065_v2 = vpop.f32.mrb[33].mxu1 }
 0x1ca   : > { %v1066_v8 = vadd.f32 %v1065_v2, %v6616_v49  ;;  %1697 = vmatprep.mubr.f32.mxu1 %v1446_v56 }
 0x1cb   : > { %v1447_v9 = vmul.f32 %v1064_v0, %v807_v61  ;;  %1698 = vmatmul.mubr.f32.gmra.mrb[94].mxu1 %v1445_v54  ;;  %v812_v12 = vpop.f32.mrb[34].mxu0 }
 0x1cc   : > { %v1448_v13 = vmul.f32 %v1066_v8, %v809_v1  ;;  %v813_v17 = vadd.f32 %v812_v12, %v6610_v45  ;;  %v1069_v18 = vpop.f32.mrb[34].mxu1  ;;  %v814_v23 = vpop.f32.mrb[35].mxu0 }
 0x1cd   : > { %v1070_v24 = vadd.f32 %v1069_v18, %v6612_v46  ;;  %v815_v29 = vadd.f32 %v814_v23, %v6614_v16  ;;  %v1071_v30 = vpop.f32.mrb[35].mxu1 }
 0x1ce   : > { %v1072_v34 = vadd.f32 %v1071_v30, %v6616_v49  ;;  %1703 = vmatprep.mubr.f32.mxu1 %v1448_v13 }
 0x1cf   : > { %v1449_v39 = vmul.f32 %v1070_v24, %v813_v17  ;;  %1704 = vmatmul.mubr.f32.gmra.mrb[96].mxu1 %v1447_v9  ;;  %v818_v40 = vpop.f32.mrb[36].mxu0 }
 0x1d0   : > { %v1450_v41 = vmul.f32 %v1072_v34, %v815_v29  ;;  %v819_v42 = vadd.f32 %v818_v40, %v6610_v45  ;;  %v1075_v50 = vpop.f32.mrb[36].mxu1  ;;  %v820_v53 = vpop.f32.mrb[37].mxu0 }
 0x1d1   : > { %v1076_v54 = vadd.f32 %v1075_v50, %v6612_v46  ;;  %v821_v55 = vadd.f32 %v820_v53, %v6614_v16  ;;  %v1077_v56 = vpop.f32.mrb[37].mxu1 }
 0x1d2   : > { %v1078_v61 = vadd.f32 %v1077_v56, %v6616_v49  ;;  %1709 = vmatprep.mubr.f32.mxu1 %v1450_v41 }
 0x1d3   : > { %v1451_v62 = vmul.f32 %v1076_v54, %v819_v42  ;;  %1710 = vmatmul.mubr.f32.gmra.mrb[98].mxu1 %v1449_v39  ;;  %v824_v63 = vpop.f32.mrb[38].mxu0 }
 0x1d4   : > { %v1452_v0 = vmul.f32 %v1078_v61, %v821_v55  ;;  %v825_v1 = vadd.f32 %v824_v63, %v6610_v45  ;;  %v1081_v2 = vpop.f32.mrb[38].mxu1  ;;  %v826_v8 = vpop.f32.mrb[39].mxu0 }
 0x1d5   : > { %v1082_v9 = vadd.f32 %v1081_v2, %v6612_v46  ;;  %v827_v12 = vadd.f32 %v826_v8, %v6614_v16  ;;  %v1083_v13 = vpop.f32.mrb[39].mxu1 }
 0x1d6   : > { %v1084_v17 = vadd.f32 %v1083_v13, %v6616_v49  ;;  %1715 = vmatprep.mubr.f32.mxu1 %v1452_v0 }
 0x1d7   : > { %v1453_v18 = vmul.f32 %v1082_v9, %v825_v1  ;;  %1716 = vmatmul.mubr.f32.gmra.mrb[100].mxu1 %v1451_v62  ;;  %v830_v23 = vpop.f32.mrb[40].mxu0 }
 0x1d8   : > { %v1454_v24 = vmul.f32 %v1084_v17, %v827_v12  ;;  %v831_v29 = vadd.f32 %v830_v23, %v6610_v45  ;;  %v1087_v30 = vpop.f32.mrb[40].mxu1  ;;  %v832_v34 = vpop.f32.mrb[41].mxu0 }
 0x1d9   : > { %v1088_v39 = vadd.f32 %v1087_v30, %v6612_v46  ;;  %v833_v40 = vadd.f32 %v832_v34, %v6614_v16  ;;  %v1089_v41 = vpop.f32.mrb[41].mxu1 }
 0x1da   : > { %v1090_v42 = vadd.f32 %v1089_v41, %v6616_v49  ;;  %1721 = vmatprep.mubr.f32.mxu1 %v1454_v24 }
 0x1db   : > { %v1455_v50 = vmul.f32 %v1088_v39, %v831_v29  ;;  %1722 = vmatmul.mubr.f32.gmra.mrb[102].mxu1 %v1453_v18  ;;  %v836_v53 = vpop.f32.mrb[42].mxu0 }
 0x1dc   : > { %v1456_v54 = vmul.f32 %v1090_v42, %v833_v40  ;;  %v837_v55 = vadd.f32 %v836_v53, %v6610_v45  ;;  %v1093_v56 = vpop.f32.mrb[42].mxu1  ;;  %v838_v61 = vpop.f32.mrb[43].mxu0 }
 0x1dd   : > { %v1094_v62 = vadd.f32 %v1093_v56, %v6612_v46  ;;  %v839_v63 = vadd.f32 %v838_v61, %v6614_v16  ;;  %v1095_v0 = vpop.f32.mrb[43].mxu1 }
 0x1de   : > { %v1096_v1 = vadd.f32 %v1095_v0, %v6616_v49  ;;  %1727 = vmatprep.mubr.f32.mxu1 %v1456_v54 }
 0x1df   : > { %v1457_v2 = vmul.f32 %v1094_v62, %v837_v55  ;;  %1728 = vmatmul.mubr.f32.gmra.mrb[104].mxu1 %v1455_v50  ;;  %v842_v8 = vpop.f32.mrb[44].mxu0 }
 0x1e0   : > { %v1458_v9 = vmul.f32 %v1096_v1, %v839_v63  ;;  %v843_v12 = vadd.f32 %v842_v8, %v6610_v45  ;;  %v1099_v13 = vpop.f32.mrb[44].mxu1  ;;  %v844_v17 = vpop.f32.mrb[45].mxu0 }
 0x1e1   : > { %v1100_v18 = vadd.f32 %v1099_v13, %v6612_v46  ;;  %v845_v23 = vadd.f32 %v844_v17, %v6614_v16  ;;  %v1101_v24 = vpop.f32.mrb[45].mxu1 }
 0x1e2   : > { %v1102_v29 = vadd.f32 %v1101_v24, %v6616_v49  ;;  %1733 = vmatprep.mubr.f32.mxu1 %v1458_v9 }
 0x1e3   : > { %v1459_v30 = vmul.f32 %v1100_v18, %v843_v12  ;;  %1734 = vmatmul.mubr.f32.gmra.mrb[106].mxu1 %v1457_v2  ;;  %v848_v34 = vpop.f32.mrb[46].mxu0 }
 0x1e4   : > { %v1460_v39 = vmul.f32 %v1102_v29, %v845_v23  ;;  %v849_v40 = vadd.f32 %v848_v34, %v6610_v45  ;;  %v1105_v41 = vpop.f32.mrb[46].mxu1  ;;  %v850_v42 = vpop.f32.mrb[47].mxu0 }
 0x1e5   : > { %v1106_v50 = vadd.f32 %v1105_v41, %v6612_v46  ;;  %v851_v53 = vadd.f32 %v850_v42, %v6614_v16  ;;  %v1107_v54 = vpop.f32.mrb[47].mxu1 }
 0x1e6   : > { %v1108_v55 = vadd.f32 %v1107_v54, %v6616_v49  ;;  %1739 = vmatprep.mubr.f32.mxu1 %v1460_v39 }
 0x1e7   : > { %v1461_v56 = vmul.f32 %v1106_v50, %v849_v40  ;;  %1740 = vmatmul.mubr.f32.gmra.mrb[108].mxu1 %v1459_v30  ;;  %v854_v61 = vpop.f32.mrb[48].mxu0 }
 0x1e8   : > { %v1462_v62 = vmul.f32 %v1108_v55, %v851_v53  ;;  %v855_v63 = vadd.f32 %v854_v61, %v6610_v45  ;;  %v1111_v0 = vpop.f32.mrb[48].mxu1  ;;  %v856_v1 = vpop.f32.mrb[49].mxu0 }
 0x1e9   : > { %v1112_v2 = vadd.f32 %v1111_v0, %v6612_v46  ;;  %v857_v8 = vadd.f32 %v856_v1, %v6614_v16  ;;  %v1113_v9 = vpop.f32.mrb[49].mxu1 }
 0x1ea   : > { %v1114_v12 = vadd.f32 %v1113_v9, %v6616_v49  ;;  %1745 = vmatprep.mubr.f32.mxu1 %v1462_v62 }
 0x1eb   : > { %v1463_v13 = vmul.f32 %v1112_v2, %v855_v63  ;;  %1746 = vmatmul.mubr.f32.gmra.mrb[110].mxu1 %v1461_v56  ;;  %v860_v17 = vpop.f32.mrb[50].mxu0 }
 0x1ec   : > { %v1464_v18 = vmul.f32 %v1114_v12, %v857_v8  ;;  %v861_v23 = vadd.f32 %v860_v17, %v6610_v45  ;;  %v1117_v24 = vpop.f32.mrb[50].mxu1  ;;  %v862_v29 = vpop.f32.mrb[51].mxu0 }
 0x1ed   : > { %v1118_v30 = vadd.f32 %v1117_v24, %v6612_v46  ;;  %v863_v34 = vadd.f32 %v862_v29, %v6614_v16  ;;  %v1119_v39 = vpop.f32.mrb[51].mxu1 }
 0x1ee   : > { %v1120_v40 = vadd.f32 %v1119_v39, %v6616_v49  ;;  %1751 = vmatprep.mubr.f32.mxu1 %v1464_v18 }
 0x1ef   : > { %v1465_v41 = vmul.f32 %v1118_v30, %v861_v23  ;;  %1752 = vmatmul.mubr.f32.gmra.mrb[112].mxu1 %v1463_v13  ;;  %v866_v42 = vpop.f32.mrb[52].mxu0 }
 0x1f0   : > { %v1466_v50 = vmul.f32 %v1120_v40, %v863_v34  ;;  %v867_v53 = vadd.f32 %v866_v42, %v6610_v45  ;;  %v1123_v54 = vpop.f32.mrb[52].mxu1  ;;  %v868_v55 = vpop.f32.mrb[53].mxu0 }
 0x1f1   : > { %v1124_v56 = vadd.f32 %v1123_v54, %v6612_v46  ;;  %v869_v61 = vadd.f32 %v868_v55, %v6614_v16  ;;  %v1125_v62 = vpop.f32.mrb[53].mxu1 }
 0x1f2   : > { %v1126_v63 = vadd.f32 %v1125_v62, %v6616_v49  ;;  %1757 = vmatprep.mubr.f32.mxu1 %v1466_v50 }
 0x1f3   : > { %v1467_v0 = vmul.f32 %v1124_v56, %v867_v53  ;;  %1758 = vmatmul.mubr.f32.gmra.mrb[114].mxu1 %v1465_v41  ;;  %v872_v1 = vpop.f32.mrb[54].mxu0 }
 0x1f4   : > { %v1468_v2 = vmul.f32 %v1126_v63, %v869_v61  ;;  %v873_v8 = vadd.f32 %v872_v1, %v6610_v45  ;;  %v1129_v9 = vpop.f32.mrb[54].mxu1  ;;  %v874_v12 = vpop.f32.mrb[55].mxu0 }
 0x1f5   : > { %v1130_v13 = vadd.f32 %v1129_v9, %v6612_v46  ;;  %v875_v17 = vadd.f32 %v874_v12, %v6614_v16  ;;  %v1131_v18 = vpop.f32.mrb[55].mxu1 }
 0x1f6   : > { %v1132_v23 = vadd.f32 %v1131_v18, %v6616_v49  ;;  %1763 = vmatprep.mubr.f32.mxu1 %v1468_v2 }
 0x1f7   : > { %v1469_v24 = vmul.f32 %v1130_v13, %v873_v8  ;;  %1764 = vmatmul.mubr.f32.gmra.mrb[116].mxu1 %v1467_v0  ;;  %v878_v29 = vpop.f32.mrb[56].mxu0 }
 0x1f8   : > { %v1470_v30 = vmul.f32 %v1132_v23, %v875_v17  ;;  %v879_v34 = vadd.f32 %v878_v29, %v6610_v45  ;;  %v1135_v39 = vpop.f32.mrb[56].mxu1  ;;  %v880_v40 = vpop.f32.mrb[57].mxu0 }
 0x1f9   : > { %v1136_v41 = vadd.f32 %v1135_v39, %v6612_v46  ;;  %v881_v42 = vadd.f32 %v880_v40, %v6614_v16  ;;  %v1137_v50 = vpop.f32.mrb[57].mxu1 }
 0x1fa   : > { %v1138_v53 = vadd.f32 %v1137_v50, %v6616_v49  ;;  %1769 = vmatprep.mubr.f32.mxu1 %v1470_v30 }
 0x1fb   : > { %v1471_v54 = vmul.f32 %v1136_v41, %v879_v34  ;;  %1770 = vmatmul.mubr.f32.gmra.mrb[118].mxu1 %v1469_v24  ;;  %v884_v55 = vpop.f32.mrb[58].mxu0 }
 0x1fc   : > { %v1472_v56 = vmul.f32 %v1138_v53, %v881_v42  ;;  %v885_v61 = vadd.f32 %v884_v55, %v6610_v45  ;;  %v1141_v62 = vpop.f32.mrb[58].mxu1  ;;  %v886_v63 = vpop.f32.mrb[59].mxu0 }
 0x1fd   : > { %v1142_v0 = vadd.f32 %v1141_v62, %v6612_v46  ;;  %v887_v1 = vadd.f32 %v886_v63, %v6614_v16  ;;  %v1143_v2 = vpop.f32.mrb[59].mxu1 }
 0x1fe   : > { %v1144_v8 = vadd.f32 %v1143_v2, %v6616_v49  ;;  %1775 = vmatprep.mubr.f32.mxu1 %v1472_v56  ;;  %v424_v2 = vld [vmem:[#allocation5 + $0x20] sm:$0xff] }
 0x1ff   : > { %v1473_v9 = vmul.f32 %v1142_v0, %v885_v61  ;;  %1776 = vmatmul.mubr.f32.gmra.mrb[120].mxu1 %v1471_v54  ;;  %v890_v12 = vpop.f32.mrb[60].mxu0  ;;  %v425_v0 = vld [vmem:[#allocation5 + $0x28] sm:$0xff] }
 0x200   : > { %v1474_v13 = vmul.f32 %v1144_v8, %v887_v1  ;;  %v891_v17 = vadd.f32 %v890_v12, %v6610_v45  ;;  %v1147_v18 = vpop.f32.mrb[60].mxu1  ;;  %v892_v23 = vpop.f32.mrb[61].mxu0  ;;  %v431_v1 = vld [vmem:[#allocation5 + $0x58] sm:$0xff] }
 0x201   : > { %v1148_v24 = vadd.f32 %v1147_v18, %v6612_v46  ;;  %v893_v29 = vadd.f32 %v892_v23, %v6614_v16  ;;  %v1149_v30 = vpop.f32.mrb[61].mxu1  ;;  %v5061_v8 = vpack.c.bf16 %v431_v1, %v425_v0  ;;  %v443_v12 = vld [vmem:[#allocation5 + $0xb8] sm:$0xff]  ;;  %v449_v18 = vld [vmem:[#allocation5 + $0xe8] sm:$0xff] }
 0x202   : > { %v1150_v34 = vadd.f32 %v1149_v30, %v6616_v49  ;;  %1781 = vmatprep.mubr.f32.mxu1 %v1474_v13  ;;  %v455_v23 = vld [vmem:[#allocation5 + $0x118] sm:$0xff]  ;;  %v454_v30 = vld [vmem:[#allocation5 + $0x110] sm:$0xff]  ;;  %v485_v0 = vld [vmem:[#allocation5 + $0x208] sm:$0xff] }
 0x203   : > { %v1475_v39 = vmul.f32 %v1148_v24, %v891_v17  ;;  %1782 = vmatmul.mubr.f32.gmra.mrb[122].mxu1 %v1473_v9  ;;  %v896_v40 = vpop.f32.mrb[62].mxu0  ;;  %5062 = vmatprep.subr.bf16.mxu0 %v5061_v8  ;;  %v442_v17 = vld [vmem:[#allocation5 + $0xb0] sm:$0xff]  ;;  %v448_v24 = vld [vmem:[#allocation5 + $0xe0] sm:$0xff]  ;;  %v491_v1 = vld [vmem:[#allocation5 + $0x238] sm:$0xff] }
 0x204   : > { %v1476_v41 = vmul.f32 %v1150_v34, %v893_v29  ;;  %v897_v42 = vadd.f32 %v896_v40, %v6610_v45  ;;  %v1153_v50 = vpop.f32.mrb[62].mxu1  ;;  %v898_v53 = vpop.f32.mrb[63].mxu0  ;;  %v430_v45 = vld [vmem:[#allocation5 + $0x50] sm:$0xff]  ;;  %v5069_v29 = vpack.c.bf16 %v455_v23, %v449_v18  ;;  %v5071_v34 = vpack.c.bf16 %v454_v30, %v448_v24  ;;  %v467_v40 = vld [vmem:[#allocation5 + $0x178] sm:$0xff]  ;;  %v509_v18 = vld [vmem:[#allocation5 + $0x2c8] sm:$0xff] }
 0x205   : > { %v1154_v54 = vadd.f32 %v1153_v50, %v6612_v46  ;;  %v899_v55 = vadd.f32 %v898_v53, %v6614_v16  ;;  %v1155_v56 = vpop.f32.mrb[63].mxu1  ;;  %v5063_v9 = vpack.c.bf16 %v430_v45, %v424_v2  ;;  %v437_v46 = vld [vmem:[#allocation5 + $0x88] sm:$0xff]  ;;  %v436_v16 = vld [vmem:[#allocation5 + $0x80] sm:$0xff]  ;;  %v466_v50 = vld [vmem:[#allocation5 + $0x170] sm:$0xff]  ;;  %v5081_v8 = vpack.c.bf16 %v491_v1, %v485_v0 }
 0x206   : > { %v1156_v61 = vadd.f32 %v1155_v56, %v6616_v49  ;;  %1787 = vmatprep.mubr.f32.mxu1 %v1476_v41  ;;  %v5065_v13 = vpack.c.bf16 %v443_v12, %v437_v46  ;;  %v5067_v49 = vpack.c.bf16 %v442_v17, %v436_v16  ;;  %v460_v41 = vld [vmem:[#allocation5 + $0x140] sm:$0xff]  ;;  %v490_v45 = vld [vmem:[#allocation5 + $0x230] sm:$0xff]  ;;  %v497_v46 = vld [vmem:[#allocation5 + $0x268] sm:$0xff] }
 0x207   : > { %v1477_v62 = vmul.f32 %v1154_v54, %v897_v42  ;;  %1788 = vmatmul.mubr.f32.gmra.mrb[124].mxu1 %v1475_v39  ;;  %5064 = vmatpush1.bf16.msra.mxu0 %v5063_v9  ;;  %v461_v39 = vld [vmem:[#allocation5 + $0x148] sm:$0xff]  ;;  %v5075_v53 = vpack.c.bf16 %v466_v50, %v460_v41  ;;  %v472_v56 = vld [vmem:[#allocation5 + $0x1a0] sm:$0xff]  ;;  %v503_v12 = vld [vmem:[#allocation5 + $0x298] sm:$0xff] }
 0x208   : > { %v1478_v63 = vmul.f32 %v1156_v61, %v899_v55  ;;  %5066 = vmatprep.subr.bf16.mxu0 %v5065_v13  ;;  %v5073_v42 = vpack.c.bf16 %v467_v40, %v461_v39  ;;  %v473_v54 = vld [vmem:[#allocation5 + $0x1a8] sm:$0xff]  ;;  %v479_v55 = vld [vmem:[#allocation5 + $0x1d8] sm:$0xff]  ;;  %v484_v2 = vld [vmem:[#allocation5 + $0x200] sm:$0xff]  ;;  %v5085_v13 = vpack.c.bf16 %v503_v12, %v497_v46 }
 0x209   : > { %v5077_v61 = vpack.c.bf16 %v479_v55, %v473_v54  ;;  %v5083_v9 = vpack.c.bf16 %v490_v45, %v484_v2  ;;  %v496_v16 = vld [vmem:[#allocation5 + $0x260] sm:$0xff]  ;;  %v502_v17 = vld [vmem:[#allocation5 + $0x290] sm:$0xff]  ;;  %v515_v23 = vld [vmem:[#allocation5 + $0x2f8] sm:$0xff] }
 0x20a   : > { %1793 = vmatprep.mubr.f32.mxu1 %v1478_v63  ;;  %v508_v24 = vld [vmem:[#allocation5 + $0x2c0] sm:$0xff]  ;;  %v514_v30 = vld [vmem:[#allocation5 + $0x2f0] sm:$0xff]  ;;  %v521_v40 = vld [vmem:[#allocation5 + $0x328] sm:$0xff] }
 0x20b   : > { %1794 = vmatmul.mubr.f32.gmra.mrb[126].mxu1 %v1477_v62  ;;  %5068 = vmatpush1.bf16.msra.mxu0 %v5067_v49  ;;  %v478_v62 = vld [vmem:[#allocation5 + $0x1d0] sm:$0xff]  ;;  %v5087_v49 = vpack.c.bf16 %v502_v17, %v496_v16  ;;  %v527_v41 = vld [vmem:[#allocation5 + $0x358] sm:$0xff]  ;;  %v533_v55 = vld [vmem:[#allocation5 + $0x388] sm:$0xff] }
 0x20c   : > { %5070 = vmatprep.subr.bf16.mxu0 %v5069_v29  ;;  %v5079_v63 = vpack.c.bf16 %v478_v62, %v472_v56  ;;  %v5089_v29 = vpack.c.bf16 %v515_v23, %v509_v18  ;;  %v526_v54 = vld [vmem:[#allocation5 + $0x350] sm:$0xff]  ;;  %v539_v56 = vld [vmem:[#allocation5 + $0x3b8] sm:$0xff]  ;;  %v532_v0 = vld [vmem:[#allocation5 + $0x380] sm:$0xff] }
 0x20d   : > { %v538_v1 = vld [vmem:[#allocation5 + $0x3b0] sm:$0xff] }
 0x20f   : > { %5072 = vmatpush1.bf16.msra.mxu0 %v5071_v34  ;;  %v5091_v34 = vpack.c.bf16 %v514_v30, %v508_v24 }
 0x210   : > { %5074 = vmatprep.subr.bf16.mxu0 %v5073_v42  ;;  %v520_v42 = vld [vmem:[#allocation5 + $0x320] sm:$0xff] }
 0x211   : > { %v5095_v62 = vpack.c.bf16 %v526_v54, %v520_v42  ;;  %v544_v42 = vld [vmem:[#allocation5 + $0x3e0] sm:$0xff] }
 0x213   : > { %5076 = vmatpush1.bf16.msra.mxu0 %v5075_v53  ;;  %v5093_v53 = vpack.c.bf16 %v527_v41, %v521_v40  ;;  %v545_v40 = vld [vmem:[#allocation5 + $0x3e8] sm:$0xff]  ;;  %v551_v41 = vld [vmem:[#allocation5 + $0x418] sm:$0xff] }
 0x214   : > { %5078 = vmatprep.subr.bf16.mxu0 %v5077_v61  ;;  %v5101_v54 = vpack.c.bf16 %v551_v41, %v545_v40 }
 0x217   : > { %5080 = vmatpush1.bf16.msra.mxu0 %v5079_v63  ;;  %v5097_v63 = vpack.c.bf16 %v539_v56, %v533_v55  ;;  %v550_v55 = vld [vmem:[#allocation5 + $0x410] sm:$0xff] }
 0x218   : > { %5082 = vmatprep.subr.bf16.mxu0 %v5081_v8  ;;  %v5099_v8 = vpack.c.bf16 %v538_v1, %v532_v0 }
 0x21b   : > { %5084 = vmatpush1.bf16.msra.mxu0 %v5083_v9 }
 0x21c   : > { %5086 = vmatprep.subr.bf16.mxu0 %v5085_v13 }
 0x21f   : > { %5088 = vmatpush1.bf16.msra.mxu0 %v5087_v49 }
 0x220   : > { %5090 = vmatprep.subr.bf16.mxu0 %v5089_v29 }
 0x223   : > { %5092 = vmatpush1.bf16.msra.mxu0 %v5091_v34 }
 0x224   : > { %5094 = vmatprep.subr.bf16.mxu0 %v5093_v53 }
 0x227   : > { %5096 = vmatpush1.bf16.msra.mxu0 %v5095_v62 }
 0x228   : > { %5098 = vmatprep.subr.bf16.mxu0 %v5097_v63 }
 0x22b   : > { %5100 = vmatpush1.bf16.msra.mxu0 %v5099_v8  ;;  %v557_v8 = vld [vmem:[#allocation5 + $0x448] sm:$0xff] }
 0x22c   : > { %5102 = vmatprep.subr.bf16.mxu0 %v5101_v54 }
 0x262   : > { %v6746_v39 = vpop.f32.mrb[64].mxu1 }
 0x263   : > { %v6748_v50 = vpop.f32.mrb[65].mxu1 }
 0x264   : > { %v1800_v61 = vmax.f32 %v6746_v39, %v6748_v50 }
 0x266   : > { %1801 = vmax.xlane.f32.xlu0 %v1800_v61  ;;  %v6752_v2 = vpop.f32.mrb[66].mxu1  ;;  %v5103_v61 = vpack.c.bf16 %v550_v55, %v544_v42 }
 0x267   : > { %v6754_v45 = vpop.f32.mrb[67].mxu1 }
 0x268   : > { %v1803_v9 = vmax.f32 %v6752_v2, %v6754_v45  ;;  %5104 = vmatpush1.bf16.msra.mxu0 %v5103_v61 }
 0x26a   : > { %1804 = vmax.xlane.f32.xlu0 %v1803_v9  ;;  %v6758_v46 = vpop.f32.mrb[68].mxu1  ;;  %v563_v9 = vld [vmem:[#allocation5 + $0x478] sm:$0xff] }
 0x26b   : > { %v6760_v12 = vpop.f32.mrb[69].mxu1 }
 0x26c   : > { %v1806_v16 = vmax.f32 %v6758_v46, %v6760_v12 }
 0x26e   : > { %1807 = vmax.xlane.f32.xlu1 %v1806_v16  ;;  %v6764_v13 = vpop.f32.mrb[70].mxu1  ;;  %v556_v16 = vld [vmem:[#allocation5 + $0x440] sm:$0xff] }
 0x26f   : > { %v6766_v17 = vpop.f32.mrb[71].mxu1 }
 0x270   : > { %v1809_v49 = vmax.f32 %v6764_v13, %v6766_v17 }
 0x272   : > { %1810 = vmax.xlane.f32.xlu1 %v1809_v49  ;;  %v6770_v18 = vpop.f32.mrb[72].mxu1 }
 0x273   : > { %v6772_v23 = vpop.f32.mrb[73].mxu1 }
 0x274   : > { %v1812_v24 = vmax.f32 %v6770_v18, %v6772_v23 }
 0x276   : > { %1813 = vmax.xlane.f32.xlu0 %v1812_v24  ;;  %v6776_v29 = vpop.f32.mrb[74].mxu1  ;;  %v5105_v24 = vpack.c.bf16 %v563_v9, %v557_v8  ;;  %v568_v8 = vld [vmem:[#allocation5 + $0x4a0] sm:$0xff] }
 0x277   : > { %v6778_v30 = vpop.f32.mrb[75].mxu1 }
 0x278   : > { %v1815_v34 = vmax.f32 %v6776_v29, %v6778_v30  ;;  %5106 = vmatprep.subr.bf16.mxu0 %v5105_v24 }
 0x27a   : > { %1816 = vmax.xlane.f32.xlu1 %v1815_v34  ;;  %v6782_v53 = vpop.f32.mrb[76].mxu1  ;;  %v562_v34 = vld [vmem:[#allocation5 + $0x470] sm:$0xff] }
 0x27b   : > { %v6784_v56 = vpop.f32.mrb[77].mxu1  ;;  %v5107_v41 = vpack.c.bf16 %v562_v34, %v556_v16  ;;  %v574_v34 = vld [vmem:[#allocation5 + $0x4d0] sm:$0xff] }
 0x27c   : > { %v1818_v62 = vmax.f32 %v6782_v53, %v6784_v56  ;;  %v5111_v24 = vpack.c.bf16 %v574_v34, %v568_v8  ;;  %v5113_v8 = vpack.c.bf16 %v587_v22, %v581_v31  ;;  %v586_v34 = vld [vmem:[#allocation5 + $0x530] sm:$0xff]  ;;  %v592_v22 = vld [vmem:[#allocation5 + $0x560] sm:$0xff] }
 0x27d   : > { %5108 = vmatpush1.bf16.msra.mxu0 %v5107_v41 }
 0x27e   : > { %1819 = vmax.xlane.f32.xlu0 %v1818_v62  ;;  %v6788_v63 = vpop.f32.mrb[78].mxu1  ;;  %v569_v62 = vld [vmem:[#allocation5 + $0x4a8] sm:$0xff] }
 0x27f   : > { %v6790_v0 = vpop.f32.mrb[79].mxu1 }
 0x280   : > { %v1821_v1 = vmax.f32 %v6788_v63, %v6790_v0 }
 0x282   : > { %1822 = vmax.xlane.f32.xlu1 %v1821_v1  ;;  %v6794_v49 = vpop.f32.mrb[80].mxu1  ;;  %v575_v1 = vld [vmem:[#allocation5 + $0x4d8] sm:$0xff] }
 0x283   : > { %v6796_v40 = vpop.f32.mrb[81].mxu1  ;;  %v5109_v16 = vpack.c.bf16 %v575_v1, %v569_v62  ;;  %v580_v62 = vld [vmem:[#allocation5 + $0x500] sm:$0xff] }
 0x284   : > { %v1824_v42 = vmax.f32 %v6794_v49, %v6796_v40 }
 0x285   : > { %5110 = vmatprep.subr.bf16.mxu0 %v5109_v16  ;;  %v5115_v16 = vpack.c.bf16 %v586_v34, %v580_v62  ;;  %v5117_v62 = vpack.c.bf16 %v599_v58, %v593_v6  ;;  %v598_v34 = vld [vmem:[#allocation5 + $0x590] sm:$0xff]  ;;  %v604_v58 = vld [vmem:[#allocation5 + $0x5c0] sm:$0xff] }
 0x286   : > { %1825 = vmax.xlane.f32.xlu0 %v1824_v42  ;;  %v6800_v54 = vpop.f32.mrb[82].mxu1  ;;  %5112 = vmatpush1.bf16.msra.mxu0 %v5111_v24  ;;  %v610_v6 = vld [vmem:[#allocation5 + $0x5f0] sm:$0xff] }
 0x287   : > { %v6802_v55 = vpop.f32.mrb[83].mxu1  ;;  %5114 = vmatprep.subr.bf16.mxu0 %v5113_v8  ;;  %v5119_v8 = vpack.c.bf16 %v598_v34, %v592_v22  ;;  %v5123_v34 = vpack.c.bf16 %v610_v6, %v604_v58  ;;  %v2376_v6 = vld [vmem:[%s9355_s4] sm:$0xff] }
 0x288   : > { %v1827_v61 = vmax.f32 %v6800_v54, %v6802_v55 }
 0x28a   : > { %1828 = vmax.xlane.f32.xlu1 %v1827_v61  ;;  %v6806_v9 = vpop.f32.mrb[84].mxu1  ;;  %5116 = vmatpush1.bf16.msra.mxu0 %v5115_v16 }
 0x28b   : > { %v6808_v32 = vpop.f32.mrb[85].mxu1  ;;  %5118 = vmatprep.subr.bf16.mxu0 %v5117_v62 }
 0x28c   : > { %v1830_v41 = vmax.f32 %v6806_v9, %v6808_v32 }
 0x28e   : > { %1831 = vmax.xlane.f32.xlu0 %v1830_v41  ;;  %v6812_v42 = vpop.f32.mrb[86].mxu1  ;;  %5120 = vmatpush1.bf16.msra.mxu0 %v5119_v8 }
 0x28f   : > { %v6814_v33 = vpop.f32.mrb[87].mxu1 }
 0x290   : > { %v1833_v61 = vmax.f32 %v6812_v42, %v6814_v33 }
 0x292   : > { %1834 = vmax.xlane.f32.xlu1 %v1833_v61  ;;  %v6818_v1 = vpop.f32.mrb[88].mxu1 }
 0x293   : > { %v6820_v21 = vpop.f32.mrb[89].mxu1 }
 0x294   : > { %v1836_v24 = vmax.f32 %v6818_v1, %v6820_v21 }
 0x296   : > { %1837 = vmax.xlane.f32.xlu0 %v1836_v24  ;;  %v6824_v41 = vpop.f32.mrb[90].mxu1 }
 0x297   : > { %v6826_v7 = vpop.f32.mrb[91].mxu1 }
 0x298   : > { %v1839_v61 = vmax.f32 %v6824_v41, %v6826_v7 }
 0x29a   : > { %1840 = vmax.xlane.f32.xlu1 %v1839_v61  ;;  %v6830_v31 = vpop.f32.mrb[92].mxu1  ;;  %v5121_v61 = vpack.c.bf16 %v611_v47, %v605_v48  ;;  %v5874_v48 = vld [vmem:[%s6425_s22 + $0x18] sm:$0xff] }
 0x29b   : > { %v6832_v57 = vpop.f32.mrb[93].mxu1 }
 0x29c   : > { %v1842_v16 = vmax.f32 %v6830_v31, %v6832_v57  ;;  %5122 = vmatprep.subr.bf16.mxu0 %v5121_v61 }
 0x29d   : > { %5124 = vmatpush1.bf16.msra.mxu0 %v5123_v34 }
 0x29e   : > { %1843 = vmax.xlane.f32.xlu0 %v1842_v16  ;;  %v6836_v24 = vpop.f32.mrb[94].mxu1 }
 0x29f   : > { %v6838_v38 = vpop.f32.mrb[95].mxu1 }
 0x2a0   : > { %v1845_v22 = vmax.f32 %v6836_v24, %v6838_v38  ;;  %1223 = vmatmul.mubr.f32.vlgmr.msra.gmra.mrb[64].mxu0 %v5873_v37  ;;  %v2377_v37 = vld [vmem:[%s9355_s4 + $0x8] sm:$0xff] }
 0x2a1   : > { %1228 = vmatprep.mubr.f32.mxu0 %v5874_v48  ;;  %v5190_v48 = vpack.c.bf16 %v2377_v37, %v2376_v6  ;;  %v5878_v6 = vld [vmem:[%s6425_s22 + $0x38] sm:$0xff] }
 0x2a2   : > { %1846 = vmax.xlane.f32.xlu1 %v1845_v22  ;;  %v6842_v62 = vpop.f32.mrb[96].mxu1  ;;  %v5875_v22 = vld [vmem:[%s6425_s22 + $0x10] sm:$0xff] }
 0x2a3   : > { %v6844_v8 = vpop.f32.mrb[97].mxu1 }
 0x2a4   : > { %v1848_v16 = vmax.f32 %v6842_v62, %v6844_v8  ;;  %1229 = vmatmul.mubr.f32.gmra.mrb[66].mxu0 %v5875_v22 }
 0x2a5   : > { %1234 = vmatprep.mubr.f32.mxu0 %v5876_v25 }
 0x2a6   : > { %1849 = vmax.xlane.f32.xlu0 %v1848_v16  ;;  %v6849_v47 = vpop.f32.mrb[98].mxu1  ;;  %v9384_v16 = vmov 0.0|0.0  }
 0x2a7   : > { %v6852_v58 = vpop.f32.mrb[99].mxu1  ;;  %5189 = vmatprep.subr.bf16.mxu0 %v9384_v16  ;;  %5317 = vmatprep.subr.bf16.mxu1 %v9384_v16 }
 0x2a8   : > { %v1851_v61 = vmax.f32 %v6849_v47, %v6852_v58  ;;  %5191 = vmatpush1.bf16.msra.mxu0 %v5190_v48  ;;  %5333 = vmatpush1.bf16.msra.mxu1 %v5190_v48  ;;  %v2378_v48 = vld [vmem:[%s9355_s4 + $0x10] sm:$0xff] }
 0x2a9   : > { %5192 = vmatprep.subr.bf16.mxu0 %v9384_v16  ;;  %5318 = vmatprep.subr.bf16.mxu1 %v9384_v16 }
 0x2aa   : > { %1852 = vmax.xlane.f32.xlu1 %v1851_v61  ;;  %v6863_v34 = vpop.f32.mrb[100].mxu1  ;;  %v5877_v61 = vld [vmem:[%s6425_s22 + $0x20] sm:$0xff] }
 0x2ab   : > { %v6866_v26 = vpop.f32.mrb[101].mxu1  ;;  %1235 = vmatmul.mubr.f32.gmra.mrb[68].mxu0 %v5877_v61  ;;  %v5879_v61 = vld [vmem:[%s6425_s22 + $0x30] sm:$0xff] }
 0x2ac   : > { %v1854_v15 = vmax.f32 %v6863_v34, %v6866_v26  ;;  %1240 = vmatprep.mubr.f32.mxu0 %v5878_v6 }
 0x2ae   : > { %1855 = vmax.xlane.f32.xlu0 %v1854_v15  ;;  %v6874_v22 = vpop.f32.mrb[102].mxu1  ;;  %v2379_v15 = vld [vmem:[%s9355_s4 + $0x18] sm:$0xff] }
 0x2af   : > { %v6877_v37 = vpop.f32.mrb[103].mxu1  ;;  %1241 = vmatmul.mubr.f32.gmra.mrb[70].mxu0 %v5879_v61  ;;  %v5193_v14 = vpack.c.bf16 %v2379_v15, %v2378_v48  ;;  %v5882_v61 = vld [vmem:[%s6425_s22 + $0x58] sm:$0xff] }
 0x2b0   : > { %v1857_v25 = vmax.f32 %v6874_v22, %v6877_v37  ;;  %1246 = vmatprep.mubr.f32.mxu0 %v5880_v5 }
 0x2b1   : > { %5194 = vmatpush1.bf16.msra.mxu0 %v5193_v14  ;;  %5334 = vmatpush1.bf16.msra.mxu1 %v5193_v14  ;;  %v5883_v14 = vld [vmem:[%s6425_s22 + $0x50] sm:$0xff] }
 0x2b2   : > { %1858 = vmax.xlane.f32.xlu1 %v1857_v25  ;;  %v6889_v6 = vpop.f32.mrb[104].mxu1  ;;  %5195 = vmatprep.subr.bf16.mxu0 %v9528_v59 }
 0x2b3   : > { %v6892_v16 = vpop.f32.mrb[105].mxu1  ;;  %1247 = vmatmul.mubr.f32.gmra.mrb[72].mxu0 %v5881_v60  ;;  %5319 = vmatprep.subr.bf16.mxu1 %v9528_v59  ;;  %v2380_v60 = vld [vmem:[%s9355_s4 + $0x20] sm:$0xff] }
 0x2b4   : > { %v1860_v4 = vmax.f32 %v6889_v6, %v6892_v16  ;;  %1252 = vmatprep.mubr.f32.mxu0 %v5882_v61 }
 0x2b6   : > { %1861 = vmax.xlane.f32.xlu0 %v1860_v4  ;;  %v6898_v25 = vpop.f32.mrb[106].mxu1  ;;  %v2381_v4 = vld [vmem:[%s9355_s4 + $0x28] sm:$0xff] }
 0x2b7   : > { %v6901_v48 = vpop.f32.mrb[107].mxu1  ;;  %1253 = vmatmul.mubr.f32.gmra.mrb[74].mxu0 %v5883_v14  ;;  %v5196_v61 = vpack.c.bf16 %v2381_v4, %v2380_v60  ;;  %v5886_v14 = vld [vmem:[%s6425_s22 + $0x78] sm:$0xff]  ;;  %v5887_v4 = vld [vmem:[%s6425_s22 + $0x70] sm:$0xff] }
 0x2b8   : > { %v1863_v5 = vmax.f32 %v6898_v25, %v6901_v48  ;;  %1258 = vmatprep.mubr.f32.mxu0 %v5884_v52 }
 0x2b9   : > { %5197 = vmatpush1.bf16.msra.mxu0 %v5196_v61  ;;  %5335 = vmatpush1.bf16.msra.mxu1 %v5196_v61 }
 0x2ba   : > { %1864 = vmax.xlane.f32.xlu1 %v1863_v5  ;;  %v6913_v15 = vpop.f32.mrb[108].mxu1  ;;  %5198 = vmatprep.subr.bf16.mxu0 %v9528_v59 }
 0x2bb   : > { %v6916_v51 = vpop.f32.mrb[109].mxu1  ;;  %1259 = vmatmul.mubr.f32.gmra.mrb[76].mxu0 %v5885_v43  ;;  %5320 = vmatprep.subr.bf16.mxu1 %v9528_v59  ;;  %v2382_v43 = vld [vmem:[%s9355_s4 + $0x30] sm:$0xff] }
 0x2bc   : > { %v1866_v44 = vmax.f32 %v6913_v15, %v6916_v51  ;;  %1264 = vmatprep.mubr.f32.mxu0 %v5886_v14 }
 0x2be   : > { %1867 = vmax.xlane.f32.xlu0 %v1866_v44  ;;  %v6922_v5 = vpop.f32.mrb[110].mxu1  ;;  %v2383_v44 = vld [vmem:[%s9355_s4 + $0x38] sm:$0xff] }
 0x2bf   : > { %v6925_v60 = vpop.f32.mrb[111].mxu1  ;;  %1265 = vmatmul.mubr.f32.gmra.mrb[78].mxu0 %v5887_v4  ;;  %v5199_v14 = vpack.c.bf16 %v2383_v44, %v2382_v43  ;;  %v5890_v4 = vld [vmem:[%s6425_s22 + $0x98] sm:$0xff]  ;;  %v5891_v44 = vld [vmem:[%s6425_s22 + $0x90] sm:$0xff] }
 0x2c0   : > { %v1869_v52 = vmax.f32 %v6922_v5, %v6925_v60  ;;  %1270 = vmatprep.mubr.f32.mxu0 %v5888_v36 }
 0x2c1   : > { %5200 = vmatpush1.bf16.msra.mxu0 %v5199_v14  ;;  %5336 = vmatpush1.bf16.msra.mxu1 %v5199_v14 }
 0x2c2   : > { %1870 = vmax.xlane.f32.xlu0 %v1869_v52  ;;  %v6937_v61 = vpop.f32.mrb[112].mxu1  ;;  %5201 = vmatprep.subr.bf16.mxu0 %v9528_v59 }
 0x2c3   : > { %v6940_v35 = vpop.f32.mrb[113].mxu1  ;;  %1271 = vmatmul.mubr.f32.gmra.mrb[80].mxu0 %v5889_v27  ;;  %5321 = vmatprep.subr.bf16.mxu1 %v9528_v59  ;;  %v2384_v27 = vld [vmem:[%s9355_s4 + $0x40] sm:$0xff] }
 0x2c4   : > { %v1872_v28 = vmax.f32 %v6937_v61, %v6940_v35  ;;  %1276 = vmatprep.mubr.f32.mxu0 %v5890_v4 }
 0x2c6   : > { %1873 = vmax.xlane.f32.xlu0 %v1872_v28  ;;  %v6946_v52 = vpop.f32.mrb[114].mxu1  ;;  %v2385_v28 = vld [vmem:[%s9355_s4 + $0x48] sm:$0xff] }
 0x2c7   : > { %v6949_v43 = vpop.f32.mrb[115].mxu1  ;;  %1277 = vmatmul.mubr.f32.gmra.mrb[82].mxu0 %v5891_v44  ;;  %v5202_v4 = vpack.c.bf16 %v2385_v28, %v2384_v27  ;;  %v5894_v44 = vld [vmem:[%s6425_s22 + $0xb8] sm:$0xff]  ;;  %v5895_v28 = vld [vmem:[%s6425_s22 + $0xb0] sm:$0xff] }
 0x2c8   : > { %v1875_v36 = vmax.f32 %v6946_v52, %v6949_v43  ;;  %1282 = vmatprep.mubr.f32.mxu0 %v5892_v20 }
 0x2c9   : > { %5203 = vmatpush1.bf16.msra.mxu0 %v5202_v4  ;;  %5337 = vmatpush1.bf16.msra.mxu1 %v5202_v4 }
 0x2ca   : > { %1876 = vmax.xlane.f32.xlu0 %v1875_v36  ;;  %v6961_v14 = vpop.f32.mrb[116].mxu1  ;;  %5204 = vmatprep.subr.bf16.mxu0 %v9528_v59 }
 0x2cb   : > { %9529 = vst [vmem:[#allocation44_spill] sm:$0xff] %v6961_v14  ;;  %v6964_v19 = vpop.f32.mrb[117].mxu1  ;;  %1283 = vmatmul.mubr.f32.gmra.mrb[84].mxu0 %v5893_v10  ;;  %5322 = vmatprep.subr.bf16.mxu1 %v9528_v59  ;;  %v2386_v10 = vld [vmem:[%s9355_s4 + $0x50] sm:$0xff] }
 0x2cc   : > { %9530 = vst [vmem:[#allocation45_spill] sm:$0xff] %v6964_v19  ;;  %v1878_v11 = vmax.f32 %v6961_v14, %v6964_v19  ;;  %1288 = vmatprep.mubr.f32.mxu0 %v5894_v44  ;;  %v5896_v19 = vld [vmem:[%s6425_s22 + $0xc8] sm:$0xff] }
 0x2ce   : > { %1879 = vmax.xlane.f32.xlu0 %v1878_v11  ;;  %v6970_v36 = vpop.f32.mrb[118].mxu1  ;;  %v2387_v11 = vld [vmem:[%s9355_s4 + $0x58] sm:$0xff] }
 0x2cf   : > { %9531 = vst [vmem:[#allocation46_spill] sm:$0xff] %v6970_v36  ;;  %v6973_v27 = vpop.f32.mrb[119].mxu1  ;;  %1289 = vmatmul.mubr.f32.gmra.mrb[86].mxu0 %v5895_v28  ;;  %v5205_v44 = vpack.c.bf16 %v2387_v11, %v2386_v10  ;;  %v5898_v28 = vld [vmem:[%s6425_s22 + $0xd8] sm:$0xff]  ;;  %v5899_v11 = vld [vmem:[%s6425_s22 + $0xd0] sm:$0xff] }
 0x2d0   : > { %9532 = vst [vmem:[#allocation47_spill] sm:$0xff] %v6973_v27  ;;  %v1881_v20 = vmax.f32 %v6970_v36, %v6973_v27  ;;  %1294 = vmatprep.mubr.f32.mxu0 %v5896_v19  ;;  %v5897_v36 = vld [vmem:[%s6425_s22 + $0xc0] sm:$0xff] }
 0x2d1   : > { %5206 = vmatpush1.bf16.msra.mxu0 %v5205_v44  ;;  %5338 = vmatpush1.bf16.msra.mxu1 %v5205_v44 }
 0x2d2   : > { %1882 = vmax.xlane.f32.xlu0 %v1881_v20  ;;  %v6985_v4 = vpop.f32.mrb[120].mxu1  ;;  %5207 = vmatprep.subr.bf16.mxu0 %v9528_v59 }
 0x2d3   : > { %9533 = vst [vmem:[#allocation48_spill] sm:$0xff] %v6985_v4  ;;  %v6988_v14 = vpop.f32.mrb[121].mxu1  ;;  %1295 = vmatmul.mubr.f32.gmra.mrb[88].mxu0 %v5897_v36  ;;  %5323 = vmatprep.subr.bf16.mxu1 %v9528_v59  ;;  %v2388_v36 = vld [vmem:[%s9355_s4 + $0x60] sm:$0xff] }
 0x2d4   : > { %9534 = vst [vmem:[#allocation49_spill] sm:$0xff] %v6988_v14  ;;  %v1884_v27 = vmax.f32 %v6985_v4, %v6988_v14  ;;  %1300 = vmatprep.mubr.f32.mxu0 %v5898_v28  ;;  %v5900_v14 = vld [vmem:[%s6425_s22 + $0xe8] sm:$0xff] }
 0x2d6   : > { %1885 = vmax.xlane.f32.xlu0 %v1884_v27  ;;  %v6994_v20 = vpop.f32.mrb[122].mxu1  ;;  %v2389_v27 = vld [vmem:[%s9355_s4 + $0x68] sm:$0xff] }
 0x2d7   : > { %9535 = vst [vmem:[#allocation50_spill] sm:$0xff] %v6994_v20  ;;  %v6997_v10 = vpop.f32.mrb[123].mxu1  ;;  %1301 = vmatmul.mubr.f32.gmra.mrb[90].mxu0 %v5899_v11  ;;  %v5208_v28 = vpack.c.bf16 %v2389_v27, %v2388_v36  ;;  %v5902_v36 = vld [vmem:[%s6425_s22 + $0xf8] sm:$0xff]  ;;  %v5903_v11 = vld [vmem:[%s6425_s22 + $0xf0] sm:$0xff] }
 0x2d8   : > { %9536 = vst [vmem:[#allocation51_spill] sm:$0xff] %v6997_v10  ;;  %v1887_v19 = vmax.f32 %v6994_v20, %v6997_v10  ;;  %1306 = vmatprep.mubr.f32.mxu0 %v5900_v14  ;;  %v5901_v20 = vld [vmem:[%s6425_s22 + $0xe0] sm:$0xff] }
 0x2d9   : > { %5209 = vmatpush1.bf16.msra.mxu0 %v5208_v28  ;;  %5339 = vmatpush1.bf16.msra.mxu1 %v5208_v28 }
 0x2da   : > { %1888 = vmax.xlane.f32.xlu0 %v1887_v19  ;;  %v7009_v44 = vpop.f32.mrb[124].mxu1  ;;  %5210 = vmatprep.subr.bf16.mxu0 %v9528_v59 }
 0x2db   : > { %9537 = vst [vmem:[#allocation52_spill] sm:$0xff] %v7009_v44  ;;  %v7012_v4 = vpop.f32.mrb[125].mxu1  ;;  %1307 = vmatmul.mubr.f32.gmra.mrb[92].mxu0 %v5901_v20  ;;  %5324 = vmatprep.subr.bf16.mxu1 %v9528_v59  ;;  %v2390_v20 = vld [vmem:[%s9355_s4 + $0x70] sm:$0xff] }
 0x2dc   : > { %9538 = vst [vmem:[#allocation53_spill] sm:$0xff] %v7012_v4  ;;  %v1890_v10 = vmax.f32 %v7009_v44, %v7012_v4  ;;  %1312 = vmatprep.mubr.f32.mxu0 %v5902_v36  ;;  %v5904_v36 = vld [vmem:[%s6425_s22 + $0x108] sm:$0xff]  ;;  %v5913_v4 = vld [vmem:[%s6425_s22 + $0x140] sm:$0xff]  ;;  %v5915_v44 = vld [vmem:[%s6425_s22 + $0x150] sm:$0xff] }
 0x2de   : > { %1891 = vmax.xlane.f32.xlu0 %v1890_v10  ;;  %v7018_v19 = vpop.f32.mrb[126].mxu1  ;;  %v2391_v10 = vld [vmem:[%s9355_s4 + $0x78] sm:$0xff] }
 0x2df   : > { %9539 = vst [vmem:[#allocation54_spill] sm:$0xff] %v7018_v19  ;;  %v7021_v14 = vpop.f32.mrb[127].mxu1  ;;  %1313 = vmatmul.mubr.f32.gmra.mrb[94].mxu0 %v5903_v11  ;;  %v5211_v28 = vpack.c.bf16 %v2391_v10, %v2390_v20  ;;  %v2393_v20 = vld [vmem:[%s9355_s4 + $0x88] sm:$0xff]  ;;  %v5907_v10 = vld [vmem:[%s6425_s22 + $0x110] sm:$0xff] }
 0x2e0   : > { %9540 = vst [vmem:[#allocation55_spill] sm:$0xff] %v7021_v14  ;;  %v1893_v27 = vmax.f32 %v7018_v19, %v7021_v14  ;;  %1318 = vmatprep.mubr.f32.mxu0 %v5904_v36  ;;  %v5905_v14 = vld [vmem:[%s6425_s22 + $0x100] sm:$0xff]  ;;  %v5906_v19 = vld [vmem:[%s6425_s22 + $0x118] sm:$0xff]  ;;  %v2394_v36 = vld [vmem:[%s9355_s4 + $0x90] sm:$0xff] }
 0x2e1   : > { %5212 = vmatpush1.bf16.msra.mxu0 %v5211_v28  ;;  %5340 = vmatpush1.bf16.msra.mxu1 %v5211_v28  ;;  %v5910_v28 = vld [vmem:[%s6425_s22 + $0x138] sm:$0xff] }
 0x2e2   : > { %1894 = vmax.xlane.f32.xlu0 %v1893_v27  ;;  %5213 = vmatprep.subr.bf16.mxu0 %v9528_v59  ;;  %v2392_v27 = vld [vmem:[%s9355_s4 + $0x80] sm:$0xff] }
 0x2e3   : > { %1319 = vmatmul.mubr.f32.gmra.mrb[96].mxu0 %v5905_v14  ;;  %5325 = vmatprep.subr.bf16.mxu1 %v9528_v59  ;;  %v5214_v11 = vpack.c.bf16 %v2393_v20, %v2392_v27  ;;  %v5908_v14 = vld [vmem:[%s6425_s22 + $0x128] sm:$0xff]  ;;  %v2395_v27 = vld [vmem:[%s9355_s4 + $0x98] sm:$0xff]  ;;  %v5911_v20 = vld [vmem:[%s6425_s22 + $0x130] sm:$0xff] }
 0x2e4   : > { %1324 = vmatprep.mubr.f32.mxu0 %v5906_v19  ;;  %v5909_v19 = vld [vmem:[%s6425_s22 + $0x120] sm:$0xff] }
 0x2e5   : > { %5215 = vmatpush1.bf16.msra.mxu0 %v5214_v11  ;;  %5341 = vmatpush1.bf16.msra.mxu1 %v5214_v11  ;;  %v5912_v11 = vld [vmem:[%s6425_s22 + $0x148] sm:$0xff] }
 0x2e6   : > { %5216 = vmatprep.subr.bf16.mxu0 %v9528_v59  ;;  %5326 = vmatprep.subr.bf16.mxu1 %v9528_v59 }
 0x2e7   : > { %1325 = vmatmul.mubr.f32.gmra.mrb[98].mxu0 %v5907_v10  ;;  %v5217_v10 = vpack.c.bf16 %v2395_v27, %v2394_v36  ;;  %v2397_v36 = vld [vmem:[%s9355_s4 + $0xa8] sm:$0xff] }
 0x2e8   : > { %1330 = vmatprep.mubr.f32.mxu0 %v5908_v14 }
 0x2e9   : > { %5218 = vmatpush1.bf16.msra.mxu0 %v5217_v10  ;;  %5342 = vmatpush1.bf16.msra.mxu1 %v5217_v10 }
 0x2ea   : > { %5219 = vmatprep.subr.bf16.mxu0 %v9528_v59  ;;  %5327 = vmatprep.subr.bf16.mxu1 %v9528_v59 }
 0x2eb   : > { %1331 = vmatmul.mubr.f32.gmra.mrb[100].mxu0 %v5909_v19 }
 0x2ec   : > { %1336 = vmatprep.mubr.f32.mxu0 %v5910_v28 }
 0x2ef   : > { %1337 = vmatmul.mubr.f32.gmra.mrb[102].mxu0 %v5911_v20  ;;  %v2396_v20 = vld [vmem:[%s9355_s4 + $0xa0] sm:$0xff] }
 0x2f0   : > { %1342 = vmatprep.mubr.f32.mxu0 %v5912_v11 }
 0x2f3   : > { %v1802_v14 = vpop.xlane.xlu0 %1801  ;;  %1343 = vmatmul.mubr.f32.gmra.mrb[104].mxu0 %v5913_v4 }
 0x2f4   : > { %v1896_v19 = vsub.f32 %v6746_v39, %v1802_v14  ;;  %v1897_v28 = vsub.f32 %v6748_v50, %v1802_v14  ;;  %v5220_v39 = vpack.c.bf16 %v2397_v36, %v2396_v20  ;;  %v5914_v50 = vld [vmem:[%s6425_s22 + $0x158] sm:$0xff]  ;;  %v5916_v20 = vld [vmem:[%s6425_s22 + $0x168] sm:$0xff]  ;;  %v2398_v36 = vld [vmem:[%s9355_s4 + $0xb0] sm:$0xff] }
 0x2f5   : > { %1348 = vmatprep.mubr.f32.mxu0 %v5914_v50 }
 0x2f6   : > { %v1960_v27 = vmul.f32 1.442695, %v1896_v19  ;;  %v1962_v11 = vmul.f32 1.442695, %v1897_v28  ;;  %5221 = vmatpush1.bf16.msra.mxu0 %v5220_v39  ;;  %5343 = vmatpush1.bf16.msra.mxu1 %v5220_v39  ;;  %v5917_v39 = vld [vmem:[%s6425_s22 + $0x160] sm:$0xff] }
 0x2f7   : > { %v1805_v4 = vpop.xlane.xlu0 %1804  ;;  %1349 = vmatmul.mubr.f32.gmra.mrb[106].mxu0 %v5915_v44  ;;  %5222 = vmatprep.subr.bf16.mxu0 %v9528_v59 }
 0x2f8   : > { %5425 = vpow2.f32 %v1960_v27  ;;  %v1898_v10 = vsub.f32 %v6752_v2, %v1805_v4  ;;  %v1899_v14 = vsub.f32 %v6754_v45, %v1805_v4  ;;  %1354 = vmatprep.mubr.f32.mxu0 %v5916_v20  ;;  %v2399_v2 = vld [vmem:[%s9355_s4 + $0xb8] sm:$0xff]  ;;  %5328 = vmatprep.subr.bf16.mxu1 %v9528_v59 }
 0x2f9   : > { %5427 = vpow2.f32 %v1962_v11  ;;  %v5223_v27 = vpack.c.bf16 %v2399_v2, %v2398_v36  ;;  %v5920_v2 = vld [vmem:[%s6425_s22 + $0x188] sm:$0xff] }
 0x2fa   : > { %v1964_v19 = vmul.f32 1.442695, %v1898_v10  ;;  %v1966_v28 = vmul.f32 1.442695, %v1899_v14  ;;  %v5918_v10 = vld [vmem:[%s6425_s22 + $0x178] sm:$0xff] }
 0x2fb   : > { %v1808_v45 = vpop.xlane.xlu1 %1807  ;;  %1355 = vmatmul.mubr.f32.gmra.mrb[108].mxu0 %v5917_v39  ;;  %5344 = vmatpush1.bf16.msra.mxu1 %v5223_v27 }
 0x2fc   : > { %5429 = vpow2.f32 %v1964_v19  ;;  %v1900_v44 = vsub.f32 %v6758_v46, %v1808_v45  ;;  %v1901_v11 = vsub.f32 %v6760_v12, %v1808_v45  ;;  %5224 = vmatpush1.bf16.msra.mxu0 %v5223_v27  ;;  %1360 = vmatprep.mubr.f32.mxu0 %v5918_v10  ;;  %v5919_v19 = vld [vmem:[%s6425_s22 + $0x170] sm:$0xff]  ;;  %v2400_v45 = vld [vmem:[%s9355_s4 + $0xc0] sm:$0xff]  ;;  %v2403_v10 = vld [vmem:[%s9355_s4 + $0xd8] sm:$0xff] }
 0x2fd   : > { %5431 = vpow2.f32 %v1966_v28  ;;  %5225 = vmatprep.subr.bf16.mxu0 %v9528_v59  ;;  %5329 = vmatprep.subr.bf16.mxu1 %v9528_v59 }
 0x2fe   : > { %v1968_v50 = vmul.f32 1.442695, %v1900_v44  ;;  %v1970_v4 = vmul.f32 1.442695, %v1901_v11 }
 0x2ff   : > { %v1811_v14 = vpop.xlane.xlu1 %1810  ;;  %1361 = vmatmul.mubr.f32.gmra.mrb[110].mxu0 %v5919_v19 }
 0x300   : > { %5433 = vpow2.f32 %v1968_v50  ;;  %v1902_v46 = vsub.f32 %v6764_v13, %v1811_v14  ;;  %v1903_v12 = vsub.f32 %v6766_v17, %v1811_v14  ;;  %1366 = vmatprep.mubr.f32.mxu0 %v5920_v2  ;;  %v2401_v13 = vld [vmem:[%s9355_s4 + $0xc8] sm:$0xff]  ;;  %v5921_v14 = vld [vmem:[%s6425_s22 + $0x180] sm:$0xff] }
 0x301   : > { %5435 = vpow2.f32 %v1970_v4  ;;  %v5226_v44 = vpack.c.bf16 %v2401_v13, %v2400_v45  ;;  %v2402_v4 = vld [vmem:[%s9355_s4 + $0xd0] sm:$0xff] }
 0x302   : > { %v7091_v28 = vpop.eup %5425  ;;  %v1972_v20 = vmul.f32 1.442695, %v1902_v46  ;;  %v1974_v36 = vmul.f32 1.442695, %v1903_v12  ;;  %v5229_v2 = vpack.c.bf16 %v2403_v10, %v2402_v4 }
 0x303   : > { %v7100_v27 = vpop.eup %5427  ;;  %v1814_v17 = vpop.xlane.xlu0 %1813  ;;  %1367 = vmatmul.mubr.f32.gmra.mrb[112].mxu0 %v5921_v14  ;;  %5345 = vmatpush1.bf16.msra.mxu1 %v5226_v44 }
 0x304   : > { %5437 = vpow2.f32 %v1972_v20  ;;  %v1904_v11 = vsub.f32 %v6770_v18, %v1814_v17  ;;  %v1905_v39 = vsub.f32 %v6772_v23, %v1814_v17  ;;  %v2088_v50 = vadd.f32 %v7100_v27, %v7091_v28  ;;  %5227 = vmatpush1.bf16.msra.mxu0 %v5226_v44  ;;  %v5922_v20 = vld [vmem:[%s6425_s22 + $0x198] sm:$0xff]  ;;  %5330 = vmatprep.subr.bf16.mxu1 %v9528_v59  ;;  %v5923_v17 = vld [vmem:[%s6425_s22 + $0x190] sm:$0xff] }
 0x305   : > { %5439 = vpow2.f32 %v1974_v36  ;;  %1372 = vmatprep.mubr.f32.mxu0 %v5922_v20  ;;  %5228 = vmatprep.subr.bf16.mxu0 %v9528_v59 }
 0x306   : > { %v7113_v46 = vpop.eup %5429  ;;  %v1976_v18 = vmul.f32 1.442695, %v1904_v11  ;;  %v1978_v23 = vmul.f32 1.442695, %v1905_v39  ;;  %2089 = vadd.xlane.f32.xlu1 %v2088_v50  ;;  %v5924_v50 = vld [vmem:[%s6425_s22 + $0x1a8] sm:$0xff] }
 0x307   : > { %v7115_v12 = vpop.eup %5431  ;;  %v1817_v19 = vpop.xlane.xlu1 %1816  ;;  %1373 = vmatmul.mubr.f32.gmra.mrb[114].mxu0 %v5923_v17  ;;  %5346 = vmatpush1.bf16.msra.mxu1 %v5229_v2  ;;  %v5927_v17 = vld [vmem:[%s6425_s22 + $0x1b0] sm:$0xff] }
 0x308   : > { %5441 = vpow2.f32 %v1976_v18  ;;  %v1906_v36 = vsub.f32 %v6776_v29, %v1817_v19  ;;  %v1907_v45 = vsub.f32 %v6778_v30, %v1817_v19  ;;  %v2091_v13 = vadd.f32 %v7115_v12, %v7113_v46  ;;  %1378 = vmatprep.mubr.f32.mxu0 %v5924_v50  ;;  %5230 = vmatpush1.bf16.msra.mxu0 %v5229_v2  ;;  %v5925_v18 = vld [vmem:[%s6425_s22 + $0x1a0] sm:$0xff]  ;;  %v5926_v2 = vld [vmem:[%s6425_s22 + $0x1b8] sm:$0xff] }
 0x309   : > { %5443 = vpow2.f32 %v1978_v23  ;;  %5331 = vmatprep.subr.bf16.mxu1 %v9528_v59  ;;  %5231 = vmatprep.subr.bf16.mxu0 %v9528_v59 }
 0x30a   : > { %v7125_v44 = vpop.eup %5433  ;;  %v1980_v11 = vmul.f32 1.442695, %v1906_v36  ;;  %v1982_v39 = vmul.f32 1.442695, %v1907_v45  ;;  %2092 = vadd.xlane.f32.xlu1 %v2091_v13 }
 0x30b   : > { %v7128_v29 = vpop.eup %5435  ;;  %v1820_v30 = vpop.xlane.xlu0 %1819  ;;  %1379 = vmatmul.mubr.f32.gmra.mrb[116].mxu0 %v5925_v18  ;;  %v5929_v18 = vld [vmem:[%s6425_s22 + $0x1c0] sm:$0xff] }
 0x30c   : > { %5445 = vpow2.f32 %v1980_v11  ;;  %v1908_v4 = vsub.f32 %v6782_v53, %v1820_v30  ;;  %v1909_v10 = vsub.f32 %v6784_v56, %v1820_v30  ;;  %v2094_v14 = vadd.f32 %v7128_v29, %v7125_v44  ;;  %1384 = vmatprep.mubr.f32.mxu0 %v5926_v2  ;;  %v5928_v30 = vld [vmem:[%s6425_s22 + $0x1c8] sm:$0xff] }
 0x30d   : > { %5447 = vpow2.f32 %v1982_v39 }
 0x30e   : > { %v7137_v23 = vpop.eup %5437  ;;  %v1984_v19 = vmul.f32 1.442695, %v1908_v4  ;;  %v1986_v20 = vmul.f32 1.442695, %v1909_v10  ;;  %2095 = vadd.xlane.f32.xlu1 %v2094_v14 }
 0x30f   : > { %v7140_v53 = vpop.eup %5439  ;;  %v1823_v56 = vpop.xlane.xlu1 %1822  ;;  %1385 = vmatmul.mubr.f32.gmra.mrb[118].mxu0 %v5927_v17  ;;  %v5931_v17 = vld [vmem:[%s6425_s22 + $0x1d0] sm:$0xff] }
 0x310   : > { %5449 = vpow2.f32 %v1984_v19  ;;  %v1910_v36 = vsub.f32 %v6788_v63, %v1823_v56  ;;  %v1911_v45 = vsub.f32 %v6790_v0, %v1823_v56  ;;  %v2097_v13 = vadd.f32 %v7140_v53, %v7137_v23  ;;  %1390 = vmatprep.mubr.f32.mxu0 %v5928_v30  ;;  %v5930_v56 = vld [vmem:[%s6425_s22 + $0x1d8] sm:$0xff] }
 0x311   : > { %5451 = vpow2.f32 %v1986_v20 }
 0x312   : > { %v7147_v11 = vpop.eup %5441  ;;  %v1988_v39 = vmul.f32 1.442695, %v1910_v36  ;;  %v1990_v50 = vmul.f32 1.442695, %v1911_v45  ;;  %2098 = vadd.xlane.f32.xlu1 %v2097_v13 }
 0x313   : > { %v7150_v4 = vpop.eup %5443  ;;  %v1826_v63 = vpop.xlane.xlu0 %1825  ;;  %1391 = vmatmul.mubr.f32.gmra.mrb[120].mxu0 %v5929_v18  ;;  %v2404_v18 = vld [vmem:[%s9355_s4 + $0xe0] sm:$0xff] }
 0x314   : > { %5453 = vpow2.f32 %v1988_v39  ;;  %v1912_v0 = vsub.f32 %v6794_v49, %v1826_v63  ;;  %v1913_v10 = vsub.f32 %v6796_v40, %v1826_v63  ;;  %v2100_v14 = vadd.f32 %v7150_v4, %v7147_v11  ;;  %1396 = vmatprep.mubr.f32.mxu0 %v5930_v56  ;;  %v5932_v63 = vld [vmem:[%s6425_s22 + $0x1e8] sm:$0xff]  ;;  %v5933_v56 = vld [vmem:[%s6425_s22 + $0x1e0] sm:$0xff] }
 0x315   : > { %5455 = vpow2.f32 %v1990_v50 }
 0x316   : > { %v7157_v19 = vpop.eup %5445  ;;  %v1992_v20 = vmul.f32 1.442695, %v1912_v0  ;;  %v1994_v2 = vmul.f32 1.442695, %v1913_v10  ;;  %2101 = vadd.xlane.f32.xlu1 %v2100_v14 }
 0x317   : > { %v7160_v36 = vpop.eup %5447  ;;  %v1829_v49 = vpop.xlane.xlu1 %1828  ;;  %1397 = vmatmul.mubr.f32.gmra.mrb[122].mxu0 %v5931_v17 }
 0x318   : > { %5457 = vpow2.f32 %v1992_v20  ;;  %v1914_v40 = vsub.f32 %v6800_v54, %v1829_v49  ;;  %v1915_v45 = vsub.f32 %v6802_v55, %v1829_v49  ;;  %v2103_v13 = vadd.f32 %v7160_v36, %v7157_v19  ;;  %1402 = vmatprep.mubr.f32.mxu0 %v5932_v63  ;;  %v2405_v20 = vld [vmem:[%s9355_s4 + $0xe8] sm:$0xff]  ;;  %v2406_v63 = vld [vmem:[%s9355_s4 + $0xf0] sm:$0xff] }
 0x319   : > { %5459 = vpow2.f32 %v1994_v2  ;;  %v5232_v2 = vpack.c.bf16 %v2405_v20, %v2404_v18 }
 0x31a   : > { %v7167_v39 = vpop.eup %5449  ;;  %v1996_v50 = vmul.f32 1.442695, %v1914_v40  ;;  %v1998_v30 = vmul.f32 1.442695, %v1915_v45  ;;  %2104 = vadd.xlane.f32.xlu1 %v2103_v13 }
 0x31b   : > { %v7170_v0 = vpop.eup %5451  ;;  %v1832_v54 = vpop.xlane.xlu0 %1831  ;;  %1403 = vmatmul.mubr.f32.gmra.mrb[124].mxu0 %v5933_v56  ;;  %5347 = vmatpush1.bf16.msra.mxu1 %v5232_v2 }
 0x31c   : > { %5461 = vpow2.f32 %v1996_v50  ;;  %v1916_v55 = vsub.f32 %v6806_v9, %v1832_v54  ;;  %v1917_v10 = vsub.f32 %v6808_v32, %v1832_v54  ;;  %v2106_v14 = vadd.f32 %v7170_v0, %v7167_v39  ;;  %v5934_v32 = vld [vmem:[%s6425_s22 + $0x1f8] sm:$0xff]  ;;  %5233 = vmatpush1.bf16.msra.mxu0 %v5232_v2  ;;  %5332 = vmatprep.subr.bf16.mxu1 %v9528_v59 }
 0x31d   : > { %5463 = vpow2.f32 %v1998_v30  ;;  %1408 = vmatprep.mubr.f32.mxu0 %v5934_v32  ;;  %5234 = vmatprep.subr.bf16.mxu0 %v9528_v59  ;;  %v2407_v54 = vld [vmem:[%s9355_s4 + $0xf8] sm:$0xff] }
 0x31e   : > { %v7183_v49 = vpop.eup %5453  ;;  %v2000_v9 = vmul.f32 1.442695, %v1916_v55  ;;  %v2002_v40 = vmul.f32 1.442695, %v1917_v10  ;;  %2107 = vadd.xlane.f32.xlu1 %v2106_v14  ;;  %v5235_v55 = vpack.c.bf16 %v2407_v54, %v2406_v63 }
 0x31f   : > { %v7186_v45 = vpop.eup %5455  ;;  %v1835_v13 = vpop.xlane.xlu1 %1834 }
 0x320   : > { %5465 = vpow2.f32 %v2000_v9  ;;  %v1918_v17 = vsub.f32 %v6812_v42, %v1835_v13  ;;  %v1919_v50 = vsub.f32 %v6814_v33, %v1835_v13  ;;  %v2109_v30 = vadd.f32 %v7186_v45, %v7183_v49  ;;  %v5935_v42 = vld [vmem:[%s6425_s22 + $0x1f0] sm:$0xff]  ;;  %5236 = vmatpush1.bf16.msra.mxu0 %v5235_v55  ;;  %5348 = vmatpush1.bf16.msra.mxu1 %v5235_v55 }
 0x321   : > { %5467 = vpow2.f32 %v2002_v40  ;;  %1409 = vmatmul.mubr.f32.gmra.mrb[126].mxu0 %v5935_v42  ;;  %5254 = vmatprep.subr.bf16.mxu0 %v6440_v3 }
 0x322   : > { %v7201_v33 = vpop.eup %5457  ;;  %v2004_v10 = vmul.f32 1.442695, %v1918_v17  ;;  %v2006_v14 = vmul.f32 1.442695, %v1919_v50  ;;  %2110 = vadd.xlane.f32.xlu1 %v2109_v30 }
 0x323   : > { %v7203_v18 = vpop.eup %5459  ;;  %v1838_v20 = vpop.xlane.xlu0 %1837 }
 0x324   : > { %5469 = vpow2.f32 %v2004_v10  ;;  %v1920_v2 = vsub.f32 %v6818_v1, %v1838_v20  ;;  %v1921_v56 = vsub.f32 %v6820_v21, %v1838_v20  ;;  %v2112_v59 = vadd.f32 %v7203_v18, %v7201_v33 }
 0x325   : > { %5471 = vpow2.f32 %v2006_v14 }
 0x326   : > { %v7210_v9 = vpop.eup %5461  ;;  %v2008_v40 = vmul.f32 1.442695, %v1920_v2  ;;  %v2010_v32 = vmul.f32 1.442695, %v1921_v56  ;;  %2113 = vadd.xlane.f32.xlu1 %v2112_v59 }
 0x327   : > { %v7212_v13 = vpop.eup %5463  ;;  %v1841_v17 = vpop.xlane.xlu1 %1840 }
 0x328   : > { %5473 = vpow2.f32 %v2008_v40  ;;  %v1922_v50 = vsub.f32 %v6824_v41, %v1841_v17  ;;  %v1923_v1 = vsub.f32 %v6826_v7, %v1841_v17  ;;  %v2115_v21 = vadd.f32 %v7212_v13, %v7210_v9 }
 0x329   : > { %5475 = vpow2.f32 %v2010_v32 }
 0x32a   : > { %v7218_v30 = vpop.eup %5465  ;;  %v2012_v3 = vmul.f32 1.442695, %v1922_v50  ;;  %v2014_v63 = vmul.f32 1.442695, %v1923_v1  ;;  %2116 = vadd.xlane.f32.xlu1 %v2115_v21 }
 0x32b   : > { %v7220_v54 = vpop.eup %5467  ;;  %v1844_v55 = vpop.xlane.xlu0 %1843 }
 0x32c   : > { %5477 = vpow2.f32 %v2012_v3  ;;  %v1924_v42 = vsub.f32 %v6830_v31, %v1844_v55  ;;  %v1925_v10 = vsub.f32 %v6832_v57, %v1844_v55  ;;  %v2118_v7 = vadd.f32 %v7220_v54, %v7218_v30 }
 0x32d   : > { %5479 = vpow2.f32 %v2014_v63 }
 0x32e   : > { %v7226_v41 = vpop.eup %5469  ;;  %v2016_v14 = vmul.f32 1.442695, %v1924_v42  ;;  %v2018_v20 = vmul.f32 1.442695, %v1925_v10  ;;  %2119 = vadd.xlane.f32.xlu0 %v2118_v7 }
 0x32f   : > { %v7228_v2 = vpop.eup %5471  ;;  %v1847_v56 = vpop.xlane.xlu1 %1846 }
 0x330   : > { %5481 = vpow2.f32 %v2016_v14  ;;  %v1926_v59 = vsub.f32 %v6836_v24, %v1847_v56  ;;  %v1927_v40 = vsub.f32 %v6838_v38, %v1847_v56  ;;  %v2121_v57 = vadd.f32 %v7228_v2, %v7226_v41 }
 0x331   : > { %5483 = vpow2.f32 %v2018_v20 }
 0x332   : > { %v7234_v31 = vpop.eup %5473  ;;  %v2020_v32 = vmul.f32 1.442695, %v1926_v59  ;;  %v2022_v17 = vmul.f32 1.442695, %v1927_v40  ;;  %2122 = vadd.xlane.f32.xlu1 %v2121_v57 }
 0x333   : > { %v7236_v50 = vpop.eup %5475  ;;  %v1850_v1 = vpop.xlane.xlu0 %1849 }
 0x334   : > { %5485 = vpow2.f32 %v2020_v32  ;;  %v1928_v21 = vsub.f32 %v6842_v62, %v1850_v1  ;;  %v1929_v3 = vsub.f32 %v6844_v8, %v1850_v1  ;;  %v2124_v38 = vadd.f32 %v7236_v50, %v7234_v31 }
 0x335   : > { %5487 = vpow2.f32 %v2022_v17 }
 0x336   : > { %v7242_v24 = vpop.eup %5477  ;;  %v2024_v63 = vmul.f32 1.442695, %v1928_v21  ;;  %v2026_v55 = vmul.f32 1.442695, %v1929_v3  ;;  %2125 = vadd.xlane.f32.xlu0 %v2124_v38 }
 0x337   : > { %v7244_v42 = vpop.eup %5479  ;;  %v1853_v10 = vpop.xlane.xlu1 %1852 }
 0x338   : > { %5489 = vpow2.f32 %v2024_v63  ;;  %v1930_v7 = vsub.f32 %v6849_v47, %v1853_v10  ;;  %v1931_v14 = vsub.f32 %v6852_v58, %v1853_v10  ;;  %v2127_v62 = vadd.f32 %v7244_v42, %v7242_v24 }
 0x339   : > { %5491 = vpow2.f32 %v2026_v55 }
 0x33a   : > { %v7250_v8 = vpop.eup %5481  ;;  %v2028_v20 = vmul.f32 1.442695, %v1930_v7  ;;  %v2030_v56 = vmul.f32 1.442695, %v1931_v14  ;;  %2128 = vadd.xlane.f32.xlu1 %v2127_v62 }
 0x33b   : > { %v7252_v59 = vpop.eup %5483  ;;  %v1856_v40 = vpop.xlane.xlu0 %1855 }
 0x33c   : > { %5493 = vpow2.f32 %v2028_v20  ;;  %v1932_v57 = vsub.f32 %v6863_v34, %v1856_v40  ;;  %v1933_v32 = vsub.f32 %v6866_v26, %v1856_v40  ;;  %v2130_v47 = vadd.f32 %v7252_v59, %v7250_v8 }
 0x33d   : > { %5495 = vpow2.f32 %v2030_v56 }
 0x33e   : > { %v7258_v58 = vpop.eup %5485  ;;  %v2032_v17 = vmul.f32 1.442695, %v1932_v57  ;;  %v2034_v1 = vmul.f32 1.442695, %v1933_v32  ;;  %2131 = vadd.xlane.f32.xlu0 %v2130_v47 }
 0x33f   : > { %v7260_v21 = vpop.eup %5487  ;;  %v1859_v3 = vpop.xlane.xlu1 %1858 }
 0x340   : > { %5497 = vpow2.f32 %v2032_v17  ;;  %v1934_v38 = vsub.f32 %v6874_v22, %v1859_v3  ;;  %v1935_v63 = vsub.f32 %v6877_v37, %v1859_v3  ;;  %v2133_v26 = vadd.f32 %v7260_v21, %v7258_v58 }
 0x341   : > { %5499 = vpow2.f32 %v2034_v1 }
 0x342   : > { %v7266_v34 = vpop.eup %5489  ;;  %v2036_v55 = vmul.f32 1.442695, %v1934_v38  ;;  %v2038_v10 = vmul.f32 1.442695, %v1935_v63  ;;  %2134 = vadd.xlane.f32.xlu1 %v2133_v26 }
 0x343   : > { %v7268_v7 = vpop.eup %5491  ;;  %v1862_v14 = vpop.xlane.xlu0 %1861 }
 0x344   : > { %5501 = vpow2.f32 %v2036_v55  ;;  %v1936_v62 = vsub.f32 %v6889_v6, %v1862_v14  ;;  %v1937_v20 = vsub.f32 %v6892_v16, %v1862_v14  ;;  %v2136_v22 = vadd.f32 %v7268_v7, %v7266_v34 }
 0x345   : > { %5503 = vpow2.f32 %v2038_v10 }
 0x346   : > { %v7274_v37 = vpop.eup %5493  ;;  %v2040_v56 = vmul.f32 1.442695, %v1936_v62  ;;  %v2042_v40 = vmul.f32 1.442695, %v1937_v20  ;;  %2137 = vadd.xlane.f32.xlu0 %v2136_v22 }
 0x347   : > { %v7276_v57 = vpop.eup %5495  ;;  %v1865_v32 = vpop.xlane.xlu1 %1864 }
 0x348   : > { %5505 = vpow2.f32 %v2040_v56  ;;  %v1938_v47 = vsub.f32 %v6898_v25, %v1865_v32  ;;  %v1939_v17 = vsub.f32 %v6901_v48, %v1865_v32  ;;  %v2139_v16 = vadd.f32 %v7276_v57, %v7274_v37 }
 0x349   : > { %5507 = vpow2.f32 %v2042_v40 }
 0x34a   : > { %v7282_v6 = vpop.eup %5497  ;;  %v2044_v1 = vmul.f32 1.442695, %v1938_v47  ;;  %v2046_v3 = vmul.f32 1.442695, %v1939_v17  ;;  %2140 = vadd.xlane.f32.xlu1 %v2139_v16 }
 0x34b   : > { %v7284_v38 = vpop.eup %5499  ;;  %v1868_v63 = vpop.xlane.xlu0 %1867 }
 0x34c   : > { %5509 = vpow2.f32 %v2044_v1  ;;  %v1940_v26 = vsub.f32 %v6913_v15, %v1868_v63  ;;  %v1941_v55 = vsub.f32 %v6916_v51, %v1868_v63  ;;  %v2142_v25 = vadd.f32 %v7284_v38, %v7282_v6 }
 0x34d   : > { %5511 = vpow2.f32 %v2046_v3 }
 0x34e   : > { %v7290_v48 = vpop.eup %5501  ;;  %v2048_v10 = vmul.f32 1.442695, %v1940_v26  ;;  %v2050_v14 = vmul.f32 1.442695, %v1941_v55  ;;  %2143 = vadd.xlane.f32.xlu0 %v2142_v25 }
 0x34f   : > { %v7292_v62 = vpop.eup %5503  ;;  %v1871_v20 = vpop.xlane.xlu0 %1870 }
 0x350   : > { %5513 = vpow2.f32 %v2048_v10  ;;  %v1942_v22 = vsub.f32 %v6922_v5, %v1871_v20  ;;  %v1943_v56 = vsub.f32 %v6925_v60, %v1871_v20  ;;  %v2145_v51 = vadd.f32 %v7292_v62, %v7290_v48 }
 0x351   : > { %5515 = vpow2.f32 %v2050_v14 }
 0x352   : > { %v7298_v15 = vpop.eup %5505  ;;  %v2052_v40 = vmul.f32 1.442695, %v1942_v22  ;;  %v2054_v32 = vmul.f32 1.442695, %v1943_v56  ;;  %2146 = vadd.xlane.f32.xlu1 %v2145_v51  ;;  %v9541_v51 = vld [vmem:[#allocation44_spill] sm:$0xff] }
 0x353   : > { %v7300_v47 = vpop.eup %5507  ;;  %v1874_v17 = vpop.xlane.xlu0 %1873 }
 0x354   : > { %5517 = vpow2.f32 %v2052_v40  ;;  %v1944_v16 = vsub.f32 %v6937_v61, %v1874_v17  ;;  %v1945_v1 = vsub.f32 %v6940_v35, %v1874_v17  ;;  %v2148_v5 = vadd.f32 %v7300_v47, %v7298_v15 }
 0x355   : > { %5519 = vpow2.f32 %v2054_v32  ;;  %v9542_v32 = vld [vmem:[#allocation45_spill] sm:$0xff] }
 0x356   : > { %v7306_v60 = vpop.eup %5509  ;;  %v2056_v3 = vmul.f32 1.442695, %v1944_v16  ;;  %v2058_v63 = vmul.f32 1.442695, %v1945_v1  ;;  %2149 = vadd.xlane.f32.xlu0 %v2148_v5 }
 0x357   : > { %v7308_v26 = vpop.eup %5511  ;;  %v1877_v55 = vpop.xlane.xlu0 %1876 }
 0x358   : > { %5521 = vpow2.f32 %v2056_v3  ;;  %v1946_v25 = vsub.f32 %v6946_v52, %v1877_v55  ;;  %v1947_v10 = vsub.f32 %v6949_v43, %v1877_v55  ;;  %v2151_v35 = vadd.f32 %v7308_v26, %v7306_v60 }
 0x359   : > { %5523 = vpow2.f32 %v2058_v63  ;;  %v9545_v63 = vld [vmem:[#allocation46_spill] sm:$0xff] }
 0x35a   : > { %v7314_v61 = vpop.eup %5513  ;;  %v2060_v14 = vmul.f32 1.442695, %v1946_v25  ;;  %v2062_v20 = vmul.f32 1.442695, %v1947_v10  ;;  %2152 = vadd.xlane.f32.xlu1 %v2151_v35  ;;  %v9546_v25 = vld [vmem:[#allocation47_spill] sm:$0xff] }
 0x35b   : > { %v7316_v22 = vpop.eup %5515  ;;  %v1880_v56 = vpop.xlane.xlu0 %1879 }
 0x35c   : > { %5525 = vpow2.f32 %v2060_v14  ;;  %v1948_v40 = vsub.f32 %v9541_v51, %v1880_v56  ;;  %v1949_v17 = vsub.f32 %v9542_v32, %v1880_v56  ;;  %v2154_v52 = vadd.f32 %v7316_v22, %v7314_v61  ;;  %v9549_v32 = vld [vmem:[#allocation48_spill] sm:$0xff] }
 0x35d   : > { %5527 = vpow2.f32 %v2062_v20 }
 0x35e   : > { %v7322_v43 = vpop.eup %5517  ;;  %v2064_v16 = vmul.f32 1.442695, %v1948_v40  ;;  %v2066_v1 = vmul.f32 1.442695, %v1949_v17  ;;  %2155 = vadd.xlane.f32.xlu0 %v2154_v52  ;;  %v9550_v52 = vld [vmem:[#allocation49_spill] sm:$0xff] }
 0x35f   : > { %9543 = vst [vmem:[#allocation44_spill] sm:$0xff] %v7322_v43  ;;  %v7324_v5 = vpop.eup %5519  ;;  %v1883_v3 = vpop.xlane.xlu0 %1882 }
 0x360   : > { %9544 = vst [vmem:[#allocation45_spill] sm:$0xff] %v7324_v5  ;;  %5529 = vpow2.f32 %v2064_v16  ;;  %v1950_v55 = vsub.f32 %v9545_v63, %v1883_v3  ;;  %v1951_v10 = vsub.f32 %v9546_v25, %v1883_v3  ;;  %v2157_v35 = vadd.f32 %v7324_v5, %v7322_v43 }
 0x361   : > { %5531 = vpow2.f32 %v2066_v1 }
 0x362   : > { %v7330_v14 = vpop.eup %5521  ;;  %v2068_v20 = vmul.f32 1.442695, %v1950_v55  ;;  %v2070_v56 = vmul.f32 1.442695, %v1951_v10  ;;  %2158 = vadd.xlane.f32.xlu1 %v2157_v35  ;;  %v9553_v35 = vld [vmem:[#allocation50_spill] sm:$0xff] }
 0x363   : > { %9547 = vst [vmem:[#allocation46_spill] sm:$0xff] %v7330_v14  ;;  %v7332_v51 = vpop.eup %5523  ;;  %v1886_v40 = vpop.xlane.xlu0 %1885 }
 0x364   : > { %9548 = vst [vmem:[#allocation47_spill] sm:$0xff] %v7332_v51  ;;  %5533 = vpow2.f32 %v2068_v20  ;;  %v1952_v17 = vsub.f32 %v9549_v32, %v1886_v40  ;;  %v1953_v16 = vsub.f32 %v9550_v52, %v1886_v40  ;;  %v2160_v3 = vadd.f32 %v7332_v51, %v7330_v14  ;;  %v9554_v20 = vld [vmem:[#allocation51_spill] sm:$0xff] }
 0x365   : > { %5535 = vpow2.f32 %v2070_v56 }
 0x366   : > { %v7338_v63 = vpop.eup %5525  ;;  %v2072_v1 = vmul.f32 1.442695, %v1952_v17  ;;  %v2074_v25 = vmul.f32 1.442695, %v1953_v16  ;;  %2161 = vadd.xlane.f32.xlu0 %v2160_v3  ;;  %v9557_v3 = vld [vmem:[#allocation52_spill] sm:$0xff] }
 0x367   : > { %9551 = vst [vmem:[#allocation48_spill] sm:$0xff] %v7338_v63  ;;  %v7340_v55 = vpop.eup %5527  ;;  %v1889_v10 = vpop.xlane.xlu0 %1888 }
 0x368   : > { %9552 = vst [vmem:[#allocation49_spill] sm:$0xff] %v7340_v55  ;;  %5537 = vpow2.f32 %v2072_v1  ;;  %v1954_v43 = vsub.f32 %v9553_v35, %v1889_v10  ;;  %v1955_v5 = vsub.f32 %v9554_v20, %v1889_v10  ;;  %v2163_v40 = vadd.f32 %v7340_v55, %v7338_v63  ;;  %v9558_v1 = vld [vmem:[#allocation53_spill] sm:$0xff] }
 0x369   : > { %5539 = vpow2.f32 %v2074_v25 }
 0x36a   : > { %v7346_v32 = vpop.eup %5529  ;;  %v2076_v56 = vmul.f32 1.442695, %v1954_v43  ;;  %v2078_v52 = vmul.f32 1.442695, %v1955_v5  ;;  %2164 = vadd.xlane.f32.xlu1 %v2163_v40  ;;  %v9561_v40 = vld [vmem:[#allocation54_spill] sm:$0xff] }
 0x36b   : > { %9555 = vst [vmem:[#allocation50_spill] sm:$0xff] %v7346_v32  ;;  %v7348_v17 = vpop.eup %5531  ;;  %v1892_v16 = vpop.xlane.xlu0 %1891 }
 0x36c   : > { %9556 = vst [vmem:[#allocation51_spill] sm:$0xff] %v7348_v17  ;;  %5541 = vpow2.f32 %v2076_v56  ;;  %v1956_v51 = vsub.f32 %v9557_v3, %v1892_v16  ;;  %v1957_v14 = vsub.f32 %v9558_v1, %v1892_v16  ;;  %v2166_v10 = vadd.f32 %v7348_v17, %v7346_v32  ;;  %v9562_v56 = vld [vmem:[#allocation55_spill] sm:$0xff] }
 0x36d   : > { %5543 = vpow2.f32 %v2078_v52 }
 0x36e   : > { %v7354_v35 = vpop.eup %5533  ;;  %v2080_v25 = vmul.f32 1.442695, %v1956_v51  ;;  %v2082_v20 = vmul.f32 1.442695, %v1957_v14  ;;  %2167 = vadd.xlane.f32.xlu0 %v2166_v10 }
 0x36f   : > { %9559 = vst [vmem:[#allocation52_spill] sm:$0xff] %v7354_v35  ;;  %v7356_v43 = vpop.eup %5535  ;;  %v1895_v5 = vpop.xlane.xlu0 %1894 }
 0x370   : > { %9560 = vst [vmem:[#allocation53_spill] sm:$0xff] %v7356_v43  ;;  %5545 = vpow2.f32 %v2080_v25  ;;  %v1958_v63 = vsub.f32 %v9561_v40, %v1895_v5  ;;  %v1959_v55 = vsub.f32 %v9562_v56, %v1895_v5  ;;  %v2169_v16 = vadd.f32 %v7356_v43, %v7354_v35 }
 0x371   : > { %5547 = vpow2.f32 %v2082_v20 }
 0x372   : > { %v7362_v3 = vpop.eup %5537  ;;  %v2084_v52 = vmul.f32 1.442695, %v1958_v63  ;;  %v2086_v1 = vmul.f32 1.442695, %v1959_v55  ;;  %2170 = vadd.xlane.f32.xlu1 %v2169_v16 }
 0x373   : > { %9563 = vst [vmem:[#allocation54_spill] sm:$0xff] %v7362_v3  ;;  %v7364_v51 = vpop.eup %5539  ;;  %v7374_v5 = vpop.f32.mrb[64].mxu0 }
 0x374   : > { %9564 = vst [vmem:[#allocation55_spill] sm:$0xff] %v7364_v51  ;;  %5549 = vpow2.f32 %v2084_v52  ;;  %v2172_v14 = vadd.f32 %v7364_v51, %v7362_v3  ;;  %v7376_v63 = vpop.f32.mrb[65].mxu0 }
 0x375   : > { %5551 = vpow2.f32 %v2086_v1 }
 0x376   : > { %v7368_v10 = vpop.eup %5541  ;;  %2173 = vadd.xlane.f32.xlu0 %v2172_v14 }
 0x377   : > { %9565 = vst [vmem:[#allocation56_spill] sm:$0xff] %v7368_v10  ;;  %v7370_v25 = vpop.eup %5543  ;;  %v7384_v16 = vpop.f32.mrb[66].mxu0 }
 0x378   : > { %9566 = vst [vmem:[#allocation57_spill] sm:$0xff] %v7370_v25  ;;  %v2175_v20 = vadd.f32 %v7370_v25, %v7368_v10  ;;  %v7386_v52 = vpop.f32.mrb[67].mxu0 }
 0x37a   : > { %v7378_v55 = vpop.eup %5545  ;;  %2176 = vadd.xlane.f32.xlu1 %v2175_v20 }
 0x37b   : > { %9567 = vst [vmem:[#allocation58_spill] sm:$0xff] %v7378_v55  ;;  %v7380_v40 = vpop.eup %5547 }
 0x37c   : > { %9568 = vst [vmem:[#allocation59_spill] sm:$0xff] %v7380_v40  ;;  %v2178_v56 = vadd.f32 %v7380_v40, %v7378_v55 }
 0x37e   : > { %v7388_v1 = vpop.eup %5549  ;;  %2179 = vadd.xlane.f32.xlu0 %v2178_v56  ;;  %v7394_v25 = vpop.f32.mrb[68].mxu0 }
 0x37f   : > { %9569 = vst [vmem:[#allocation60_spill] sm:$0xff] %v7388_v1  ;;  %v7390_v14 = vpop.eup %5551  ;;  %9571 = vst [vmem:[#allocation62_spill] sm:$0xff] %v7394_v25  ;;  %v7396_v20 = vpop.f32.mrb[69].mxu0 }
 0x380   : > { %9570 = vst [vmem:[#allocation61_spill] sm:$0xff] %v7390_v14  ;;  %v2181_v10 = vadd.f32 %v7390_v14, %v7388_v1  ;;  %9572 = vst [vmem:[#allocation63_spill] sm:$0xff] %v7396_v20  ;;  %v7463_v20 = vld [vmem:[%s6425_s22 + $0x28] sm:$0xff] }
 0x382   : > { %2182 = vadd.xlane.f32.xlu1 %v2181_v10  ;;  %v7398_v3 = vpop.f32.mrb[70].mxu0 }
 0x383   : > { %9573 = vst [vmem:[#allocation64_spill] sm:$0xff] %v7398_v3  ;;  %v7400_v55 = vpop.f32.mrb[71].mxu0 }
 0x384   : > { %9574 = vst [vmem:[#allocation65_spill] sm:$0xff] %v7400_v55 }
 0x386   : > { %v7402_v40 = vpop.f32.mrb[72].mxu0 }
 0x387   : > { %9575 = vst [vmem:[#allocation66_spill] sm:$0xff] %v7402_v40  ;;  %v7404_v51 = vpop.f32.mrb[73].mxu0 }
 0x388   : > { %9576 = vst [vmem:[#allocation67_spill] sm:$0xff] %v7404_v51 }
 0x38a   : > { %v7406_v35 = vpop.f32.mrb[74].mxu0 }
 0x38b   : > { %9577 = vst [vmem:[#allocation68_spill] sm:$0xff] %v7406_v35  ;;  %v7408_v56 = vpop.f32.mrb[75].mxu0 }
 0x38c   : > { %9578 = vst [vmem:[#allocation69_spill] sm:$0xff] %v7408_v56 }
 0x38e   : > { %v7410_v43 = vpop.f32.mrb[76].mxu0 }
 0x38f   : > { %9579 = vst [vmem:[#allocation70_spill] sm:$0xff] %v7410_v43  ;;  %v7412_v1 = vpop.f32.mrb[77].mxu0 }
 0x390   : > { %9580 = vst [vmem:[#allocation71_spill] sm:$0xff] %v7412_v1 }
 0x392   : > { %v7414_v17 = vpop.f32.mrb[78].mxu0 }
 0x393   : > { %v2090_v14 = vpop.xlane.xlu1 %2089  ;;  %9581 = vst [vmem:[#allocation72_spill] sm:$0xff] %v7414_v17  ;;  %v7416_v10 = vpop.f32.mrb[79].mxu0 }
 0x394   : > { %v2184_v32 = vmul.f32 0.03125, %v2090_v14  ;;  %9582 = vst [vmem:[#allocation73_spill] sm:$0xff] %v7416_v10 }
 0x396   : > { %5553 = vrcp.f32 %v2184_v32  ;;  %v7418_v40 = vpop.f32.mrb[80].mxu0 }
 0x397   : > { %v2093_v3 = vpop.xlane.xlu1 %2092  ;;  %9583 = vst [vmem:[#allocation74_spill] sm:$0xff] %v7418_v40  ;;  %v7420_v51 = vpop.f32.mrb[81].mxu0 }
 0x398   : > { %v2185_v55 = vmul.f32 0.03125, %v2093_v3  ;;  %9584 = vst [vmem:[#allocation75_spill] sm:$0xff] %v7420_v51 }
 0x39a   : > { %5555 = vrcp.f32 %v2185_v55  ;;  %v7422_v56 = vpop.f32.mrb[82].mxu0 }
 0x39b   : > { %v2096_v35 = vpop.xlane.xlu1 %2095  ;;  %9585 = vst [vmem:[#allocation76_spill] sm:$0xff] %v7422_v56  ;;  %v7424_v1 = vpop.f32.mrb[83].mxu0 }
 0x39c   : > { %v2186_v43 = vmul.f32 0.03125, %v2096_v35  ;;  %9586 = vst [vmem:[#allocation77_spill] sm:$0xff] %v7424_v1  ;;  %v7433_v35 = vld [vmem:[%s6425_s22 + $0x8] sm:$0xff] }
 0x39e   : > { %5557 = vrcp.f32 %v2186_v43  ;;  %v7426_v32 = vpop.f32.mrb[84].mxu0  ;;  %v7437_v43 = vld [vmem:[%s6425_s22] sm:$0xff] }
 0x39f   : > { %v2099_v14 = vpop.xlane.xlu1 %2098  ;;  %9587 = vst [vmem:[#allocation78_spill] sm:$0xff] %v7426_v32  ;;  %v7430_v51 = vpop.f32.mrb[85].mxu0 }
 0x3a0   : > { %v5554_v17 = vpop.eup %5553  ;;  %v2187_v10 = vmul.f32 0.03125, %v2099_v14  ;;  %9588 = vst [vmem:[#allocation79_spill] sm:$0xff] %v7430_v51  ;;  %v7447_v51 = vld [vmem:[%s6425_s22 + $0x18] sm:$0xff] }
 0x3a1   : > { %v2248_v3 = vmul.f32 %v5554_v17, %v7091_v28  ;;  %v2249_v40 = vmul.f32 %v5554_v17, %v7100_v27 }
 0x3a2   : > { %5559 = vrcp.f32 %v2187_v10  ;;  %v7440_v25 = vpop.f32.mrb[86].mxu0 }
 0x3a3   : > { %v2102_v55 = vpop.xlane.xlu1 %2101  ;;  %v2313_v56 = vmul.f32 %v7433_v35, %v2249_v40  ;;  %v2312_v14 = vmul.f32 %v7437_v43, %v2248_v3  ;;  %9589 = vst [vmem:[#allocation80_spill] sm:$0xff] %v7440_v25  ;;  %v7444_v17 = vpop.f32.mrb[87].mxu0  ;;  %v7451_v3 = vld [vmem:[%s6425_s22 + $0x10] sm:$0xff] }
 0x3a4   : > { %v5556_v1 = vpop.eup %5555  ;;  %v2188_v32 = vmul.f32 0.03125, %v2102_v55  ;;  %9590 = vst [vmem:[#allocation81_spill] sm:$0xff] %v7444_v17 }
 0x3a5   : > { %2472 = vmatprep.mubr.f32.mxu0 %v2313_v56  ;;  %v2251_v28 = vmul.f32 %v5556_v1, %v7115_v12  ;;  %v2250_v27 = vmul.f32 %v5556_v1, %v7113_v46  ;;  %v9591_v56 = vld [vmem:[#allocation12_spill] sm:$0xff]  ;;  %v9592_v46 = vld [vmem:[#allocation13_spill] sm:$0xff] }
 0x3a6   : > { %5561 = vrcp.f32 %v2188_v32  ;;  %2473 = vmatmul.mubr.f32.vlgmr.msra.gmra.mrb[128].mxu0 %v2312_v14  ;;  %v7456_v1 = vpop.f32.mrb[88].mxu0 }
 0x3a7   : > { %v2105_v10 = vpop.xlane.xlu1 %2104  ;;  %v2315_v40 = vmul.f32 %v7447_v51, %v2251_v28  ;;  %v2314_v55 = vmul.f32 %v7451_v3, %v2250_v27  ;;  %5256 = vmatpush1.bf16.msra.mxu0 %v9591_v56  ;;  %9593 = vst [vmem:[#allocation12_spill] sm:$0xff] %v7456_v1  ;;  %v7460_v17 = vpop.f32.mrb[89].mxu0 }
 0x3a8   : > { %v5558_v12 = vpop.eup %5557  ;;  %v2189_v25 = vmul.f32 0.03125, %v2105_v10  ;;  %5258 = vmatprep.subr.bf16.mxu0 %v9592_v46  ;;  %9594 = vst [vmem:[#allocation13_spill] sm:$0xff] %v7460_v17  ;;  %v7467_v10 = vld [vmem:[%s6425_s22 + $0x20] sm:$0xff]  ;;  %v7479_v17 = vld [vmem:[%s6425_s22 + $0x38] sm:$0xff] }
 0x3a9   : > { %2477 = vmatprep.mubr.f32.mxu0 %v2315_v40  ;;  %v2253_v32 = vmul.f32 %v5558_v12, %v7128_v29  ;;  %v2252_v14 = vmul.f32 %v5558_v12, %v7125_v44  ;;  %v9595_v40 = vld [vmem:[#allocation14_spill] sm:$0xff]  ;;  %v9596_v44 = vld [vmem:[#allocation15_spill] sm:$0xff] }
 0x3aa   : > { %5563 = vrcp.f32 %v2189_v25  ;;  %2478 = vmatmul.mubr.f32.gmra.mrb[130].mxu0 %v2314_v55  ;;  %v7472_v12 = vpop.f32.mrb[90].mxu0 }
 0x3ab   : > { %v2108_v28 = vpop.xlane.xlu1 %2107  ;;  %v2317_v27 = vmul.f32 %v7463_v20, %v2253_v32  ;;  %v2316_v56 = vmul.f32 %v7467_v10, %v2252_v14  ;;  %5260 = vmatpush1.bf16.msra.mxu0 %v9595_v40  ;;  %9597 = vst [vmem:[#allocation14_spill] sm:$0xff] %v7472_v12  ;;  %v7476_v1 = vpop.f32.mrb[91].mxu0 }
 0x3ac   : > { %v5560_v29 = vpop.eup %5559  ;;  %v2190_v46 = vmul.f32 0.03125, %v2108_v28  ;;  %5262 = vmatprep.subr.bf16.mxu0 %v9596_v44  ;;  %9598 = vst [vmem:[#allocation15_spill] sm:$0xff] %v7476_v1  ;;  %v7483_v28 = vld [vmem:[%s6425_s22 + $0x30] sm:$0xff]  ;;  %v7495_v1 = vld [vmem:[%s6425_s22 + $0x48] sm:$0xff] }
 0x3ad   : > { %2482 = vmatprep.mubr.f32.mxu0 %v2317_v27  ;;  %v2255_v25 = vmul.f32 %v5560_v29, %v7140_v53  ;;  %v2254_v55 = vmul.f32 %v5560_v29, %v7137_v23  ;;  %v9599_v27 = vld [vmem:[#allocation16_spill] sm:$0xff]  ;;  %v9600_v23 = vld [vmem:[#allocation17_spill] sm:$0xff] }
 0x3ae   : > { %5565 = vrcp.f32 %v2190_v46  ;;  %2483 = vmatmul.mubr.f32.gmra.mrb[132].mxu0 %v2316_v56  ;;  %v7488_v29 = vpop.f32.mrb[92].mxu0 }
 0x3af   : > { %v2111_v32 = vpop.xlane.xlu1 %2110  ;;  %v2319_v14 = vmul.f32 %v7479_v17, %v2255_v25  ;;  %v2318_v40 = vmul.f32 %v7483_v28, %v2254_v55  ;;  %5264 = vmatpush1.bf16.msra.mxu0 %v9599_v27  ;;  %9601 = vst [vmem:[#allocation16_spill] sm:$0xff] %v7488_v29  ;;  %v7492_v12 = vpop.f32.mrb[93].mxu0 }
 0x3b0   : > { %v5562_v53 = vpop.eup %5561  ;;  %v2191_v44 = vmul.f32 0.03125, %v2111_v32  ;;  %5266 = vmatprep.subr.bf16.mxu0 %v9600_v23  ;;  %9602 = vst [vmem:[#allocation17_spill] sm:$0xff] %v7492_v12  ;;  %v7499_v32 = vld [vmem:[%s6425_s22 + $0x40] sm:$0xff]  ;;  %v7511_v12 = vld [vmem:[%s6425_s22 + $0x58] sm:$0xff] }
 0x3b1   : > { %2487 = vmatprep.mubr.f32.mxu0 %v2319_v14  ;;  %v2257_v56 = vmul.f32 %v5562_v53, %v7150_v4  ;;  %v2256_v46 = vmul.f32 %v5562_v53, %v7147_v11  ;;  %v9603_v14 = vld [vmem:[#allocation18_spill] sm:$0xff]  ;;  %v9604_v11 = vld [vmem:[#allocation19_spill] sm:$0xff] }
 0x3b2   : > { %5567 = vrcp.f32 %v2191_v44  ;;  %2488 = vmatmul.mubr.f32.gmra.mrb[134].mxu0 %v2318_v40  ;;  %v7504_v53 = vpop.f32.mrb[94].mxu0 }
 0x3b3   : > { %v2114_v25 = vpop.xlane.xlu1 %2113  ;;  %v2321_v55 = vmul.f32 %v7495_v1, %v2257_v56  ;;  %v2320_v27 = vmul.f32 %v7499_v32, %v2256_v46  ;;  %5268 = vmatpush1.bf16.msra.mxu0 %v9603_v14  ;;  %9605 = vst [vmem:[#allocation18_spill] sm:$0xff] %v7504_v53  ;;  %v7508_v29 = vpop.f32.mrb[95].mxu0 }
 0x3b4   : > { %v5564_v4 = vpop.eup %5563  ;;  %v2192_v23 = vmul.f32 0.03125, %v2114_v25  ;;  %5270 = vmatprep.subr.bf16.mxu0 %v9604_v11  ;;  %9606 = vst [vmem:[#allocation19_spill] sm:$0xff] %v7508_v29  ;;  %v7515_v25 = vld [vmem:[%s6425_s22 + $0x50] sm:$0xff]  ;;  %v7527_v29 = vld [vmem:[%s6425_s22 + $0x68] sm:$0xff] }
 0x3b5   : > { %2492 = vmatprep.mubr.f32.mxu0 %v2321_v55  ;;  %v2259_v40 = vmul.f32 %v5564_v4, %v7160_v36  ;;  %v2258_v44 = vmul.f32 %v5564_v4, %v7157_v19  ;;  %v9607_v55 = vld [vmem:[#allocation20_spill] sm:$0xff]  ;;  %v9608_v19 = vld [vmem:[#allocation21_spill] sm:$0xff] }
 0x3b6   : > { %5569 = vrcp.f32 %v2192_v23  ;;  %2493 = vmatmul.mubr.f32.gmra.mrb[136].mxu0 %v2320_v27  ;;  %v7520_v4 = vpop.f32.mrb[96].mxu0 }
 0x3b7   : > { %v2117_v56 = vpop.xlane.xlu1 %2116  ;;  %v2323_v46 = vmul.f32 %v7511_v12, %v2259_v40  ;;  %v2322_v14 = vmul.f32 %v7515_v25, %v2258_v44  ;;  %5272 = vmatpush1.bf16.msra.mxu0 %v9607_v55  ;;  %9609 = vst [vmem:[#allocation20_spill] sm:$0xff] %v7520_v4  ;;  %v7524_v53 = vpop.f32.mrb[97].mxu0 }
 0x3b8   : > { %v5566_v36 = vpop.eup %5565  ;;  %v2193_v11 = vmul.f32 0.03125, %v2117_v56  ;;  %5274 = vmatprep.subr.bf16.mxu0 %v9608_v19  ;;  %9610 = vst [vmem:[#allocation21_spill] sm:$0xff] %v7524_v53  ;;  %v7531_v56 = vld [vmem:[%s6425_s22 + $0x60] sm:$0xff]  ;;  %v7543_v53 = vld [vmem:[%s6425_s22 + $0x78] sm:$0xff] }
 0x3b9   : > { %2497 = vmatprep.mubr.f32.mxu0 %v2323_v46  ;;  %v2261_v27 = vmul.f32 %v5566_v36, %v7170_v0  ;;  %v2260_v23 = vmul.f32 %v5566_v36, %v7167_v39  ;;  %v9611_v46 = vld [vmem:[#allocation22_spill] sm:$0xff]  ;;  %v9612_v39 = vld [vmem:[#allocation23_spill] sm:$0xff] }
 0x3ba   : > { %5571 = vrcp.f32 %v2193_v11  ;;  %2498 = vmatmul.mubr.f32.gmra.mrb[138].mxu0 %v2322_v14  ;;  %v7536_v36 = vpop.f32.mrb[98].mxu0 }
 0x3bb   : > { %v2120_v40 = vpop.xlane.xlu0 %2119  ;;  %v2325_v44 = vmul.f32 %v7527_v29, %v2261_v27  ;;  %v2324_v55 = vmul.f32 %v7531_v56, %v2260_v23  ;;  %5276 = vmatpush1.bf16.msra.mxu0 %v9611_v46  ;;  %9613 = vst [vmem:[#allocation22_spill] sm:$0xff] %v7536_v36  ;;  %v7540_v4 = vpop.f32.mrb[99].mxu0 }
 0x3bc   : > { %v5568_v0 = vpop.eup %5567  ;;  %v2194_v19 = vmul.f32 0.03125, %v2120_v40  ;;  %5278 = vmatprep.subr.bf16.mxu0 %v9612_v39  ;;  %9614 = vst [vmem:[#allocation23_spill] sm:$0xff] %v7540_v4  ;;  %v7547_v40 = vld [vmem:[%s6425_s22 + $0x70] sm:$0xff]  ;;  %v7559_v4 = vld [vmem:[%s6425_s22 + $0x88] sm:$0xff] }
 0x3bd   : > { %2502 = vmatprep.mubr.f32.mxu0 %v2325_v44  ;;  %v2263_v14 = vmul.f32 %v5568_v0, %v7186_v45  ;;  %v2262_v11 = vmul.f32 %v5568_v0, %v7183_v49  ;;  %v9615_v44 = vld [vmem:[#allocation24_spill] sm:$0xff]  ;;  %v9616_v49 = vld [vmem:[#allocation25_spill] sm:$0xff] }
 0x3be   : > { %5573 = vrcp.f32 %v2194_v19  ;;  %2503 = vmatmul.mubr.f32.gmra.mrb[140].mxu0 %v2324_v55  ;;  %v7552_v0 = vpop.f32.mrb[100].mxu0 }
 0x3bf   : > { %v2123_v27 = vpop.xlane.xlu1 %2122  ;;  %v2327_v23 = vmul.f32 %v7543_v53, %v2263_v14  ;;  %v2326_v46 = vmul.f32 %v7547_v40, %v2262_v11  ;;  %5280 = vmatpush1.bf16.msra.mxu0 %v9615_v44  ;;  %9617 = vst [vmem:[#allocation24_spill] sm:$0xff] %v7552_v0  ;;  %v7556_v36 = vpop.f32.mrb[101].mxu0 }
 0x3c0   : > { %v5570_v45 = vpop.eup %5569  ;;  %v2195_v39 = vmul.f32 0.03125, %v2123_v27  ;;  %5282 = vmatprep.subr.bf16.mxu0 %v9616_v49  ;;  %9618 = vst [vmem:[#allocation25_spill] sm:$0xff] %v7556_v36  ;;  %v7563_v27 = vld [vmem:[%s6425_s22 + $0x80] sm:$0xff]  ;;  %v7575_v36 = vld [vmem:[%s6425_s22 + $0x98] sm:$0xff] }
 0x3c1   : > { %2507 = vmatprep.mubr.f32.mxu0 %v2327_v23  ;;  %v2265_v55 = vmul.f32 %v5570_v45, %v7203_v18  ;;  %v2264_v19 = vmul.f32 %v5570_v45, %v7201_v33  ;;  %v9619_v23 = vld [vmem:[#allocation26_spill] sm:$0xff]  ;;  %v9620_v33 = vld [vmem:[#allocation27_spill] sm:$0xff] }
 0x3c2   : > { %5575 = vrcp.f32 %v2195_v39  ;;  %2508 = vmatmul.mubr.f32.gmra.mrb[142].mxu0 %v2326_v46  ;;  %v7568_v45 = vpop.f32.mrb[102].mxu0 }
 0x3c3   : > { %v2126_v14 = vpop.xlane.xlu0 %2125  ;;  %v2329_v11 = vmul.f32 %v7559_v4, %v2265_v55  ;;  %v2328_v44 = vmul.f32 %v7563_v27, %v2264_v19  ;;  %5284 = vmatpush1.bf16.msra.mxu0 %v9619_v23  ;;  %9621 = vst [vmem:[#allocation26_spill] sm:$0xff] %v7568_v45  ;;  %v7572_v0 = vpop.f32.mrb[103].mxu0 }
 0x3c4   : > { %v5572_v18 = vpop.eup %5571  ;;  %v2196_v49 = vmul.f32 0.03125, %v2126_v14  ;;  %5286 = vmatprep.subr.bf16.mxu0 %v9620_v33  ;;  %9622 = vst [vmem:[#allocation27_spill] sm:$0xff] %v7572_v0  ;;  %v7579_v14 = vld [vmem:[%s6425_s22 + $0x90] sm:$0xff]  ;;  %v7591_v0 = vld [vmem:[%s6425_s22 + $0xa8] sm:$0xff] }
 0x3c5   : > { %2512 = vmatprep.mubr.f32.mxu0 %v2329_v11  ;;  %v2267_v46 = vmul.f32 %v5572_v18, %v7212_v13  ;;  %v2266_v39 = vmul.f32 %v5572_v18, %v7210_v9  ;;  %v9623_v11 = vld [vmem:[#allocation28_spill] sm:$0xff]  ;;  %v9624_v9 = vld [vmem:[#allocation29_spill] sm:$0xff] }
 0x3c6   : > { %5577 = vrcp.f32 %v2196_v49  ;;  %2513 = vmatmul.mubr.f32.gmra.mrb[144].mxu0 %v2328_v44  ;;  %v7584_v18 = vpop.f32.mrb[104].mxu0 }
 0x3c7   : > { %v2129_v55 = vpop.xlane.xlu1 %2128  ;;  %v2331_v19 = vmul.f32 %v7575_v36, %v2267_v46  ;;  %v2330_v23 = vmul.f32 %v7579_v14, %v2266_v39  ;;  %5288 = vmatpush1.bf16.msra.mxu0 %v9623_v11  ;;  %9625 = vst [vmem:[#allocation28_spill] sm:$0xff] %v7584_v18  ;;  %v7588_v45 = vpop.f32.mrb[105].mxu0 }
 0x3c8   : > { %v5574_v13 = vpop.eup %5573  ;;  %v2197_v33 = vmul.f32 0.03125, %v2129_v55  ;;  %5290 = vmatprep.subr.bf16.mxu0 %v9624_v9  ;;  %9626 = vst [vmem:[#allocation29_spill] sm:$0xff] %v7588_v45  ;;  %v7595_v55 = vld [vmem:[%s6425_s22 + $0xa0] sm:$0xff]  ;;  %v7607_v45 = vld [vmem:[%s6425_s22 + $0xb8] sm:$0xff] }
 0x3c9   : > { %2517 = vmatprep.mubr.f32.mxu0 %v2331_v19  ;;  %v2269_v44 = vmul.f32 %v5574_v13, %v7220_v54  ;;  %v2268_v49 = vmul.f32 %v5574_v13, %v7218_v30  ;;  %v9627_v19 = vld [vmem:[#allocation30_spill] sm:$0xff]  ;;  %v9628_v30 = vld [vmem:[#allocation31_spill] sm:$0xff] }
 0x3ca   : > { %5579 = vrcp.f32 %v2197_v33  ;;  %2518 = vmatmul.mubr.f32.gmra.mrb[146].mxu0 %v2330_v23  ;;  %v7600_v13 = vpop.f32.mrb[106].mxu0 }
 0x3cb   : > { %v2132_v46 = vpop.xlane.xlu0 %2131  ;;  %v2333_v39 = vmul.f32 %v7591_v0, %v2269_v44  ;;  %v2332_v11 = vmul.f32 %v7595_v55, %v2268_v49  ;;  %5292 = vmatpush1.bf16.msra.mxu0 %v9627_v19  ;;  %9629 = vst [vmem:[#allocation30_spill] sm:$0xff] %v7600_v13  ;;  %v7604_v18 = vpop.f32.mrb[107].mxu0 }
 0x3cc   : > { %v5576_v54 = vpop.eup %5575  ;;  %v2198_v9 = vmul.f32 0.03125, %v2132_v46  ;;  %5294 = vmatprep.subr.bf16.mxu0 %v9628_v30  ;;  %9630 = vst [vmem:[#allocation31_spill] sm:$0xff] %v7604_v18  ;;  %v7611_v46 = vld [vmem:[%s6425_s22 + $0xb0] sm:$0xff]  ;;  %v7623_v18 = vld [vmem:[%s6425_s22 + $0xc8] sm:$0xff] }
 0x3cd   : > { %2522 = vmatprep.mubr.f32.mxu0 %v2333_v39  ;;  %v2271_v23 = vmul.f32 %v5576_v54, %v7228_v2  ;;  %v2270_v33 = vmul.f32 %v5576_v54, %v7226_v41  ;;  %v9631_v39 = vld [vmem:[#allocation32_spill] sm:$0xff]  ;;  %v9632_v41 = vld [vmem:[#allocation33_spill] sm:$0xff] }
 0x3ce   : > { %5581 = vrcp.f32 %v2198_v9  ;;  %2523 = vmatmul.mubr.f32.gmra.mrb[148].mxu0 %v2332_v11  ;;  %v7616_v54 = vpop.f32.mrb[108].mxu0 }
 0x3cf   : > { %v2135_v44 = vpop.xlane.xlu1 %2134  ;;  %v2335_v49 = vmul.f32 %v7607_v45, %v2271_v23  ;;  %v2334_v19 = vmul.f32 %v7611_v46, %v2270_v33  ;;  %5296 = vmatpush1.bf16.msra.mxu0 %v9631_v39  ;;  %9633 = vst [vmem:[#allocation32_spill] sm:$0xff] %v7616_v54  ;;  %v7620_v13 = vpop.f32.mrb[109].mxu0 }
 0x3d0   : > { %v5578_v2 = vpop.eup %5577  ;;  %v2199_v30 = vmul.f32 0.03125, %v2135_v44  ;;  %5298 = vmatprep.subr.bf16.mxu0 %v9632_v41  ;;  %9634 = vst [vmem:[#allocation33_spill] sm:$0xff] %v7620_v13  ;;  %v7627_v44 = vld [vmem:[%s6425_s22 + $0xc0] sm:$0xff]  ;;  %v7639_v13 = vld [vmem:[%s6425_s22 + $0xd8] sm:$0xff] }
 0x3d1   : > { %2527 = vmatprep.mubr.f32.mxu0 %v2335_v49  ;;  %v2273_v11 = vmul.f32 %v5578_v2, %v7236_v50  ;;  %v2272_v9 = vmul.f32 %v5578_v2, %v7234_v31  ;;  %v9635_v49 = vld [vmem:[#allocation34_spill] sm:$0xff]  ;;  %v9636_v31 = vld [vmem:[#allocation35_spill] sm:$0xff] }
 0x3d2   : > { %5583 = vrcp.f32 %v2199_v30  ;;  %2528 = vmatmul.mubr.f32.gmra.mrb[150].mxu0 %v2334_v19  ;;  %v7632_v2 = vpop.f32.mrb[110].mxu0 }
 0x3d3   : > { %v2138_v23 = vpop.xlane.xlu0 %2137  ;;  %v2337_v33 = vmul.f32 %v7623_v18, %v2273_v11  ;;  %v2336_v39 = vmul.f32 %v7627_v44, %v2272_v9  ;;  %5300 = vmatpush1.bf16.msra.mxu0 %v9635_v49  ;;  %9637 = vst [vmem:[#allocation34_spill] sm:$0xff] %v7632_v2  ;;  %v7636_v54 = vpop.f32.mrb[111].mxu0 }
 0x3d4   : > { %v5580_v50 = vpop.eup %5579  ;;  %v2200_v41 = vmul.f32 0.03125, %v2138_v23  ;;  %5302 = vmatprep.subr.bf16.mxu0 %v9636_v31  ;;  %9638 = vst [vmem:[#allocation35_spill] sm:$0xff] %v7636_v54  ;;  %v7643_v23 = vld [vmem:[%s6425_s22 + $0xd0] sm:$0xff]  ;;  %v7655_v54 = vld [vmem:[%s6425_s22 + $0xe8] sm:$0xff] }
 0x3d5   : > { %2532 = vmatprep.mubr.f32.mxu0 %v2337_v33  ;;  %v2275_v19 = vmul.f32 %v5580_v50, %v7244_v42  ;;  %v2274_v30 = vmul.f32 %v5580_v50, %v7242_v24  ;;  %v9639_v33 = vld [vmem:[#allocation36_spill] sm:$0xff]  ;;  %v9640_v24 = vld [vmem:[#allocation37_spill] sm:$0xff] }
 0x3d6   : > { %5585 = vrcp.f32 %v2200_v41  ;;  %2533 = vmatmul.mubr.f32.gmra.mrb[152].mxu0 %v2336_v39  ;;  %v7648_v50 = vpop.f32.mrb[112].mxu0 }
 0x3d7   : > { %v2141_v11 = vpop.xlane.xlu1 %2140  ;;  %v2339_v9 = vmul.f32 %v7639_v13, %v2275_v19  ;;  %v2338_v49 = vmul.f32 %v7643_v23, %v2274_v30  ;;  %5304 = vmatpush1.bf16.msra.mxu0 %v9639_v33  ;;  %9641 = vst [vmem:[#allocation36_spill] sm:$0xff] %v7648_v50  ;;  %v7652_v2 = vpop.f32.mrb[113].mxu0 }
 0x3d8   : > { %v5582_v42 = vpop.eup %5581  ;;  %v2201_v31 = vmul.f32 0.03125, %v2141_v11  ;;  %5306 = vmatprep.subr.bf16.mxu0 %v9640_v24  ;;  %9642 = vst [vmem:[#allocation37_spill] sm:$0xff] %v7652_v2  ;;  %v7659_v11 = vld [vmem:[%s6425_s22 + $0xe0] sm:$0xff]  ;;  %v7671_v2 = vld [vmem:[%s6425_s22 + $0xf8] sm:$0xff] }
 0x3d9   : > { %2537 = vmatprep.mubr.f32.mxu0 %v2339_v9  ;;  %v2277_v39 = vmul.f32 %v5582_v42, %v7252_v59  ;;  %v2276_v41 = vmul.f32 %v5582_v42, %v7250_v8  ;;  %v9643_v9 = vld [vmem:[#allocation38_spill] sm:$0xff]  ;;  %v9644_v8 = vld [vmem:[#allocation39_spill] sm:$0xff] }
 0x3da   : > { %5587 = vrcp.f32 %v2201_v31  ;;  %2538 = vmatmul.mubr.f32.gmra.mrb[154].mxu0 %v2338_v49  ;;  %v7664_v42 = vpop.f32.mrb[114].mxu0 }
 0x3db   : > { %v2144_v19 = vpop.xlane.xlu0 %2143  ;;  %v2341_v30 = vmul.f32 %v7655_v54, %v2277_v39  ;;  %v2340_v33 = vmul.f32 %v7659_v11, %v2276_v41  ;;  %5308 = vmatpush1.bf16.msra.mxu0 %v9643_v9  ;;  %9645 = vst [vmem:[#allocation38_spill] sm:$0xff] %v7664_v42  ;;  %v7668_v50 = vpop.f32.mrb[115].mxu0 }
 0x3dc   : > { %v5584_v59 = vpop.eup %5583  ;;  %v2202_v24 = vmul.f32 0.03125, %v2144_v19  ;;  %5310 = vmatprep.subr.bf16.mxu0 %v9644_v8  ;;  %9646 = vst [vmem:[#allocation39_spill] sm:$0xff] %v7668_v50  ;;  %v7675_v19 = vld [vmem:[%s6425_s22 + $0xf0] sm:$0xff]  ;;  %v7745_v50 = vld [vmem:[%s6425_s22 + $0x148] sm:$0xff] }
 0x3dd   : > { %2542 = vmatprep.mubr.f32.mxu0 %v2341_v30  ;;  %v2279_v49 = vmul.f32 %v5584_v59, %v7260_v21  ;;  %v2278_v31 = vmul.f32 %v5584_v59, %v7258_v58  ;;  %v9647_v30 = vld [vmem:[#allocation40_spill] sm:$0xff]  ;;  %v9648_v58 = vld [vmem:[#allocation41_spill] sm:$0xff] }
 0x3de   : > { %5589 = vrcp.f32 %v2202_v24  ;;  %2543 = vmatmul.mubr.f32.gmra.mrb[156].mxu0 %v2340_v33  ;;  %v7680_v59 = vpop.f32.mrb[116].mxu0 }
 0x3df   : > { %v2147_v39 = vpop.xlane.xlu1 %2146  ;;  %v2343_v41 = vmul.f32 %v7671_v2, %v2279_v49  ;;  %v2342_v9 = vmul.f32 %v7675_v19, %v2278_v31  ;;  %5312 = vmatpush1.bf16.msra.mxu0 %v9647_v30  ;;  %9649 = vst [vmem:[#allocation40_spill] sm:$0xff] %v7680_v59  ;;  %v7684_v42 = vpop.f32.mrb[117].mxu0  ;;  %v7687_v31 = vld [vmem:[%s6425_s22 + $0x108] sm:$0xff] }
 0x3e0   : > { %v5586_v21 = vpop.eup %5585  ;;  %v2203_v8 = vmul.f32 0.03125, %v2147_v39  ;;  %5314 = vmatprep.subr.bf16.mxu0 %v9648_v58  ;;  %9650 = vst [vmem:[#allocation41_spill] sm:$0xff] %v7684_v42  ;;  %v7691_v39 = vld [vmem:[%s6425_s22 + $0x100] sm:$0xff]  ;;  %v7702_v42 = vld [vmem:[%s6425_s22 + $0x118] sm:$0xff] }
 0x3e1   : > { %2547 = vmatprep.mubr.f32.mxu0 %v2343_v41  ;;  %v2281_v33 = vmul.f32 %v5586_v21, %v7268_v7  ;;  %v2280_v24 = vmul.f32 %v5586_v21, %v7266_v34  ;;  %v9651_v41 = vld [vmem:[#allocation42_spill] sm:$0xff] }
 0x3e2   : > { %5591 = vrcp.f32 %v2203_v8  ;;  %2548 = vmatmul.mubr.f32.gmra.mrb[158].mxu0 %v2342_v9  ;;  %v7695_v34 = vpop.f32.mrb[118].mxu0 }
 0x3e3   : > { %v2150_v49 = vpop.xlane.xlu0 %2149  ;;  %v2345_v30 = vmul.f32 %v7687_v31, %v2281_v33  ;;  %v2344_v58 = vmul.f32 %v7691_v39, %v2280_v24  ;;  %5316 = vmatpush1.bf16.msra.mxu0 %v9651_v41  ;;  %9652 = vst [vmem:[#allocation42_spill] sm:$0xff] %v7695_v34  ;;  %v7699_v8 = vpop.f32.mrb[119].mxu0  ;;  %v7706_v41 = vld [vmem:[%s6425_s22 + $0x110] sm:$0xff] }
 0x3e4   : > { %v5588_v7 = vpop.eup %5587  ;;  %v2204_v59 = vmul.f32 0.03125, %v2150_v49  ;;  %9653 = vst [vmem:[#allocation82_spill] sm:$0xff] %v7699_v8  ;;  %v7720_v8 = vld [vmem:[%s6425_s22 + $0x120] sm:$0xff] }
 0x3e5   : > { %2552 = vmatprep.mubr.f32.mxu0 %v2345_v30  ;;  %v2283_v9 = vmul.f32 %v5588_v7, %v7276_v57  ;;  %v2282_v21 = vmul.f32 %v5588_v7, %v7274_v37 }
 0x3e6   : > { %5593 = vrcp.f32 %v2204_v59  ;;  %2553 = vmatmul.mubr.f32.gmra.mrb[160].mxu0 %v2344_v58  ;;  %v7709_v57 = vpop.f32.mrb[120].mxu0 }
 0x3e7   : > { %v2153_v33 = vpop.xlane.xlu1 %2152  ;;  %v2347_v24 = vmul.f32 %v7702_v42, %v2283_v9  ;;  %v2346_v49 = vmul.f32 %v7706_v41, %v2282_v21  ;;  %9654 = vst [vmem:[#allocation83_spill] sm:$0xff] %v7709_v57  ;;  %v7713_v58 = vpop.f32.mrb[121].mxu0  ;;  %v7716_v9 = vld [vmem:[%s6425_s22 + $0x128] sm:$0xff] }
 0x3e8   : > { %v5590_v30 = vpop.eup %5589  ;;  %v2205_v34 = vmul.f32 0.03125, %v2153_v33  ;;  %9655 = vst [vmem:[#allocation84_spill] sm:$0xff] %v7713_v58 }
 0x3e9   : > { %2557 = vmatprep.mubr.f32.mxu0 %v2347_v24  ;;  %v2285_v37 = vmul.f32 %v5590_v30, %v7284_v38  ;;  %v2284_v59 = vmul.f32 %v5590_v30, %v7282_v6 }
 0x3ea   : > { %5595 = vrcp.f32 %v2205_v34  ;;  %2558 = vmatmul.mubr.f32.gmra.mrb[162].mxu0 %v2346_v49  ;;  %v7723_v38 = vpop.f32.mrb[122].mxu0 }
 0x3eb   : > { %v2156_v7 = vpop.xlane.xlu0 %2155  ;;  %v2349_v21 = vmul.f32 %v7716_v9, %v2285_v37  ;;  %v2348_v33 = vmul.f32 %v7720_v8, %v2284_v59  ;;  %9656 = vst [vmem:[#allocation85_spill] sm:$0xff] %v7723_v38  ;;  %v7727_v49 = vpop.f32.mrb[123].mxu0  ;;  %v7730_v37 = vld [vmem:[%s6425_s22 + $0x138] sm:$0xff]  ;;  %v7734_v59 = vld [vmem:[%s6425_s22 + $0x130] sm:$0xff] }
 0x3ec   : > { %v5592_v24 = vpop.eup %5591  ;;  %v2206_v57 = vmul.f32 0.03125, %v2156_v7  ;;  %9657 = vst [vmem:[#allocation86_spill] sm:$0xff] %v7727_v49  ;;  %9658 = vst [vmem:[#allocation87_spill] sm:$0xff] %v7734_v59 }
 0x3ed   : > { %2562 = vmatprep.mubr.f32.mxu0 %v2349_v21  ;;  %v2287_v6 = vmul.f32 %v5592_v24, %v7292_v62  ;;  %v2286_v34 = vmul.f32 %v5592_v24, %v7290_v48 }
 0x3ee   : > { %5597 = vrcp.f32 %v2206_v57  ;;  %2563 = vmatmul.mubr.f32.gmra.mrb[164].mxu0 %v2348_v33  ;;  %v7737_v62 = vpop.f32.mrb[124].mxu0  ;;  %v9660_v33 = vld [vmem:[#allocation43_spill] sm:$0xff] }
 0x3ef   : > { %v2159_v30 = vpop.xlane.xlu1 %2158  ;;  %v2351_v58 = vmul.f32 %v7730_v37, %v2287_v6  ;;  %v2350_v7 = vmul.f32 %v7734_v59, %v2286_v34  ;;  %9659 = vst [vmem:[#allocation88_spill] sm:$0xff] %v7737_v62  ;;  %v636_v24 = vsub.s32 5, %v9660_v33  ;;  %v7742_v49 = vpop.f32.mrb[125].mxu0  ;;  %v7749_v59 = vld [vmem:[%s6425_s22 + $0x140] sm:$0xff] }
 0x3f0   : > { %v5594_v21 = vpop.eup %5593  ;;  %v2207_v38 = vmul.f32 0.03125, %v2159_v30  ;;  %9661 = vst [vmem:[#allocation43_spill] sm:$0xff] %v7742_v49  ;;  %9662 = vst [vmem:[#allocation89_spill] sm:$0xff] %v7749_v59 }
 0x3f1   : > { %2567 = vmatprep.mubr.f32.mxu0 %v2351_v58  ;;  %v2289_v48 = vmul.f32 %v5594_v21, %v7300_v47  ;;  %v2288_v57 = vmul.f32 %v5594_v21, %v7298_v15  ;;  %v632_v47 = vsub.s32 4, %v9660_v33 }
 0x3f2   : > { %5599 = vrcp.f32 %v2207_v38  ;;  %2568 = vmatmul.mubr.f32.gmra.mrb[166].mxu0 %v2350_v7  ;;  %v5978_v38 = vld [vmem:[%s9353_s2] sm:$0x3f] }
 0x3f3   : > { %v2162_v6 = vpop.xlane.xlu0 %2161  ;;  %v2353_v34 = vmul.f32 %v7745_v50, %v2289_v48  ;;  %v2352_v58 = vmul.f32 %v7749_v59, %v2288_v57  ;;  %v7758_v7 = vrot.slane %v5978_v38, %v636_v24  ;;  %v7764_v33 = vrot.slane %v5978_v38, %v632_v47  ;;  %v7781_v38 = vld [vmem:[%s6425_s22 + $0x168] sm:$0xff] }
 0x3f4   : > { %v5596_v15 = vpop.eup %5595  ;;  %v2208_v30 = vmul.f32 0.03125, %v2162_v6  ;;  %v7753_v21 = vpop.f32.mrb[126].mxu0  ;;  %v7767_v6 = vld [vmem:[%s6425_s22 + $0x158] sm:$0xff] }
 0x3f5   : > { %9663 = vst [vmem:[#allocation90_spill] sm:$0xff] %v7753_v21  ;;  %2572 = vmatprep.mubr.f32.mxu0 %v2353_v34  ;;  %v2291_v48 = vmul.f32 %v5596_v15, %v7308_v26  ;;  %v2290_v62 = vmul.f32 %v5596_v15, %v7306_v60  ;;  %v7762_v49 = vpop.f32.mrb[127].mxu0  ;;  %v7771_v21 = vld [vmem:[%s6425_s22 + $0x150] sm:$0xff]  ;;  %v1227_v60 = vadd.f32 %v7376_v63, %v7758_v7 }
 0x3f6   : > { %9664 = vst [vmem:[#allocation91_spill] sm:$0xff] %v7762_v49  ;;  %5601 = vrcp.f32 %v2208_v30  ;;  %2573 = vmatmul.mubr.f32.gmra.mrb[168].mxu0 %v2352_v58  ;;  %v1225_v15 = vadd.f32 %v7374_v5, %v7764_v33  ;;  %v9667_v5 = vld [vmem:[#allocation45_spill] sm:$0xff] }
 0x3f7   : > { %v2165_v57 = vpop.xlane.xlu1 %2164  ;;  %v2355_v34 = vmul.f32 %v7767_v6, %v2291_v48  ;;  %v2354_v24 = vmul.f32 %v7771_v21, %v2290_v62  ;;  %v7785_v48 = vld [vmem:[%s6425_s22 + $0x160] sm:$0xff] }
 0x3f8   : > { %v5598_v26 = vpop.eup %5597  ;;  %v2209_v59 = vmul.f32 0.03125, %v2165_v57  ;;  %9665 = vst [vmem:[#allocation92_spill] sm:$0xff] %v7785_v48 }
 0x3f9   : > { %2577 = vmatprep.mubr.f32.mxu0 %v2355_v34  ;;  %v2293_v58 = vmul.f32 %v5598_v26, %v7316_v22  ;;  %v2292_v47 = vmul.f32 %v5598_v26, %v7314_v61  ;;  %v1233_v61 = vadd.f32 %v7386_v52, %v7758_v7 }
 0x3fa   : > { %5603 = vrcp.f32 %v2209_v59  ;;  %2578 = vmatmul.mubr.f32.gmra.mrb[170].mxu0 %v2354_v24  ;;  %v7791_v59 = vadd.f32 %v7433_v35, %v1227_v60  ;;  %v9668_v24 = vld [vmem:[#allocation44_spill] sm:$0xff]  ;;  %v1231_v60 = vadd.f32 %v7384_v16, %v7764_v33 }
 0x3fb   : > { %v2168_v30 = vpop.xlane.xlu0 %2167  ;;  %v2357_v62 = vmul.f32 %v7781_v38, %v2293_v58  ;;  %v2356_v63 = vmul.f32 %v7785_v48, %v2292_v47  ;;  %v7796_v58 = vadd.f32 %v7437_v43, %v1225_v15  ;;  %v7799_v47 = vld [vmem:[%s6425_s22 + $0x178] sm:$0xff]  ;;  %v7803_v48 = vld [vmem:[%s6425_s22 + $0x170] sm:$0xff] }
 0x3fc   : > { %v5600_v57 = vpop.eup %5599  ;;  %v2210_v22 = vmul.f32 0.03125, %v2168_v30  ;;  %9666 = vst [vmem:[#allocation93_spill] sm:$0xff] %v7791_v59  ;;  %v9671_v15 = vld [vmem:[#allocation46_spill] sm:$0xff] }
 0x3fd   : > { %2582 = vmatprep.mubr.f32.mxu0 %v2357_v62  ;;  %v2295_v34 = vmul.f32 %v5600_v57, %v9667_v5  ;;  %v2294_v26 = vmul.f32 %v5600_v57, %v9668_v24  ;;  %9669 = vst [vmem:[#allocation45_spill] sm:$0xff] %v7796_v58  ;;  %v7809_v62 = vadd.f32 %v7447_v51, %v1233_v61  ;;  %v9672_v57 = vld [vmem:[#allocation63_spill] sm:$0xff]  ;;  %v7820_v61 = vld [vmem:[%s6425_s22 + $0x188] sm:$0xff] }
 0x3fe   : > { %5605 = vrcp.f32 %v2210_v22  ;;  %2583 = vmatmul.mubr.f32.gmra.mrb[172].mxu0 %v2356_v63  ;;  %v1239_v22 = vadd.f32 %v9672_v57, %v7758_v7  ;;  %v4000_v5 = vmul.f32 %v7791_v59, %v7791_v59  ;;  %v3999_v16 = vmul.f32 %v7796_v58, %v7796_v58 }
 0x3ff   : > { %v2171_v49 = vpop.xlane.xlu1 %2170  ;;  %v2359_v30 = vmul.f32 %v7799_v47, %v2295_v34  ;;  %v2358_v52 = vmul.f32 %v7803_v48, %v2294_v26  ;;  %9670 = vst [vmem:[#allocation44_spill] sm:$0xff] %v7809_v62  ;;  %v9673_v34 = vld [vmem:[#allocation47_spill] sm:$0xff]  ;;  %v7824_v26 = vld [vmem:[%s6425_s22 + $0x180] sm:$0xff]  ;;  %v7828_v57 = vadd.f32 %v7451_v3, %v1231_v60 }
 0x400   : > { %v5602_v35 = vpop.eup %5601  ;;  %v2211_v43 = vmul.f32 0.03125, %v2171_v49  ;;  %9674 = vst [vmem:[#allocation46_spill] sm:$0xff] %v7824_v26  ;;  %v9681_v60 = vld [vmem:[#allocation64_spill] sm:$0xff] }
 0x401   : > { %v2296_v63 = vmul.f32 %v5602_v35, %v9671_v15  ;;  %2587 = vmatprep.mubr.f32.mxu0 %v2359_v30  ;;  %v2297_v24 = vmul.f32 %v5602_v35, %v9673_v34  ;;  %9675 = vst [vmem:[#allocation63_spill] sm:$0xff] %v7828_v57  ;;  %v7835_v34 = vadd.f32 %v7463_v20, %v1239_v22  ;;  %v7848_v22 = vld [vmem:[%s6425_s22 + $0x190] sm:$0xff] }
 0x402   : > { %5607 = vrcp.f32 %v2211_v43  ;;  %2588 = vmatmul.mubr.f32.gmra.mrb[174].mxu0 %v2358_v52  ;;  %v9676_v52 = vld [vmem:[#allocation62_spill] sm:$0xff] }
 0x403   : > { %4127 = vmatprep.mubr.f32.mxu0 %v4000_v5  ;;  %v2174_v51 = vpop.xlane.xlu0 %2173  ;;  %v2361_v49 = vmul.f32 %v7820_v61, %v2297_v24  ;;  %v2360_v30 = vmul.f32 %v7824_v26, %v2296_v63  ;;  %v1237_v35 = vadd.f32 %v9676_v52, %v7764_v33  ;;  %v4002_v5 = vmul.f32 %v7809_v62, %v7809_v62  ;;  %v9678_v24 = vld [vmem:[#allocation65_spill] sm:$0xff]  ;;  %v9680_v26 = vld [vmem:[#allocation48_spill] sm:$0xff]  ;;  %v7844_v62 = vld [vmem:[%s6425_s22 + $0x198] sm:$0xff] }
 0x404   : > { %v5604_v15 = vpop.eup %5603  ;;  %v2212_v43 = vmul.f32 0.03125, %v2174_v51  ;;  %9677 = vst [vmem:[#allocation47_spill] sm:$0xff] %v7835_v34  ;;  %v1245_v59 = vadd.f32 %v9678_v24, %v7758_v7  ;;  %v9679_v63 = vld [vmem:[#allocation49_spill] sm:$0xff]  ;;  %v1243_v51 = vadd.f32 %v9681_v60, %v7764_v33  ;;  %v9686_v60 = vld [vmem:[#allocation50_spill] sm:$0xff] }
 0x405   : > { %2592 = vmatprep.mubr.f32.mxu1 %v2361_v49  ;;  %v2299_v58 = vmul.f32 %v5604_v15, %v9679_v63  ;;  %v2298_v3 = vmul.f32 %v5604_v15, %v9680_v26  ;;  %v7852_v26 = vadd.f32 %v7467_v10, %v1237_v35  ;;  %v9685_v63 = vld [vmem:[#allocation51_spill] sm:$0xff] }
 0x406   : > { %5609 = vrcp.f32 %v2212_v43  ;;  %2593 = vmatmul.mubr.f32.vlgmr.msra.gmra.mrb[128].mxu1 %v2360_v30  ;;  %4128 = vmatmul.mubr.f32.vlgmr.msra.gmra.mrb[176].mxu0 %v3999_v16  ;;  %v9683_v16 = vld [vmem:[#allocation67_spill] sm:$0xff]  ;;  %v4001_v43 = vmul.f32 %v7828_v57, %v7828_v57  ;;  %v7866_v35 = vadd.f32 %v7483_v28, %v1243_v51 }
 0x407   : > { %v2177_v52 = vpop.xlane.xlu1 %2176  ;;  %4133 = vmatprep.mubr.f32.mxu0 %v4002_v5  ;;  %v2363_v20 = vmul.f32 %v7844_v62, %v2299_v58  ;;  %v2362_v49 = vmul.f32 %v7848_v22, %v2298_v3  ;;  %9682 = vst [vmem:[#allocation62_spill] sm:$0xff] %v7852_v26  ;;  %v1251_v15 = vadd.f32 %v9683_v16, %v7758_v7  ;;  %v7869_v16 = vld [vmem:[%s6425_s22 + $0x1a8] sm:$0xff] }
 0x408   : > { %v5606_v24 = vpop.eup %5605  ;;  %v2213_v30 = vmul.f32 0.03125, %v2177_v52  ;;  %v7859_v5 = vadd.f32 %v7479_v17, %v1245_v59  ;;  %v4004_v58 = vmul.f32 %v7835_v34, %v7835_v34  ;;  %9687 = vst [vmem:[#allocation49_spill] sm:$0xff] %v7866_v35  ;;  %v7873_v59 = vld [vmem:[%s6425_s22 + $0x1a0] sm:$0xff]  ;;  %v4003_v51 = vmul.f32 %v7852_v26, %v7852_v26  ;;  %v9698_v26 = vld [vmem:[#allocation54_spill] sm:$0xff] }
 0x409   : > { %2597 = vmatprep.mubr.f32.mxu1 %v2363_v20  ;;  %v2301_v3 = vmul.f32 %v5606_v24, %v9685_v63  ;;  %v2300_v10 = vmul.f32 %v5606_v24, %v9686_v60  ;;  %v9688_v24 = vld [vmem:[#allocation66_spill] sm:$0xff]  ;;  %v9691_v60 = vld [vmem:[#allocation53_spill] sm:$0xff]  ;;  %v9692_v34 = vld [vmem:[#allocation52_spill] sm:$0xff] }
 0x40a   : > { %9684 = vst [vmem:[#allocation65_spill] sm:$0xff] %v7859_v5  ;;  %5611 = vrcp.f32 %v2213_v30  ;;  %2598 = vmatmul.mubr.f32.gmra.mrb[130].mxu1 %v2362_v49  ;;  %4134 = vmatmul.mubr.f32.gmra.mrb[178].mxu0 %v4001_v43  ;;  %v1249_v30 = vadd.f32 %v9688_v24, %v7764_v33  ;;  %v7879_v49 = vadd.f32 %v7495_v1, %v1251_v15  ;;  %v9690_v43 = vld [vmem:[#allocation69_spill] sm:$0xff]  ;;  %v7890_v15 = vld [vmem:[%s6425_s22 + $0x1b8] sm:$0xff]  ;;  %v7894_v24 = vld [vmem:[%s6425_s22 + $0x1b0] sm:$0xff] }
 0x40b   : > { %4139 = vmatprep.mubr.f32.mxu0 %v4004_v58  ;;  %v2180_v52 = vpop.xlane.xlu0 %2179  ;;  %v2365_v17 = vmul.f32 %v7869_v16, %v2301_v3  ;;  %v2364_v20 = vmul.f32 %v7873_v59, %v2300_v10  ;;  %v1257_v58 = vadd.f32 %v9690_v43, %v7758_v7  ;;  %v4006_v3 = vmul.f32 %v7859_v5, %v7859_v5  ;;  %v9697_v5 = vld [vmem:[#allocation55_spill] sm:$0xff] }
 0x40c   : > { %v5608_v63 = vpop.eup %5607  ;;  %9689 = vst [vmem:[#allocation48_spill] sm:$0xff] %v7879_v49  ;;  %v2214_v28 = vmul.f32 0.03125, %v2180_v52  ;;  %9693 = vst [vmem:[#allocation64_spill] sm:$0xff] %v7894_v24  ;;  %v4005_v43 = vmul.f32 %v7866_v35, %v7866_v35 }
 0x40d   : > { %2602 = vmatprep.mubr.f32.mxu1 %v2365_v17  ;;  %v2303_v10 = vmul.f32 %v5608_v63, %v9691_v60  ;;  %v2302_v57 = vmul.f32 %v5608_v63, %v9692_v34  ;;  %v7900_v34 = vadd.f32 %v7499_v32, %v1249_v30  ;;  %v7914_v32 = vld [vmem:[%s6425_s22 + $0x1c8] sm:$0xff] }
 0x40e   : > { %5613 = vrcp.f32 %v2214_v28  ;;  %2603 = vmatmul.mubr.f32.gmra.mrb[132].mxu1 %v2364_v20  ;;  %4140 = vmatmul.mubr.f32.gmra.mrb[180].mxu0 %v4003_v51  ;;  %v9694_v20 = vld [vmem:[#allocation68_spill] sm:$0xff]  ;;  %v4008_v51 = vmul.f32 %v7879_v49, %v7879_v49 }
 0x40f   : > { %v2183_v1 = vpop.xlane.xlu1 %2182  ;;  %4145 = vmatprep.mubr.f32.mxu0 %v4006_v3  ;;  %v2367_v52 = vmul.f32 %v7890_v15, %v2303_v10  ;;  %v2366_v17 = vmul.f32 %v7894_v24, %v2302_v57  ;;  %v1255_v63 = vadd.f32 %v9694_v20, %v7764_v33  ;;  %v7907_v3 = vadd.f32 %v7511_v12, %v1257_v58  ;;  %v9696_v57 = vld [vmem:[#allocation71_spill] sm:$0xff]  ;;  %v9702_v20 = vld [vmem:[#allocation57_spill] sm:$0xff] }
 0x410   : > { %v5610_v60 = vpop.eup %5609  ;;  %v2215_v28 = vmul.f32 0.03125, %v2183_v1  ;;  %v1263_v10 = vadd.f32 %v9696_v57, %v7758_v7  ;;  %v7918_v1 = vld [vmem:[%s6425_s22 + $0x1c0] sm:$0xff] }
 0x411   : > { %9695 = vst [vmem:[#allocation67_spill] sm:$0xff] %v7907_v3  ;;  %2607 = vmatprep.mubr.f32.mxu1 %v2367_v52  ;;  %v2305_v35 = vmul.f32 %v5610_v60, %v9697_v5  ;;  %v2304_v24 = vmul.f32 %v5610_v60, %v9698_v26  ;;  %v7922_v52 = vadd.f32 %v7515_v25, %v1255_v63  ;;  %v9699_v26 = vld [vmem:[#allocation70_spill] sm:$0xff]  ;;  %v9703_v25 = vld [vmem:[#allocation56_spill] sm:$0xff] }
 0x412   : > { %5615 = vrcp.f32 %v2215_v28  ;;  %2608 = vmatmul.mubr.f32.gmra.mrb[134].mxu1 %v2366_v17  ;;  %4146 = vmatmul.mubr.f32.gmra.mrb[182].mxu0 %v4005_v43  ;;  %v1261_v5 = vadd.f32 %v9699_v26, %v7764_v33  ;;  %v9700_v17 = vld [vmem:[#allocation73_spill] sm:$0xff]  ;;  %v4007_v60 = vmul.f32 %v7900_v34, %v7900_v34  ;;  %v7942_v26 = vld [vmem:[%s6425_s22 + $0x1d0] sm:$0xff] }
 0x413   : > { %4151 = vmatprep.mubr.f32.mxu0 %v4008_v51  ;;  %v2369_v30 = vmul.f32 %v7914_v32, %v2305_v35  ;;  %v2368_v12 = vmul.f32 %v7918_v1, %v2304_v24  ;;  %v1269_v43 = vadd.f32 %v9700_v17, %v7758_v7  ;;  %v7931_v35 = vadd.f32 %v7527_v29, %v1263_v10  ;;  %v7938_v51 = vld [vmem:[%s6425_s22 + $0x1d8] sm:$0xff]  ;;  %v9705_v17 = vld [vmem:[#allocation72_spill] sm:$0xff] }
 0x414   : > { %v5612_v58 = vpop.eup %5611  ;;  %v4010_v24 = vmul.f32 %v7907_v3, %v7907_v3 }
 0x415   : > { %9701 = vst [vmem:[#allocation51_spill] sm:$0xff] %v7931_v35  ;;  %2612 = vmatprep.mubr.f32.mxu1 %v2369_v30  ;;  %v2307_v28 = vmul.f32 %v5612_v58, %v9702_v20  ;;  %v2306_v63 = vmul.f32 %v5612_v58, %v9703_v25  ;;  %v7946_v30 = vadd.f32 %v7531_v56, %v1261_v5  ;;  %v9708_v25 = vld [vmem:[#allocation59_spill] sm:$0xff]  ;;  %v9709_v56 = vld [vmem:[#allocation58_spill] sm:$0xff] }
 0x416   : > { %2613 = vmatmul.mubr.f32.gmra.mrb[136].mxu1 %v2368_v12  ;;  %4152 = vmatmul.mubr.f32.gmra.mrb[184].mxu0 %v4007_v60  ;;  %v1267_v58 = vadd.f32 %v9705_v17, %v7764_v33  ;;  %v7951_v12 = vadd.f32 %v7543_v53, %v1269_v43  ;;  %v4009_v60 = vmul.f32 %v7922_v52, %v7922_v52  ;;  %v7962_v17 = vld [vmem:[%s6425_s22 + $0x1e8] sm:$0xff]  ;;  %v7966_v43 = vld [vmem:[%s6425_s22 + $0x1e0] sm:$0xff] }
 0x417   : > { %4157 = vmatprep.mubr.f32.mxu0 %v4010_v24  ;;  %v2371_v57 = vmul.f32 %v7938_v51, %v2307_v28  ;;  %v2370_v29 = vmul.f32 %v7942_v26, %v2306_v63  ;;  %9704 = vst [vmem:[#allocation50_spill] sm:$0xff] %v7946_v30  ;;  %v9707_v24 = vld [vmem:[#allocation75_spill] sm:$0xff]  ;;  %v4012_v28 = vmul.f32 %v7931_v35, %v7931_v35 }
 0x418   : > { %v5614_v10 = vpop.eup %5613  ;;  %9706 = vst [vmem:[#allocation66_spill] sm:$0xff] %v7951_v12  ;;  %v1275_v20 = vadd.f32 %v9707_v24, %v7758_v7  ;;  %v7970_v35 = vadd.f32 %v7547_v40, %v1267_v58  ;;  %v9714_v40 = vld [vmem:[#allocation60_spill] sm:$0xff] }
 0x419   : > { %2617 = vmatprep.mubr.f32.mxu1 %v2371_v57  ;;  %v2309_v63 = vmul.f32 %v5614_v10, %v9708_v25  ;;  %v2308_v5 = vmul.f32 %v5614_v10, %v9709_v56  ;;  %v9710_v25 = vld [vmem:[#allocation74_spill] sm:$0xff] }
 0x41a   : > { %2618 = vmatmul.mubr.f32.gmra.mrb[138].mxu1 %v2370_v29  ;;  %4158 = vmatmul.mubr.f32.gmra.mrb[186].mxu0 %v4009_v60  ;;  %v1273_v10 = vadd.f32 %v9710_v25, %v7764_v33  ;;  %v4011_v29 = vmul.f32 %v7946_v30, %v7946_v30  ;;  %v4014_v60 = vmul.f32 %v7951_v12, %v7951_v12  ;;  %v7986_v25 = vld [vmem:[%s6425_s22 + $0x1f8] sm:$0xff]  ;;  %v7990_v30 = vld [vmem:[%s6425_s22 + $0x1f0] sm:$0xff] }
 0x41b   : > { %4163 = vmatprep.mubr.f32.mxu0 %v4012_v28  ;;  %v2373_v53 = vmul.f32 %v7962_v17, %v2309_v63  ;;  %v2372_v24 = vmul.f32 %v7966_v43, %v2308_v5  ;;  %v7979_v28 = vadd.f32 %v7559_v4, %v1275_v20  ;;  %v9712_v63 = vld [vmem:[#allocation77_spill] sm:$0xff] }
 0x41c   : > { %v5616_v57 = vpop.eup %5615  ;;  %v1281_v56 = vadd.f32 %v9712_v63, %v7758_v7  ;;  %v9713_v5 = vld [vmem:[#allocation61_spill] sm:$0xff]  ;;  %v7994_v20 = vadd.f32 %v7563_v27, %v1273_v10  ;;  %v9718_v10 = vld [vmem:[#allocation78_spill] sm:$0xff] }
 0x41d   : > { %9711 = vst [vmem:[#allocation69_spill] sm:$0xff] %v7979_v28  ;;  %2622 = vmatprep.mubr.f32.mxu1 %v2373_v53  ;;  %v2311_v3 = vmul.f32 %v5616_v57, %v9713_v5  ;;  %v2310_v58 = vmul.f32 %v5616_v57, %v9714_v40  ;;  %v9715_v53 = vld [vmem:[#allocation76_spill] sm:$0xff]  ;;  %v4013_v57 = vmul.f32 %v7970_v35, %v7970_v35 }
 0x41e   : > { %2623 = vmatmul.mubr.f32.gmra.mrb[140].mxu1 %v2372_v24  ;;  %4164 = vmatmul.mubr.f32.gmra.mrb[188].mxu0 %v4011_v29  ;;  %v1279_v63 = vadd.f32 %v9715_v53, %v7764_v33  ;;  %v8001_v24 = vadd.f32 %v7575_v36, %v1281_v56  ;;  %v9717_v29 = vld [vmem:[#allocation79_spill] sm:$0xff]  ;;  %v1285_v5 = vadd.f32 %v9718_v10, %v7764_v33 }
 0x41f   : > { %4169 = vmatprep.mubr.f32.mxu0 %v4014_v60  ;;  %v2375_v49 = vmul.f32 %v7986_v25, %v2311_v3  ;;  %v2374_v4 = vmul.f32 %v7990_v30, %v2310_v58  ;;  %v1287_v60 = vadd.f32 %v9717_v29, %v7758_v7  ;;  %v4016_v3 = vmul.f32 %v7979_v28, %v7979_v28 }
 0x420   : > { %9716 = vst [vmem:[#allocation53_spill] sm:$0xff] %v8001_v24  ;;  %v8008_v27 = vadd.f32 %v7579_v14, %v1279_v63  ;;  %v4015_v36 = vmul.f32 %v7994_v20, %v7994_v20  ;;  %v4018_v58 = vmul.f32 %v8001_v24, %v8001_v24  ;;  %v8022_v14 = vadd.f32 %v7595_v55, %v1285_v5 }
 0x421   : > { %2627 = vmatprep.mubr.f32.mxu1 %v2375_v49  ;;  %v8015_v56 = vadd.f32 %v7591_v0, %v1287_v60  ;;  %v9720_v49 = vld [vmem:[#allocation81_spill] sm:$0xff] }
 0x422   : > { %2628 = vmatmul.mubr.f32.gmra.mrb[142].mxu1 %v2374_v4  ;;  %4170 = vmatmul.mubr.f32.gmra.mrb[190].mxu0 %v4013_v57  ;;  %v1293_v40 = vadd.f32 %v9720_v49, %v7758_v7  ;;  %v9721_v4 = vld [vmem:[#allocation80_spill] sm:$0xff]  ;;  %v4017_v63 = vmul.f32 %v8008_v27, %v8008_v27  ;;  %v9723_v57 = vld [vmem:[#allocation13_spill] sm:$0xff]  ;;  %v4019_v5 = vmul.f32 %v8022_v14, %v8022_v14 }
 0x423   : > { %4175 = vmatprep.mubr.f32.mxu0 %v4016_v3  ;;  %9719 = vst [vmem:[#allocation52_spill] sm:$0xff] %v8015_v56  ;;  %v1291_v53 = vadd.f32 %v9721_v4, %v7764_v33  ;;  %v1299_v29 = vadd.f32 %v9723_v57, %v7758_v7  ;;  %v4020_v60 = vmul.f32 %v8015_v56, %v8015_v56  ;;  %v9724_v3 = vld [vmem:[#allocation12_spill] sm:$0xff] }
 0x424   : > { %v8029_v0 = vadd.f32 %v7607_v45, %v1293_v40  ;;  %v1297_v10 = vadd.f32 %v9724_v3, %v7764_v33 }
 0x425   : > { %v8036_v55 = vadd.f32 %v7611_v46, %v1291_v53  ;;  %v8043_v45 = vadd.f32 %v7623_v18, %v1299_v29 }
 0x426   : > { %4176 = vmatmul.mubr.f32.gmra.mrb[192].mxu0 %v4015_v36  ;;  %9722 = vst [vmem:[#allocation68_spill] sm:$0xff] %v8029_v0  ;;  %v9726_v36 = vld [vmem:[#allocation15_spill] sm:$0xff]  ;;  %v4022_v40 = vmul.f32 %v8029_v0, %v8029_v0  ;;  %v8050_v46 = vadd.f32 %v7627_v44, %v1297_v10 }
 0x427   : > { %4181 = vmatprep.mubr.f32.mxu0 %v4018_v58  ;;  %9725 = vst [vmem:[#allocation71_spill] sm:$0xff] %v8043_v45  ;;  %v1305_v49 = vadd.f32 %v9726_v36, %v7758_v7  ;;  %v9727_v58 = vld [vmem:[#allocation14_spill] sm:$0xff]  ;;  %v4021_v53 = vmul.f32 %v8036_v55, %v8036_v55  ;;  %v4024_v29 = vmul.f32 %v8043_v45, %v8043_v45 }
 0x428   : > { %v1303_v4 = vadd.f32 %v9727_v58, %v7764_v33  ;;  %v4023_v10 = vmul.f32 %v8050_v46, %v8050_v46 }
 0x429   : > { %v8057_v18 = vadd.f32 %v7639_v13, %v1305_v49 }
 0x42a   : > { %4182 = vmatmul.mubr.f32.gmra.mrb[194].mxu0 %v4017_v63  ;;  %v9729_v63 = vld [vmem:[#allocation17_spill] sm:$0xff]  ;;  %v8064_v44 = vadd.f32 %v7643_v23, %v1303_v4 }
 0x42b   : > { %4187 = vmatprep.mubr.f32.mxu0 %v4020_v60  ;;  %9728 = vst [vmem:[#allocation55_spill] sm:$0xff] %v8057_v18  ;;  %v1311_v57 = vadd.f32 %v9729_v63, %v7758_v7  ;;  %v9730_v60 = vld [vmem:[#allocation16_spill] sm:$0xff]  ;;  %v4026_v49 = vmul.f32 %v8057_v18, %v8057_v18 }
 0x42c   : > { %v1309_v3 = vadd.f32 %v9730_v60, %v7764_v33  ;;  %v4025_v4 = vmul.f32 %v8064_v44, %v8064_v44 }
 0x42d   : > { %v8071_v13 = vadd.f32 %v7655_v54, %v1311_v57 }
 0x42e   : > { %4188 = vmatmul.mubr.f32.gmra.mrb[196].mxu0 %v4019_v5  ;;  %v9732_v5 = vld [vmem:[#allocation19_spill] sm:$0xff]  ;;  %v8078_v23 = vadd.f32 %v7659_v11, %v1309_v3 }
 0x42f   : > { %4193 = vmatprep.mubr.f32.mxu0 %v4022_v40  ;;  %9731 = vst [vmem:[#allocation54_spill] sm:$0xff] %v8071_v13  ;;  %v1317_v36 = vadd.f32 %v9732_v5, %v7758_v7  ;;  %v9733_v40 = vld [vmem:[#allocation18_spill] sm:$0xff]  ;;  %v4028_v57 = vmul.f32 %v8071_v13, %v8071_v13 }
 0x430   : > { %v1315_v58 = vadd.f32 %v9733_v40, %v7764_v33  ;;  %v4027_v3 = vmul.f32 %v8078_v23, %v8078_v23 }
 0x431   : > { %v8085_v54 = vadd.f32 %v7671_v2, %v1317_v36 }
 0x432   : > { %4194 = vmatmul.mubr.f32.gmra.mrb[198].mxu0 %v4021_v53  ;;  %v9735_v53 = vld [vmem:[#allocation21_spill] sm:$0xff]  ;;  %v8092_v11 = vadd.f32 %v7675_v19, %v1315_v58 }
 0x433   : > { %4199 = vmatprep.mubr.f32.mxu0 %v4024_v29  ;;  %9734 = vst [vmem:[#allocation70_spill] sm:$0xff] %v8085_v54  ;;  %v1323_v63 = vadd.f32 %v9735_v53, %v7758_v7  ;;  %v9736_v29 = vld [vmem:[#allocation20_spill] sm:$0xff]  ;;  %v4030_v36 = vmul.f32 %v8085_v54, %v8085_v54 }
 0x434   : > { %v1321_v60 = vadd.f32 %v9736_v29, %v7764_v33  ;;  %v4029_v58 = vmul.f32 %v8092_v11, %v8092_v11 }
 0x435   : > { %v8099_v2 = vadd.f32 %v7687_v31, %v1323_v63 }
 0x436   : > { %4200 = vmatmul.mubr.f32.gmra.mrb[200].mxu0 %v4023_v10  ;;  %v9738_v10 = vld [vmem:[#allocation23_spill] sm:$0xff]  ;;  %v8106_v19 = vadd.f32 %v7691_v39, %v1321_v60 }
 0x437   : > { %4205 = vmatprep.mubr.f32.mxu0 %v4026_v49  ;;  %9737 = vst [vmem:[#allocation73_spill] sm:$0xff] %v8099_v2  ;;  %v1329_v5 = vadd.f32 %v9738_v10, %v7758_v7  ;;  %v9739_v49 = vld [vmem:[#allocation22_spill] sm:$0xff]  ;;  %v4032_v63 = vmul.f32 %v8099_v2, %v8099_v2 }
 0x438   : > { %v1327_v40 = vadd.f32 %v9739_v49, %v7764_v33  ;;  %v4031_v60 = vmul.f32 %v8106_v19, %v8106_v19 }
 0x439   : > { %v8113_v31 = vadd.f32 %v7702_v42, %v1329_v5 }
 0x43a   : > { %4206 = vmatmul.mubr.f32.gmra.mrb[202].mxu0 %v4025_v4  ;;  %v9741_v4 = vld [vmem:[#allocation25_spill] sm:$0xff]  ;;  %v8120_v39 = vadd.f32 %v7706_v41, %v1327_v40 }
 0x43b   : > { %4211 = vmatprep.mubr.f32.mxu0 %v4028_v57  ;;  %9740 = vst [vmem:[#allocation57_spill] sm:$0xff] %v8113_v31  ;;  %v1335_v53 = vadd.f32 %v9741_v4, %v7758_v7  ;;  %v9742_v57 = vld [vmem:[#allocation24_spill] sm:$0xff]  ;;  %v4034_v5 = vmul.f32 %v8113_v31, %v8113_v31 }
 0x43c   : > { %v1333_v29 = vadd.f32 %v9742_v57, %v7764_v33  ;;  %v4033_v40 = vmul.f32 %v8120_v39, %v8120_v39  ;;  %v9749_v57 = vld [vmem:[#allocation28_spill] sm:$0xff] }
 0x43d   : > { %v8127_v42 = vadd.f32 %v7716_v9, %v1335_v53 }
 0x43e   : > { %4212 = vmatmul.mubr.f32.gmra.mrb[204].mxu0 %v4027_v3  ;;  %v9744_v3 = vld [vmem:[#allocation27_spill] sm:$0xff]  ;;  %v8134_v41 = vadd.f32 %v7720_v8, %v1333_v29  ;;  %v1345_v29 = vadd.f32 %v9749_v57, %v7764_v33 }
 0x43f   : > { %4217 = vmatprep.mubr.f32.mxu0 %v4030_v36  ;;  %9743 = vst [vmem:[#allocation56_spill] sm:$0xff] %v8127_v42  ;;  %v1341_v10 = vadd.f32 %v9744_v3, %v7758_v7  ;;  %v9745_v36 = vld [vmem:[#allocation26_spill] sm:$0xff]  ;;  %v4036_v53 = vmul.f32 %v8127_v42, %v8127_v42  ;;  %v9751_v3 = vld [vmem:[#allocation31_spill] sm:$0xff] }
 0x440   : > { %v1339_v49 = vadd.f32 %v9745_v36, %v7764_v33  ;;  %v9752_v36 = vld [vmem:[#allocation89_spill] sm:$0xff] }
 0x441   : > { %v8141_v9 = vadd.f32 %v7730_v37, %v1341_v10  ;;  %v1353_v10 = vadd.f32 %v9751_v3, %v7758_v7 }
 0x442   : > { %4218 = vmatmul.mubr.f32.gmra.mrb[206].mxu0 %v4029_v58  ;;  %v9747_v58 = vld [vmem:[#allocation29_spill] sm:$0xff] }
 0x443   : > { %4223 = vmatprep.mubr.f32.mxu0 %v4032_v63  ;;  %9746 = vst [vmem:[#allocation72_spill] sm:$0xff] %v8141_v9  ;;  %v1347_v4 = vadd.f32 %v9747_v58, %v7758_v7  ;;  %v9748_v63 = vld [vmem:[#allocation87_spill] sm:$0xff] }
 0x444   : > { %v8148_v8 = vadd.f32 %v9748_v63, %v1339_v49  ;;  %v8162_v49 = vadd.f32 %v9752_v36, %v1345_v29 }
 0x445   : > { %v8155_v37 = vadd.f32 %v7745_v50, %v1347_v4  ;;  %v8169_v50 = vadd.f32 %v7767_v6, %v1353_v10  ;;  %v9755_v4 = vld [vmem:[#allocation33_spill] sm:$0xff]  ;;  %v9758_v10 = vld [vmem:[#allocation35_spill] sm:$0xff] }
 0x446   : > { %4224 = vmatmul.mubr.f32.gmra.mrb[208].mxu0 %v4031_v60  ;;  %v4035_v60 = vmul.f32 %v8134_v41, %v8134_v41  ;;  %v1359_v63 = vadd.f32 %v9755_v4, %v7758_v7  ;;  %v1365_v36 = vadd.f32 %v9758_v10, %v7758_v7 }
 0x447   : > { %4229 = vmatprep.mubr.f32.mxu0 %v4034_v5  ;;  %9750 = vst [vmem:[#allocation75_spill] sm:$0xff] %v8155_v37  ;;  %v4038_v5 = vmul.f32 %v8141_v9, %v8141_v9  ;;  %9754 = vst [vmem:[#allocation59_spill] sm:$0xff] %v8169_v50  ;;  %v4040_v57 = vmul.f32 %v8155_v37, %v8155_v37 }
 0x448   : > { %v8183_v6 = vadd.f32 %v7781_v38, %v1359_v63  ;;  %v8197_v38 = vadd.f32 %v7799_v47, %v1365_v36  ;;  %v9762_v63 = vld [vmem:[#allocation37_spill] sm:$0xff]  ;;  %v9765_v36 = vld [vmem:[#allocation39_spill] sm:$0xff] }
 0x44a   : > { %4230 = vmatmul.mubr.f32.gmra.mrb[210].mxu0 %v4033_v40  ;;  %v9753_v40 = vld [vmem:[#allocation30_spill] sm:$0xff]  ;;  %9757 = vst [vmem:[#allocation58_spill] sm:$0xff] %v8183_v6  ;;  %9761 = vst [vmem:[#allocation74_spill] sm:$0xff] %v8197_v38  ;;  %v4044_v10 = vmul.f32 %v8183_v6, %v8183_v6 }
 0x44b   : > { %4235 = vmatprep.mubr.f32.mxu0 %v4036_v53  ;;  %v1351_v58 = vadd.f32 %v9753_v40, %v7764_v33  ;;  %v4037_v53 = vmul.f32 %v8148_v8, %v8148_v8  ;;  %v4042_v40 = vmul.f32 %v8169_v50, %v8169_v50 }
 0x44d   : > { %v8176_v29 = vadd.f32 %v7771_v21, %v1351_v58  ;;  %v9760_v58 = vld [vmem:[#allocation34_spill] sm:$0xff] }
 0x44e   : > { %4236 = vmatmul.mubr.f32.gmra.mrb[212].mxu0 %v4035_v60  ;;  %v9756_v60 = vld [vmem:[#allocation32_spill] sm:$0xff]  ;;  %v1363_v4 = vadd.f32 %v9760_v58, %v7764_v33  ;;  %v1377_v58 = vadd.f32 %v9765_v36, %v7758_v7 }
 0x44f   : > { %4241 = vmatprep.mubr.f32.mxu0 %v4038_v5  ;;  %v1357_v3 = vadd.f32 %v9756_v60, %v7764_v33  ;;  %v4039_v5 = vmul.f32 %v8162_v49, %v8162_v49  ;;  %v1371_v60 = vadd.f32 %v9762_v63, %v7758_v7  ;;  %v4046_v63 = vmul.f32 %v8197_v38, %v8197_v38 }
 0x451   : > { %v8211_v47 = vadd.f32 %v7820_v61, %v1371_v60  ;;  %v8225_v61 = vadd.f32 %v7844_v62, %v1377_v58  ;;  %v9769_v60 = vld [vmem:[#allocation41_spill] sm:$0xff]  ;;  %v9772_v58 = vld [vmem:[#allocation82_spill] sm:$0xff] }
 0x452   : > { %4242 = vmatmul.mubr.f32.gmra.mrb[214].mxu0 %v4037_v53  ;;  %v9759_v53 = vld [vmem:[#allocation92_spill] sm:$0xff]  ;;  %v1383_v36 = vadd.f32 %v9769_v60, %v7758_v7 }
 0x453   : > { %4247 = vmatprep.mubr.f32.mxu0 %v4040_v57  ;;  %v8190_v21 = vadd.f32 %v9759_v53, %v1357_v3  ;;  %v4041_v57 = vmul.f32 %v8176_v29, %v8176_v29  ;;  %v8204_v3 = vadd.f32 %v7803_v48, %v1363_v4  ;;  %9764 = vst [vmem:[#allocation77_spill] sm:$0xff] %v8211_v47  ;;  %v9767_v4 = vld [vmem:[#allocation38_spill] sm:$0xff]  ;;  %9768 = vst [vmem:[#allocation61_spill] sm:$0xff] %v8225_v61 }
 0x454   : > { %v4048_v38 = vmul.f32 %v8211_v47, %v8211_v47  ;;  %v8239_v62 = vadd.f32 %v7869_v16, %v1383_v36  ;;  %v4050_v60 = vmul.f32 %v8225_v61, %v8225_v61  ;;  %v9775_v36 = vld [vmem:[#allocation84_spill] sm:$0xff] }
 0x455   : > { %v4043_v53 = vmul.f32 %v8190_v21, %v8190_v21 }
 0x456   : > { %4248 = vmatmul.mubr.f32.gmra.mrb[216].mxu0 %v4039_v5  ;;  %v9763_v5 = vld [vmem:[#allocation36_spill] sm:$0xff]  ;;  %9771 = vst [vmem:[#allocation60_spill] sm:$0xff] %v8239_v62 }
 0x457   : > { %4253 = vmatprep.mubr.f32.mxu0 %v4042_v40  ;;  %v1369_v40 = vadd.f32 %v9763_v5, %v7764_v33  ;;  %v4045_v5 = vmul.f32 %v8204_v3, %v8204_v3 }
 0x45a   : > { %4254 = vmatmul.mubr.f32.gmra.mrb[218].mxu0 %v4041_v57  ;;  %v9766_v57 = vld [vmem:[#allocation46_spill] sm:$0xff] }
 0x45b   : > { %4259 = vmatprep.mubr.f32.mxu0 %v4044_v10  ;;  %v8218_v48 = vadd.f32 %v9766_v57, %v1369_v40  ;;  %v1375_v10 = vadd.f32 %v9767_v4, %v7764_v33  ;;  %v1389_v4 = vadd.f32 %v9772_v58, %v7758_v7  ;;  %v4052_v58 = vmul.f32 %v8239_v62, %v8239_v62 }
 0x45d   : > { %v8232_v40 = vadd.f32 %v7848_v22, %v1375_v10  ;;  %v4047_v57 = vmul.f32 %v8218_v48, %v8218_v48  ;;  %v8253_v16 = vadd.f32 %v7890_v15, %v1389_v4  ;;  %v9779_v4 = vld [vmem:[#allocation86_spill] sm:$0xff] }
 0x45e   : > { %4260 = vmatmul.mubr.f32.gmra.mrb[220].mxu0 %v4043_v53  ;;  %v9770_v53 = vld [vmem:[#allocation40_spill] sm:$0xff] }
 0x45f   : > { %4265 = vmatprep.mubr.f32.mxu0 %v4046_v63  ;;  %v1381_v63 = vadd.f32 %v9770_v53, %v7764_v33  ;;  %9774 = vst [vmem:[#allocation76_spill] sm:$0xff] %v8253_v16  ;;  %v1395_v53 = vadd.f32 %v9775_v36, %v7758_v7  ;;  %v1401_v36 = vadd.f32 %v9779_v4, %v7758_v7 }
 0x460   : > { %v4054_v62 = vmul.f32 %v8253_v16, %v8253_v16 }
 0x461   : > { %v8246_v22 = vadd.f32 %v7873_v59, %v1381_v63  ;;  %v9777_v63 = vld [vmem:[#allocation83_spill] sm:$0xff]  ;;  %v8267_v15 = vadd.f32 %v7914_v32, %v1395_v53  ;;  %v8281_v32 = vadd.f32 %v7938_v51, %v1401_v36 }
 0x462   : > { %4266 = vmatmul.mubr.f32.gmra.mrb[222].mxu0 %v4045_v5  ;;  %v4049_v5 = vmul.f32 %v8232_v40, %v8232_v40  ;;  %v9782_v53 = vld [vmem:[#allocation43_spill] sm:$0xff] }
 0x463   : > { %4271 = vmatprep.mubr.f32.mxu0 %v4048_v38  ;;  %v9773_v38 = vld [vmem:[#allocation42_spill] sm:$0xff]  ;;  %9778 = vst [vmem:[#allocation79_spill] sm:$0xff] %v8267_v15  ;;  %9781 = vst [vmem:[#allocation78_spill] sm:$0xff] %v8281_v32  ;;  %v4056_v4 = vmul.f32 %v8267_v15, %v8267_v15  ;;  %v9785_v36 = vld [vmem:[#allocation91_spill] sm:$0xff] }
 0x464   : > { %v1387_v10 = vadd.f32 %v9773_v38, %v7764_v33  ;;  %v4051_v38 = vmul.f32 %v8246_v22, %v8246_v22 }
 0x466   : > { %4272 = vmatmul.mubr.f32.gmra.mrb[224].mxu0 %v4047_v57  ;;  %v9776_v57 = vld [vmem:[#allocation64_spill] sm:$0xff] }
 0x467   : > { %4277 = vmatprep.mubr.f32.mxu0 %v4050_v60  ;;  %v8260_v59 = vadd.f32 %v9776_v57, %v1387_v10  ;;  %v1393_v60 = vadd.f32 %v9777_v63, %v7764_v33  ;;  %v1407_v63 = vadd.f32 %v9782_v53, %v7758_v7  ;;  %v4058_v53 = vmul.f32 %v8281_v32, %v8281_v32 }
 0x469   : > { %v8274_v10 = vadd.f32 %v7918_v1, %v1393_v60  ;;  %v4053_v57 = vmul.f32 %v8260_v59, %v8260_v59  ;;  %v8295_v51 = vadd.f32 %v7962_v17, %v1407_v63 }
 0x46a   : > { %4278 = vmatmul.mubr.f32.gmra.mrb[226].mxu0 %v4049_v5  ;;  %v9780_v5 = vld [vmem:[#allocation85_spill] sm:$0xff] }
 0x46b   : > { %4283 = vmatprep.mubr.f32.mxu0 %v4052_v58  ;;  %v1399_v58 = vadd.f32 %v9780_v5, %v7764_v33  ;;  %9784 = vst [vmem:[#allocation81_spill] sm:$0xff] %v8295_v51  ;;  %v1413_v5 = vadd.f32 %v9785_v36, %v7758_v7  ;;  %v4060_v7 = vmul.f32 %v8295_v51, %v8295_v51 }
 0x46d   : > { %v8288_v1 = vadd.f32 %v7942_v26, %v1399_v58  ;;  %v9786_v58 = vld [vmem:[#allocation90_spill] sm:$0xff]  ;;  %v8309_v17 = vadd.f32 %v7986_v25, %v1413_v5 }
 0x46e   : > { %4284 = vmatmul.mubr.f32.gmra.mrb[228].mxu0 %v4051_v38  ;;  %v4055_v38 = vmul.f32 %v8274_v10, %v8274_v10 }
 0x46f   : > { %4289 = vmatprep.mubr.f32.mxu0 %v4054_v62  ;;  %v9783_v62 = vld [vmem:[#allocation88_spill] sm:$0xff]  ;;  %9787 = vst [vmem:[#allocation80_spill] sm:$0xff] %v8309_v17  ;;  %v4062_v36 = vmul.f32 %v8309_v17, %v8309_v17 }
 0x470   : > { %v1405_v60 = vadd.f32 %v9783_v62, %v7764_v33 }
 0x472   : > { %4290 = vmatmul.mubr.f32.gmra.mrb[230].mxu0 %v4053_v57  ;;  %v8302_v26 = vadd.f32 %v7966_v43, %v1405_v60  ;;  %v1411_v57 = vadd.f32 %v9786_v58, %v7764_v33 }
 0x473   : > { %4295 = vmatprep.mubr.f32.mxu0 %v4056_v4  ;;  %v4057_v4 = vmul.f32 %v8288_v1, %v8288_v1 }
 0x474   : > { %v8318_v33 = vadd.f32 %v7990_v30, %v1411_v57  ;;  %v4059_v25 = vmul.f32 %v8302_v26, %v8302_v26 }
 0x476   : > { %4296 = vmatmul.mubr.f32.gmra.mrb[232].mxu0 %v4055_v38  ;;  %v4061_v58 = vmul.f32 %v8318_v33, %v8318_v33 }
 0x477   : > { %4301 = vmatprep.mubr.f32.mxu0 %v4058_v53 }
 0x479   : > { %v8311_v63 = vpop.f32.mrb[128].mxu0 }
 0x47a   : > { %v2633_v62 = vmul.f32 %v8311_v63, %v8311_v63  ;;  %v2476_v43 = vpop.f32.mrb[129].mxu0  ;;  %4302 = vmatmul.mubr.f32.gmra.mrb[234].mxu0 %v4057_v4 }
 0x47b   : > { %4307 = vmatprep.mubr.f32.mxu0 %v4060_v7 }
 0x47c   : > { %v2666_v60 = vsel %vm2665_vm0, %v2633_v62, 0.0 }
 0x47d   : > { %v8323_v38 = vpop.f32.mrb[130].mxu0  ;;  %2667 = vadd.xlane.f32.xlu0 %v2666_v60 }
 0x47e   : > { %v2634_v5 = vmul.f32 %v8323_v38, %v8323_v38  ;;  %v2481_v53 = vpop.f32.mrb[131].mxu0  ;;  %4308 = vmatmul.mubr.f32.gmra.mrb[236].mxu0 %v4059_v25 }
 0x47f   : > { %4313 = vmatprep.mubr.f32.mxu0 %v4062_v36 }
 0x480   : > { %v2669_v30 = vsel %vm2665_vm0, %v2634_v5, 0.0 }
 0x481   : > { %v8332_v57 = vpop.f32.mrb[132].mxu0  ;;  %2670 = vadd.xlane.f32.xlu1 %v2669_v30 }
 0x482   : > { %v2635_v4 = vmul.f32 %v8332_v57, %v8332_v57  ;;  %v2486_v7 = vpop.f32.mrb[133].mxu0  ;;  %4314 = vmatmul.mubr.f32.gmra.mrb[238].mxu0 %v4061_v58 }
 0x484   : > { %v2672_v62 = vsel %vm2665_vm0, %v2635_v4, 0.0  ;;  %v2858_v4 = vld [vmem:[%s9356_s5] sm:$0xff] }
 0x485   : > { %v8337_v43 = vpop.f32.mrb[134].mxu0  ;;  %2673 = vadd.xlane.f32.xlu0 %v2672_v62  ;;  %v2859_v62 = vld [vmem:[%s9356_s5 + $0x8] sm:$0xff] }
 0x486   : > { %v2636_v60 = vmul.f32 %v8337_v43, %v8337_v43  ;;  %v2491_v25 = vpop.f32.mrb[135].mxu0 }
 0x488   : > { %v2675_v36 = vsel %vm2665_vm0, %v2636_v60, 0.0 }
 0x489   : > { %v8342_v5 = vpop.f32.mrb[136].mxu0  ;;  %2676 = vadd.xlane.f32.xlu1 %v2675_v36  ;;  %v5237_v36 = vpack.c.bf16 %v2859_v62, %v2858_v4 }
 0x48a   : > { %v2637_v53 = vmul.f32 %v8342_v5, %v8342_v5  ;;  %v2496_v30 = vpop.f32.mrb[137].mxu0 }
 0x48b   : > { %5238 = vmatprep.subr.bf16.mxu1 %v5237_v36 }
 0x48c   : > { %v2678_v58 = vsel %vm2665_vm0, %v2637_v53, 0.0  ;;  %5240 = vmatpush3.bf16.msra.mxu1 %v5237_v36  ;;  %v2861_v36 = vld [vmem:[%s9356_s5 + $0x18] sm:$0xff] }
 0x48d   : > { %v8347_v7 = vpop.f32.mrb[138].mxu0  ;;  %2679 = vadd.xlane.f32.xlu0 %v2678_v58 }
 0x48e   : > { %v2638_v60 = vmul.f32 %v8347_v7, %v8347_v7  ;;  %v2501_v25 = vpop.f32.mrb[139].mxu0 }
 0x490   : > { %v2681_v30 = vsel %vm2665_vm0, %v2638_v60, 0.0  ;;  %v2860_v60 = vld [vmem:[%s9356_s5 + $0x10] sm:$0xff] }
 0x491   : > { %v8358_v53 = vpop.f32.mrb[140].mxu0  ;;  %2682 = vadd.xlane.f32.xlu1 %v2681_v30  ;;  %v5241_v30 = vpack.c.bf16 %v2861_v36, %v2860_v60 }
 0x492   : > { %v2639_v58 = vmul.f32 %v8358_v53, %v8358_v53  ;;  %v2506_v17 = vpop.f32.mrb[141].mxu0 }
 0x493   : > { %5242 = vmatprep.subr.bf16.mxu1 %v5241_v30 }
 0x494   : > { %v2684_v51 = vsel %vm2665_vm0, %v2639_v58, 0.0  ;;  %5244 = vmatpush3.bf16.msra.mxu1 %v5241_v30 }
 0x495   : > { %v8363_v32 = vpop.f32.mrb[142].mxu0  ;;  %2685 = vadd.xlane.f32.xlu0 %v2684_v51 }
 0x496   : > { %v2640_v25 = vmul.f32 %v8363_v32, %v8363_v32  ;;  %v2511_v4 = vpop.f32.mrb[143].mxu0 }
 0x498   : > { %v2687_v62 = vsel %vm2665_vm0, %v2640_v25, 0.0 }
 0x499   : > { %v8374_v17 = vpop.f32.mrb[144].mxu0  ;;  %2688 = vadd.xlane.f32.xlu1 %v2687_v62 }
 0x49a   : > { %v2641_v51 = vmul.f32 %v8374_v17, %v8374_v17  ;;  %v2516_v58 = vpop.f32.mrb[145].mxu0 }
 0x49c   : > { %v2690_v4 = vsel %vm2665_vm0, %v2641_v51, 0.0 }
 0x49d   : > { %v8379_v25 = vpop.f32.mrb[146].mxu0  ;;  %2691 = vadd.xlane.f32.xlu0 %v2690_v4 }
 0x49e   : > { %v2642_v15 = vmul.f32 %v8379_v25, %v8379_v25  ;;  %v2521_v16 = vpop.f32.mrb[147].mxu0 }
 0x4a0   : > { %v2693_v61 = vsel %vm2665_vm0, %v2642_v15, 0.0 }
 0x4a1   : > { %2694 = vadd.xlane.f32.xlu1 %v2693_v61  ;;  %v8384_v62 = vpop.f32.mrb[148].mxu0 }
 0x4a2   : > { %v2643_v60 = vmul.f32 %v8384_v62, %v8384_v62  ;;  %v2526_v36 = vpop.f32.mrb[149].mxu0 }
 0x4a4   : > { %v2696_v58 = vsel %vm2665_vm0, %v2643_v60, 0.0 }
 0x4a5   : > { %2697 = vadd.xlane.f32.xlu0 %v2696_v58  ;;  %v8389_v30 = vpop.f32.mrb[150].mxu0 }
 0x4a6   : > { %v2644_v51 = vmul.f32 %v8389_v30, %v8389_v30  ;;  %v2531_v4 = vpop.f32.mrb[151].mxu0 }
 0x4a8   : > { %v2699_v16 = vsel %vm2665_vm0, %v2644_v51, 0.0 }
 0x4a9   : > { %2700 = vadd.xlane.f32.xlu1 %v2699_v16  ;;  %v8394_v15 = vpop.f32.mrb[152].mxu0 }
 0x4aa   : > { %v2645_v61 = vmul.f32 %v8394_v15, %v8394_v15  ;;  %v2536_v47 = vpop.f32.mrb[153].mxu0 }
 0x4ac   : > { %v2702_v36 = vsel %vm2665_vm0, %v2645_v61, 0.0 }
 0x4ad   : > { %2703 = vadd.xlane.f32.xlu0 %v2702_v36  ;;  %v8399_v60 = vpop.f32.mrb[154].mxu0 }
 0x4ae   : > { %v2646_v58 = vmul.f32 %v8399_v60, %v8399_v60  ;;  %v2541_v6 = vpop.f32.mrb[155].mxu0 }
 0x4b0   : > { %v2705_v4 = vsel %vm2665_vm0, %v2646_v58, 0.0 }
 0x4b1   : > { %2706 = vadd.xlane.f32.xlu1 %v2705_v4  ;;  %v8404_v51 = vpop.f32.mrb[156].mxu0 }
 0x4b2   : > { %v2647_v16 = vmul.f32 %v8404_v51, %v8404_v51  ;;  %v2546_v50 = vpop.f32.mrb[157].mxu0 }
 0x4b4   : > { %v2708_v47 = vsel %vm2665_vm0, %v2647_v16, 0.0 }
 0x4b5   : > { %2709 = vadd.xlane.f32.xlu0 %v2708_v47  ;;  %v8409_v61 = vpop.f32.mrb[158].mxu0 }
 0x4b6   : > { %v2648_v36 = vmul.f32 %v8409_v61, %v8409_v61  ;;  %v2551_v37 = vpop.f32.mrb[159].mxu0 }
 0x4b8   : > { %v2711_v6 = vsel %vm2665_vm0, %v2648_v36, 0.0 }
 0x4b9   : > { %2712 = vadd.xlane.f32.xlu1 %v2711_v6  ;;  %v8414_v58 = vpop.f32.mrb[160].mxu0 }
 0x4ba   : > { %v2649_v4 = vmul.f32 %v8414_v58, %v8414_v58  ;;  %v2556_v9 = vpop.f32.mrb[161].mxu0 }
 0x4bc   : > { %v2714_v50 = vsel %vm2665_vm0, %v2649_v4, 0.0 }
 0x4bd   : > { %2715 = vadd.xlane.f32.xlu0 %v2714_v50  ;;  %v8419_v16 = vpop.f32.mrb[162].mxu0 }
 0x4be   : > { %v2650_v47 = vmul.f32 %v8419_v16, %v8419_v16  ;;  %v2561_v42 = vpop.f32.mrb[163].mxu0 }
 0x4c0   : > { %v2717_v37 = vsel %vm2665_vm0, %v2650_v47, 0.0 }
 0x4c1   : > { %2718 = vadd.xlane.f32.xlu1 %v2717_v37  ;;  %v8424_v36 = vpop.f32.mrb[164].mxu0 }
 0x4c2   : > { %v2651_v6 = vmul.f32 %v8424_v36, %v8424_v36  ;;  %v2566_v31 = vpop.f32.mrb[165].mxu0 }
 0x4c4   : > { %v2720_v9 = vsel %vm2665_vm0, %v2651_v6, 0.0 }
 0x4c5   : > { %2721 = vadd.xlane.f32.xlu0 %v2720_v9  ;;  %v8429_v4 = vpop.f32.mrb[166].mxu0 }
 0x4c6   : > { %v2652_v50 = vmul.f32 %v8429_v4, %v8429_v4  ;;  %v2571_v2 = vpop.f32.mrb[167].mxu0 }
 0x4c8   : > { %v2723_v42 = vsel %vm2665_vm0, %v2652_v50, 0.0 }
 0x4c9   : > { %2724 = vadd.xlane.f32.xlu1 %v2723_v42  ;;  %v8434_v47 = vpop.f32.mrb[168].mxu0 }
 0x4ca   : > { %v2653_v37 = vmul.f32 %v8434_v47, %v8434_v47  ;;  %v2576_v54 = vpop.f32.mrb[169].mxu0 }
 0x4cc   : > { %v2726_v31 = vsel %vm2665_vm0, %v2653_v37, 0.0 }
 0x4cd   : > { %2727 = vadd.xlane.f32.xlu0 %v2726_v31  ;;  %v8439_v6 = vpop.f32.mrb[170].mxu0 }
 0x4ce   : > { %v2654_v9 = vmul.f32 %v8439_v6, %v8439_v6  ;;  %v2581_v13 = vpop.f32.mrb[171].mxu0 }
 0x4d0   : > { %v2729_v2 = vsel %vm2665_vm0, %v2654_v9, 0.0 }
 0x4d1   : > { %2730 = vadd.xlane.f32.xlu1 %v2729_v2  ;;  %v8444_v50 = vpop.f32.mrb[172].mxu0 }
 0x4d2   : > { %9788 = vst [vmem:[#allocation13_spill] sm:$0xff] %v8444_v50  ;;  %v2655_v42 = vmul.f32 %v8444_v50, %v8444_v50  ;;  %v2586_v18 = vpop.f32.mrb[173].mxu0 }
 0x4d4   : > { %v2732_v54 = vsel %vm2665_vm0, %v2655_v42, 0.0 }
 0x4d5   : > { %2733 = vadd.xlane.f32.xlu0 %v2732_v54  ;;  %v8449_v37 = vpop.f32.mrb[174].mxu0 }
 0x4d6   : > { %9789 = vst [vmem:[#allocation12_spill] sm:$0xff] %v8449_v37  ;;  %v2656_v31 = vmul.f32 %v8449_v37, %v8449_v37  ;;  %v2591_v45 = vpop.f32.mrb[175].mxu0 }
 0x4d8   : > { %v2735_v13 = vsel %vm2665_vm0, %v2656_v31, 0.0 }
 0x4d9   : > { %2736 = vadd.xlane.f32.xlu1 %v2735_v13  ;;  %v8454_v9 = vpop.f32.mrb[128].mxu1  ;;  %v4129_v2 = vpop.f32.mrb[176].mxu0 }
 0x4da   : > { %9790 = vst [vmem:[#allocation15_spill] sm:$0xff] %v8454_v9  ;;  %v2657_v0 = vmul.f32 %v8454_v9, %v8454_v9  ;;  %v4320_v56 = vmax.f32 %v4129_v2, 1e-24  ;;  %v2596_v18 = vpop.f32.mrb[129].mxu1  ;;  %v8458_v24 = vpop.f32.mrb[177].mxu0 }
 0x4db   : > { %9791 = vst [vmem:[#allocation14_spill] sm:$0xff] %v8458_v24 }
 0x4dc   : > { %5617 = vrsqrt.f32 %v4320_v56  ;;  %v2738_v42 = vsel %vm2665_vm0, %v2657_v0, 0.0 }
 0x4dd   : > { %v4135_v54 = vpop.f32.mrb[178].mxu0  ;;  %2739 = vadd.xlane.f32.xlu0 %v2738_v42  ;;  %v8461_v28 = vpop.f32.mrb[130].mxu1 }
 0x4de   : > { %9792 = vst [vmem:[#allocation17_spill] sm:$0xff] %v8461_v28  ;;  %v4322_v45 = vmax.f32 %v4135_v54, 1e-24  ;;  %v2658_v31 = vmul.f32 %v8461_v28, %v8461_v28  ;;  %v2601_v13 = vpop.f32.mrb[131].mxu1  ;;  %v8465_v12 = vpop.f32.mrb[179].mxu0 }
 0x4df   : > { %9793 = vst [vmem:[#allocation16_spill] sm:$0xff] %v8465_v12 }
 0x4e0   : > { %5619 = vrsqrt.f32 %v4322_v45  ;;  %v2741_v2 = vsel %vm2665_vm0, %v2658_v31, 0.0 }
 0x4e1   : > { %v4141_v18 = vpop.f32.mrb[180].mxu0  ;;  %2742 = vadd.xlane.f32.xlu1 %v2741_v2  ;;  %v8468_v24 = vpop.f32.mrb[132].mxu1 }
 0x4e2   : > { %9794 = vst [vmem:[#allocation19_spill] sm:$0xff] %v8468_v24  ;;  %v4324_v56 = vmax.f32 %v4141_v18, 1e-24  ;;  %v2659_v0 = vmul.f32 %v8468_v24, %v8468_v24  ;;  %v2606_v42 = vpop.f32.mrb[133].mxu1  ;;  %v8472_v54 = vpop.f32.mrb[181].mxu0  ;;  %v9798_v24 = vld [vmem:[#allocation45_spill] sm:$0xff] }
 0x4e3   : > { %9795 = vst [vmem:[#allocation18_spill] sm:$0xff] %v8472_v54 }
 0x4e4   : > { %5621 = vrsqrt.f32 %v4324_v56  ;;  %v2744_v13 = vsel %vm2665_vm0, %v2659_v0, 0.0 }
 0x4e5   : > { %v4147_v28 = vpop.f32.mrb[182].mxu0  ;;  %2745 = vadd.xlane.f32.xlu0 %v2744_v13  ;;  %v8475_v45 = vpop.f32.mrb[134].mxu1 }
 0x4e6   : > { %9796 = vst [vmem:[#allocation21_spill] sm:$0xff] %v8475_v45  ;;  %v5618_v31 = vpop.eup %5617  ;;  %v4326_v12 = vmax.f32 %v4147_v28, 1e-24  ;;  %v2660_v2 = vmul.f32 %v8475_v45, %v8475_v45  ;;  %v2611_v18 = vpop.f32.mrb[135].mxu1 }
 0x4e7   : > { %v8479_v9 = vpop.f32.mrb[183].mxu0  ;;  %v4448_v37 = vmul.f32 %v5618_v31, %v9798_v24 }
 0x4e8   : > { %9797 = vst [vmem:[#allocation20_spill] sm:$0xff] %v8479_v9  ;;  %5623 = vrsqrt.f32 %v4326_v12  ;;  %v2747_v42 = vsel %vm2665_vm0, %v2660_v2, 0.0  ;;  %v9801_v12 = vld [vmem:[#allocation63_spill] sm:$0xff] }
 0x4e9   : > { %4581 = vst [vmem:[%s8485_s15] sm:$0xff] %v4448_v37  ;;  %v4153_v56 = vpop.f32.mrb[184].mxu0  ;;  %2748 = vadd.xlane.f32.xlu1 %v2747_v42  ;;  %v8488_v28 = vpop.f32.mrb[136].mxu1 }
 0x4ea   : > { %9799 = vst [vmem:[#allocation23_spill] sm:$0xff] %v8488_v28  ;;  %v5620_v0 = vpop.eup %5619  ;;  %v4328_v13 = vmax.f32 %v4153_v56, 1e-24  ;;  %v2661_v18 = vmul.f32 %v8488_v28, %v8488_v28  ;;  %v2616_v9 = vpop.f32.mrb[137].mxu1 }
 0x4eb   : > { %v8492_v24 = vpop.f32.mrb[185].mxu0  ;;  %v4450_v31 = vmul.f32 %v5620_v0, %v9801_v12 }
 0x4ec   : > { %9800 = vst [vmem:[#allocation22_spill] sm:$0xff] %v8492_v24  ;;  %5625 = vrsqrt.f32 %v4328_v13  ;;  %v2750_v2 = vsel %vm2665_vm0, %v2661_v18, 0.0  ;;  %v9804_v24 = vld [vmem:[#allocation62_spill] sm:$0xff] }
 0x4ed   : > { %4583 = vst [vmem:[%s8485_s15 + $0x10] sm:$0xff] %v4450_v31  ;;  %v4159_v37 = vpop.f32.mrb[186].mxu0  ;;  %2751 = vadd.xlane.f32.xlu0 %v2750_v2  ;;  %v8497_v42 = vpop.f32.mrb[138].mxu1 }
 0x4ee   : > { %9802 = vst [vmem:[#allocation25_spill] sm:$0xff] %v8497_v42  ;;  %v5622_v54 = vpop.eup %5621  ;;  %v4330_v45 = vmax.f32 %v4159_v37, 1e-24  ;;  %v2662_v56 = vmul.f32 %v8497_v42, %v8497_v42  ;;  %v2621_v28 = vpop.f32.mrb[139].mxu1 }
 0x4ef   : > { %v8501_v9 = vpop.f32.mrb[187].mxu0  ;;  %v4452_v50 = vmul.f32 %v5622_v54, %v9804_v24 }
 0x4f0   : > { %9803 = vst [vmem:[#allocation24_spill] sm:$0xff] %v8501_v9  ;;  %5627 = vrsqrt.f32 %v4330_v45  ;;  %v2753_v0 = vsel %vm2665_vm0, %v2662_v56, 0.0  ;;  %v9806_v9 = vld [vmem:[#allocation49_spill] sm:$0xff] }
 0x4f1   : > { %4585 = vst [vmem:[%s8485_s15 + $0x20] sm:$0xff] %v4452_v50  ;;  %v4165_v13 = vpop.f32.mrb[188].mxu0  ;;  %2754 = vadd.xlane.f32.xlu1 %v2753_v0  ;;  %v8506_v18 = vpop.f32.mrb[140].mxu1 }
 0x4f2   : > { %v5624_v12 = vpop.eup %5623  ;;  %v4332_v31 = vmax.f32 %v4165_v13, 1e-24  ;;  %v2663_v2 = vmul.f32 %v8506_v18, %v8506_v18  ;;  %v2626_v37 = vpop.f32.mrb[141].mxu1 }
 0x4f3   : > { %v8510_v28 = vpop.f32.mrb[189].mxu0  ;;  %v4454_v42 = vmul.f32 %v5624_v12, %v9806_v9 }
 0x4f4   : > { %9805 = vst [vmem:[#allocation27_spill] sm:$0xff] %v8510_v28  ;;  %5629 = vrsqrt.f32 %v4332_v31  ;;  %v2756_v54 = vsel %vm2665_vm0, %v2663_v2, 0.0 }
 0x4f5   : > { %4587 = vst [vmem:[%s8485_s15 + $0x30] sm:$0xff] %v4454_v42  ;;  %v4171_v50 = vpop.f32.mrb[190].mxu0  ;;  %2757 = vadd.xlane.f32.xlu0 %v2756_v54  ;;  %v8515_v45 = vpop.f32.mrb[142].mxu1 }
 0x4f6   : > { %v5626_v24 = vpop.eup %5625  ;;  %v4334_v56 = vmax.f32 %v4171_v50, 1e-24  ;;  %v2664_v0 = vmul.f32 %v8515_v45, %v8515_v45  ;;  %v2631_v13 = vpop.f32.mrb[143].mxu1 }
 0x4f7   : > { %v8519_v37 = vpop.f32.mrb[191].mxu0  ;;  %v4456_v28 = vmul.f32 %v5626_v24, %v7900_v34  ;;  %v9808_v24 = vld [vmem:[#allocation50_spill] sm:$0xff] }
 0x4f8   : > { %9807 = vst [vmem:[#allocation26_spill] sm:$0xff] %v8519_v37  ;;  %5631 = vrsqrt.f32 %v4334_v56  ;;  %v2759_v9 = vsel %vm2665_vm0, %v2664_v0, 0.0 }
 0x4f9   : > { %4589 = vst [vmem:[%s8485_s15 + $0x40] sm:$0xff] %v4456_v28  ;;  %v4177_v42 = vpop.f32.mrb[192].mxu0  ;;  %2760 = vadd.xlane.f32.xlu1 %v2759_v9 }
 0x4fa   : > { %v5628_v12 = vpop.eup %5627  ;;  %v4336_v31 = vmax.f32 %v4177_v42, 1e-24  ;;  %v8524_v2 = vpop.f32.mrb[193].mxu0 }
 0x4fb   : > { %v4458_v54 = vmul.f32 %v5628_v12, %v7922_v52 }
 0x4fc   : > { %5633 = vrsqrt.f32 %v4336_v31 }
 0x4fd   : > { %4591 = vst [vmem:[%s8485_s15 + $0x50] sm:$0xff] %v4458_v54  ;;  %v4183_v50 = vpop.f32.mrb[194].mxu0 }
 0x4fe   : > { %v5630_v13 = vpop.eup %5629  ;;  %v4338_v37 = vmax.f32 %v4183_v50, 1e-24  ;;  %v8528_v34 = vpop.f32.mrb[195].mxu0 }
 0x4ff   : > { %v4460_v56 = vmul.f32 %v5630_v13, %v9808_v24 }
 0x500   : > { %5635 = vrsqrt.f32 %v4338_v37 }
 0x501   : > { %4593 = vst [vmem:[%s8485_s15 + $0x60] sm:$0xff] %v4460_v56  ;;  %v4189_v28 = vpop.f32.mrb[196].mxu0 }
 0x502   : > { %v5632_v0 = vpop.eup %5631  ;;  %v4340_v9 = vmax.f32 %v4189_v28, 1e-24  ;;  %v8532_v42 = vpop.f32.mrb[197].mxu0 }
 0x503   : > { %9809 = vst [vmem:[#allocation29_spill] sm:$0xff] %v8532_v42  ;;  %v4462_v52 = vmul.f32 %v5632_v0, %v7970_v35  ;;  %v6001_v35 = vld [vmem:[%s6425_s22 + $0x18] sm:$0xff] }
 0x504   : > { %5637 = vrsqrt.f32 %v4340_v9 }
 0x505   : > { %4595 = vst [vmem:[%s8485_s15 + $0x70] sm:$0xff] %v4462_v52  ;;  %v4195_v12 = vpop.f32.mrb[198].mxu0  ;;  %v6002_v52 = vld [vmem:[%s6425_s22 + $0x8] sm:$0xff] }
 0x506   : > { %v5634_v31 = vpop.eup %5633  ;;  %v4342_v54 = vmax.f32 %v4195_v12, 1e-24  ;;  %v8536_v50 = vpop.f32.mrb[199].mxu0 }
 0x507   : > { %v4464_v13 = vmul.f32 %v5634_v31, %v7994_v20 }
 0x508   : > { %5639 = vrsqrt.f32 %v4342_v54 }
 0x509   : > { %4597 = vst [vmem:[%s8485_s15 + $0x80] sm:$0xff] %v4464_v13  ;;  %v4201_v37 = vpop.f32.mrb[200].mxu0 }
 0x50a   : > { %v5636_v24 = vpop.eup %5635  ;;  %v4344_v56 = vmax.f32 %v4201_v37, 1e-24  ;;  %v8540_v28 = vpop.f32.mrb[201].mxu0  ;;  %3224 = vrot.lane.b32.xlu1 %v6001_v35, %s6199_s24  ;;  %v6003_v37 = vld [vmem:[%s6425_s22 + $0x28] sm:$0xff] }
 0x50b   : > { %v2668_v42 = vpop.xlane.xlu0 %2667  ;;  %v4466_v0 = vmul.f32 %v5636_v24, %v8008_v27  ;;  %3222 = vrot.lane.b32.xlu0 %v6002_v52, %s6199_s24  ;;  %v6004_v24 = vld [vmem:[%s6425_s22 + $0x48] sm:$0xff] }
 0x50c   : > { %v2762_v9 = vmax.f32 %v2668_v42, 1e-24  ;;  %5641 = vrsqrt.f32 %v4344_v56 }
 0x50d   : > { %4599 = vst [vmem:[%s8485_s15 + $0x90] sm:$0xff] %v4466_v0  ;;  %v4207_v20 = vpop.f32.mrb[202].mxu0 }
 0x50e   : > { %v5638_v12 = vpop.eup %5637  ;;  %5643 = vrsqrt.f32 %v2762_v9  ;;  %v4346_v31 = vmax.f32 %v4207_v20, 1e-24  ;;  %v2671_v54 = vpop.xlane.xlu1 %2670  ;;  %3226 = vrot.lane.b32.xlu1 %v6003_v37, %s6199_s24  ;;  %v6005_v20 = vld [vmem:[%s6425_s22 + $0x38] sm:$0xff] }
 0x50f   : > { %v8548_v13 = vpop.f32.mrb[203].mxu0  ;;  %v4468_v27 = vmul.f32 %v5638_v12, %v8022_v14  ;;  %v2763_v42 = vmax.f32 %v2671_v54, 1e-24  ;;  %3230 = vrot.lane.b32.xlu0 %v6004_v24, %s6199_s24  ;;  %v6006_v54 = vld [vmem:[%s6425_s22 + $0x68] sm:$0xff] }
 0x510   : > { %5645 = vrsqrt.f32 %v4346_v31 }
 0x511   : > { %4601 = vst [vmem:[%s8485_s15 + $0xa0] sm:$0xff] %v4468_v27  ;;  %5647 = vrsqrt.f32 %v2763_v42  ;;  %v4213_v56 = vpop.f32.mrb[204].mxu0 }
 0x512   : > { %v5640_v35 = vpop.eup %5639  ;;  %v4348_v0 = vmax.f32 %v4213_v56, 1e-24  ;;  %v8556_v9 = vpop.f32.mrb[205].mxu0  ;;  %3228 = vrot.lane.b32.xlu1 %v6005_v20, %s6199_s24  ;;  %v6007_v56 = vld [vmem:[%s6425_s22 + $0x58] sm:$0xff] }
 0x513   : > { %v2674_v52 = vpop.xlane.xlu0 %2673  ;;  %v4470_v14 = vmul.f32 %v5640_v35, %v8036_v55  ;;  %3234 = vrot.lane.b32.xlu0 %v6006_v54, %s6199_s24 }
 0x514   : > { %v2764_v12 = vmax.f32 %v2674_v52, 1e-24  ;;  %5649 = vrsqrt.f32 %v4348_v0  ;;  %v6008_v52 = vld [vmem:[%s6425_s22 + $0x88] sm:$0xff] }
 0x515   : > { %4603 = vst [vmem:[%s8485_s15 + $0xb0] sm:$0xff] %v4470_v14  ;;  %v4219_v31 = vpop.f32.mrb[206].mxu0 }
 0x516   : > { %v5642_v37 = vpop.eup %5641  ;;  %5651 = vrsqrt.f32 %v2764_v12  ;;  %v4350_v27 = vmax.f32 %v4219_v31, 1e-24  ;;  %v2677_v42 = vpop.xlane.xlu1 %2676  ;;  %3232 = vrot.lane.b32.xlu1 %v6007_v56, %s6199_s24 }
 0x517   : > { %v8564_v24 = vpop.f32.mrb[207].mxu0  ;;  %v4472_v55 = vmul.f32 %v5642_v37, %v8050_v46  ;;  %v2765_v35 = vmax.f32 %v2677_v42, 1e-24  ;;  %3238 = vrot.lane.b32.xlu0 %v6008_v52, %s6199_s24  ;;  %v6010_v42 = vld [vmem:[%s6425_s22 + $0xa8] sm:$0xff] }
 0x518   : > { %9810 = vst [vmem:[#allocation87_spill] sm:$0xff] %v8564_v24  ;;  %v5644_v0 = vpop.eup %5643  ;;  %5653 = vrsqrt.f32 %v4350_v27  ;;  %v6009_v24 = vld [vmem:[%s6425_s22 + $0x78] sm:$0xff] }
 0x519   : > { %4605 = vst [vmem:[%s8485_s15 + $0xc0] sm:$0xff] %v4472_v55  ;;  %5655 = vrsqrt.f32 %v2765_v35  ;;  %v4225_v20 = vpop.f32.mrb[208].mxu0  ;;  %v2826_v14 = vmul.f32 %v5644_v0, %v8311_v63  ;;  %v6011_v0 = vld [vmem:[%s6425_s22 + $0x98] sm:$0xff] }
 0x51a   : > { %v5646_v12 = vpop.eup %5645  ;;  %v4352_v54 = vmax.f32 %v4225_v20, 1e-24  ;;  %v8573_v31 = vpop.f32.mrb[209].mxu0  ;;  %3236 = vrot.lane.b32.xlu1 %v6009_v24, %s6199_s24 }
 0x51b   : > { %v2680_v56 = vpop.xlane.xlu0 %2679  ;;  %v5648_v46 = vpop.eup %5647  ;;  %v4474_v37 = vmul.f32 %v5646_v12, %v8064_v44  ;;  %4885 = vmatprep.mubr.msk.f32.mxu1 %vm2665_vm0, %v2826_v14  ;;  %3242 = vrot.lane.b32.xlu0 %v6010_v42, %s6199_s24 }
 0x51c   : > { %v2766_v27 = vmax.f32 %v2680_v56, 1e-24  ;;  %v2827_v63 = vmul.f32 %v5648_v46, %v8323_v38  ;;  %5657 = vrsqrt.f32 %v4352_v54  ;;  %v6012_v38 = vld [vmem:[%s6425_s22 + $0xc8] sm:$0xff] }
 0x51d   : > { %4607 = vst [vmem:[%s8485_s15 + $0xd0] sm:$0xff] %v4474_v37  ;;  %v4231_v55 = vpop.f32.mrb[210].mxu0 }
 0x51e   : > { %v5650_v35 = vpop.eup %5649  ;;  %5659 = vrsqrt.f32 %v2766_v27  ;;  %v4354_v24 = vmax.f32 %v4231_v55, 1e-24  ;;  %v2683_v52 = vpop.xlane.xlu1 %2682  ;;  %4886 = vmatmul.mubr.msk.f32.vlgmr.msra.gmra.mrb[144].mxu1 %vm2665_vm0, %v2827_v63  ;;  %3240 = vrot.lane.b32.xlu1 %v6011_v0, %s6199_s24  ;;  %v6013_v63 = vld [vmem:[%s6425_s22 + $0xb8] sm:$0xff] }
 0x51f   : > { %v8584_v44 = vpop.f32.mrb[211].mxu0  ;;  %v4476_v20 = vmul.f32 %v5650_v35, %v8078_v23  ;;  %v2767_v14 = vmax.f32 %v2683_v52, 1e-24  ;;  %3246 = vrot.lane.b32.xlu0 %v6012_v38, %s6199_s24  ;;  %v6015_v38 = vld [vmem:[%s6425_s22 + $0xd8] sm:$0xff] }
 0x520   : > { %v5652_v12 = vpop.eup %5651  ;;  %5661 = vrsqrt.f32 %v4354_v24  ;;  %v6014_v24 = vld [vmem:[%s6425_s22 + $0xe8] sm:$0xff] }
 0x521   : > { %4609 = vst [vmem:[%s8485_s15 + $0xe0] sm:$0xff] %v4476_v20  ;;  %5663 = vrsqrt.f32 %v2767_v14  ;;  %v4237_v54 = vpop.f32.mrb[212].mxu0  ;;  %v2828_v56 = vmul.f32 %v5652_v12, %v8332_v57 }
 0x522   : > { %v5654_v46 = vpop.eup %5653  ;;  %v4356_v37 = vmax.f32 %v4237_v54, 1e-24  ;;  %v8593_v27 = vpop.f32.mrb[213].mxu0  ;;  %3244 = vrot.lane.b32.xlu1 %v6013_v63, %s6199_s24 }
 0x523   : > { %v2686_v42 = vpop.xlane.xlu0 %2685  ;;  %v5656_v23 = vpop.eup %5655  ;;  %v4478_v55 = vmul.f32 %v5654_v46, %v8092_v11  ;;  %4888 = vmatprep.mubr.msk.f32.mxu1 %vm2665_vm0, %v2828_v56  ;;  %3250 = vrot.lane.b32.xlu0 %v6014_v24, %s6199_s24  ;;  %v6016_v56 = vld [vmem:[%s6425_s22 + $0x118] sm:$0xff] }
 0x524   : > { %v2768_v35 = vmax.f32 %v2686_v42, 1e-24  ;;  %5665 = vrsqrt.f32 %v4356_v37  ;;  %v2829_v57 = vmul.f32 %v5656_v23, %v8337_v43 }
 0x525   : > { %4611 = vst [vmem:[%s8485_s15 + $0xf0] sm:$0xff] %v4478_v55  ;;  %v4243_v52 = vpop.f32.mrb[214].mxu0 }
 0x526   : > { %v5658_v0 = vpop.eup %5657  ;;  %5667 = vrsqrt.f32 %v2768_v35  ;;  %v4358_v20 = vmax.f32 %v4243_v52, 1e-24  ;;  %v2689_v14 = vpop.xlane.xlu1 %2688  ;;  %4889 = vmatmul.mubr.msk.f32.gmra.mrb[146].mxu1 %vm2665_vm0, %v2829_v57  ;;  %3248 = vrot.lane.b32.xlu1 %v6015_v38, %s6199_s24  ;;  %v6017_v35 = vld [vmem:[%s6425_s22 + $0xf8] sm:$0xff] }
 0x527   : > { %v8604_v11 = vpop.f32.mrb[215].mxu0  ;;  %v4480_v12 = vmul.f32 %v5658_v0, %v8106_v19  ;;  %v2769_v54 = vmax.f32 %v2689_v14, 1e-24  ;;  %3256 = vrot.lane.b32.xlu0 %v6016_v56, %s6199_s24 }
 0x528   : > { %v5660_v43 = vpop.eup %5659  ;;  %5669 = vrsqrt.f32 %v4358_v20 }
 0x529   : > { %4613 = vst [vmem:[%s8485_s15 + $0x100] sm:$0xff] %v4480_v12  ;;  %5671 = vrsqrt.f32 %v2769_v54  ;;  %v4249_v46 = vpop.f32.mrb[216].mxu0  ;;  %v2830_v37 = vmul.f32 %v5660_v43, %v8342_v5  ;;  %v6018_v12 = vld [vmem:[%s6425_s22 + $0x108] sm:$0xff] }
 0x52a   : > { %v5662_v42 = vpop.eup %5661  ;;  %v4360_v63 = vmax.f32 %v4249_v46, 1e-24  ;;  %v8613_v23 = vpop.f32.mrb[217].mxu0  ;;  %3252 = vrot.lane.b32.xlu1 %v6017_v35, %s6199_s24 }
 0x52b   : > { %v2692_v55 = vpop.xlane.xlu0 %2691  ;;  %v5664_v19 = vpop.eup %5663  ;;  %v4482_v24 = vmul.f32 %v5662_v42, %v8120_v39  ;;  %4891 = vmatprep.mubr.msk.f32.mxu1 %vm2665_vm0, %v2830_v37 }
 0x52c   : > { %v2770_v57 = vmax.f32 %v2692_v55, 1e-24  ;;  %5673 = vrsqrt.f32 %v4360_v63  ;;  %v2831_v52 = vmul.f32 %v5664_v19, %v8347_v7  ;;  %v6019_v55 = vld [vmem:[%s6425_s22 + $0x128] sm:$0xff] }
 0x52d   : > { %4615 = vst [vmem:[%s8485_s15 + $0x110] sm:$0xff] %v4482_v24  ;;  %v4255_v5 = vpop.f32.mrb[218].mxu0 }
 0x52e   : > { %v5666_v0 = vpop.eup %5665  ;;  %5675 = vrsqrt.f32 %v2770_v57  ;;  %v4362_v20 = vmax.f32 %v4255_v5, 1e-24  ;;  %v2695_v14 = vpop.xlane.xlu1 %2694  ;;  %4892 = vmatmul.mubr.msk.f32.gmra.mrb[148].mxu1 %vm2665_vm0, %v2831_v52  ;;  %3254 = vrot.lane.b32.xlu1 %v6018_v12, %s6199_s24 }
 0x52f   : > { %v8622_v38 = vpop.f32.mrb[219].mxu0  ;;  %v4484_v39 = vmul.f32 %v5666_v0, %v8134_v41  ;;  %v2771_v54 = vmax.f32 %v2695_v14, 1e-24 }
 0x530   : > { %v5668_v56 = vpop.eup %5667  ;;  %5677 = vrsqrt.f32 %v4362_v20 }
 0x531   : > { %4617 = vst [vmem:[%s8485_s15 + $0x120] sm:$0xff] %v4484_v39  ;;  %5679 = vrsqrt.f32 %v2771_v54  ;;  %v4261_v7 = vpop.f32.mrb[220].mxu0  ;;  %v2832_v43 = vmul.f32 %v5668_v56, %v8358_v53 }
 0x532   : > { %v5670_v46 = vpop.eup %5669  ;;  %v4364_v37 = vmax.f32 %v4261_v7, 1e-24  ;;  %v8629_v42 = vpop.f32.mrb[221].mxu0  ;;  %3258 = vrot.lane.b32.xlu1 %v6019_v55, %s6199_s24 }
 0x533   : > { %v2698_v63 = vpop.xlane.xlu0 %2697  ;;  %v5672_v35 = vpop.eup %5671  ;;  %v4486_v41 = vmul.f32 %v5670_v46, %v8148_v8  ;;  %4894 = vmatprep.mubr.msk.f32.mxu1 %vm2665_vm0, %v2832_v43 }
 0x534   : > { %v2772_v19 = vmax.f32 %v2698_v63, 1e-24  ;;  %5681 = vrsqrt.f32 %v4364_v37  ;;  %v2833_v24 = vmul.f32 %v5672_v35, %v8363_v32 }
 0x535   : > { %4619 = vst [vmem:[%s8485_s15 + $0x130] sm:$0xff] %v4486_v41  ;;  %v4267_v53 = vpop.f32.mrb[222].mxu0 }
 0x536   : > { %v5674_v57 = vpop.eup %5673  ;;  %5683 = vrsqrt.f32 %v2772_v19  ;;  %v4366_v52 = vmax.f32 %v4267_v53, 1e-24  ;;  %v2701_v5 = vpop.xlane.xlu1 %2700  ;;  %4895 = vmatmul.mubr.msk.f32.gmra.mrb[150].mxu1 %vm2665_vm0, %v2833_v24 }
 0x537   : > { %v8638_v0 = vpop.f32.mrb[223].mxu0  ;;  %v4488_v20 = vmul.f32 %v5674_v57, %v8162_v49  ;;  %v2773_v8 = vmax.f32 %v2701_v5, 1e-24 }
 0x538   : > { %v5676_v14 = vpop.eup %5675  ;;  %5685 = vrsqrt.f32 %v4366_v52 }
 0x539   : > { %4621 = vst [vmem:[%s8485_s15 + $0x140] sm:$0xff] %v4488_v20  ;;  %5687 = vrsqrt.f32 %v2773_v8  ;;  %v4273_v12 = vpop.f32.mrb[224].mxu0  ;;  %v2834_v32 = vmul.f32 %v5676_v14, %v8374_v17 }
 0x53a   : > { %v5678_v39 = vpop.eup %5677  ;;  %v4368_v54 = vmax.f32 %v4273_v12, 1e-24  ;;  %v8643_v56 = vpop.f32.mrb[225].mxu0 }
 0x53b   : > { %v2704_v7 = vpop.xlane.xlu0 %2703  ;;  %v5680_v43 = vpop.eup %5679  ;;  %v4490_v46 = vmul.f32 %v5678_v39, %v8176_v29  ;;  %4897 = vmatprep.mubr.msk.f32.mxu1 %vm2665_vm0, %v2834_v32 }
 0x53c   : > { %v2774_v49 = vmax.f32 %v2704_v7, 1e-24  ;;  %5689 = vrsqrt.f32 %v4368_v54  ;;  %v2835_v37 = vmul.f32 %v5680_v43, %v8379_v25 }
 0x53d   : > { %4623 = vst [vmem:[%s8485_s15 + $0x150] sm:$0xff] %v4490_v46  ;;  %v4279_v63 = vpop.f32.mrb[226].mxu0 }
 0x53e   : > { %v5682_v55 = vpop.eup %5681  ;;  %5691 = vrsqrt.f32 %v2774_v49  ;;  %v4370_v17 = vmax.f32 %v4279_v63, 1e-24  ;;  %v2707_v35 = vpop.xlane.xlu1 %2706  ;;  %4898 = vmatmul.mubr.msk.f32.gmra.mrb[152].mxu1 %vm2665_vm0, %v2835_v37 }
 0x53f   : > { %v8650_v41 = vpop.f32.mrb[227].mxu0  ;;  %v4492_v19 = vmul.f32 %v5682_v55, %v8190_v21  ;;  %v2775_v29 = vmax.f32 %v2707_v35, 1e-24 }
 0x540   : > { %v5684_v24 = vpop.eup %5683  ;;  %5693 = vrsqrt.f32 %v4370_v17 }
 0x541   : > { %4625 = vst [vmem:[%s8485_s15 + $0x160] sm:$0xff] %v4492_v19  ;;  %5695 = vrsqrt.f32 %v2775_v29  ;;  %v4285_v53 = vpop.f32.mrb[228].mxu0  ;;  %v2836_v25 = vmul.f32 %v5684_v24, %v8384_v62 }
 0x542   : > { %v5686_v57 = vpop.eup %5685  ;;  %v4372_v52 = vmax.f32 %v4285_v53, 1e-24  ;;  %v8655_v5 = vpop.f32.mrb[229].mxu0 }
 0x543   : > { %v2710_v20 = vpop.xlane.xlu0 %2709  ;;  %v5688_v8 = vpop.eup %5687  ;;  %v4494_v14 = vmul.f32 %v5686_v57, %v8204_v3  ;;  %4900 = vmatprep.mubr.msk.f32.mxu1 %vm2665_vm0, %v2836_v25 }
 0x544   : > { %v2776_v21 = vmax.f32 %v2710_v20, 1e-24  ;;  %5697 = vrsqrt.f32 %v4372_v52  ;;  %v2837_v12 = vmul.f32 %v5688_v8, %v8389_v30 }
 0x545   : > { %4627 = vst [vmem:[%s8485_s15 + $0x170] sm:$0xff] %v4494_v14  ;;  %v4291_v32 = vpop.f32.mrb[230].mxu0 }
 0x546   : > { %v5690_v39 = vpop.eup %5689  ;;  %5699 = vrsqrt.f32 %v2776_v21  ;;  %v4374_v62 = vmax.f32 %v4291_v32, 1e-24  ;;  %v2713_v54 = vpop.xlane.xlu1 %2712  ;;  %4901 = vmatmul.mubr.msk.f32.gmra.mrb[154].mxu1 %vm2665_vm0, %v2837_v12 }
 0x547   : > { %v8662_v7 = vpop.f32.mrb[231].mxu0  ;;  %v4496_v43 = vmul.f32 %v5690_v39, %v8218_v48  ;;  %v2777_v3 = vmax.f32 %v2713_v54, 1e-24 }
 0x548   : > { %9811 = vst [vmem:[#allocation28_spill] sm:$0xff] %v8662_v7  ;;  %v5692_v46 = vpop.eup %5691  ;;  %5701 = vrsqrt.f32 %v4374_v62 }
 0x549   : > { %4629 = vst [vmem:[%s8485_s15 + $0x180] sm:$0xff] %v4496_v43  ;;  %5703 = vrsqrt.f32 %v2777_v3  ;;  %v4297_v49 = vpop.f32.mrb[232].mxu0  ;;  %v2838_v30 = vmul.f32 %v5692_v46, %v8394_v15 }
 0x54a   : > { %v5694_v37 = vpop.eup %5693  ;;  %v4376_v63 = vmax.f32 %v4297_v49, 1e-24  ;;  %v8667_v55 = vpop.f32.mrb[233].mxu0 }
 0x54b   : > { %9812 = vst [vmem:[#allocation31_spill] sm:$0xff] %v8667_v55  ;;  %v2716_v17 = vpop.xlane.xlu0 %2715  ;;  %v5696_v35 = vpop.eup %5695  ;;  %v4498_v19 = vmul.f32 %v5694_v37, %v8232_v40  ;;  %4903 = vmatprep.mubr.msk.f32.mxu1 %vm2665_vm0, %v2838_v30 }
 0x54c   : > { %v2778_v48 = vmax.f32 %v2716_v17, 1e-24  ;;  %5705 = vrsqrt.f32 %v4376_v63  ;;  %v2839_v29 = vmul.f32 %v5696_v35, %v8399_v60 }
 0x54d   : > { %4631 = vst [vmem:[%s8485_s15 + $0x190] sm:$0xff] %v4498_v19  ;;  %v4303_v24 = vpop.f32.mrb[234].mxu0 }
 0x54e   : > { %v5698_v53 = vpop.eup %5697  ;;  %5707 = vrsqrt.f32 %v2778_v48  ;;  %v4378_v15 = vmax.f32 %v4303_v24, 1e-24  ;;  %v2719_v25 = vpop.xlane.xlu1 %2718  ;;  %4904 = vmatmul.mubr.msk.f32.gmra.mrb[156].mxu1 %vm2665_vm0, %v2839_v29 }
 0x54f   : > { %v8674_v57 = vpop.f32.mrb[235].mxu0  ;;  %v4500_v52 = vmul.f32 %v5698_v53, %v8246_v22  ;;  %v2779_v40 = vmax.f32 %v2719_v25, 1e-24 }
 0x550   : > { %9813 = vst [vmem:[#allocation89_spill] sm:$0xff] %v8674_v57  ;;  %v5700_v20 = vpop.eup %5699  ;;  %5709 = vrsqrt.f32 %v4378_v15 }
 0x551   : > { %4633 = vst [vmem:[%s8485_s15 + $0x1a0] sm:$0xff] %v4500_v52  ;;  %5711 = vrsqrt.f32 %v2779_v40  ;;  %v4309_v8 = vpop.f32.mrb[236].mxu0  ;;  %v2840_v60 = vmul.f32 %v5700_v20, %v8404_v51 }
 0x552   : > { %v5702_v14 = vpop.eup %5701  ;;  %v4380_v21 = vmax.f32 %v4309_v8, 1e-24  ;;  %v8679_v12 = vpop.f32.mrb[237].mxu0 }
 0x553   : > { %9814 = vst [vmem:[#allocation30_spill] sm:$0xff] %v8679_v12  ;;  %v2722_v32 = vpop.xlane.xlu0 %2721  ;;  %v5704_v39 = vpop.eup %5703  ;;  %v4502_v62 = vmul.f32 %v5702_v14, %v8260_v59  ;;  %4906 = vmatprep.mubr.msk.f32.mxu1 %vm2665_vm0, %v2840_v60 }
 0x554   : > { %v2780_v22 = vmax.f32 %v2722_v32, 1e-24  ;;  %5713 = vrsqrt.f32 %v4380_v21  ;;  %v2841_v54 = vmul.f32 %v5704_v39, %v8409_v61 }
 0x555   : > { %4635 = vst [vmem:[%s8485_s15 + $0x1b0] sm:$0xff] %v4502_v62  ;;  %v4315_v43 = vpop.f32.mrb[238].mxu0 }
 0x556   : > { %v5706_v3 = vpop.eup %5705  ;;  %5715 = vrsqrt.f32 %v2780_v22  ;;  %v4382_v51 = vmax.f32 %v4315_v43, 1e-24  ;;  %v2725_v46 = vpop.xlane.xlu1 %2724  ;;  %4907 = vmatmul.mubr.msk.f32.gmra.mrb[158].mxu1 %vm2665_vm0, %v2841_v54  ;;  %v9816_v54 = vld [vmem:[#allocation13_spill] sm:$0xff] }
 0x557   : > { %v8686_v49 = vpop.f32.mrb[239].mxu0  ;;  %v4504_v59 = vmul.f32 %v5706_v3, %v8274_v10  ;;  %v2781_v30 = vmax.f32 %v2725_v46, 1e-24  ;;  %v9817_v46 = vld [vmem:[#allocation12_spill] sm:$0xff] }
 0x558   : > { %9815 = vst [vmem:[#allocation33_spill] sm:$0xff] %v8686_v49  ;;  %v5708_v37 = vpop.eup %5707  ;;  %5717 = vrsqrt.f32 %v4382_v51 }
 0x559   : > { %4637 = vst [vmem:[%s8485_s15 + $0x1c0] sm:$0xff] %v4504_v59  ;;  %5719 = vrsqrt.f32 %v2781_v30  ;;  %v2842_v61 = vmul.f32 %v5708_v37, %v8414_v58 }
 0x55a   : > { %v5710_v63 = vpop.eup %5709  ;;  %v2728_v17 = vpop.xlane.xlu0 %2727 }
 0x55b   : > { %v5712_v35 = vpop.eup %5711  ;;  %v4506_v19 = vmul.f32 %v5710_v63, %v8288_v1  ;;  %4909 = vmatprep.mubr.msk.f32.mxu1 %vm2665_vm0, %v2842_v61  ;;  %v2782_v48 = vmax.f32 %v2728_v17, 1e-24  ;;  %v9818_v61 = vld [vmem:[#allocation15_spill] sm:$0xff] }
 0x55c   : > { %v2843_v29 = vmul.f32 %v5712_v35, %v8419_v16 }
 0x55d   : > { %4639 = vst [vmem:[%s8485_s15 + $0x1d0] sm:$0xff] %v4506_v19  ;;  %5721 = vrsqrt.f32 %v2782_v48  ;;  %v9819_v48 = vld [vmem:[#allocation17_spill] sm:$0xff] }
 0x55e   : > { %v5714_v10 = vpop.eup %5713  ;;  %v2731_v24 = vpop.xlane.xlu1 %2730  ;;  %4910 = vmatmul.mubr.msk.f32.gmra.mrb[160].mxu1 %vm2665_vm0, %v2843_v29 }
 0x55f   : > { %v4508_v58 = vmul.f32 %v5714_v10, %v8302_v26  ;;  %v2783_v53 = vmax.f32 %v2731_v24, 1e-24 }
 0x560   : > { %v5716_v15 = vpop.eup %5715 }
 0x561   : > { %4641 = vst [vmem:[%s8485_s15 + $0x1e0] sm:$0xff] %v4508_v58  ;;  %5723 = vrsqrt.f32 %v2783_v53  ;;  %v2844_v1 = vmul.f32 %v5716_v15, %v8424_v36  ;;  %v9820_v53 = vld [vmem:[#allocation19_spill] sm:$0xff] }
 0x562   : > { %v5718_v25 = vpop.eup %5717  ;;  %v2734_v52 = vpop.xlane.xlu0 %2733 }
 0x563   : > { %v5720_v40 = vpop.eup %5719  ;;  %v4510_v16 = vmul.f32 %v5718_v25, %v8318_v33  ;;  %4912 = vmatprep.mubr.msk.f32.mxu1 %vm2665_vm0, %v2844_v1  ;;  %v2784_v20 = vmax.f32 %v2734_v52, 1e-24 }
 0x564   : > { %v2845_v8 = vmul.f32 %v5720_v40, %v8429_v4  ;;  %v9821_v40 = vld [vmem:[#allocation21_spill] sm:$0xff] }
 0x565   : > { %4643 = vst [vmem:[%s8485_s15 + $0x1f0] sm:$0xff] %v4510_v16  ;;  %5725 = vrsqrt.f32 %v2784_v20 }
 0x566   : > { %v2737_v60 = vpop.xlane.xlu1 %2736  ;;  %4913 = vmatmul.mubr.msk.f32.gmra.mrb[162].mxu1 %vm2665_vm0, %v2845_v8 }
 0x567   : > { %v5722_v26 = vpop.eup %5721  ;;  %v2785_v14 = vmax.f32 %v2737_v60, 1e-24 }
 0x568   : > { %v2846_v21 = vmul.f32 %v5722_v26, %v8434_v47  ;;  %v9822_v26 = vld [vmem:[#allocation23_spill] sm:$0xff] }
 0x569   : > { %5727 = vrsqrt.f32 %v2785_v14 }
 0x56a   : > { %4915 = vmatprep.mubr.msk.f32.mxu1 %vm2665_vm0, %v2846_v21  ;;  %v2740_v36 = vpop.xlane.xlu0 %2739 }
 0x56b   : > { %v5724_v32 = vpop.eup %5723  ;;  %v2786_v33 = vmax.f32 %v2740_v36, 1e-24  ;;  %v9823_v36 = vld [vmem:[#allocation25_spill] sm:$0xff] }
 0x56c   : > { %v2847_v39 = vmul.f32 %v5724_v32, %v8439_v6 }
 0x56d   : > { %5729 = vrsqrt.f32 %v2786_v33 }
 0x56e   : > { %v2743_v62 = vpop.xlane.xlu1 %2742  ;;  %4916 = vmatmul.mubr.msk.f32.gmra.mrb[164].mxu1 %vm2665_vm0, %v2847_v39 }
 0x56f   : > { %v5726_v4 = vpop.eup %5725  ;;  %v2787_v22 = vmax.f32 %v2743_v62, 1e-24 }
 0x570   : > { %v2848_v43 = vmul.f32 %v5726_v4, %v9816_v54  ;;  %v8731_v54 = vld [vmem:[%s9357_s6] ss:$0 sm:$0xff] }
 0x571   : > { %5731 = vrsqrt.f32 %v2787_v22 }
 0x572   : > { %4918 = vmatprep.mubr.msk.f32.mxu1 %vm2665_vm0, %v2848_v43  ;;  %v2746_v47 = vpop.xlane.xlu0 %2745 }
 0x573   : > { %v5728_v3 = vpop.eup %5727  ;;  %v2788_v51 = vmax.f32 %v2746_v47, 1e-24 }
 0x574   : > { %v2849_v59 = vmul.f32 %v5728_v3, %v9817_v46 }
 0x575   : > { %5733 = vrsqrt.f32 %v2788_v51 }
 0x576   : > { %v2749_v30 = vpop.xlane.xlu1 %2748  ;;  %4919 = vmatmul.mubr.msk.f32.gmra.mrb[166].mxu1 %vm2665_vm0, %v2849_v59 }
 0x577   : > { %v5730_v6 = vpop.eup %5729  ;;  %v2789_v37 = vmax.f32 %v2749_v30, 1e-24 }
 0x578   : > { %v2850_v63 = vmul.f32 %v5730_v6, %v9818_v61 }
 0x579   : > { %5735 = vrsqrt.f32 %v2789_v37 }
 0x57a   : > { %4921 = vmatprep.mubr.msk.f32.mxu1 %vm2665_vm0, %v2850_v63  ;;  %v2752_v17 = vpop.xlane.xlu0 %2751 }
 0x57b   : > { %v5732_v35 = vpop.eup %5731  ;;  %v2790_v19 = vmax.f32 %v2752_v17, 1e-24 }
 0x57c   : > { %v2851_v29 = vmul.f32 %v5732_v35, %v9819_v48 }
 0x57d   : > { %5737 = vrsqrt.f32 %v2790_v19 }
 0x57e   : > { %v2755_v10 = vpop.xlane.xlu1 %2754  ;;  %4922 = vmatmul.mubr.msk.f32.gmra.mrb[168].mxu1 %vm2665_vm0, %v2851_v29 }
 0x57f   : > { %v5734_v24 = vpop.eup %5733  ;;  %v2791_v58 = vmax.f32 %v2755_v10, 1e-24 }
 0x580   : > { %v2852_v15 = vmul.f32 %v5734_v24, %v9820_v53 }
 0x581   : > { %5739 = vrsqrt.f32 %v2791_v58 }
 0x582   : > { %4924 = vmatprep.mubr.msk.f32.mxu1 %vm2665_vm0, %v2852_v15  ;;  %v2758_v1 = vpop.xlane.xlu0 %2757 }
 0x583   : > { %v5736_v25 = vpop.eup %5735  ;;  %v2792_v52 = vmax.f32 %v2758_v1, 1e-24 }
 0x584   : > { %v2853_v16 = vmul.f32 %v5736_v25, %v9821_v40 }
 0x585   : > { %5741 = vrsqrt.f32 %v2792_v52 }
 0x586   : > { %v2761_v20 = vpop.xlane.xlu1 %2760  ;;  %4925 = vmatmul.mubr.msk.f32.gmra.mrb[170].mxu1 %vm2665_vm0, %v2853_v16  ;;  %v3223_v51 = vpop.permute.xlu0 %3222  ;;  %v3575_v16 = vld [vmem:[%s9358_s7 + $0x8] sm:$0xff] }
 0x587   : > { %v5738_v8 = vpop.eup %5737  ;;  %v2793_v60 = vmax.f32 %v2761_v20, 1e-24  ;;  %v3577_v20 = vld [vmem:[%s9358_s7 + $0x18] sm:$0xff] }
 0x588   : > { %v2854_v14 = vmul.f32 %v5738_v8, %v9822_v26  ;;  %v5245_v8 = vpack.c.bf16 %v3577_v20, %v3575_v16  ;;  %v3576_v26 = vld [vmem:[%s9358_s7 + $0x10] sm:$0xff]  ;;  %v6027_v16 = vld [vmem:[%s6425_s22 + $0x1a8] sm:$0xff] }
 0x589   : > { %5743 = vrsqrt.f32 %v2793_v60  ;;  %v3574_v60 = vld [vmem:[%s9358_s7] sm:$0xff] }
 0x58a   : > { %4927 = vmatprep.mubr.msk.f32.mxu1 %vm2665_vm0, %v2854_v14  ;;  %v3225_v22 = vpop.permute.xlu1 %3224  ;;  %v5247_v14 = vpack.c.bf16 %v3576_v26, %v3574_v60  ;;  %5246 = vmatprep.subr.bf16.mxu1 %v5245_v8 }
 0x58b   : > { %v5740_v21 = vpop.eup %5739 }
 0x58c   : > { %v2855_v32 = vmul.f32 %v5740_v21, %v9823_v36  ;;  %5248 = vmatpush1.bf16.msra.mxu1 %v5247_v14  ;;  %v3579_v36 = vld [vmem:[%s9358_s7 + $0x28] sm:$0xff] }
 0x58e   : > { %4928 = vmatmul.mubr.msk.f32.gmra.mrb[172].mxu1 %vm2665_vm0, %v2855_v32  ;;  %v3227_v46 = vpop.permute.xlu1 %3226  ;;  %v3581_v32 = vld [vmem:[%s9358_s7 + $0x38] sm:$0xff] }
 0x58f   : > { %v5742_v33 = vpop.eup %5741 }
 0x590   : > { %v2856_v39 = vmul.f32 %v5742_v33, %v8506_v18 }
 0x592   : > { %4930 = vmatprep.mubr.msk.f32.mxu1 %vm2665_vm0, %v2856_v39  ;;  %v3229_v17 = vpop.permute.xlu1 %3228  ;;  %v5249_v39 = vpack.c.bf16 %v3581_v32, %v3579_v36 }
 0x593   : > { %v5744_v62 = vpop.eup %5743 }
 0x594   : > { %v2857_v4 = vmul.f32 %v5744_v62, %v8515_v45  ;;  %v3578_v62 = vld [vmem:[%s9358_s7 + $0x20] sm:$0xff]  ;;  %5250 = vmatprep.subr.bf16.mxu1 %v5249_v39 }
 0x596   : > { %4931 = vmatmul.mubr.msk.f32.gmra.mrb[174].mxu1 %vm2665_vm0, %v2857_v4  ;;  %v3580_v4 = vld [vmem:[%s9358_s7 + $0x30] sm:$0xff] }
 0x5f1   : > { %v4887_v43 = vpop.f32.mrb[144].mxu1 }
 0x5f2   : > { %v3037_v47 = vadd.f32 %v4887_v43, %v8731_v54  ;;  %v3031_v3 = vpop.f32.mrb[145].mxu1  ;;  %v5251_v43 = vpack.c.bf16 %v3580_v4, %v3578_v62 }
 0x5f3   : > { %v3032_v18 = vadd.f32 %v8731_v54, %v3031_v3  ;;  %v9481_v3 = vmov 0.0  }
 0x5f4   : > { %v8735_v59 = vadd.f32 %v3225_v22, %v3037_v47  ;;  %v6020_v22 = vld [vmem:[%s6425_s22 + $0x138] sm:$0xff]  ;;  %5252 = vmatpush1.bf16.msra.mxu1 %v5251_v43  ;;  %v6021_v47 = vld [vmem:[%s6425_s22 + $0x148] sm:$0xff]  ;;  %3742 = vmatprep.mubr.f32.mxu1 %v9481_v3 }
 0x5f5   : > { %v8737_v30 = vadd.f32 %v3223_v51, %v3032_v18 }
 0x5f6   : > { %v3351_v45 = vmul.f32 %v8735_v59, %v8735_v59 }
 0x5f7   : > { %v3350_v6 = vmul.f32 %v8737_v30, %v8737_v30 }
 0x5f8   : > { %v3385_v37 = vsel %vm2665_vm0, %v3351_v45, 0.0  ;;  %v6023_v45 = vld [vmem:[%s6425_s22 + $0x168] sm:$0xff] }
 0x5f9   : > { %3386 = vadd.xlane.f32.xlu1 %v3385_v37  ;;  %v4890_v61 = vpop.f32.mrb[146].mxu1  ;;  %v3382_v63 = vsel %vm2665_vm0, %v3350_v6, 0.0 }
 0x5fa   : > { %v3047_v35 = vadd.f32 %v4890_v61, %v8731_v54  ;;  %v3041_v19 = vpop.f32.mrb[147].mxu1  ;;  %3383 = vadd.xlane.f32.xlu0 %v3382_v63  ;;  %v6024_v61 = vld [vmem:[%s6425_s22 + $0x178] sm:$0xff]  ;;  %v6025_v63 = vld [vmem:[%s6425_s22 + $0x188] sm:$0xff] }
 0x5fb   : > { %v3042_v48 = vadd.f32 %v8731_v54, %v3041_v19 }
 0x5fc   : > { %v8747_v29 = vadd.f32 %v3229_v17, %v3047_v35 }
 0x5fd   : > { %v8749_v10 = vadd.f32 %v3227_v46, %v3042_v48  ;;  %v6022_v46 = vld [vmem:[%s6425_s22 + $0x158] sm:$0xff]  ;;  %v3231_v48 = vpop.permute.xlu0 %3230 }
 0x5fe   : > { %v3353_v24 = vmul.f32 %v8747_v29, %v8747_v29 }
 0x5ff   : > { %v3352_v58 = vmul.f32 %v8749_v10, %v8749_v10 }
 0x600   : > { %v3391_v53 = vsel %vm2665_vm0, %v3353_v24, 0.0  ;;  %v6026_v24 = vld [vmem:[%s6425_s22 + $0x198] sm:$0xff] }
 0x601   : > { %v4893_v15 = vpop.f32.mrb[148].mxu1  ;;  %3392 = vadd.xlane.f32.xlu0 %v3391_v53  ;;  %v3388_v1 = vsel %vm2665_vm0, %v3352_v58, 0.0  ;;  %v3235_v14 = vpop.permute.xlu0 %3234 }
 0x602   : > { %3389 = vadd.xlane.f32.xlu1 %v3388_v1  ;;  %v3051_v25 = vpop.f32.mrb[149].mxu1  ;;  %v3057_v58 = vadd.f32 %v4893_v15, %v8731_v54  ;;  %v3233_v1 = vpop.permute.xlu1 %3232  ;;  %v6028_v15 = vld [vmem:[%s6425_s22 + $0x1b8] sm:$0xff] }
 0x603   : > { %v3052_v35 = vadd.f32 %v8731_v54, %v3051_v25 }
 0x604   : > { %v8816_v8 = vadd.f32 %v3233_v1, %v3057_v58  ;;  %v6031_v1 = vld [vmem:[%s6425_s22 + $0x1e8] sm:$0xff] }
 0x605   : > { %v8810_v53 = vadd.f32 %v3231_v48, %v3052_v35 }
 0x606   : > { %v3355_v36 = vmul.f32 %v8816_v8, %v8816_v8  ;;  %v3237_v4 = vpop.permute.xlu1 %3236 }
 0x607   : > { %v3354_v25 = vmul.f32 %v8810_v53, %v8810_v53 }
 0x609   : > { %v4896_v52 = vpop.f32.mrb[150].mxu1  ;;  %v3394_v62 = vsel %vm2665_vm0, %v3354_v25, 0.0 }
 0x60a   : > { %v3061_v40 = vpop.f32.mrb[151].mxu1  ;;  %v3067_v32 = vadd.f32 %v4896_v52, %v8731_v54  ;;  %v3241_v58 = vpop.permute.xlu1 %3240 }
 0x60b   : > { %v3062_v60 = vadd.f32 %v8731_v54, %v3061_v40 }
 0x60c   : > { %v8835_v43 = vadd.f32 %v3237_v4, %v3067_v32  ;;  %v6032_v32 = vld [vmem:[%s6425_s22 + $0x1f8] sm:$0xff] }
 0x60d   : > { %v8828_v39 = vadd.f32 %v3235_v14, %v3062_v60 }
 0x60e   : > { %v3357_v35 = vmul.f32 %v8835_v43, %v8835_v43 }
 0x611   : > { %v8769_v21 = vpop.f32.mrb[152].mxu1 }
 0x612   : > { %v3071_v33 = vpop.f32.mrb[153].mxu1  ;;  %v3077_v48 = vadd.f32 %v8769_v21, %v8731_v54  ;;  %v3403_v21 = vsel %vm2665_vm0, %v3357_v35, 0.0 }
 0x613   : > { %3260 = vrot.lane.b32.xlu1 %v6020_v22, %s6199_s24  ;;  %v6029_v22 = vld [vmem:[%s6425_s22 + $0x1c8] sm:$0xff] }
 0x614   : > { %v8856_v25 = vadd.f32 %v3241_v58, %v3077_v48 }
 0x617   : > { %3262 = vrot.lane.b32.xlu0 %v6021_v47, %s6199_s24  ;;  %v3356_v47 = vmul.f32 %v8828_v39, %v8828_v39 }
 0x619   : > { %v8788_v51 = vpop.f32.mrb[154].mxu1 }
 0x61a   : > { %v3081_v18 = vpop.f32.mrb[155].mxu1  ;;  %v3087_v4 = vadd.f32 %v8788_v51, %v8731_v54 }
 0x61b   : > { %3264 = vrot.lane.b32.xlu0 %v6022_v46, %s6199_s24  ;;  %v3072_v46 = vadd.f32 %v8731_v54, %v3071_v33  ;;  %v3400_v33 = vsel %vm2665_vm0, %v3356_v47, 0.0  ;;  %v3082_v14 = vadd.f32 %v8731_v54, %v3081_v18  ;;  %v3245_v18 = vpop.permute.xlu1 %3244 }
 0x61f   : > { %3266 = vrot.lane.b32.xlu0 %v6023_v45, %s6199_s24  ;;  %v3397_v45 = vsel %vm2665_vm0, %v3355_v36, 0.0 }
 0x621   : > { %v8794_v6 = vpop.f32.mrb[156].mxu1 }
 0x622   : > { %v8796_v37 = vpop.f32.mrb[157].mxu1  ;;  %v3097_v58 = vadd.f32 %v8794_v6, %v8731_v54 }
 0x623   : > { %3268 = vrot.lane.b32.xlu0 %v6024_v61, %s6199_s24  ;;  %v3239_v61 = vpop.permute.xlu0 %3238 }
 0x627   : > { %3270 = vrot.lane.b32.xlu0 %v6025_v63, %s6199_s24  ;;  %v6030_v63 = vld [vmem:[%s6425_s22 + $0x1d8] sm:$0xff]  ;;  %v3243_v36 = vpop.permute.xlu0 %3242  ;;  %s4840_s22 = sshll.u32 %s6270_s9, 13  ;;  %s4646_s9 = scalar_lea.sflag [#allocation4], %s6419_s19 }
 0x628   : > { %s9303_s25 = scalar_lea.hbm %s9359_s8, %s4840_s22 }
 0x629   : > { %v8802_v17 = vpop.f32.mrb[158].mxu1 }
 0x62a   : > { %v8805_v19 = vpop.f32.mrb[159].mxu1 }
 0x62b   : > { %3272 = vrot.lane.b32.xlu0 %v6026_v24, %s6199_s24  ;;  %v8849_v24 = vadd.f32 %v3239_v61, %v3072_v46  ;;  %v3247_v48 = vpop.permute.xlu0 %3246 }
 0x62d   : > { %v3358_v60 = vmul.f32 %v8849_v24, %v8849_v24 }
 0x62f   : > { %3274 = vrot.lane.b32.xlu0 %v6027_v16, %s6199_s24  ;;  %v3406_v47 = vsel %vm2665_vm0, %v3358_v60, 0.0 }
 0x631   : > { %v8814_v20 = vpop.f32.mrb[160].mxu1 }
 0x632   : > { %v8821_v26 = vpop.f32.mrb[161].mxu1 }
 0x633   : > { %3276 = vrot.lane.b32.xlu0 %v6028_v15, %s6199_s24 }
 0x637   : > { %3278 = vrot.lane.b32.xlu0 %v6029_v22, %s6199_s24  ;;  %3395 = vadd.xlane.f32.xlu1 %v3394_v62  ;;  %v3359_v62 = vmul.f32 %v8856_v25, %v8856_v25  ;;  %v8870_v22 = vadd.f32 %v3243_v36, %v3082_v14  ;;  %v3249_v14 = vpop.permute.xlu1 %3248 }
 0x639   : > { %v8833_v40 = vpop.f32.mrb[162].mxu1  ;;  %v3360_v61 = vmul.f32 %v8870_v22, %v8870_v22  ;;  %v3409_v51 = vsel %vm2665_vm0, %v3359_v62, 0.0  ;;  %v3251_v62 = vpop.permute.xlu0 %3250 }
 0x63a   : > { %v8840_v52 = vpop.f32.mrb[163].mxu1 }
 0x63b   : > { %3280 = vrot.lane.b32.xlu0 %v6030_v63, %s6199_s24  ;;  %3398 = vadd.xlane.f32.xlu1 %v3397_v45  ;;  %v8875_v45 = vadd.f32 %v3245_v18, %v3087_v4  ;;  %v3092_v63 = vadd.f32 %v8731_v54, %v8796_v37  ;;  %v3412_v60 = vsel %vm2665_vm0, %v3360_v61, 0.0  ;;  %v8893_v37 = vadd.f32 %v3249_v14, %v3097_v58 }
 0x63c   : > { %v3107_v61 = vadd.f32 %v8802_v17, %v8731_v54  ;;  %v3112_v14 = vadd.f32 %v8731_v54, %v8821_v26 }
 0x63d   : > { %v3363_v18 = vmul.f32 %v8893_v37, %v8893_v37 }
 0x63f   : > { %3282 = vrot.lane.b32.xlu0 %v6031_v1, %s6199_s24  ;;  %3401 = vadd.xlane.f32.xlu1 %v3400_v33  ;;  %v3361_v33 = vmul.f32 %v8875_v45, %v8875_v45  ;;  %v8888_v1 = vadd.f32 %v3247_v48, %v3092_v63  ;;  %v3253_v48 = vpop.permute.xlu1 %3252 }
 0x641   : > { %v8854_v16 = vpop.f32.mrb[164].mxu1  ;;  %v3362_v36 = vmul.f32 %v8888_v1, %v8888_v1  ;;  %v3415_v6 = vsel %vm2665_vm0, %v3361_v33, 0.0 }
 0x642   : > { %v8861_v15 = vpop.f32.mrb[165].mxu1 }
 0x643   : > { %3284 = vrot.lane.b32.xlu0 %v6032_v32, %s6199_s24  ;;  %3404 = vadd.xlane.f32.xlu1 %v3403_v21  ;;  %v3102_v32 = vadd.f32 %v8731_v54, %v8805_v19  ;;  %v3418_v19 = vsel %vm2665_vm0, %v3362_v36, 0.0  ;;  %s4660_s24 = sshll.u32 %s8485_s15, 4  ;;  %s9305_s24 = int_to_ptr.vmem [resolvable:$true] %s4660_s24 }
 0x644   : > { %s6119_s11 = scalar_lea.vmem %s9305_s24, 8192  ;;  %p6126_p8 = scmp.lt.s32.totalorder %s9305_s24, %s6124_s10 }
 0x645   : > { %v8908_v63 = vadd.f32 %v3251_v62, %v3102_v32  ;;  %v3421_v32 = vsel %vm2665_vm0, %v3363_v18, 0.0  ;;  %v3255_v62 = vpop.permute.xlu1 %3254  ;;  %p6120_p1 = scmp.ne.s32.totalorder %s9305_s24, %s6119_s11  ;;  %p6127_p13 = scmp.lt.s32.totalorder %s6125_s17, %s6119_s11 }
 0x647   : > { %3407 = vadd.xlane.f32.xlu1 %v3406_v47  ;;  %v3117_v47 = vadd.f32 %v8814_v20, %v8731_v54  ;;  %v3364_v20 = vmul.f32 %v8908_v63, %v8908_v63  ;;  %p6121_p2 = pnand %p6120_p1, %p6367_p6  ;;  %p6128_p3 = por %p6127_p13, %p6126_p8 }
 0x649   : > { %v8873_v46 = vpop.f32.mrb[166].mxu1  ;;  %v3259_v26 = vpop.permute.xlu1 %3258  ;;  %p6122_p4 = pneg %p6121_p2 }
 0x64a   : > { %v8881_v35 = vpop.f32.mrb[167].mxu1 }
 0x64b   : > { %3410 = vadd.xlane.f32.xlu1 %v3409_v51  ;;  %v3257_v51 = vpop.permute.xlu0 %3256  ;;  %p6129_p7 = pnand %p6128_p3, %p6122_p4 }
 0x64c   : > { %v8911_v58 = vadd.f32 %v3257_v51, %v3117_v47  ;;  %v8928_v47 = vadd.f32 %v3255_v62, %v3112_v14  ;;  %v3424_v51 = vsel %vm2665_vm0, %v3364_v20, 0.0 }
 0x64e   : > { %v3367_v36 = vmul.f32 %v8911_v58, %v8911_v58 }
 0x64f   : > { %3413 = vadd.xlane.f32.xlu1 %v3412_v60  ;;  %v8915_v60 = vadd.f32 %v3253_v48, %v3107_v61  ;;  %v3122_v61 = vadd.f32 %v8731_v54, %v8840_v52  ;;  %v3366_v48 = vmul.f32 %v8928_v47, %v8928_v47 }
 0x650   : > { %v3433_v18 = vsel %vm2665_vm0, %v3367_v36, 0.0 }
 0x651   : > { %v8891_v21 = vpop.f32.mrb[168].mxu1  ;;  %v3430_v20 = vsel %vm2665_vm0, %v3366_v48, 0.0  ;;  %v3127_v48 = vadd.f32 %v8833_v40, %v8731_v54 }
 0x652   : > { %v8899_v4 = vpop.f32.mrb[169].mxu1 }
 0x653   : > { %3416 = vadd.xlane.f32.xlu1 %v3415_v6  ;;  %v3365_v6 = vmul.f32 %v8915_v60, %v8915_v60 }
 0x655   : > { %v3427_v14 = vsel %vm2665_vm0, %v3365_v6, 0.0 }
 0x657   : > { %3419 = vadd.xlane.f32.xlu1 %v3418_v19 }
 0x659   : > { %v8913_v33 = vpop.f32.mrb[170].mxu1 }
 0x65a   : > { %v8921_v17 = vpop.f32.mrb[171].mxu1 }
 0x65b   : > { %3422 = vadd.xlane.f32.xlu1 %v3421_v32  ;;  %v8938_v32 = vadd.f32 %v3259_v26, %v3122_v61 }
 0x65d   : > { %v3368_v52 = vmul.f32 %v8938_v32, %v8938_v32 }
 0x65f   : > { %3425 = vadd.xlane.f32.xlu1 %v3424_v51  ;;  %v3436_v51 = vsel %vm2665_vm0, %v3368_v52, 0.0 }
 0x661   : > { %v8933_v19 = vpop.f32.mrb[172].mxu1 }
 0x662   : > { %v8940_v3 = vpop.f32.mrb[173].mxu1  ;;  %3434 = vadd.xlane.f32.xlu0 %v3433_v18 }
 0x663   : > { %3428 = vadd.xlane.f32.xlu1 %v3427_v14 }
 0x667   : > { %3431 = vadd.xlane.f32.xlu1 %v3430_v20  ;;  %v3132_v20 = vadd.f32 %v8731_v54, %v8861_v15  ;;  %v9824_v15 = vmov 0.0  }
 0x669   : > { %v8946_v62 = vpop.f32.mrb[174].mxu1 }
 0x66a   : > { %v8948_v36 = vpop.f32.mrb[175].mxu1 }
 0x66b   : > { %3437 = vadd.xlane.f32.xlu1 %v3436_v51 }
 0x686   : > { %v3387_v61 = vpop.xlane.xlu1 %3386 }
 0x687   : > { %v3384_v26 = vpop.xlane.xlu0 %3383  ;;  %v3479_v49 = vmax.f32 %v3387_v61, 1e-24 }
 0x688   : > { %v3478_v18 = vmax.f32 %v3384_v26, 1e-24 }
 0x68a   : > { %5745 = vrsqrt.f32 %v3478_v18  ;;  %v3137_v18 = vadd.f32 %v8854_v16, %v8731_v54  ;;  %v3142_v16 = vadd.f32 %v8731_v54, %v8881_v35  ;;  %v3147_v35 = vadd.f32 %v8873_v46, %v8731_v54 }
 0x68b   : > { %5747 = vrsqrt.f32 %v3479_v49 }
 0x68e   : > { %v3393_v6 = vpop.xlane.xlu0 %3392 }
 0x68f   : > { %v3390_v14 = vpop.xlane.xlu1 %3389  ;;  %v3481_v12 = vmax.f32 %v3393_v6, 1e-24 }
 0x690   : > { %v3480_v57 = vmax.f32 %v3390_v14, 1e-24 }
 0x692   : > { %5749 = vrsqrt.f32 %v3480_v57  ;;  %v3263_v55 = vpop.permute.xlu0 %3262 }
 0x693   : > { %v3261_v52 = vpop.permute.xlu1 %3260  ;;  %5751 = vrsqrt.f32 %v3481_v12  ;;  %v8955_v7 = vadd.f32 %v3263_v55, %v3132_v20 }
 0x694   : > { %v5746_v51 = vpop.eup %5745  ;;  %v8957_v61 = vadd.f32 %v3261_v52, %v3127_v48 }
 0x695   : > { %v3542_v49 = vmul.f32 %v5746_v51, %v8737_v30  ;;  %v5748_v26 = vpop.eup %5747  ;;  %v3370_v57 = vmul.f32 %v8955_v7, %v8955_v7 }
 0x696   : > { %v3369_v40 = vmul.f32 %v8957_v61, %v8957_v61  ;;  %v3265_v6 = vpop.permute.xlu0 %3264  ;;  %v3543_v30 = vmul.f32 %v5748_v26, %v8735_v59 }
 0x697   : > { %4799 = vmatmul.mubr.msk.f32.vlgmr.msra.gmra.mrb[176].mxu1 %vm2665_vm0, %v3542_v49  ;;  %v8967_v12 = vadd.f32 %v3265_v6, %v3137_v18  ;;  %v3442_v51 = vsel %vm2665_vm0, %v3370_v57, 0.0 }
 0x698   : > { %v3439_v55 = vsel %vm2665_vm0, %v3369_v40, 0.0  ;;  %3748 = vmatprep.mubr.f32.mxu1 %v9824_v15 }
 0x699   : > { %3440 = vadd.xlane.f32.xlu1 %v3439_v55  ;;  %v3371_v20 = vmul.f32 %v8967_v12, %v8967_v12 }
 0x69a   : > { %v3267_v14 = vpop.permute.xlu0 %3266 }
 0x69b   : > { %4800 = vmatmul.mubr.msk.f32.gmra.mrb[178].mxu1 %vm2665_vm0, %v3543_v30  ;;  %v8977_v52 = vadd.f32 %v3267_v14, %v3142_v16  ;;  %v3445_v6 = vsel %vm2665_vm0, %v3371_v20, 0.0  ;;  %v3157_v14 = vadd.f32 %v8891_v21, %v8731_v54 }
 0x69c   : > { %v5750_v48 = vpop.eup %5749  ;;  %3754 = vmatprep.mubr.f32.mxu1 %v9824_v15 }
 0x69d   : > { %3443 = vadd.xlane.f32.xlu1 %v3442_v51  ;;  %v3544_v49 = vmul.f32 %v5750_v48, %v8749_v10  ;;  %v5752_v59 = vpop.eup %5751  ;;  %v3372_v18 = vmul.f32 %v8977_v52, %v8977_v52  ;;  %v3152_v10 = vadd.f32 %v8731_v54, %v8899_v4  ;;  %v3162_v51 = vadd.f32 %v8731_v54, %v8921_v17 }
 0x69e   : > { %v3269_v26 = vpop.permute.xlu0 %3268  ;;  %v3545_v57 = vmul.f32 %v5752_v59, %v8747_v29 }
 0x69f   : > { %4801 = vmatmul.mubr.msk.f32.gmra.mrb[180].mxu1 %vm2665_vm0, %v3544_v49  ;;  %v8987_v40 = vadd.f32 %v3269_v26, %v3147_v35  ;;  %v3448_v16 = vsel %vm2665_vm0, %v3372_v18, 0.0  ;;  %v3167_v26 = vadd.f32 %v8913_v33, %v8731_v54 }
 0x6a0   : > { %3760 = vmatprep.mubr.f32.mxu1 %v9824_v15 }
 0x6a1   : > { %3446 = vadd.xlane.f32.xlu1 %v3445_v6  ;;  %v3373_v46 = vmul.f32 %v8987_v40, %v8987_v40 }
 0x6a2   : > { %v3271_v55 = vpop.permute.xlu0 %3270 }
 0x6a3   : > { %4802 = vmatmul.mubr.msk.f32.gmra.mrb[182].mxu1 %vm2665_vm0, %v3545_v57  ;;  %v8997_v30 = vadd.f32 %v3271_v55, %v3152_v10  ;;  %v3451_v20 = vsel %vm2665_vm0, %v3373_v46, 0.0  ;;  %v3172_v55 = vadd.f32 %v8731_v54, %v8940_v3 }
 0x6a4   : > { %3766 = vmatprep.mubr.f32.mxu1 %v9824_v15 }
 0x6a5   : > { %3449 = vadd.xlane.f32.xlu1 %v3448_v16  ;;  %v3374_v4 = vmul.f32 %v8997_v30, %v8997_v30 }
 0x6a6   : > { %v3273_v29 = vpop.permute.xlu0 %3272 }
 0x6a7   : > { %v9005_v48 = vadd.f32 %v3273_v29, %v3157_v14  ;;  %v3454_v21 = vsel %vm2665_vm0, %v3374_v4, 0.0  ;;  %v3177_v29 = vadd.f32 %v8933_v19, %v8731_v54 }
 0x6a9   : > { %3452 = vadd.xlane.f32.xlu1 %v3451_v20  ;;  %v3375_v35 = vmul.f32 %v9005_v48, %v9005_v48 }
 0x6aa   : > { %v3275_v49 = vpop.permute.xlu0 %3274 }
 0x6ab   : > { %v9010_v59 = vadd.f32 %v3275_v49, %v3162_v51  ;;  %v3457_v10 = vsel %vm2665_vm0, %v3375_v35, 0.0  ;;  %v3182_v49 = vadd.f32 %v8731_v54, %v8948_v36 }
 0x6ad   : > { %v3376_v18 = vmul.f32 %v9010_v59, %v9010_v59  ;;  %3455 = vadd.xlane.f32.xlu1 %v3454_v21 }
 0x6ae   : > { %v3277_v6 = vpop.permute.xlu0 %3276 }
 0x6af   : > { %v9019_v57 = vadd.f32 %v3277_v6, %v3167_v26  ;;  %v3460_v17 = vsel %vm2665_vm0, %v3376_v18, 0.0  ;;  %v3187_v18 = vadd.f32 %v8946_v62, %v8731_v54 }
 0x6b0   : > { %3461 = vadd.xlane.f32.xlu0 %v3460_v17 }
 0x6b1   : > { %v3377_v46 = vmul.f32 %v9019_v57, %v9019_v57  ;;  %3458 = vadd.xlane.f32.xlu1 %v3457_v10 }
 0x6b2   : > { %v3279_v33 = vpop.permute.xlu0 %3278 }
 0x6b3   : > { %v9027_v16 = vadd.f32 %v3279_v33, %v3172_v55  ;;  %v3463_v14 = vsel %vm2665_vm0, %v3377_v46, 0.0 }
 0x6b5   : > { %v3378_v4 = vmul.f32 %v9027_v16, %v9027_v16  ;;  %3464 = vadd.xlane.f32.xlu1 %v3463_v14 }
 0x6b6   : > { %v3281_v20 = vpop.permute.xlu0 %3280 }
 0x6b7   : > { %v9034_v51 = vadd.f32 %v3281_v20, %v3177_v29  ;;  %v3466_v3 = vsel %vm2665_vm0, %v3378_v4, 0.0 }
 0x6b8   : > { %3467 = vadd.xlane.f32.xlu0 %v3466_v3 }
 0x6b9   : > { %v3379_v35 = vmul.f32 %v9034_v51, %v9034_v51 }
 0x6ba   : > { %v3283_v21 = vpop.permute.xlu0 %3282 }
 0x6bb   : > { %v9041_v26 = vadd.f32 %v3283_v21, %v3182_v49  ;;  %v3469_v19 = vsel %vm2665_vm0, %v3379_v35, 0.0 }
 0x6bc   : > { %3470 = vadd.xlane.f32.xlu1 %v3469_v19 }
 0x6bd   : > { %v3380_v6 = vmul.f32 %v9041_v26, %v9041_v26 }
 0x6be   : > { %v3285_v17 = vpop.permute.xlu0 %3284 }
 0x6bf   : > { %v9048_v10 = vadd.f32 %v3285_v17, %v3187_v18  ;;  %v3472_v36 = vsel %vm2665_vm0, %v3380_v6, 0.0 }
 0x6c0   : > { %3473 = vadd.xlane.f32.xlu0 %v3472_v36 }
 0x6c1   : > { %v3381_v55 = vmul.f32 %v9048_v10, %v9048_v10 }
 0x6c3   : > { %v3475_v46 = vsel %vm2665_vm0, %v3381_v55, 0.0 }
 0x6c4   : > { %v3396_v33 = vpop.xlane.xlu1 %3395  ;;  %3476 = vadd.xlane.f32.xlu1 %v3475_v46 }
 0x6c5   : > { %v3482_v14 = vmax.f32 %v3396_v33, 1e-24 }
 0x6c7   : > { %5753 = vrsqrt.f32 %v3482_v14 }
 0x6c8   : > { %v3399_v29 = vpop.xlane.xlu1 %3398 }
 0x6c9   : > { %v3483_v54 = vmax.f32 %v3399_v29, 1e-24 }
 0x6cb   : > { %5755 = vrsqrt.f32 %v3483_v54 }
 0x6cc   : > { %v3402_v62 = vpop.xlane.xlu1 %3401 }
 0x6cd   : > { %v3484_v4 = vmax.f32 %v3402_v62, 1e-24 }
 0x6cf   : > { %5757 = vrsqrt.f32 %v3484_v4 }
 0x6d0   : > { %v3405_v20 = vpop.xlane.xlu1 %3404 }
 0x6d1   : > { %v5754_v3 = vpop.eup %5753  ;;  %v3485_v49 = vmax.f32 %v3405_v20, 1e-24 }
 0x6d2   : > { %v3546_v35 = vmul.f32 %v5754_v3, %v8810_v53 }
 0x6d3   : > { %5759 = vrsqrt.f32 %v3485_v49 }
 0x6d4   : > { %v3408_v21 = vpop.xlane.xlu1 %3407  ;;  %4803 = vmatmul.mubr.msk.f32.gmra.mrb[184].mxu1 %vm2665_vm0, %v3546_v35 }
 0x6d5   : > { %v5756_v19 = vpop.eup %5755  ;;  %v3486_v18 = vmax.f32 %v3408_v21, 1e-24  ;;  %3772 = vmatprep.mubr.f32.mxu1 %v9824_v15 }
 0x6d6   : > { %v3547_v6 = vmul.f32 %v5756_v19, %v8816_v8 }
 0x6d7   : > { %5761 = vrsqrt.f32 %v3486_v18 }
 0x6d8   : > { %v3411_v17 = vpop.xlane.xlu1 %3410  ;;  %4804 = vmatmul.mubr.msk.f32.gmra.mrb[186].mxu1 %vm2665_vm0, %v3547_v6 }
 0x6d9   : > { %v5758_v36 = vpop.eup %5757  ;;  %v3487_v55 = vmax.f32 %v3411_v17, 1e-24  ;;  %3778 = vmatprep.mubr.f32.mxu1 %v9824_v15 }
 0x6da   : > { %v3548_v53 = vmul.f32 %v5758_v36, %v8828_v39 }
 0x6db   : > { %5763 = vrsqrt.f32 %v3487_v55 }
 0x6dc   : > { %v3414_v46 = vpop.xlane.xlu1 %3413  ;;  %4805 = vmatmul.mubr.msk.f32.gmra.mrb[188].mxu1 %vm2665_vm0, %v3548_v53 }
 0x6dd   : > { %v5760_v33 = vpop.eup %5759  ;;  %v3488_v14 = vmax.f32 %v3414_v46, 1e-24  ;;  %3784 = vmatprep.mubr.f32.mxu1 %v9824_v15 }
 0x6de   : > { %v3549_v8 = vmul.f32 %v5760_v33, %v8835_v43 }
 0x6df   : > { %5765 = vrsqrt.f32 %v3488_v14 }
 0x6e0   : > { %v3417_v29 = vpop.xlane.xlu1 %3416  ;;  %4806 = vmatmul.mubr.msk.f32.gmra.mrb[190].mxu1 %vm2665_vm0, %v3549_v8 }
 0x6e1   : > { %v5762_v54 = vpop.eup %5761  ;;  %v3489_v62 = vmax.f32 %v3417_v29, 1e-24  ;;  %3790 = vmatprep.mubr.f32.mxu1 %v9824_v15 }
 0x6e2   : > { %v3550_v39 = vmul.f32 %v5762_v54, %v8849_v24 }
 0x6e3   : > { %5767 = vrsqrt.f32 %v3489_v62 }
 0x6e4   : > { %v3420_v4 = vpop.xlane.xlu1 %3419  ;;  %4807 = vmatmul.mubr.msk.f32.gmra.mrb[192].mxu1 %vm2665_vm0, %v3550_v39 }
 0x6e5   : > { %v5764_v20 = vpop.eup %5763  ;;  %v3490_v3 = vmax.f32 %v3420_v4, 1e-24  ;;  %3796 = vmatprep.mubr.f32.mxu1 %v9824_v15 }
 0x6e6   : > { %v3551_v43 = vmul.f32 %v5764_v20, %v8856_v25 }
 0x6e7   : > { %5769 = vrsqrt.f32 %v3490_v3 }
 0x6e8   : > { %v3423_v49 = vpop.xlane.xlu1 %3422  ;;  %4808 = vmatmul.mubr.msk.f32.gmra.mrb[194].mxu1 %vm2665_vm0, %v3551_v43 }
 0x6e9   : > { %v5766_v35 = vpop.eup %5765  ;;  %v3491_v21 = vmax.f32 %v3423_v49, 1e-24  ;;  %3802 = vmatprep.mubr.f32.mxu1 %v9824_v15 }
 0x6ea   : > { %v3552_v24 = vmul.f32 %v5766_v35, %v8870_v22 }
 0x6eb   : > { %5771 = vrsqrt.f32 %v3491_v21 }
 0x6ec   : > { %v3426_v19 = vpop.xlane.xlu1 %3425  ;;  %4809 = vmatmul.mubr.msk.f32.gmra.mrb[196].mxu1 %vm2665_vm0, %v3552_v24 }
 0x6ed   : > { %v5768_v18 = vpop.eup %5767  ;;  %v3492_v6 = vmax.f32 %v3426_v19, 1e-24  ;;  %3808 = vmatprep.mubr.f32.mxu1 %v9824_v15 }
 0x6ee   : > { %v3553_v25 = vmul.f32 %v5768_v18, %v8875_v45 }
 0x6ef   : > { %5773 = vrsqrt.f32 %v3492_v6  ;;  %v3435_v53 = vpop.xlane.xlu0 %3434 }
 0x6f0   : > { %v3429_v17 = vpop.xlane.xlu1 %3428  ;;  %4810 = vmatmul.mubr.msk.f32.gmra.mrb[198].mxu1 %vm2665_vm0, %v3553_v25  ;;  %v3495_v14 = vmax.f32 %v3435_v53, 1e-24 }
 0x6f1   : > { %v5770_v36 = vpop.eup %5769  ;;  %v3493_v55 = vmax.f32 %v3429_v17, 1e-24  ;;  %3814 = vmatprep.mubr.f32.mxu1 %v9824_v15 }
 0x6f2   : > { %v3554_v22 = vmul.f32 %v5770_v36, %v8888_v1 }
 0x6f3   : > { %5775 = vrsqrt.f32 %v3493_v55 }
 0x6f4   : > { %v3432_v46 = vpop.xlane.xlu1 %3431  ;;  %4811 = vmatmul.mubr.msk.f32.gmra.mrb[200].mxu1 %vm2665_vm0, %v3554_v22 }
 0x6f5   : > { %v5772_v33 = vpop.eup %5771  ;;  %v3494_v8 = vmax.f32 %v3432_v46, 1e-24  ;;  %3820 = vmatprep.mubr.f32.mxu1 %v9824_v15 }
 0x6f6   : > { %v3555_v45 = vmul.f32 %v5772_v33, %v8893_v37 }
 0x6f7   : > { %5777 = vrsqrt.f32 %v3494_v8 }
 0x6f8   : > { %v3438_v29 = vpop.xlane.xlu1 %3437  ;;  %4812 = vmatmul.mubr.msk.f32.gmra.mrb[202].mxu1 %vm2665_vm0, %v3555_v45  ;;  %5779 = vrsqrt.f32 %v3495_v14 }
 0x6f9   : > { %v5774_v54 = vpop.eup %5773  ;;  %v3496_v62 = vmax.f32 %v3438_v29, 1e-24  ;;  %3826 = vmatprep.mubr.f32.mxu1 %v9824_v15 }
 0x6fa   : > { %v3556_v1 = vmul.f32 %v5774_v54, %v8908_v63 }
 0x6fb   : > { %5781 = vrsqrt.f32 %v3496_v62 }
 0x6fc   : > { %4813 = vmatmul.mubr.msk.f32.gmra.mrb[204].mxu1 %vm2665_vm0, %v3556_v1 }
 0x6fd   : > { %v5776_v39 = vpop.eup %5775  ;;  %3832 = vmatprep.mubr.f32.mxu1 %v9824_v15 }
 0x6fe   : > { %v3557_v4 = vmul.f32 %v5776_v39, %v8915_v60 }
 0x700   : > { %4814 = vmatmul.mubr.msk.f32.gmra.mrb[206].mxu1 %vm2665_vm0, %v3557_v4 }
 0x701   : > { %v5778_v37 = vpop.eup %5777  ;;  %3838 = vmatprep.mubr.f32.mxu1 %v9824_v15 }
 0x702   : > { %v3558_v20 = vmul.f32 %v5778_v37, %v8928_v47  ;;  %v5780_v3 = vpop.eup %5779 }
 0x703   : > { %v3559_v63 = vmul.f32 %v5780_v3, %v8911_v58 }
 0x704   : > { %4815 = vmatmul.mubr.msk.f32.gmra.mrb[208].mxu1 %vm2665_vm0, %v3558_v20 }
 0x705   : > { %3844 = vmatprep.mubr.f32.mxu1 %v9824_v15  ;;  %v5782_v43 = vpop.eup %5781 }
 0x706   : > { %v3560_v60 = vmul.f32 %v5782_v43, %v8938_v32 }
 0x708   : > { %4816 = vmatmul.mubr.msk.f32.gmra.mrb[210].mxu1 %vm2665_vm0, %v3559_v63 }
 0x709   : > { %3850 = vmatprep.mubr.f32.mxu1 %v9824_v15 }
 0x70c   : > { %4817 = vmatmul.mubr.msk.f32.gmra.mrb[212].mxu1 %vm2665_vm0, %v3560_v60 }
 0x70d   : > { %3856 = vmatprep.mubr.f32.mxu1 %v9824_v15 }
 0x726   : > { %v3441_v49 = vpop.xlane.xlu1 %3440 }
 0x727   : > { %v3497_v47 = vmax.f32 %v3441_v49, 1e-24 }
 0x729   : > { %5783 = vrsqrt.f32 %v3497_v47 }
 0x72a   : > { %v3444_v35 = vpop.xlane.xlu1 %3443 }
 0x72b   : > { %v3498_v21 = vmax.f32 %v3444_v35, 1e-24 }
 0x72d   : > { %5785 = vrsqrt.f32 %v3498_v21 }
 0x72e   : > { %v3447_v24 = vpop.xlane.xlu1 %3446 }
 0x72f   : > { %v3499_v19 = vmax.f32 %v3447_v24, 1e-24 }
 0x731   : > { %5787 = vrsqrt.f32 %v3499_v19 }
 0x732   : > { %v3450_v58 = vpop.xlane.xlu1 %3449 }
 0x733   : > { %v5784_v18 = vpop.eup %5783  ;;  %v3500_v6 = vmax.f32 %v3450_v58, 1e-24 }
 0x734   : > { %v3561_v25 = vmul.f32 %v5784_v18, %v8957_v61 }
 0x735   : > { %5789 = vrsqrt.f32 %v3500_v6 }
 0x736   : > { %v3453_v32 = vpop.xlane.xlu1 %3452  ;;  %4818 = vmatmul.mubr.msk.f32.gmra.mrb[214].mxu1 %vm2665_vm0, %v3561_v25 }
 0x737   : > { %v5786_v17 = vpop.eup %5785  ;;  %v3501_v36 = vmax.f32 %v3453_v32, 1e-24  ;;  %3862 = vmatprep.mubr.f32.mxu1 %v9824_v15 }
 0x738   : > { %v3562_v55 = vmul.f32 %v5786_v17, %v8955_v7 }
 0x739   : > { %5791 = vrsqrt.f32 %v3501_v36  ;;  %v9827_v36 = vlaneseq }
 0x73a   : > { %v3456_v53 = vpop.xlane.xlu1 %3455  ;;  %4819 = vmatmul.mubr.msk.f32.gmra.mrb[216].mxu1 %vm2665_vm0, %v3562_v55 }
 0x73b   : > { %v5788_v22 = vpop.eup %5787  ;;  %v3502_v46 = vmax.f32 %v3456_v53, 1e-24  ;;  %3868 = vmatprep.mubr.f32.mxu1 %v9824_v15  ;;  %v4513_v55 = vand.u32 127, %v9827_v36  ;;  %v9828_v53 = vld [vmem:[#allocation18_spill] sm:$0xff] }
 0x73c   : > { %v3563_v61 = vmul.f32 %v5788_v22, %v8967_v12  ;;  %v4325_v22 = vmax.f32 %v9828_v53, 1e-24 }
 0x73d   : > { %5793 = vrsqrt.f32 %v3502_v46  ;;  %v3462_v33 = vpop.xlane.xlu0 %3461  ;;  %v9140_v46 = vadd.s32 128, %v4513_v55  ;;  %v4339_v55 = vmax.f32 %v8528_v34, 1e-24 }
 0x73e   : > { %v3459_v14 = vpop.xlane.xlu1 %3458  ;;  %4820 = vmatmul.mubr.msk.f32.gmra.mrb[218].mxu1 %vm2665_vm0, %v3563_v61  ;;  %v3504_v45 = vmax.f32 %v3462_v33, 1e-24  ;;  %v9829_v61 = vld [vmem:[#allocation20_spill] sm:$0xff] }
 0x73f   : > { %v5790_v8 = vpop.eup %5789  ;;  %v3503_v29 = vmax.f32 %v3459_v14, 1e-24  ;;  %3874 = vmatprep.mubr.f32.mxu1 %v9824_v15  ;;  %v4327_v33 = vmax.f32 %v9829_v61, 1e-24  ;;  %vm4516_vm1 = vcmp.lt.s32.totalorder %v9140_v46, 224 }
 0x740   : > { %v3564_v7 = vmul.f32 %v5790_v8, %v8977_v52  ;;  %v9830_v8 = vld [vmem:[#allocation93_spill] sm:$0xff] }
 0x741   : > { %5795 = vrsqrt.f32 %v3503_v29 }
 0x742   : > { %v3465_v54 = vpop.xlane.xlu1 %3464  ;;  %4821 = vmatmul.mubr.msk.f32.gmra.mrb[220].mxu1 %vm2665_vm0, %v3564_v7  ;;  %5797 = vrsqrt.f32 %v3504_v45 }
 0x743   : > { %v5792_v62 = vpop.eup %5791  ;;  %v3505_v1 = vmax.f32 %v3465_v54, 1e-24  ;;  %3880 = vmatprep.mubr.f32.mxu1 %v9824_v15  ;;  %v9831_v54 = vld [vmem:[#allocation44_spill] sm:$0xff] }
 0x744   : > { %v3565_v12 = vmul.f32 %v5792_v62, %v8987_v40 }
 0x745   : > { %v3468_v39 = vpop.xlane.xlu0 %3467  ;;  %5799 = vrsqrt.f32 %v3505_v1 }
 0x746   : > { %4822 = vmatmul.mubr.msk.f32.gmra.mrb[222].mxu1 %vm2665_vm0, %v3565_v12  ;;  %v3506_v37 = vmax.f32 %v3468_v39, 1e-24 }
 0x747   : > { %v5794_v4 = vpop.eup %5793  ;;  %3886 = vmatprep.mubr.f32.mxu1 %v9824_v15 }
 0x748   : > { %v3566_v52 = vmul.f32 %v5794_v4, %v8997_v30  ;;  %5801 = vrsqrt.f32 %v3506_v37  ;;  %v9832_v37 = vld [vmem:[#allocation47_spill] sm:$0xff] }
 0x749   : > { %v3471_v20 = vpop.xlane.xlu1 %3470 }
 0x74a   : > { %4823 = vmatmul.mubr.msk.f32.gmra.mrb[224].mxu1 %vm2665_vm0, %v3566_v52  ;;  %v3507_v63 = vmax.f32 %v3471_v20, 1e-24 }
 0x74b   : > { %v5796_v3 = vpop.eup %5795  ;;  %3892 = vmatprep.mubr.f32.mxu1 %v9824_v15 }
 0x74c   : > { %v3567_v40 = vmul.f32 %v5796_v3, %v9005_v48  ;;  %v5798_v43 = vpop.eup %5797  ;;  %5803 = vrsqrt.f32 %v3507_v63 }
 0x74d   : > { %v3474_v60 = vpop.xlane.xlu0 %3473  ;;  %v3568_v30 = vmul.f32 %v5798_v43, %v9010_v59  ;;  %v9825_v59 = vld [vmem:[#allocation14_spill] sm:$0xff]  ;;  %v9833_v43 = vld [vmem:[#allocation65_spill] sm:$0xff] }
 0x74e   : > { %4824 = vmatmul.mubr.msk.f32.gmra.mrb[226].mxu1 %vm2665_vm0, %v3567_v40  ;;  %v3508_v49 = vmax.f32 %v3474_v60, 1e-24  ;;  %v4321_v18 = vmax.f32 %v9825_v59, 1e-24 }
 0x74f   : > { %3898 = vmatprep.mubr.f32.mxu1 %v9824_v15  ;;  %v5800_v47 = vpop.eup %5799 }
 0x750   : > { %5805 = vrsqrt.f32 %v3508_v49  ;;  %v3569_v48 = vmul.f32 %v5800_v47, %v9019_v57  ;;  %v9826_v57 = vld [vmem:[#allocation16_spill] sm:$0xff]  ;;  %v9834_v47 = vld [vmem:[#allocation22_spill] sm:$0xff] }
 0x751   : > { %v3477_v35 = vpop.xlane.xlu1 %3476  ;;  %v4323_v32 = vmax.f32 %v9826_v57, 1e-24  ;;  %v9838_v57 = vld [vmem:[#allocation48_spill] sm:$0xff] }
 0x752   : > { %4825 = vmatmul.mubr.msk.f32.gmra.mrb[228].mxu1 %vm2665_vm0, %v3568_v30  ;;  %v3509_v21 = vmax.f32 %v3477_v35, 1e-24  ;;  %v5802_v24 = vpop.eup %5801  ;;  %v4329_v35 = vmax.f32 %v9834_v47, 1e-24 }
 0x753   : > { %3904 = vmatprep.mubr.f32.mxu1 %v9824_v15  ;;  %v3570_v19 = vmul.f32 %v5802_v24, %v9027_v16  ;;  %v9836_v24 = vld [vmem:[#allocation27_spill] sm:$0xff] }
 0x754   : > { %5807 = vrsqrt.f32 %v3509_v21  ;;  %v9835_v21 = vld [vmem:[#allocation24_spill] sm:$0xff] }
 0x755   : > { %5809 = vrsqrt.f32 %v4321_v18 }
 0x756   : > { %4826 = vmatmul.mubr.msk.f32.gmra.mrb[230].mxu1 %vm2665_vm0, %v3569_v48  ;;  %v5804_v58 = vpop.eup %5803  ;;  %5811 = vrsqrt.f32 %v4323_v32  ;;  %v4331_v48 = vmax.f32 %v9835_v21, 1e-24  ;;  %v4349_v21 = vmax.f32 %v8556_v9, 1e-24 }
 0x757   : > { %3910 = vmatprep.mubr.f32.mxu1 %v9824_v15  ;;  %v3571_v6 = vmul.f32 %v5804_v58, %v9034_v51  ;;  %5813 = vrsqrt.f32 %v4325_v22  ;;  %v9837_v58 = vld [vmem:[#allocation26_spill] sm:$0xff]  ;;  %v9839_v22 = vld [vmem:[#allocation67_spill] sm:$0xff] }
 0x758   : > { %5815 = vrsqrt.f32 %v4327_v33  ;;  %v4335_v59 = vmax.f32 %v9837_v58, 1e-24 }
 0x759   : > { %5817 = vrsqrt.f32 %v4329_v35 }
 0x75a   : > { %4827 = vmatmul.mubr.msk.f32.gmra.mrb[232].mxu1 %vm2665_vm0, %v3570_v19  ;;  %v5806_v25 = vpop.eup %5805  ;;  %5819 = vrsqrt.f32 %v4331_v48  ;;  %v4333_v19 = vmax.f32 %v9836_v24, 1e-24  ;;  %v9845_v24 = vld [vmem:[#allocation52_spill] sm:$0xff] }
 0x75b   : > { %3916 = vmatprep.mubr.f32.mxu1 %v9824_v15  ;;  %v3572_v17 = vmul.f32 %v5806_v25, %v9041_v26 }
 0x75c   : > { %5821 = vrsqrt.f32 %v4333_v19 }
 0x75d   : > { %5823 = vrsqrt.f32 %v4335_v59 }
 0x75e   : > { %4828 = vmatmul.mubr.msk.f32.gmra.mrb[234].mxu1 %vm2665_vm0, %v3571_v6  ;;  %v5808_v16 = vpop.eup %5807  ;;  %v4337_v6 = vmax.f32 %v8524_v2, 1e-24 }
 0x75f   : > { %3922 = vmatprep.mubr.f32.mxu1 %v9824_v15  ;;  %v3573_v51 = vmul.f32 %v5808_v16, %v9048_v10  ;;  %v5810_v26 = vpop.eup %5809 }
 0x760   : > { %v4449_v45 = vmul.f32 %v5810_v26, %v9830_v8  ;;  %v5812_v29 = vpop.eup %5811  ;;  %5825 = vrsqrt.f32 %v4337_v6  ;;  %v9840_v26 = vld [vmem:[#allocation29_spill] sm:$0xff] }
 0x761   : > { %v4451_v62 = vmul.f32 %v5812_v29, %v9831_v54  ;;  %v5814_v1 = vpop.eup %5813  ;;  %5827 = vrsqrt.f32 %v4339_v55 }
 0x762   : > { %4829 = vmatmul.mubr.msk.f32.gmra.mrb[236].mxu1 %vm2665_vm0, %v3572_v17  ;;  %v4453_v52 = vmul.f32 %v5814_v1, %v9832_v37  ;;  %v5816_v20 = vpop.eup %5815  ;;  %v4345_v37 = vmax.f32 %v8540_v28, 1e-24 }
 0x763   : > { %3928 = vmatprep.mubr.f32.mxu1 %v9824_v15  ;;  %v4455_v60 = vmul.f32 %v5816_v20, %v9833_v43  ;;  %v5818_v18 = vpop.eup %5817  ;;  %v9843_v20 = vld [vmem:[#allocation69_spill] sm:$0xff]  ;;  %v4347_v43 = vmax.f32 %v8548_v13, 1e-24 }
 0x764   : > { %v4457_v32 = vmul.f32 %v5818_v18, %v9838_v57  ;;  %v5820_v17 = vpop.eup %5819  ;;  %v9846_v18 = vld [vmem:[#allocation87_spill] sm:$0xff]  ;;  %v9847_v57 = vld [vmem:[#allocation68_spill] sm:$0xff] }
 0x765   : > { %v4351_v6 = vmax.f32 %v9846_v18, 1e-24  ;;  %v4365_v18 = vmax.f32 %v8629_v42, 1e-24  ;;  %v9856_v42 = vld [vmem:[#allocation75_spill] sm:$0xff] }
 0x766   : > { %4830 = vmatmul.mubr.msk.f32.gmra.mrb[238].mxu1 %vm2665_vm0, %v3573_v51  ;;  %v4459_v51 = vmul.f32 %v5820_v17, %v9839_v22  ;;  %v5822_v61 = vpop.eup %5821 }
 0x76a   : > { %v3744_v14 = vpop.f32.mrb[176].mxu1 }
 0x76b   : > { %v3746_v15 = vpop.f32.mrb[177].mxu1  ;;  %v4341_v14 = vmax.f32 %v9840_v26, 1e-24 }
 0x76c   : > { %v4518_v10 = vsel %vm4516_vm1, %v4449_v45, %v3746_v15  ;;  %v9841_v45 = vld [vmem:[#allocation51_spill] sm:$0xff]  ;;  %v5824_v15 = vpop.eup %5823 }
 0x76d   : > { %4582 = vst [vmem:[%s8485_s15 + $0x8] sm:$0xff] %v4518_v10  ;;  %v4461_v29 = vmul.f32 %v5822_v61, %v9841_v45  ;;  %5829 = vrsqrt.f32 %v4341_v14  ;;  %v9849_v14 = vld [vmem:[#allocation55_spill] sm:$0xff] }
 0x76e   : > { %v3750_v7 = vpop.f32.mrb[178].mxu1 }
 0x76f   : > { %v3752_v12 = vpop.f32.mrb[179].mxu1  ;;  %v4343_v7 = vmax.f32 %v8536_v50, 1e-24 }
 0x770   : > { %v4520_v39 = vsel %vm4516_vm1, %v4451_v62, %v3752_v12  ;;  %v9842_v62 = vld [vmem:[#allocation66_spill] sm:$0xff]  ;;  %v5826_v12 = vpop.eup %5825 }
 0x771   : > { %4584 = vst [vmem:[%s8485_s15 + $0x18] sm:$0xff] %v4520_v39  ;;  %v4463_v1 = vmul.f32 %v5824_v15, %v9842_v62  ;;  %5831 = vrsqrt.f32 %v4343_v7  ;;  %v4357_v15 = vmax.f32 %v8593_v27, 1e-24 }
 0x772   : > { %v3756_v4 = vpop.f32.mrb[180].mxu1  ;;  %5833 = vrsqrt.f32 %v4345_v37 }
 0x773   : > { %v3758_v3 = vpop.f32.mrb[181].mxu1  ;;  %5835 = vrsqrt.f32 %v4347_v43 }
 0x774   : > { %v4522_v63 = vsel %vm4516_vm1, %v4453_v52, %v3758_v3  ;;  %v4465_v3 = vmul.f32 %v5826_v12, %v9843_v20  ;;  %5837 = vrsqrt.f32 %v4349_v21  ;;  %v9851_v12 = vld [vmem:[#allocation70_spill] sm:$0xff]  ;;  %v9852_v20 = vld [vmem:[#allocation73_spill] sm:$0xff]  ;;  %v9854_v21 = vld [vmem:[#allocation56_spill] sm:$0xff] }
 0x775   : > { %4586 = vst [vmem:[%s8485_s15 + $0x28] sm:$0xff] %v4522_v63  ;;  %v5828_v63 = vpop.eup %5827  ;;  %5839 = vrsqrt.f32 %v4351_v6 }
 0x776   : > { %v3762_v40 = vpop.f32.mrb[182].mxu1 }
 0x777   : > { %v3764_v49 = vpop.f32.mrb[183].mxu1  ;;  %v5830_v47 = vpop.eup %5829 }
 0x778   : > { %v4524_v30 = vsel %vm4516_vm1, %v4455_v60, %v3764_v49  ;;  %v9844_v49 = vld [vmem:[#allocation53_spill] sm:$0xff]  ;;  %v4469_v19 = vmul.f32 %v5830_v47, %v9845_v24 }
 0x779   : > { %4588 = vst [vmem:[%s8485_s15 + $0x38] sm:$0xff] %v4524_v30  ;;  %v4467_v30 = vmul.f32 %v5828_v63, %v9844_v49 }
 0x77b   : > { %v5832_v58 = vpop.eup %5831 }
 0x77c   : > { %v5834_v17 = vpop.eup %5833 }
 0x7a7   : > { %v3768_v25 = vpop.f32.mrb[184].mxu1 }
 0x7a8   : > { %v3770_v16 = vpop.f32.mrb[185].mxu1 }
 0x7a9   : > { %v4526_v36 = vsel %vm4516_vm1, %v4457_v32, %v3770_v16  ;;  %v4471_v32 = vmul.f32 %v5832_v58, %v9847_v57  ;;  %v4359_v58 = vmax.f32 %v8604_v11, 1e-24 }
 0x7aa   : > { %4590 = vst [vmem:[%s8485_s15 + $0x48] sm:$0xff] %v4526_v36  ;;  %v4353_v36 = vmax.f32 %v8573_v31, 1e-24 }
 0x7ab   : > { %v3774_v53 = vpop.f32.mrb[186].mxu1 }
 0x7ac   : > { %v3776_v33 = vpop.f32.mrb[187].mxu1  ;;  %v9848_v53 = vld [vmem:[#allocation71_spill] sm:$0xff]  ;;  %5841 = vrsqrt.f32 %v4353_v36 }
 0x7ad   : > { %v4528_v2 = vsel %vm4516_vm1, %v4459_v51, %v3776_v33  ;;  %v4473_v22 = vmul.f32 %v5834_v17, %v9848_v53  ;;  %v5836_v51 = vpop.eup %5835 }
 0x7ae   : > { %4592 = vst [vmem:[%s8485_s15 + $0x58] sm:$0xff] %v4528_v2  ;;  %v4355_v2 = vmax.f32 %v8584_v44, 1e-24  ;;  %v5838_v45 = vpop.eup %5837 }
 0x7af   : > { %v3780_v8 = vpop.f32.mrb[188].mxu1 }
 0x7b0   : > { %v3782_v34 = vpop.f32.mrb[189].mxu1  ;;  %v4475_v8 = vmul.f32 %v5836_v51, %v9849_v14  ;;  %5843 = vrsqrt.f32 %v4355_v2  ;;  %v4373_v14 = vmax.f32 %v8655_v5, 1e-24 }
 0x7b1   : > { %v4530_v10 = vsel %vm4516_vm1, %v4461_v29, %v3782_v34  ;;  %5845 = vrsqrt.f32 %v4357_v15 }
 0x7b2   : > { %4594 = vst [vmem:[%s8485_s15 + $0x68] sm:$0xff] %v4530_v10  ;;  %v9850_v10 = vld [vmem:[#allocation54_spill] sm:$0xff]  ;;  %5847 = vrsqrt.f32 %v4359_v58 }
 0x7b3   : > { %v3786_v54 = vpop.f32.mrb[190].mxu1  ;;  %v4477_v7 = vmul.f32 %v5838_v45, %v9850_v10  ;;  %v9858_v45 = vld [vmem:[#allocation58_spill] sm:$0xff] }
 0x7b4   : > { %v3788_v39 = vpop.f32.mrb[191].mxu1  ;;  %v5840_v54 = vpop.eup %5839 }
 0x7b5   : > { %v4532_v4 = vsel %vm4516_vm1, %v4463_v1, %v3788_v39  ;;  %v4479_v39 = vmul.f32 %v5840_v54, %v9851_v12  ;;  %v9860_v54 = vld [vmem:[#allocation74_spill] sm:$0xff]  ;;  %v9861_v12 = vld [vmem:[#allocation31_spill] sm:$0xff] }
 0x7b6   : > { %4596 = vst [vmem:[%s8485_s15 + $0x78] sm:$0xff] %v4532_v4  ;;  %v5842_v4 = vpop.eup %5841 }
 0x7b7   : > { %v3792_v52 = vpop.f32.mrb[192].mxu1 }
 0x7b8   : > { %v3794_v50 = vpop.f32.mrb[193].mxu1 }
 0x7b9   : > { %v4534_v40 = vsel %vm4516_vm1, %v4465_v3, %v3794_v50  ;;  %v4481_v3 = vmul.f32 %v5842_v4, %v9852_v20 }
 0x7ba   : > { %4598 = vst [vmem:[%s8485_s15 + $0x88] sm:$0xff] %v4534_v40  ;;  %v5844_v63 = vpop.eup %5843 }
 0x7bb   : > { %v3798_v60 = vpop.f32.mrb[194].mxu1 }
 0x7bc   : > { %v3800_v28 = vpop.f32.mrb[195].mxu1  ;;  %v9853_v60 = vld [vmem:[#allocation57_spill] sm:$0xff] }
 0x7bd   : > { %v4536_v35 = vsel %vm4516_vm1, %v4467_v30, %v3800_v28  ;;  %v4483_v49 = vmul.f32 %v5844_v63, %v9853_v60  ;;  %v5846_v30 = vpop.eup %5845  ;;  %v9863_v63 = vld [vmem:[#allocation89_spill] sm:$0xff] }
 0x7be   : > { %4600 = vst [vmem:[%s8485_s15 + $0x98] sm:$0xff] %v4536_v35  ;;  %v5848_v6 = vpop.eup %5847 }
 0x7bf   : > { %v3804_v48 = vpop.f32.mrb[196].mxu1 }
 0x7c0   : > { %v3806_v13 = vpop.f32.mrb[197].mxu1  ;;  %v4485_v48 = vmul.f32 %v5846_v30, %v9854_v21 }
 0x7c1   : > { %v4538_v59 = vsel %vm4516_vm1, %v4469_v19, %v3806_v13  ;;  %v4361_v13 = vmax.f32 %v8613_v23, 1e-24  ;;  %v4369_v23 = vmax.f32 %v8643_v56, 1e-24 }
 0x7c2   : > { %4602 = vst [vmem:[%s8485_s15 + $0xa8] sm:$0xff] %v4538_v59  ;;  %v4363_v59 = vmax.f32 %v8622_v38, 1e-24 }
 0x7c3   : > { %v3810_v25 = vpop.f32.mrb[198].mxu1  ;;  %5849 = vrsqrt.f32 %v4361_v13 }
 0x7c4   : > { %v3812_v9 = vpop.f32.mrb[199].mxu1  ;;  %5851 = vrsqrt.f32 %v4363_v59  ;;  %v4367_v25 = vmax.f32 %v8638_v0, 1e-24  ;;  %v9867_v59 = vld [vmem:[#allocation33_spill] sm:$0xff] }
 0x7c5   : > { %v4540_v16 = vsel %vm4516_vm1, %v4471_v32, %v3812_v9  ;;  %5853 = vrsqrt.f32 %v4365_v18  ;;  %v9855_v32 = vld [vmem:[#allocation72_spill] sm:$0xff]  ;;  %v4383_v18 = vmax.f32 %v9867_v59, 1e-24 }
 0x7c6   : > { %4604 = vst [vmem:[%s8485_s15 + $0xb8] sm:$0xff] %v4540_v16  ;;  %v4487_v17 = vmul.f32 %v5848_v6, %v9855_v32  ;;  %5855 = vrsqrt.f32 %v4367_v25  ;;  %v9868_v25 = vld [vmem:[#allocation76_spill] sm:$0xff] }
 0x7c7   : > { %v3816_v55 = vpop.f32.mrb[200].mxu1  ;;  %5857 = vrsqrt.f32 %v4369_v23 }
 0x7c8   : > { %v3818_v61 = vpop.f32.mrb[201].mxu1 }
 0x7c9   : > { %v4542_v33 = vsel %vm4516_vm1, %v4473_v22, %v3818_v61  ;;  %v4371_v22 = vmax.f32 %v8650_v41, 1e-24  ;;  %v9857_v61 = vld [vmem:[#allocation59_spill] sm:$0xff] }
 0x7ca   : > { %4606 = vst [vmem:[%s8485_s15 + $0xc8] sm:$0xff] %v4542_v33 }
 0x7cb   : > { %v3822_v26 = vpop.f32.mrb[202].mxu1  ;;  %5859 = vrsqrt.f32 %v4371_v22 }
 0x7cc   : > { %v3824_v31 = vpop.f32.mrb[203].mxu1  ;;  %5861 = vrsqrt.f32 %v4373_v14 }
 0x7cd   : > { %v4544_v29 = vsel %vm4516_vm1, %v4475_v8, %v3824_v31  ;;  %v5850_v9 = vpop.eup %5849 }
 0x7ce   : > { %4608 = vst [vmem:[%s8485_s15 + $0xd8] sm:$0xff] %v4544_v29  ;;  %v4489_v36 = vmul.f32 %v5850_v9, %v9856_v42  ;;  %v5852_v55 = vpop.eup %5851 }
 0x7cf   : > { %v3828_v34 = vpop.f32.mrb[204].mxu1  ;;  %v4491_v33 = vmul.f32 %v5852_v55, %v9857_v61  ;;  %v5854_v2 = vpop.eup %5853 }
 0x7d0   : > { %v3830_v44 = vpop.f32.mrb[205].mxu1  ;;  %v4493_v31 = vmul.f32 %v5854_v2, %v9858_v45  ;;  %v5856_v29 = vpop.eup %5855  ;;  %v9859_v34 = vld [vmem:[#allocation28_spill] sm:$0xff]  ;;  %v9871_v2 = vld [vmem:[#allocation81_spill] sm:$0xff] }
 0x7d1   : > { %v4546_v62 = vsel %vm4516_vm1, %v4477_v7, %v3830_v44  ;;  %v4375_v10 = vmax.f32 %v9859_v34, 1e-24  ;;  %v4495_v44 = vmul.f32 %v5856_v29, %v9860_v54 }
 0x7d2   : > { %4610 = vst [vmem:[%s8485_s15 + $0xe8] sm:$0xff] %v4546_v62  ;;  %v5858_v62 = vpop.eup %5857 }
 0x7d3   : > { %v3834_v1 = vpop.f32.mrb[206].mxu1  ;;  %5863 = vrsqrt.f32 %v4375_v10 }
 0x7d4   : > { %v3836_v37 = vpop.f32.mrb[207].mxu1 }
 0x7d5   : > { %v4548_v27 = vsel %vm4516_vm1, %v4479_v39, %v3836_v37  ;;  %v4377_v39 = vmax.f32 %v9861_v12, 1e-24  ;;  %v9862_v37 = vld [vmem:[#allocation77_spill] sm:$0xff] }
 0x7d6   : > { %4612 = vst [vmem:[%s8485_s15 + $0xf8] sm:$0xff] %v4548_v27  ;;  %v4497_v27 = vmul.f32 %v5858_v62, %v9862_v37 }
 0x7d7   : > { %v3840_v52 = vpop.f32.mrb[208].mxu1  ;;  %5865 = vrsqrt.f32 %v4377_v39 }
 0x7d8   : > { %v3842_v50 = vpop.f32.mrb[209].mxu1  ;;  %v5860_v52 = vpop.eup %5859 }
 0x7d9   : > { %v4550_v40 = vsel %vm4516_vm1, %v4481_v3, %v3842_v50  ;;  %v4379_v50 = vmax.f32 %v9863_v63, 1e-24 }
 0x7da   : > { %4614 = vst [vmem:[%s8485_s15 + $0x108] sm:$0xff] %v4550_v40 }
 0x7db   : > { %v3846_v43 = vpop.f32.mrb[210].mxu1  ;;  %5867 = vrsqrt.f32 %v4379_v50 }
 0x7dc   : > { %v3848_v47 = vpop.f32.mrb[211].mxu1  ;;  %v9864_v43 = vld [vmem:[#allocation61_spill] sm:$0xff] }
 0x7dd   : > { %v4552_v28 = vsel %vm4516_vm1, %v4483_v49, %v3848_v47  ;;  %v4499_v60 = vmul.f32 %v5860_v52, %v9864_v43  ;;  %v5862_v49 = vpop.eup %5861 }
 0x7de   : > { %4616 = vst [vmem:[%s8485_s15 + $0x118] sm:$0xff] %v4552_v28  ;;  %v9865_v28 = vld [vmem:[#allocation30_spill] sm:$0xff] }
 0x7df   : > { %v3852_v35 = vpop.f32.mrb[212].mxu1 }
 0x7e0   : > { %v3854_v24 = vpop.f32.mrb[213].mxu1  ;;  %v4381_v35 = vmax.f32 %v9865_v28, 1e-24 }
 0x7e1   : > { %v4554_v19 = vsel %vm4516_vm1, %v4485_v48, %v3854_v24  ;;  %v9866_v48 = vld [vmem:[#allocation60_spill] sm:$0xff] }
 0x7e2   : > { %4618 = vst [vmem:[%s8485_s15 + $0x128] sm:$0xff] %v4554_v19  ;;  %v4501_v24 = vmul.f32 %v5862_v49, %v9866_v48  ;;  %v5864_v19 = vpop.eup %5863  ;;  %5869 = vrsqrt.f32 %v4381_v35 }
 0x7e3   : > { %v5866_v32 = vpop.eup %5865  ;;  %5871 = vrsqrt.f32 %v4383_v18 }
 0x809   : > { %v3858_v57 = vpop.f32.mrb[214].mxu1 }
 0x80a   : > { %v3860_v11 = vpop.f32.mrb[215].mxu1  ;;  %v4503_v57 = vmul.f32 %v5864_v19, %v9868_v25 }
 0x80b   : > { %v4556_v16 = vsel %vm4516_vm1, %v4487_v17, %v3860_v11 }
 0x80c   : > { %4620 = vst [vmem:[%s8485_s15 + $0x138] sm:$0xff] %v4556_v16  ;;  %v9869_v16 = vld [vmem:[#allocation79_spill] sm:$0xff] }
 0x80d   : > { %v3864_v38 = vpop.f32.mrb[216].mxu1  ;;  %v4505_v23 = vmul.f32 %v5866_v32, %v9869_v16 }
 0x80e   : > { %v3866_v53 = vpop.f32.mrb[217].mxu1  ;;  %v5868_v38 = vpop.eup %5867 }
 0x80f   : > { %v4558_v0 = vsel %vm4516_vm1, %v4489_v36, %v3866_v53  ;;  %v9870_v53 = vld [vmem:[#allocation78_spill] sm:$0xff]  ;;  %v5870_v22 = vpop.eup %5869 }
 0x810   : > { %4622 = vst [vmem:[%s8485_s15 + $0x148] sm:$0xff] %v4558_v0  ;;  %v4507_v0 = vmul.f32 %v5868_v38, %v9870_v53 }
 0x811   : > { %v3870_v51 = vpop.f32.mrb[218].mxu1 }
 0x812   : > { %v3872_v56 = vpop.f32.mrb[219].mxu1 }
 0x813   : > { %v4560_v26 = vsel %vm4516_vm1, %v4491_v33, %v3872_v56  ;;  %v4509_v56 = vmul.f32 %v5870_v22, %v9871_v2 }
 0x814   : > { %4624 = vst [vmem:[%s8485_s15 + $0x158] sm:$0xff] %v4560_v26  ;;  %v5872_v26 = vpop.eup %5871 }
 0x815   : > { %v3876_v8 = vpop.f32.mrb[220].mxu1 }
 0x816   : > { %v3878_v41 = vpop.f32.mrb[221].mxu1 }
 0x817   : > { %v4562_v15 = vsel %vm4516_vm1, %v4493_v31, %v3878_v41  ;;  %v9872_v31 = vld [vmem:[#allocation80_spill] sm:$0xff] }
 0x818   : > { %4626 = vst [vmem:[%s8485_s15 + $0x168] sm:$0xff] %v4562_v15  ;;  %v4511_v29 = vmul.f32 %v5872_v26, %v9872_v31 }
 0x819   : > { %v3882_v7 = vpop.f32.mrb[222].mxu1 }
 0x81a   : > { %v3884_v5 = vpop.f32.mrb[223].mxu1 }
 0x81b   : > { %v4564_v1 = vsel %vm4516_vm1, %v4495_v44, %v3884_v5 }
 0x81c   : > { %4628 = vst [vmem:[%s8485_s15 + $0x178] sm:$0xff] %v4564_v1 }
 0x81d   : > { %v3888_v4 = vpop.f32.mrb[224].mxu1 }
 0x81e   : > { %v3890_v20 = vpop.f32.mrb[225].mxu1 }
 0x81f   : > { %v4566_v3 = vsel %vm4516_vm1, %v4497_v27, %v3890_v20 }
 0x820   : > { %4630 = vst [vmem:[%s8485_s15 + $0x188] sm:$0xff] %v4566_v3 }
 0x821   : > { %v3894_v40 = vpop.f32.mrb[226].mxu1 }
 0x822   : > { %v3896_v30 = vpop.f32.mrb[227].mxu1 }
 0x823   : > { %v4568_v47 = vsel %vm4516_vm1, %v4499_v60, %v3896_v30 }
 0x824   : > { %4632 = vst [vmem:[%s8485_s15 + $0x198] sm:$0xff] %v4568_v47 }
 0x825   : > { %v3900_v21 = vpop.f32.mrb[228].mxu1 }
 0x826   : > { %v3902_v58 = vpop.f32.mrb[229].mxu1 }
 0x827   : > { %v4570_v13 = vsel %vm4516_vm1, %v4501_v24, %v3902_v58 }
 0x828   : > { %4634 = vst [vmem:[%s8485_s15 + $0x1a8] sm:$0xff] %v4570_v13 }
 0x829   : > { %v3906_v6 = vpop.f32.mrb[230].mxu1 }
 0x82a   : > { %v3908_v17 = vpop.f32.mrb[231].mxu1 }
 0x82b   : > { %v4572_v9 = vsel %vm4516_vm1, %v4503_v57, %v3908_v17 }
 0x82c   : > { %4636 = vst [vmem:[%s8485_s15 + $0x1b8] sm:$0xff] %v4572_v9 }
 0x82d   : > { %v3912_v11 = vpop.f32.mrb[232].mxu1 }
 0x82e   : > { %v3914_v42 = vpop.f32.mrb[233].mxu1 }
 0x82f   : > { %v4574_v36 = vsel %vm4516_vm1, %v4505_v23, %v3914_v42 }
 0x830   : > { %4638 = vst [vmem:[%s8485_s15 + $0x1c8] sm:$0xff] %v4574_v36 }
 0x831   : > { %v3918_v55 = vpop.f32.mrb[234].mxu1 }
 0x832   : > { %v3920_v51 = vpop.f32.mrb[235].mxu1 }
 0x833   : > { %v4576_v61 = vsel %vm4516_vm1, %v4507_v0, %v3920_v51 }
 0x834   : > { %4640 = vst [vmem:[%s8485_s15 + $0x1d8] sm:$0xff] %v4576_v61 }
 0x835   : > { %v3924_v33 = vpop.f32.mrb[236].mxu1 }
 0x836   : > { %v3926_v14 = vpop.f32.mrb[237].mxu1 }
 0x837   : > { %v4578_v8 = vsel %vm4516_vm1, %v4509_v56, %v3926_v14 }
 0x838   : > { %4642 = vst [vmem:[%s8485_s15 + $0x1e8] sm:$0xff] %v4578_v8 }
 0x839   : > { %v3930_v45 = vpop.f32.mrb[238].mxu1 }
 0x83a   : > { %v3932_v41 = vpop.f32.mrb[239].mxu1 }
 0x83b   : > { %v4580_v15 = vsel %vm4516_vm1, %v4511_v29, %v3932_v41 }
 0x83c   : > { %4644 = vst [vmem:[%s8485_s15 + $0x1f8] sm:$0xff] %v4580_v15 }
 0x83d   : > { %6132 = shalt.err (!%p6129_p7)
}
 0x83e   : > { %s6133_s15 = scalar_lea.hbm %s9303_s25, 8192  ;;  %s6137_s22 = scalar_lea.hbm %s9359_s8, 32768 }
 0x83f   : > { %p6134_p9 = scmp.ne.s32.totalorder %s9303_s25, %s6133_s15  ;;  %p6138_p5 = scmp.lt.u32.totalorder %s9303_s25, %s9359_s8 }
 0x840   : > { %p6139_p10 = scmp.lt.u32.totalorder %s6137_s22, %s6133_s15  ;;  %p6141_p1 = scmp.lt.u32.totalorder %s6133_s15, %s9303_s25 }
 0x841   : > { %p6135_p12 = pnand %p6134_p9, %p6367_p6 }
 0x842   : > { %p6140_p11 = por %p6139_p10, %p6138_p5 }
 0x843   : > { %p6136_p0 = pneg %p6135_p12 }
 0x844   : > { %p6142_p2 = por %p6141_p1, %p6140_p11 }
 0x846   : > { %p6143_p4 = pnand %p6142_p2, %p6136_p0 }
 0x848   : > { %6146 = shalt.err (!%p6143_p4)
}
 0x849   : > { %s6202_s11 = smov 256   ;;  %s6203_s13 = smov 16  }
 0x84a   : > { %5359 = dma.vmem_to_hbm [thread:$0]  (%p6367_p6), %s9305_s24, 8192, %s9303_s25, %s4646_s9, %s6202_s11, %s6202_s11, %s6203_s13  }
 0x84b PF: > { %p5381_p8 = scmp.ge.s32.totalorder %s6189_s30, 2  ;;  %s4675_s10 = sand.u32 1, %s6177_s27  }
 0x84c   : > { %p9873_p13 = scmp.ne.s32.totalorder %s9484_s12, 0  ;;  %s4676_s17 = scalar_lea.sflag [#allocation4], %s4675_s10 }
 0x84e   : > { %p5373_p3 = pnand %p5381_p8, %p9873_p13 }
 0x850   : > { %6172 = dma.done.wait (!%p5373_p3), %s4676_s17, 8192  }
 0x851   : > { %6174 = vsyncadd (!%p5373_p3), %s4676_s17, 4294959104  ;;  %p22_p7 = scmp.ge.s32.totalorder %s6354_s20, 6   ;;  %s9874_s27 = smov %s6181_s28 }
 0x852   : > { %s9875_s28 = smov %s6185_s29  ;;  %s9876_s29 = smov %s6363_s23 }
 0x853   : > { %s9877_s30 = smov %s6354_s20  ;;  %24 = sbr.rel (!%p22_p7) target bundleno = 6 (0x6), region = 105 }
 0x85a   :  { %4681 = vsyncpa [#allocation3], 1 }
 0x85b   :  { %4683 = vsyncpa [#allocation3 + $0x1], 1 }
 0x85c   :  { %4684 = vsyncpa [#allocation6], 1 }
 0x85d   :  { %4685 = vsyncpa [#allocation4], 1 }
 0x85e   :  { %4687 = vsyncpa [#allocation4 + $0x1], 1 }

</bundles_post_ra>
